<compile_context>
chip_gen: v6e
topology: v6e:2x2x1
jax: 0.10.0
libtpu: 0.0.40
codegen_flags: <defaults>
</compile_context>

<pallas_src>
import jax
import jax.numpy as jnp
from jax.experimental import pallas as pl
from jax.experimental.pallas import tpu as pltpu

_BN_EPS = 1e-5


# ----------------------------------------------------------------------------
# In-kernel helper: 3x3 "same" conv (+ bias + ReLU) of a zero-padded VMEM tile
# as a single im2col MXU matmul.
# ----------------------------------------------------------------------------
def _conv3x3_block(xp_ref, w_ref, b_ref, H, W):
    # xp_ref: VMEM (H+2, W+2, C) bf16 (zero halo already in place)
    # w_ref : (9*C, Cout) bf16, tap-major / channel-minor (kh, kw, cin)
    # b_ref : (1, Cout) f32  (BN already folded in)
    C = xp_ref.shape[-1]
    cols = []
    for kh in range(3):
        for kw in range(3):
            cols.append(xp_ref[pl.ds(kh, H), pl.ds(kw, W), :].reshape(H * W, C))
    patch = jnp.concatenate(cols, axis=-1)                   # (H*W, 9*C) bf16
    y = jnp.dot(patch, w_ref[...], preferred_element_type=jnp.float32)
    return jnp.maximum(y + b_ref[...], 0.0)                  # (H*W, Cout) f32


# ----------------------------------------------------------------------------
# Fused kernel: conv1(+BN+ReLU) -> conv2(+BN+ReLU), one batch image per step.
# ----------------------------------------------------------------------------
def _double_conv_kernel(x_ref, w1_ref, b1_ref, w2_ref, b2_ref, o_ref,
                        xpad1_ref, xpad2_ref):
    # x_ref : (1, H, W, Cin)  bf16
    # o_ref : (1, H, W, Cout) f32
    # xpad1_ref / xpad2_ref: VMEM (H+2, W+2, Cin/Cmid) bf16 halo scratch.
    _, H, W, Cout = o_ref.shape
    Cmid = xpad2_ref.shape[-1]

    # Build zero halos in VMEM (replaces wrapper-side jnp.pad / extra HBM pass).
    xpad1_ref[...] = jnp.zeros_like(xpad1_ref)
    xpad2_ref[...] = jnp.zeros_like(xpad2_ref)
    xpad1_ref[pl.ds(1, H), pl.ds(1, W), :] = x_ref[0]

    # Layer 1: conv + folded BN + ReLU; result stays in VMEM as bf16.
    y1 = _conv3x3_block(xpad1_ref, w1_ref, b1_ref, H, W)      # (H*W, Cmid) f32
    xpad2_ref[pl.ds(1, H), pl.ds(1, W), :] = (
        y1.reshape(H, W, Cmid).astype(xpad2_ref.dtype))

    # Layer 2: conv + folded BN + ReLU -> output.
    y2 = _conv3x3_block(xpad2_ref, w2_ref, b2_ref, H, W)      # (H*W, Cout) f32
    o_ref[...] = y2.reshape(1, H, W, Cout).astype(o_ref.dtype)


# ----------------------------------------------------------------------------
# BN folding (inference form, running stats):
#   BN(conv(x) + b) = conv(x) * s + (b - mean) * s + beta,  s = gamma/sqrt(var+eps)
# ----------------------------------------------------------------------------
def _fold_bn(w, b, gamma, beta, mean, var, eps=_BN_EPS):
    scale = gamma * jax.lax.rsqrt(var + eps)                  # (Cout,)
    return w * scale, (b - mean) * scale + beta


# ----------------------------------------------------------------------------
# Wrapper: NCHW in -> NCHW out (matches the PyTorch module interface).
# ----------------------------------------------------------------------------
def double_conv_forward(params, x_nchw):
    # TODO(synk): BatchNorm is applied in inference form (folded running
    # stats); training-mode batch-statistic computation is not modeled.
    x = jnp.transpose(x_nchw, (0, 2, 3, 1)).astype(jnp.float32)   # NCHW -> NHWC
    N, H, W, Cin = x.shape

    w1, b1, g1, be1, m1, v1 = params["block1"]
    w2, b2, g2, be2, m2, v2 = params["block2"]
    w1f, b1f = _fold_bn(w1, b1, g1, be1, m1, v1)
    w2f, b2f = _fold_bn(w2, b2, g2, be2, m2, v2)
    Cmid = w1f.shape[-1]
    Cout = w2f.shape[-1]

    # bf16 operands for full-rate MXU + halved DMA bytes; f32 accumulation.
    x_bf = x.astype(jnp.bfloat16)
    w1m = w1f.reshape(9 * Cin, Cmid).astype(jnp.bfloat16)     # (kh,kw,cin)-major
    w2m = w2f.reshape(9 * Cmid, Cout).astype(jnp.bfloat16)
    b1m = b1f.reshape(1, Cmid).astype(jnp.float32)
    b2m = b2f.reshape(1, Cout).astype(jnp.float32)

    out_nhwc = pl.pallas_call(
        _double_conv_kernel,
        out_shape=jax.ShapeDtypeStruct((N, H, W, Cout), jnp.float32),
        grid=(N,),
        in_specs=[
            pl.BlockSpec((1, H, W, Cin), lambda n: (n, 0, 0, 0)),
            pl.BlockSpec((9 * Cin, Cmid), lambda n: (0, 0)),   # weights resident
            pl.BlockSpec((1, Cmid), lambda n: (0, 0)),
            pl.BlockSpec((9 * Cmid, Cout), lambda n: (0, 0)),
            pl.BlockSpec((1, Cout), lambda n: (0, 0)),
        ],
        out_specs=pl.BlockSpec((1, H, W, Cout), lambda n: (n, 0, 0, 0)),
        scratch_shapes=[
            pltpu.VMEM((H + 2, W + 2, Cin), jnp.bfloat16),     # layer-1 halo
            pltpu.VMEM((H + 2, W + 2, Cmid), jnp.bfloat16),    # layer-2 halo
        ],
        compiler_params=pltpu.CompilerParams(
            dimension_semantics=("parallel",)),
    )(x_bf, w1m, b1m, w2m, b2m)

    return jnp.transpose(out_nhwc, (0, 3, 1, 2))              # NHWC -> NCHW


# ----------------------------------------------------------------------------
# Parameter init (conv: PyTorch-default-like uniform; BN: non-trivial values
# so the folding path is actually exercised).
# ----------------------------------------------------------------------------
def init_double_conv_params(key, in_channels, out_channels):
    keys = jax.random.split(key, 12)

    def conv_init(kw_, kb_, cin, cout):
        fan_in = cin * 9
        bound = float(fan_in) ** -0.5
        w = jax.random.uniform(kw_, (3, 3, cin, cout), jnp.float32, -bound, bound)
        b = jax.random.uniform(kb_, (cout,), jnp.float32, -bound, bound)
        return w, b

    def bn_init(kg, kb, km, kv, c):
        gamma = jax.random.uniform(kg, (c,), jnp.float32, 0.8, 1.2)
        beta = 0.1 * jax.random.normal(kb, (c,), jnp.float32)
        mean = 0.1 * jax.random.normal(km, (c,), jnp.float32)
        var = jax.random.uniform(kv, (c,), jnp.float32, 0.5, 1.5)
        return gamma, beta, mean, var

    w1, b1 = conv_init(keys[0], keys[1], in_channels, out_channels)
    g1, be1, m1, v1 = bn_init(keys[2], keys[3], keys[4], keys[5], out_channels)
    w2, b2 = conv_init(keys[6], keys[7], out_channels, out_channels)
    g2, be2, m2, v2 = bn_init(keys[8], keys[9], keys[10], keys[11], out_channels)
    return {
        "block1": (w1, b1, g1, be1, m1, v1),
        "block2": (w2, b2, g2, be2, m2, v2),
    }


# ----------------------------------------------------------------------------
# Pure-JAX (f32) reference of the module for a numerical sanity check.
# ----------------------------------------------------------------------------
def double_conv_ref(params, x_nchw, eps=_BN_EPS):
    x = jnp.transpose(x_nchw, (0, 2, 3, 1)).astype(jnp.float32)
    for name in ("block1", "block2"):
        w, b, g, be, m, v = params[name]
        y = jax.lax.conv_general_dilated(
            x, w, window_strides=(1, 1), padding="SAME",
            dimension_numbers=("NHWC", "HWIO", "NHWC")) + b
        y = (y - m) * (g * jax.lax.rsqrt(v + eps)) + be
        x = jnp.maximum(y, 0.0)
    return jnp.transpose(x, (0, 3, 1, 2))


if __name__ == "__main__":
    key = jax.random.PRNGKey(0)
    pkey, xkey = jax.random.split(key)

    batch, in_channels, out_channels, spatial = 2, 4, 32, 16
    params = init_double_conv_params(pkey, in_channels, out_channels)
    x = jax.random.normal(xkey, (batch, in_channels, spatial, spatial),
                          dtype=jnp.float32)                  # NCHW, like PyTorch

    out = jax.jit(double_conv_forward)(params, x)
    out = jax.block_until_ready(out)
    assert out.shape == (batch, out_channels, spatial, spatial), out.shape
    assert out.dtype == jnp.float32

    # Numerical check against the f32 JAX reference (bf16 MXU tolerance).
    ref = double_conv_ref(params, x)
    max_err = float(jnp.max(jnp.abs(out - ref)))
    ref_scale = float(jnp.max(jnp.abs(ref)))
    assert max_err <= 5e-2 * ref_scale + 2e-2, (max_err, ref_scale)

    print("KERNEL_OK")
</pallas_src>

<mosaic_0001>
module attributes {stable_mosaic.version = 11 : i64} {
  func.func @_double_conv_kernel(%arg0: i32, %arg1: memref<1x16x16x4xbf16, #tpu.memory_space<vmem>>, %arg2: memref<36x32xbf16, #tpu.memory_space<vmem>>, %arg3: memref<1x32xf32, #tpu.memory_space<vmem>>, %arg4: memref<288x32xbf16, #tpu.memory_space<vmem>>, %arg5: memref<1x32xf32, #tpu.memory_space<vmem>>, %arg6: memref<1x16x16x32xf32, #tpu.memory_space<vmem>>, %arg7: memref<18x18x4xbf16, #tpu.memory_space<vmem>>, %arg8: memref<18x18x32xbf16, #tpu.memory_space<vmem>>) attributes {dimension_semantics = [#tpu.dimension_semantics<parallel>], iteration_bounds = array<i64: 2>, scalar_prefetch = 0 : i64, scratch_operands = 2 : i64, tpu.core_type = #tpu.core_type<tc>, window_params = [{transform_indices = @transform_0, window_bounds = array<i64: 1, 16, 16, 4>}, {pipeline_mode = #tpu.pipeline_mode<synchronous>, transform_indices = @transform_1, window_bounds = array<i64: 36, 32>}, {pipeline_mode = #tpu.pipeline_mode<synchronous>, transform_indices = @transform_2, window_bounds = array<i64: 1, 32>}, {pipeline_mode = #tpu.pipeline_mode<synchronous>, transform_indices = @transform_3, window_bounds = array<i64: 288, 32>}, {pipeline_mode = #tpu.pipeline_mode<synchronous>, transform_indices = @transform_4, window_bounds = array<i64: 1, 32>}, {transform_indices = @transform_5, window_bounds = array<i64: 1, 16, 16, 32>}]} {
    %cst = arith.constant 0.000000e+00 : bf16
    %0 = vector.broadcast %cst : bf16 to vector<18x18x4xbf16>
    %c0 = arith.constant 0 : index
    %c0_0 = arith.constant 0 : index
    %c0_1 = arith.constant 0 : index
    %1 = vector.load %arg7[%c0, %c0_0, %c0_1] : memref<18x18x4xbf16, #tpu.memory_space<vmem>>, vector<18x18x4xbf16>
    tpu.vector_store %arg7[%c0, %c0_0, %c0_1], %0 {strides = array<i32>} : memref<18x18x4xbf16, #tpu.memory_space<vmem>>, vector<18x18x4xbf16>,
    %cst_2 = arith.constant 0.000000e+00 : bf16
    %2 = vector.broadcast %cst_2 : bf16 to vector<18x18x32xbf16>
    %c0_3 = arith.constant 0 : index
    %c0_4 = arith.constant 0 : index
    %c0_5 = arith.constant 0 : index
    %3 = vector.load %arg8[%c0_3, %c0_4, %c0_5] : memref<18x18x32xbf16, #tpu.memory_space<vmem>>, vector<18x18x32xbf16>
    tpu.vector_store %arg8[%c0_3, %c0_4, %c0_5], %2 {strides = array<i32>} : memref<18x18x32xbf16, #tpu.memory_space<vmem>>, vector<18x18x32xbf16>,
    %c0_6 = arith.constant 0 : index
    %c0_7 = arith.constant 0 : index
    %c0_8 = arith.constant 0 : index
    %c0_9 = arith.constant 0 : index
    %4 = vector.load %arg1[%c0_6, %c0_7, %c0_8, %c0_9] : memref<1x16x16x4xbf16, #tpu.memory_space<vmem>>, vector<1x16x16x4xbf16>
    %5 = vector.shape_cast %4 : vector<1x16x16x4xbf16> to vector<16x16x4xbf16>
    %c1 = arith.constant 1 : index
    %c1_10 = arith.constant 1 : index
    %c0_11 = arith.constant 0 : index
    %6 = vector.load %arg7[%c1, %c1_10, %c0_11] : memref<18x18x4xbf16, #tpu.memory_space<vmem>>, vector<16x16x4xbf16>
    tpu.vector_store %arg7[%c1, %c1_10, %c0_11], %5 {strides = array<i32>} : memref<18x18x4xbf16, #tpu.memory_space<vmem>>, vector<16x16x4xbf16>,
    %c0_12 = arith.constant 0 : index
    %c0_13 = arith.constant 0 : index
    %c0_14 = arith.constant 0 : index
    %7 = vector.load %arg7[%c0_12, %c0_13, %c0_14] : memref<18x18x4xbf16, #tpu.memory_space<vmem>>, vector<16x16x4xbf16>
    %8 = vector.shape_cast %7 : vector<16x16x4xbf16> to vector<256x4xbf16>
    %c0_15 = arith.constant 0 : index
    %c1_16 = arith.constant 1 : index
    %c0_17 = arith.constant 0 : index
    %9 = vector.load %arg7[%c0_15, %c1_16, %c0_17] : memref<18x18x4xbf16, #tpu.memory_space<vmem>>, vector<16x16x4xbf16>
    %10 = vector.shape_cast %9 : vector<16x16x4xbf16> to vector<256x4xbf16>
    %c0_18 = arith.constant 0 : index
    %c2 = arith.constant 2 : index
    %c0_19 = arith.constant 0 : index
    %11 = vector.load %arg7[%c0_18, %c2, %c0_19] : memref<18x18x4xbf16, #tpu.memory_space<vmem>>, vector<16x16x4xbf16>
    %12 = vector.shape_cast %11 : vector<16x16x4xbf16> to vector<256x4xbf16>
    %c1_20 = arith.constant 1 : index
    %c0_21 = arith.constant 0 : index
    %c0_22 = arith.constant 0 : index
    %13 = vector.load %arg7[%c1_20, %c0_21, %c0_22] : memref<18x18x4xbf16, #tpu.memory_space<vmem>>, vector<16x16x4xbf16>
    %14 = vector.shape_cast %13 : vector<16x16x4xbf16> to vector<256x4xbf16>
    %c1_23 = arith.constant 1 : index
    %c1_24 = arith.constant 1 : index
    %c0_25 = arith.constant 0 : index
    %15 = vector.load %arg7[%c1_23, %c1_24, %c0_25] : memref<18x18x4xbf16, #tpu.memory_space<vmem>>, vector<16x16x4xbf16>
    %16 = vector.shape_cast %15 : vector<16x16x4xbf16> to vector<256x4xbf16>
    %c1_26 = arith.constant 1 : index
    %c2_27 = arith.constant 2 : index
    %c0_28 = arith.constant 0 : index
    %17 = vector.load %arg7[%c1_26, %c2_27, %c0_28] : memref<18x18x4xbf16, #tpu.memory_space<vmem>>, vector<16x16x4xbf16>
    %18 = vector.shape_cast %17 : vector<16x16x4xbf16> to vector<256x4xbf16>
    %c2_29 = arith.constant 2 : index
    %c0_30 = arith.constant 0 : index
    %c0_31 = arith.constant 0 : index
    %19 = vector.load %arg7[%c2_29, %c0_30, %c0_31] : memref<18x18x4xbf16, #tpu.memory_space<vmem>>, vector<16x16x4xbf16>
    %20 = vector.shape_cast %19 : vector<16x16x4xbf16> to vector<256x4xbf16>
    %c2_32 = arith.constant 2 : index
    %c1_33 = arith.constant 1 : index
    %c0_34 = arith.constant 0 : index
    %21 = vector.load %arg7[%c2_32, %c1_33, %c0_34] : memref<18x18x4xbf16, #tpu.memory_space<vmem>>, vector<16x16x4xbf16>
    %22 = vector.shape_cast %21 : vector<16x16x4xbf16> to vector<256x4xbf16>
    %c2_35 = arith.constant 2 : index
    %c2_36 = arith.constant 2 : index
    %c0_37 = arith.constant 0 : index
    %23 = vector.load %arg7[%c2_35, %c2_36, %c0_37] : memref<18x18x4xbf16, #tpu.memory_space<vmem>>, vector<16x16x4xbf16>
    %24 = vector.shape_cast %23 : vector<16x16x4xbf16> to vector<256x4xbf16>
    %25 = tpu.concatenate %8, %10, %12, %14, %16, %18, %20, %22, %24 in 1 : vector<256x4xbf16>, vector<256x4xbf16>, vector<256x4xbf16>, vector<256x4xbf16>, vector<256x4xbf16>, vector<256x4xbf16>, vector<256x4xbf16>, vector<256x4xbf16>, vector<256x4xbf16> -> vector<256x36xbf16>
    %c0_38 = arith.constant 0 : index
    %c0_39 = arith.constant 0 : index
    %26 = vector.load %arg2[%c0_38, %c0_39] : memref<36x32xbf16, #tpu.memory_space<vmem>>, vector<36x32xbf16>
    %cst_40 = arith.constant dense<0.000000e+00> : vector<256x32xf32>
    %27 = tpu.matmul %25, %26, %cst_40 {dimension_numbers = #tpu.dot_dimension_numbers<[1], [0], [0], [1], [0, 0, 1, 1], [], []>} : vector<256x36xbf16>, vector<36x32xbf16>, vector<256x32xf32> -> vector<256x32xf32>
    %c0_41 = arith.constant 0 : index
    %c0_42 = arith.constant 0 : index
    %28 = vector.load %arg3[%c0_41, %c0_42] : memref<1x32xf32, #tpu.memory_space<vmem>>, vector<1x32xf32>
    %29 = vector.broadcast %28 : vector<1x32xf32> to vector<256x32xf32>
    %30 = arith.addf %27, %29 : vector<256x32xf32>
    %cst_43 = arith.constant 0.000000e+00 : f32
    %31 = vector.broadcast %cst_43 : f32 to vector<256x32xf32>
    %32 = arith.maximumf %30, %31 : vector<256x32xf32>
    %33 = vector.shape_cast %32 : vector<256x32xf32> to vector<16x16x32xf32>
    %34 = arith.truncf %33 : vector<16x16x32xf32> to vector<16x16x32xbf16>
    %c1_44 = arith.constant 1 : index
    %c1_45 = arith.constant 1 : index
    %c0_46 = arith.constant 0 : index
    %35 = vector.load %arg8[%c1_44, %c1_45, %c0_46] : memref<18x18x32xbf16, #tpu.memory_space<vmem>>, vector<16x16x32xbf16>
    tpu.vector_store %arg8[%c1_44, %c1_45, %c0_46], %34 {strides = array<i32>} : memref<18x18x32xbf16, #tpu.memory_space<vmem>>, vector<16x16x32xbf16>,
    %c0_47 = arith.constant 0 : index
    %c0_48 = arith.constant 0 : index
    %c0_49 = arith.constant 0 : index
    %36 = vector.load %arg8[%c0_47, %c0_48, %c0_49] : memref<18x18x32xbf16, #tpu.memory_space<vmem>>, vector<16x16x32xbf16>
    %37 = vector.shape_cast %36 : vector<16x16x32xbf16> to vector<256x32xbf16>
    %c0_50 = arith.constant 0 : index
    %c1_51 = arith.constant 1 : index
    %c0_52 = arith.constant 0 : index
    %38 = vector.load %arg8[%c0_50, %c1_51, %c0_52] : memref<18x18x32xbf16, #tpu.memory_space<vmem>>, vector<16x16x32xbf16>
    %39 = vector.shape_cast %38 : vector<16x16x32xbf16> to vector<256x32xbf16>
    %c0_53 = arith.constant 0 : index
    %c2_54 = arith.constant 2 : index
    %c0_55 = arith.constant 0 : index
    %40 = vector.load %arg8[%c0_53, %c2_54, %c0_55] : memref<18x18x32xbf16, #tpu.memory_space<vmem>>, vector<16x16x32xbf16>
    %41 = vector.shape_cast %40 : vector<16x16x32xbf16> to vector<256x32xbf16>
    %c1_56 = arith.constant 1 : index
    %c0_57 = arith.constant 0 : index
    %c0_58 = arith.constant 0 : index
    %42 = vector.load %arg8[%c1_56, %c0_57, %c0_58] : memref<18x18x32xbf16, #tpu.memory_space<vmem>>, vector<16x16x32xbf16>
    %43 = vector.shape_cast %42 : vector<16x16x32xbf16> to vector<256x32xbf16>
    %c1_59 = arith.constant 1 : index
    %c1_60 = arith.constant 1 : index
    %c0_61 = arith.constant 0 : index
    %44 = vector.load %arg8[%c1_59, %c1_60, %c0_61] : memref<18x18x32xbf16, #tpu.memory_space<vmem>>, vector<16x16x32xbf16>
    %45 = vector.shape_cast %44 : vector<16x16x32xbf16> to vector<256x32xbf16>
    %c1_62 = arith.constant 1 : index
    %c2_63 = arith.constant 2 : index
    %c0_64 = arith.constant 0 : index
    %46 = vector.load %arg8[%c1_62, %c2_63, %c0_64] : memref<18x18x32xbf16, #tpu.memory_space<vmem>>, vector<16x16x32xbf16>
    %47 = vector.shape_cast %46 : vector<16x16x32xbf16> to vector<256x32xbf16>
    %c2_65 = arith.constant 2 : index
    %c0_66 = arith.constant 0 : index
    %c0_67 = arith.constant 0 : index
    %48 = vector.load %arg8[%c2_65, %c0_66, %c0_67] : memref<18x18x32xbf16, #tpu.memory_space<vmem>>, vector<16x16x32xbf16>
    %49 = vector.shape_cast %48 : vector<16x16x32xbf16> to vector<256x32xbf16>
    %c2_68 = arith.constant 2 : index
    %c1_69 = arith.constant 1 : index
    %c0_70 = arith.constant 0 : index
    %50 = vector.load %arg8[%c2_68, %c1_69, %c0_70] : memref<18x18x32xbf16, #tpu.memory_space<vmem>>, vector<16x16x32xbf16>
    %51 = vector.shape_cast %50 : vector<16x16x32xbf16> to vector<256x32xbf16>
    %c2_71 = arith.constant 2 : index
    %c2_72 = arith.constant 2 : index
    %c0_73 = arith.constant 0 : index
    %52 = vector.load %arg8[%c2_71, %c2_72, %c0_73] : memref<18x18x32xbf16, #tpu.memory_space<vmem>>, vector<16x16x32xbf16>
    %53 = vector.shape_cast %52 : vector<16x16x32xbf16> to vector<256x32xbf16>
    %54 = tpu.concatenate %37, %39, %41, %43, %45, %47, %49, %51, %53 in 1 : vector<256x32xbf16>, vector<256x32xbf16>, vector<256x32xbf16>, vector<256x32xbf16>, vector<256x32xbf16>, vector<256x32xbf16>, vector<256x32xbf16>, vector<256x32xbf16>, vector<256x32xbf16> -> vector<256x288xbf16>
    %c0_74 = arith.constant 0 : index
    %c0_75 = arith.constant 0 : index
    %55 = vector.load %arg4[%c0_74, %c0_75] : memref<288x32xbf16, #tpu.memory_space<vmem>>, vector<288x32xbf16>
    %cst_76 = arith.constant dense<0.000000e+00> : vector<256x32xf32>
    %56 = tpu.matmul %54, %55, %cst_76 {dimension_numbers = #tpu.dot_dimension_numbers<[1], [0], [0], [1], [0, 0, 1, 1], [], []>} : vector<256x288xbf16>, vector<288x32xbf16>, vector<256x32xf32> -> vector<256x32xf32>
    %c0_77 = arith.constant 0 : index
    %c0_78 = arith.constant 0 : index
    %57 = vector.load %arg5[%c0_77, %c0_78] : memref<1x32xf32, #tpu.memory_space<vmem>>, vector<1x32xf32>
    %58 = vector.broadcast %57 : vector<1x32xf32> to vector<256x32xf32>
    %59 = arith.addf %56, %58 : vector<256x32xf32>
    %cst_79 = arith.constant 0.000000e+00 : f32
    %60 = vector.broadcast %cst_79 : f32 to vector<256x32xf32>
    %61 = arith.maximumf %59, %60 : vector<256x32xf32>
    %62 = vector.shape_cast %61 : vector<256x32xf32> to vector<1x16x16x32xf32>
    %c0_80 = arith.constant 0 : index
    %c0_81 = arith.constant 0 : index
    %c0_82 = arith.constant 0 : index
    %c0_83 = arith.constant 0 : index
    %63 = vector.load %arg6[%c0_80, %c0_81, %c0_82, %c0_83] : memref<1x16x16x32xf32, #tpu.memory_space<vmem>>, vector<1x16x16x32xf32>
    tpu.vector_store %arg6[%c0_80, %c0_81, %c0_82, %c0_83], %62 {strides = array<i32>} : memref<1x16x16x32xf32, #tpu.memory_space<vmem>>, vector<1x16x16x32xf32>,
    return
  }
  func.func @transform_0(%arg0: i32) -> (i32, i32, i32, i32) {
    %c0_i32 = arith.constant 0 : i32
    %c0_i32_0 = arith.constant 0 : i32
    %c0_i32_1 = arith.constant 0 : i32
    %c0_i32_2 = arith.constant 0 : i32
    return %arg0, %c0_i32, %c0_i32_0, %c0_i32_1 : i32, i32, i32, i32
  }
  func.func @transform_1(%arg0: i32) -> (i32, i32) {
    %c0_i32 = arith.constant 0 : i32
    %c0_i32_0 = arith.constant 0 : i32
    %c0_i32_1 = arith.constant 0 : i32
    return %c0_i32, %c0_i32_0 : i32, i32
  }
  func.func @transform_2(%arg0: i32) -> (i32, i32) {
    %c0_i32 = arith.constant 0 : i32
    %c0_i32_0 = arith.constant 0 : i32
    %c0_i32_1 = arith.constant 0 : i32
    return %c0_i32, %c0_i32_0 : i32, i32
  }
  func.func @transform_3(%arg0: i32) -> (i32, i32) {
    %c0_i32 = arith.constant 0 : i32
    %c0_i32_0 = arith.constant 0 : i32
    %c0_i32_1 = arith.constant 0 : i32
    return %c0_i32, %c0_i32_0 : i32, i32
  }
  func.func @transform_4(%arg0: i32) -> (i32, i32) {
    %c0_i32 = arith.constant 0 : i32
    %c0_i32_0 = arith.constant 0 : i32
    %c0_i32_1 = arith.constant 0 : i32
    return %c0_i32, %c0_i32_0 : i32, i32
  }
  func.func @transform_5(%arg0: i32) -> (i32, i32, i32, i32) {
    %c0_i32 = arith.constant 0 : i32
    %c0_i32_0 = arith.constant 0 : i32
    %c0_i32_1 = arith.constant 0 : i32
    %c0_i32_2 = arith.constant 0 : i32
    return %arg0, %c0_i32, %c0_i32_0, %c0_i32_1 : i32, i32, i32, i32
  }
}

</mosaic_0001>

<bundles_post_ra>
// kernel: double_conv_forward.1
= control target key start
LH: loop header
LB: loop body
LE: loop exit
PB: predicated region body
PF: predicated region fallthrough
CT: control target
= control target key end

     0   :  { %10 = vsyncpa [#allocation5], 0  ;;  %s13069_s0 = inlined_call_operand.vmem [shape: bf16[2,16,16,4], index: 0, kind: input, shape index: {}]   ;;  %s13070_s1 = inlined_call_operand.vmem [shape: bf16[36,32], index: 1, kind: input, shape index: {}]   ;;  %s13071_s2 = inlined_call_operand.vmem [shape: f32[1,32], index: 2, kind: input, shape index: {}]   ;;  %s13072_s3 = inlined_call_operand.vmem [shape: bf16[288,32], index: 3, kind: input, shape index: {}]   ;;  %s13073_s4 = inlined_call_operand.vmem [shape: f32[1,32], index: 4, kind: input, shape index: {}]   ;;  %s13074_s5 = inlined_call_operand.hbm [shape: f32[2,16,16,32], index: 5, kind: output, shape index: {}]  }
   0x1   :  { %12 = vsyncpa [#allocation5 + $0x1], 0  ;;  %s8947_s18 = smov 0   ;;  %s8949_s19 = smov 0  }
   0x2   :  { %s8951_s20 = smov 0   ;;  %s8953_s21 = smov 0  }
   0x3 LB: > { %s8968_s22 = sadd.s32 4294967295, %s8902_s21   ;;  %s7862_s23 = sadd.s32 4294967294, %s8902_s21   ;;  %s8902_s21 = sphi %s8953_s21, %s13259_s21   ;;  %s8898_s20 = sphi %s8951_s20, %s13258_s20   ;;  %s8894_s19 = sphi %s8949_s19, %s13257_s19   ;;  %s8890_s18 = sphi %s8947_s18, %s13256_s18  }
   0x4   : > { %s8972_s24 = sadd.s32 1, %s8902_s21   ;;  %s135_s25 = sadd.s32 1, %s8898_s20 }
   0x5   : > { %s132_s26 = ssub.s32 %s8902_s21, %s8972_s24  ;;  %p145_p0 = scmp.ne.s32.totalorder %s8898_s20, %s8894_s19 }
   0x6   : > { %p133_p1 = scmp.eq.s32.totalorder %s132_s26, 0  ;;  %p146_p2 = scmp.eq.s32.totalorder %s8968_s22, 1 }
   0x7   : > { %p151_p3 = scmp.ne.s32.totalorder %s8894_s19, %s8890_s18  ;;  %p152_p4 = scmp.eq.s32.totalorder %s7862_s23, 1 }
   0x8   : > { %s8983_s27 = scalar_select %p133_p1, %s8898_s20, %s135_s25  }
   0x9   : > { %p8985_p5 = por %p146_p2, %p145_p0  ;;  %p8989_p6 = por %p152_p4, %p151_p3 }
   0xa   : > { %p7865_p7 = scmp.ge.s32.totalorder %s8902_s21, 1  ;;  %p190_p8 = scmp.lt.s32.totalorder %s8902_s21, 3 }
   0xc   : > { %p191_p9 = pnand %p7865_p7, %p190_p8 }
   0xe   : > { %194 = sbr.rel (%p191_p9) target bundleno = 1182 (0x49e), region = 40 }
  0x13   : > { %vm224_vm0 = vcmask 27648   ;;  %vm227_vm1 = vcmask 24576   ;;  %v13075_v0 = vmov 0   ;;  %p218_p10 = scmp.lt.s32.totalorder %s8968_s22, 1  ;;  %vm1308_vm2 = vcmask 1042432   ;;  %s8905_s10 = smov 8  }
  0x14   : > { %225 = vst.msk [vmem:[#allocation2] sm:$0xf] %vm224_vm0, %v13075_v0  ;;  %226 = vst.msk [vmem:[#allocation2 + $0x4] sm:$0xf] %vm224_vm0, %v13075_v0  ;;  %vm1309_vm3 = vcmask 1046532   ;;  %v13108_v1 = vmov 0 }
  0x15   : > { %228 = vst.msk [vmem:[#allocation2 + $0x8] sm:$0x1] %vm227_vm1, %v13075_v0  ;;  %231 = vst.msk [vmem:[#allocation2 + $0x14] sm:$0x1] %vm227_vm1, %v13075_v0  ;;  %s219_s30 = scalar_select %p218_p10, %s8968_s22, 1  ;;  %vm3376_vm14 = vcmask 31744  }
  0x16   : > { %229 = vst.msk [vmem:[#allocation2 + $0xc] sm:$0xf] %vm224_vm0, %v13075_v0  ;;  %230 = vst.msk [vmem:[#allocation2 + $0x10] sm:$0xf] %vm224_vm0, %v13075_v0  ;;  %vm857_vm4 = vsmask.f32 3328 }
  0x17   : > { %232 = vst.msk [vmem:[#allocation2 + $0x18] sm:$0xf] %vm224_vm0, %v13075_v0  ;;  %233 = vst.msk [vmem:[#allocation2 + $0x1c] sm:$0xf] %vm224_vm0, %v13075_v0  ;;  %vm858_vm5 = vsmask.f32 7440 }
  0x18   : > { %234 = vst.msk [vmem:[#allocation2 + $0x20] sm:$0x1] %vm227_vm1, %v13075_v0  ;;  %237 = vst.msk [vmem:[#allocation2 + $0x2c] sm:$0x1] %vm227_vm1, %v13075_v0  ;;  %s8345_s6 = sshll.u32 %s219_s30, 7  ;;  %s8906_s11 = smov 4  }
  0x19   : > { %235 = vst.msk [vmem:[#allocation2 + $0x24] sm:$0xf] %vm224_vm0, %v13075_v0  ;;  %236 = vst.msk [vmem:[#allocation2 + $0x28] sm:$0xf] %vm224_vm0, %v13075_v0  ;;  %s9108_s9 = scalar_lea.vmem %s13069_s0, %s8345_s6  ;;  %vm13077_vm6 = vsmask.f32 256 }
  0x1a   : > { %238 = vst.msk [vmem:[#allocation2 + $0x30] sm:$0xf] %vm224_vm0, %v13075_v0  ;;  %239 = vst.msk [vmem:[#allocation2 + $0x34] sm:$0xf] %vm224_vm0, %v13075_v0  ;;  %v338_v2 = vld [vmem:[%s9108_s9 + $0x8] sm:$0xf] }
  0x1b   : > { %240 = vst.msk [vmem:[#allocation2 + $0x38] sm:$0x1] %vm227_vm1, %v13075_v0  ;;  %243 = vst.msk [vmem:[#allocation2 + $0x44] sm:$0x1] %vm227_vm1, %v13075_v0  ;;  %vm369_vm8 = vsmask.f32 4368 }
  0x1c   : > { %241 = vst.msk [vmem:[#allocation2 + $0x3c] sm:$0xf] %vm224_vm0, %v13075_v0  ;;  %242 = vst.msk [vmem:[#allocation2 + $0x40] sm:$0xf] %vm224_vm0, %v13075_v0  ;;  %vm693_vm9 = vsmask.f32 7938 }
  0x1d   : > { %244 = vst.msk [vmem:[#allocation2 + $0x48] sm:$0xf] %vm224_vm0, %v13075_v0  ;;  %245 = vst.msk [vmem:[#allocation2 + $0x4c] sm:$0xf] %vm224_vm0, %v13075_v0  ;;  %v810_v3 = vld [vmem:[#allocation2 + $0x4] sm:$0xf] }
  0x1e   : > { %246 = vst.msk [vmem:[#allocation2 + $0x50] sm:$0x1] %vm227_vm1, %v13075_v0  ;;  %249 = vst.msk [vmem:[#allocation2 + $0x5c] sm:$0x1] %vm227_vm1, %v13075_v0  ;;  %v841_v4 = vld [vmem:[#allocation2 + $0x8] sm:$0x1] }
  0x1f   : > { %247 = vst.msk [vmem:[#allocation2 + $0x54] sm:$0xf] %vm224_vm0, %v13075_v0  ;;  %248 = vst.msk [vmem:[#allocation2 + $0x58] sm:$0xf] %vm224_vm0, %v13075_v0  ;;  %v1244_v5 = vld [vmem:[#allocation2] sm:$0xe] }
  0x20   : > { %250 = vst.msk [vmem:[#allocation2 + $0x60] sm:$0xf] %vm224_vm0, %v13075_v0  ;;  %251 = vst.msk [vmem:[#allocation2 + $0x64] sm:$0xf] %vm224_vm0, %v13075_v0  ;;  %v7869_v6 = vrot.slane %v1244_v5, 9  ;;  %v1313_v7 = vrot.slane %v810_v3, 5 }
  0x21   : > { %252 = vst.msk [vmem:[#allocation2 + $0x68] sm:$0x1] %vm227_vm1, %v13075_v0  ;;  %255 = vst.msk [vmem:[#allocation2 + $0x74] sm:$0x1] %vm227_vm1, %v13075_v0  ;;  %v1316_v8 = vrot.slane %v841_v4, 5  ;;  %v870_v10 = vshll.u32 %v810_v3, 16 }
  0x22   : > { %253 = vst.msk [vmem:[#allocation2 + $0x6c] sm:$0xf] %vm224_vm0, %v13075_v0  ;;  %254 = vst.msk [vmem:[#allocation2 + $0x70] sm:$0xf] %vm224_vm0, %v13075_v0  ;;  %v809_v9 = vld [vmem:[#allocation2] sm:$0xf] }
  0x23   : > { %256 = vst.msk [vmem:[#allocation2 + $0x78] sm:$0xf] %vm224_vm0, %v13075_v0  ;;  %257 = vst.msk [vmem:[#allocation2 + $0x7c] sm:$0xf] %vm224_vm0, %v13075_v0  ;;  %v861_v11 = vshrl.u32 %v809_v9, 16  ;;  %v864_v12 = vshll.u32 %v809_v9, 16 }
  0x24   : > { %258 = vst.msk [vmem:[#allocation2 + $0x80] sm:$0x1] %vm227_vm1, %v13075_v0  ;;  %261 = vst.msk [vmem:[#allocation2 + $0x8c] sm:$0x1] %vm227_vm1, %v13075_v0  ;;  %v874_v13 = vshrl.u32 %v810_v3, 16  ;;  %v880_v14 = vshll.u32 %v841_v4, 16 }
  0x25   : > { %259 = vst.msk [vmem:[#allocation2 + $0x84] sm:$0xf] %vm224_vm0, %v13075_v0  ;;  %260 = vst.msk [vmem:[#allocation2 + $0x88] sm:$0xf] %vm224_vm0, %v13075_v0  ;;  %v339_v15 = vld [vmem:[%s9108_s9 + $0xc] sm:$0xf] }
  0x26   : > { %262 = vst.msk [vmem:[#allocation2 + $0x90] sm:$0xf] %vm224_vm0, %v13075_v0  ;;  %263 = vst.msk [vmem:[#allocation2 + $0x94] sm:$0xf] %vm224_vm0, %v13075_v0  ;;  %v1315_v17 = vrot.slane %v1313_v7, 4  ;;  %v872_v18 = vrot.slane %v870_v10, 5 }
  0x27   : > { %264 = vst.msk [vmem:[#allocation2 + $0x98] sm:$0x1] %vm227_vm1, %v13075_v0  ;;  %267 = vst.msk [vmem:[#allocation2 + $0xa4] sm:$0x1] %vm227_vm1, %v13075_v0  ;;  %v389_v19 = vshrl.u32 %v338_v2, 16  ;;  %v863_v20 = vrot.slane %v861_v11, 4 }
  0x28   : > { %265 = vst.msk [vmem:[#allocation2 + $0x9c] sm:$0xf] %vm224_vm0, %v13075_v0  ;;  %266 = vst.msk [vmem:[#allocation2 + $0xa0] sm:$0xf] %vm224_vm0, %v13075_v0  ;;  %v866_v21 = vrot.slane %v864_v12, 5  ;;  %v876_v22 = vrot.slane %v874_v13, 4 }
  0x29   : > { %268 = vst.msk [vmem:[#allocation2 + $0xa8] sm:$0xf] %vm224_vm0, %v13075_v0  ;;  %269 = vst.msk [vmem:[#allocation2 + $0xac] sm:$0xf] %vm224_vm0, %v13075_v0  ;;  %v882_v23 = vrot.slane %v880_v14, 5  ;;  %v391_v26 = vrot.slane %v389_v19, 7 }
  0x2a   : > { %270 = vst.msk [vmem:[#allocation2 + $0xb0] sm:$0x1] %vm227_vm1, %v13075_v0  ;;  %273 = vst.msk [vmem:[#allocation2 + $0xbc] sm:$0x1] %vm227_vm1, %v13075_v0  ;;  %v336_v24 = vld [vmem:[%s9108_s9] sm:$0xf]  ;;  %v867_v31 = vor.u32 %v866_v21, %v863_v20  ;;  %v877_v32 = vor.u32 %v876_v22, %v872_v18 }
  0x2b   : > { %271 = vst.msk [vmem:[#allocation2 + $0xb4] sm:$0xf] %vm224_vm0, %v13075_v0  ;;  %272 = vst.msk [vmem:[#allocation2 + $0xb8] sm:$0xf] %vm224_vm0, %v13075_v0  ;;  %v392_v27 = vshll.u32 %v338_v2, 16  ;;  %v397_v28 = vshrl.u32 %v339_v15, 16 }
  0x2c   : > { %274 = vst.msk [vmem:[#allocation2 + $0xc0] sm:$0xf] %vm224_vm0, %v13075_v0  ;;  %275 = vst.msk [vmem:[#allocation2 + $0xc4] sm:$0xf] %vm224_vm0, %v13075_v0  ;;  %v337_v29 = vld [vmem:[%s9108_s9 + $0x4] sm:$0xf] }
  0x2d   : > { %276 = vst.msk [vmem:[#allocation2 + $0xc8] sm:$0x1] %vm227_vm1, %v13075_v0  ;;  %279 = vst.msk [vmem:[#allocation2 + $0xd4] sm:$0x1] %vm227_vm1, %v13075_v0  ;;  %v400_v33 = vshll.u32 %v339_v15, 16  ;;  %v394_v37 = vor.u32 %v392_v27, %v391_v26  ;;  %v395_v38 = vrot.slane %v391_v26, 4 }
  0x2e   : > { %277 = vst.msk [vmem:[#allocation2 + $0xcc] sm:$0xf] %vm224_vm0, %v13075_v0  ;;  %278 = vst.msk [vmem:[#allocation2 + $0xd0] sm:$0xf] %vm224_vm0, %v13075_v0  ;;  %v704_v35 = vld [vmem:[#allocation2 + $0x18] sm:$0xf] }
  0x2f   : > { %vm9110_vm7 = vmor %vm1308_vm2, %vm1309_vm3  ;;  %v399_v39 = vrot.slane %v397_v28, 7  ;;  %v372_v40 = vshrl.u32 %v336_v24, 16  ;;  %v340_v41 = vld [vmem:[%s9108_s9 + $0x10] sm:$0xf]  ;;  %v868_v42 = vrot.slane %v867_v31, 4  ;;  %v878_v43 = vrot.slane %v877_v32, 4 }
  0x30   : > { %v13109_v1 = vsel %vm9110_vm7, 4294967295, %v13108_v1  ;;  %v1314_v16 = vsel %vm9110_vm7, %v7869_v6, %v1313_v7  ;;  %v1317_v25 = vsel %vm9110_vm7, %v1315_v17, %v1316_v8  ;;  %vm9124_vm10 = vmand %vm224_vm0, %vm693_vm9  ;;  %v375_v45 = vshll.u32 %v336_v24, 16  ;;  %v341_v51 = vld [vmem:[%s9108_s9 + $0x14] sm:$0xf]  ;;  %v695_v55 = vld [vmem:[#allocation2 + $0xc] sm:$0xf] }
  0x31   : > { %13110 = vst [vmem:[#allocation7_spill] sm:$0xff] %v13109_v1  ;;  %v7949_v30 = vcombine.low %v1314_v16, %v1317_v25  ;;  %vm9130_vm11 = vmor %vm857_vm4, %vm858_vm5  ;;  %v380_v46 = vshrl.u32 %v337_v29, 16  ;;  %v402_v47 = vor.u32 %v400_v33, %v399_v39  ;;  %v705_v48 = vsel %vm9124_vm10, %v394_v37, %v704_v35  ;;  %v701_v61 = vld [vmem:[#allocation2 + $0x14] sm:$0x1]  ;;  %v708_v62 = vld [vmem:[#allocation2 + $0x20] sm:$0x1] }
  0x32   : > { %vm9138_vm12 = vmor %vm13077_vm6, %vm369_vm8  ;;  %v374_v49 = vrot.slane %v372_v40, 7  ;;  %v383_v50 = vshll.u32 %v337_v29, 16  ;;  %v873_v52 = vsel %vm9130_vm11, %v868_v42, %v872_v18  ;;  %v883_v53 = vsel %vm9130_vm11, %v878_v43, %v882_v23  ;;  %706 = vst [vmem:[#allocation2 + $0x18] sm:$0xf] %v705_v48  ;;  %v9159_v6 = vld [vmem:[%s9108_s9 + $0x18] sm:$0xf] }
  0x33   : > { %2832 = vrot.lane.b32.xlu1 %v7949_v30, %s8905_s10  ;;  %v382_v54 = vrot.slane %v380_v46, 7  ;;  %v406_v56 = vshrl.u32 %v340_v41, 16  ;;  %v7933_v57 = vcombine.low %v873_v52, %v883_v53  ;;  %v403_v58 = vsel %vm9138_vm12, %v395_v38, %v402_v47  ;;  %vm9154_vm13 = vmand %vm227_vm1, %vm13077_vm6  ;;  %v711_v9 = vld [vmem:[#allocation2 + $0x24] sm:$0xf]  ;;  %v715_v22 = vld [vmem:[#allocation2 + $0x2c] sm:$0x1] }
  0x34   : > { %v377_v59 = vor.u32 %v375_v45, %v374_v49  ;;  %v378_v60 = vrot.slane %v374_v49, 4  ;;  %707 = vst.msk [vmem:[#allocation2 + $0x1c] sm:$0xf] %vm224_vm0, %v403_v58  ;;  %v409_v3 = vshll.u32 %v340_v41, 16  ;;  %v414_v4 = vshrl.u32 %v341_v51, 16  ;;  %s8907_s12 = smov 12  }
  0x35   : > { %v385_v63 = vor.u32 %v383_v50, %v382_v54  ;;  %v408_v2 = vrot.slane %v406_v56, 7  ;;  %2752 = vrot.lane.b32.xlu0 %v7933_v57, %s8906_s11  ;;  %v417_v8 = vshll.u32 %v341_v51, 16  ;;  %v387_v10 = vrot.slane %v382_v54, 4  ;;  %v9175_v23 = vld [vmem:[%s9108_s9 + $0x1c] sm:$0xf]  ;;  %s8908_s13 = smov 24  }
  0x36   : > { %v696_v7 = vsel %vm9124_vm10, %v377_v59, %v695_v55  ;;  %v404_v11 = vrot.slane %v399_v39, 4  ;;  %v416_v15 = vrot.slane %v414_v4, 7  ;;  %v423_v18 = vshrl.u32 %v9159_v6, 16  ;;  %s8909_s14 = smov 20   ;;  %s8910_s15 = smov 32  }
  0x37   : > { %v386_v12 = vsel %vm9138_vm12, %v378_v60, %v385_v63  ;;  %697 = vst [vmem:[#allocation2 + $0xc] sm:$0xf] %v696_v7  ;;  %v411_v13 = vor.u32 %v409_v3, %v408_v2  ;;  %v412_v14 = vrot.slane %v408_v2, 4  ;;  %v702_v16 = vsel %vm9154_vm13, %v387_v10, %v701_v61  ;;  %s8911_s16 = smov 16   ;;  %s8912_s17 = smov 28  }
  0x38   : > { %698 = vst.msk [vmem:[#allocation2 + $0x10] sm:$0xf] %vm224_vm0, %v386_v12  ;;  %v709_v17 = vsel %vm9154_vm13, %v404_v11, %v708_v62  ;;  %v419_v19 = vor.u32 %v417_v8, %v416_v15  ;;  %703 = vst [vmem:[#allocation2 + $0x14] sm:$0x1] %v702_v16  ;;  %v421_v21 = vrot.slane %v416_v15, 4  ;;  %v426_v24 = vshll.u32 %v9159_v6, 16 }
  0x39   : > { %v712_v20 = vsel %vm9124_vm10, %v411_v13, %v711_v9  ;;  %710 = vst [vmem:[#allocation2 + $0x20] sm:$0x1] %v709_v17  ;;  %v1425_v25 = vld [vmem:[#allocation2 + $0x18] sm:$0xf]  ;;  %v431_v38 = vshrl.u32 %v9175_v23, 16  ;;  %vm3425_vm15 = vcmask 64512  }
  0x3a   : > { %713 = vst [vmem:[#allocation2 + $0x24] sm:$0xf] %v712_v20  ;;  %v9178_v26 = vld [vmem:[#allocation2 + $0x18] sm:$0xf]  ;;  %v1496_v28 = vshrl.u32 %v1425_v25, 16  ;;  %v1499_v29 = vshll.u32 %v1425_v25, 16  ;;  %v420_v30 = vsel %vm9138_vm12, %v412_v14, %v419_v19  ;;  %v716_v37 = vsel %vm9154_vm13, %v421_v21, %v715_v22 }
  0x3b   : > { %v2464_v27 = vld [vmem:[#allocation2 + $0x18] sm:$0xe]  ;;  %v2081_v31 = vshrl.u32 %v9178_v26, 16  ;;  %v9183_v32 = vld [vmem:[#allocation2 + $0x1c] sm:$0xf]  ;;  %v2084_v35 = vshll.u32 %v9178_v26, 16 }
  0x3c   : > { %714 = vst.msk [vmem:[#allocation2 + $0x28] sm:$0xf] %vm224_vm0, %v420_v30  ;;  %v9186_v33 = vld [vmem:[#allocation2 + $0x1c] sm:$0xf]  ;;  %v7966_v39 = vcombine.low %v1425_v25, %v9183_v32  ;;  %v9193_v40 = vrot.slane %v1496_v28, 4  ;;  %v9195_v41 = vrot.slane %v1499_v29, 5 }
  0x3d   : > { %v7901_v42 = vrot.slane %v2464_v27, 9  ;;  %717 = vst [vmem:[#allocation2 + $0x2c] sm:$0x1] %v716_v37  ;;  %v1509_v43 = vshrl.u32 %v9183_v32, 16  ;;  %v9198_v46 = vrot.slane %v2081_v31, 4  ;;  %v9200_v47 = vrot.slane %v2084_v35, 5 }
  0x3e   : > { %v1423_v45 = vld [vmem:[#allocation2 + $0xc] sm:$0xf]  ;;  %v2094_v48 = vshrl.u32 %v9186_v33, 16  ;;  %2930 = vrot.lane.b32.xlu1 %v7966_v39, %s8907_s12  ;;  %v8013_v52 = vcombine.low %v9178_v26, %v9186_v33  ;;  %v1502_v58 = vor.u32 %v9195_v41, %v9193_v40  ;;  %v2530_v63 = vrot.slane %v9186_v33, 5  ;;  %v1856_v2 = vld [vmem:[#allocation2 + $0x18] sm:$0xe] }
  0x3f   : > { %v9204_v49 = vld [vmem:[#allocation2 + $0x10] sm:$0xf]  ;;  %v1472_v50 = vshrl.u32 %v1423_v45, 16  ;;  %v1475_v51 = vshll.u32 %v1423_v45, 16  ;;  %v1855_v53 = vld [vmem:[#allocation2 + $0xc] sm:$0xe]  ;;  %v2087_v16 = vor.u32 %v9200_v47, %v9198_v46 }
  0x40   : > { %v7965_v54 = vcombine.low %v1423_v45, %v9204_v49  ;;  %v9209_v55 = vld [vmem:[#allocation2 + $0x14] sm:$0x1]  ;;  %v7885_v56 = vrot.slane %v1855_v53, 9  ;;  %v1921_v57 = vrot.slane %v9204_v49, 5  ;;  %v1485_v3 = vshrl.u32 %v9204_v49, 16  ;;  %s8913_s8 = smov 64  }
  0x41   : > { %v9214_v59 = vrot.slane %v1472_v50, 4  ;;  %v9216_v60 = vrot.slane %v1475_v51, 5  ;;  %v2034_v61 = vld [vmem:[#allocation2 + $0x24] sm:$0xf]  ;;  %v1924_v62 = vrot.slane %v9209_v55, 5  ;;  %v2531_v14 = vsel %vm9110_vm7, %v7901_v42, %v2530_v63  ;;  %s8378_s6 = sshll.u32 %s8968_s22, 12 }
  0x42   : > { %2928 = vrot.lane.b32.xlu0 %v7965_v54, %s8907_s12  ;;  %v2105_v4 = vshrl.u32 %v2034_v61, 16  ;;  %v2108_v7 = vshll.u32 %v2034_v61, 16  ;;  %v1923_v8 = vrot.slane %v1921_v57, 4  ;;  %v9222_v9 = vld [vmem:[#allocation2 + $0x10] sm:$0xf]  ;;  %v1922_v11 = vsel %vm9110_vm7, %v7885_v56, %v1921_v57 }
  0x43   : > { %v2035_v10 = vld [vmem:[#allocation2 + $0x28] sm:$0xf]  ;;  %v9226_v12 = vld [vmem:[#allocation2 + $0x14] sm:$0x1]  ;;  %v1245_v13 = vld [vmem:[#allocation2 + $0xc] sm:$0xe]  ;;  %v1478_v15 = vor.u32 %v9216_v60, %v9214_v59 }
  0x44   : > { %v2107_v17 = vrot.slane %v2105_v4, 4  ;;  %v2110_v19 = vrot.slane %v2108_v7, 5  ;;  %v2118_v20 = vshrl.u32 %v2035_v10, 16  ;;  %v8014_v21 = vcombine.low %v2034_v61, %v2035_v10  ;;  %v9234_v22 = vld [vmem:[#allocation2 + $0x20] sm:$0x1] }
  0x45   : > { %v1925_v25 = vsel %vm9110_vm7, %v1923_v8, %v1924_v62  ;;  %v7870_v26 = vrot.slane %v1245_v13, 9  ;;  %v1320_v27 = vrot.slane %v9222_v9, 5  ;;  %v1323_v28 = vrot.slane %v9226_v12, 5  ;;  %v1456_v29 = vld [vmem:[#allocation2 + $0x20] sm:$0x1] }
  0x46   : > { %3186 = vrot.lane.b32.xlu1 %v8014_v21, %s8908_s13  ;;  %3184 = vrot.lane.b32.xlu0 %v8013_v52, %s8908_s13  ;;  %v7997_v30 = vcombine.low %v1922_v11, %v1925_v25  ;;  %v2532_v31 = vrot.slane %v2530_v63, 4  ;;  %v2533_v35 = vrot.slane %v9234_v22, 5  ;;  %v7886_v37 = vrot.slane %v1856_v2, 9  ;;  %v2065_v39 = vld [vmem:[#allocation2 + $0x2c] sm:$0x1] }
  0x47   : > { %v1321_v40 = vsel %vm9110_vm7, %v7870_v26, %v1320_v27  ;;  %v1322_v41 = vrot.slane %v1320_v27, 4  ;;  %v1928_v42 = vrot.slane %v9183_v32, 5  ;;  %v1931_v45 = vrot.slane %v1456_v29, 5  ;;  %v2465_v50 = vld [vmem:[#allocation2 + $0x24] sm:$0xe] }
  0x48   : > { %v2534_v51 = vsel %vm9110_vm7, %v2532_v31, %v2533_v35  ;;  %v7902_v53 = vrot.slane %v2465_v50, 9  ;;  %v2537_v54 = vrot.slane %v2035_v10, 5  ;;  %v2540_v52 = vrot.slane %v2065_v39, 5  ;;  %v9260_v21 = vld [vmem:[#allocation2 + $0xc] sm:$0xf] }
  0x49   : > { %v1324_v56 = vsel %vm9110_vm7, %v1322_v41, %v1323_v28  ;;  %v8045_v57 = vcombine.low %v2531_v14, %v2534_v51  ;;  %v1929_v61 = vsel %vm9110_vm7, %v7886_v37, %v1928_v42  ;;  %v1930_v62 = vrot.slane %v1928_v42, 4  ;;  %v9276_v50 = vld [vmem:[#allocation2 + $0x1c] sm:$0xf]  ;;  %v10459_v34 = vld [vmem:[#allocation2 + $0xcc] sm:$0xf] }
  0x4a   : > { %3088 = vrot.lane.b32.xlu0 %v7997_v30, %s8909_s14  ;;  %v7950_v63 = vcombine.low %v1321_v40, %v1324_v56  ;;  %v2538_v2 = vsel %vm9110_vm7, %v7902_v53, %v2537_v54  ;;  %v2539_v4 = vrot.slane %v2537_v54, 4  ;;  %v1503_v7 = vrot.slane %v1502_v58, 4 }
  0x4b   : > { %v1932_v8 = vsel %vm9110_vm7, %v1930_v62, %v1931_v45  ;;  %v1505_v11 = vshll.u32 %v9183_v32, 16  ;;  %v1511_v13 = vrot.slane %v1509_v43, 4  ;;  %v1515_v14 = vshll.u32 %v1456_v29, 16 }
  0x4c   : > { %2834 = vrot.lane.b32.xlu1 %v7950_v63, %s8905_s10  ;;  %v7998_v25 = vcombine.low %v1929_v61, %v1932_v8  ;;  %v2541_v26 = vsel %vm9110_vm7, %v2539_v4, %v2540_v52  ;;  %v2111_v27 = vor.u32 %v2110_v19, %v2107_v17  ;;  %v2114_v28 = vshll.u32 %v2035_v10, 16  ;;  %v9271_v17 = vld [vmem:[#allocation2 + $0x18] sm:$0xf] }
  0x4d   : > { %v8046_v58 = vcombine.low %v2538_v2, %v2541_v26  ;;  %v1507_v30 = vrot.slane %v1505_v11, 5  ;;  %v1517_v31 = vrot.slane %v1515_v14, 5  ;;  %v2120_v35 = vrot.slane %v2118_v20, 4 }
  0x4e   : > { %3344 = vrot.lane.b32.xlu0 %v8045_v57, %s8910_s15  ;;  %v2112_v32 = vrot.slane %v2111_v27, 4  ;;  %v2116_v43 = vrot.slane %v2114_v28, 5  ;;  %v2124_v29 = vshll.u32 %v2065_v39, 16  ;;  %v885_v37 = vshrl.u32 %v9260_v21, 16 }
  0x4f   : > { %v1508_v40 = vsel %vm9130_vm11, %v1503_v7, %v1507_v30  ;;  %v1512_v41 = vor.u32 %v1511_v13, %v1507_v30  ;;  %v888_v42 = vshll.u32 %v9260_v21, 16  ;;  %v894_v10 = vshll.u32 %v9222_v9, 16  ;;  %v9285_v7 = vld [vmem:[#allocation2 + $0x20] sm:$0x1] }
  0x50   : > { %3090 = vrot.lane.b32.xlu1 %v7998_v25, %s8909_s14  ;;  %v2117_v19 = vsel %vm9130_vm11, %v2112_v32, %v2116_v43  ;;  %v2121_v20 = vor.u32 %v2120_v35, %v2116_v43  ;;  %v2126_v45 = vrot.slane %v2124_v29, 5  ;;  %v887_v39 = vrot.slane %v885_v37, 4  ;;  %v815_v35 = vld [vmem:[#allocation2 + $0x24] sm:$0xf] }
  0x51   : > { %v1513_v51 = vrot.slane %v1512_v41, 4  ;;  %v890_v53 = vrot.slane %v888_v42, 5  ;;  %v896_v54 = vrot.slane %v894_v10, 5  ;;  %v898_v52 = vshrl.u32 %v9222_v9, 16 }
  0x52   : > { %3346 = vrot.lane.b32.xlu0 %v8046_v58, %s8910_s15  ;;  %v2122_v56 = vrot.slane %v2121_v20, 4  ;;  %v904_v57 = vshll.u32 %v9226_v12, 16  ;;  %v909_v61 = vshrl.u32 %v9271_v17, 16  ;;  %v912_v62 = vshll.u32 %v9271_v17, 16  ;;  %v844_v20 = vld [vmem:[#allocation2 + $0x2c] sm:$0x1] }
  0x53   : > { %v1518_v63 = vsel %vm9130_vm11, %v1513_v51, %v1517_v31  ;;  %v891_v2 = vor.u32 %v890_v53, %v887_v39  ;;  %v900_v4 = vrot.slane %v898_v52, 4  ;;  %v918_v8 = vshll.u32 %v9276_v50, 16 }
  0x54   : > { %v7982_v11 = vcombine.low %v1508_v40, %v1518_v63  ;;  %v2127_v9 = vsel %vm9130_vm11, %v2122_v56, %v2126_v45  ;;  %v906_v13 = vrot.slane %v904_v57, 5  ;;  %v911_v14 = vrot.slane %v909_v61, 4  ;;  %v816_v40 = vld [vmem:[#allocation2 + $0x28] sm:$0xf]  ;;  %v1247_v63 = vld [vmem:[#allocation2 + $0x24] sm:$0xe] }
  0x55   : > { %v8030_v12 = vcombine.low %v2117_v19, %v2127_v9  ;;  %v892_v25 = vrot.slane %v891_v2, 4  ;;  %v901_v26 = vor.u32 %v900_v4, %v896_v54  ;;  %v914_v27 = vrot.slane %v912_v62, 5 }
  0x56   : > { %3010 = vrot.lane.b32.xlu1 %v7982_v11, %s8911_s16  ;;  %v920_v28 = vrot.slane %v918_v8, 5  ;;  %v922_v58 = vshrl.u32 %v9276_v50, 16  ;;  %v928_v30 = vshll.u32 %v9285_v7, 16  ;;  %v1479_v31 = vrot.slane %v1478_v15, 4 }
  0x57   : > { %v897_v32 = vsel %vm9130_vm11, %v892_v25, %v896_v54  ;;  %v902_v43 = vrot.slane %v901_v26, 4  ;;  %v915_v29 = vor.u32 %v914_v27, %v911_v14  ;;  %v1481_v37 = vshll.u32 %v9204_v49, 16 }
  0x58   : > { %v924_v41 = vrot.slane %v922_v58, 4  ;;  %v930_v42 = vrot.slane %v928_v30, 5  ;;  %v1487_v10 = vrot.slane %v1485_v3, 4  ;;  %v1491_v19 = vshll.u32 %v9209_v55, 16  ;;  %v1246_v58 = vld [vmem:[#allocation2 + $0x18] sm:$0xe] }
  0x59   : > { %v907_v59 = vsel %vm9130_vm11, %v902_v43, %v906_v13  ;;  %v916_v60 = vrot.slane %v915_v29, 4  ;;  %v1483_v15 = vrot.slane %v1481_v37, 5  ;;  %v933_v45 = vshrl.u32 %v815_v35, 16 }
  0x5a   : > { %3266 = vrot.lane.b32.xlu1 %v8030_v12, %s8912_s17  ;;  %v7934_v39 = vcombine.low %v897_v32, %v907_v59  ;;  %v925_v51 = vor.u32 %v924_v41, %v920_v28  ;;  %v1493_v53 = vrot.slane %v1491_v19, 5  ;;  %v936_v54 = vshll.u32 %v815_v35, 16  ;;  %v9329_v59 = vld [vmem:[#allocation2 + $0x24] sm:$0xf] }
  0x5b   : > { %v921_v49 = vsel %vm9130_vm11, %v916_v60, %v920_v28  ;;  %v1484_v55 = vsel %vm9130_vm11, %v1479_v31, %v1483_v15  ;;  %v1488_v3 = vor.u32 %v1487_v10, %v1483_v15  ;;  %v935_v52 = vrot.slane %v933_v45, 4  ;;  %v9331_v60 = vld [vmem:[#allocation2 + $0x28] sm:$0xf] }
  0x5c   : > { %2754 = vrot.lane.b32.xlu0 %v7934_v39, %s8906_s11  ;;  %v926_v56 = vrot.slane %v925_v51, 4  ;;  %v938_v57 = vrot.slane %v936_v54, 5  ;;  %v942_v61 = vshll.u32 %v816_v40, 16  ;;  %v946_v62 = vshrl.u32 %v816_v40, 16  ;;  %v718_v39 = vld [vmem:[#allocation2 + $0x30] sm:$0xf] }
  0x5d   : > { %v1489_v2 = vrot.slane %v1488_v3, 4  ;;  %v952_v4 = vshll.u32 %v844_v20, 16  ;;  %v2088_v8 = vrot.slane %v2087_v16, 4  ;;  %v2090_v11 = vshll.u32 %v9186_v33, 16 }
  0x5e   : > { %v931_v9 = vsel %vm9130_vm11, %v926_v56, %v930_v42  ;;  %v939_v13 = vor.u32 %v938_v57, %v935_v52  ;;  %v944_v14 = vrot.slane %v942_v61, 5  ;;  %v948_v12 = vrot.slane %v946_v62, 4  ;;  %v1457_v52 = vld [vmem:[#allocation2 + $0x2c] sm:$0x1]  ;;  %v1857_v56 = vld [vmem:[#allocation2 + $0x24] sm:$0xe] }
  0x5f   : > { %v7935_v25 = vcombine.low %v921_v49, %v931_v9  ;;  %v1494_v26 = vsel %vm9130_vm11, %v1489_v2, %v1493_v53  ;;  %v954_v27 = vrot.slane %v952_v4, 5  ;;  %v2092_v28 = vrot.slane %v2090_v11, 5  ;;  %v722_v62 = vld [vmem:[#allocation2 + $0x38] sm:$0x1]  ;;  %v344_v11 = vld [vmem:[%s9108_s9 + $0x20] sm:$0xf] }
  0x60   : > { %v7981_v30 = vcombine.low %v1484_v55, %v1494_v26  ;;  %v940_v31 = vrot.slane %v939_v13, 4  ;;  %v949_v35 = vor.u32 %v948_v12, %v944_v14  ;;  %v2096_v46 = vrot.slane %v2094_v48, 4  ;;  %v345_v26 = vld [vmem:[%s9108_s9 + $0x24] sm:$0xf] }
  0x61   : > { %2756 = vrot.lane.b32.xlu1 %v7935_v25, %s8906_s11  ;;  %v2093_v47 = vsel %vm9130_vm11, %v2088_v8, %v2092_v28  ;;  %v2100_v16 = vshll.u32 %v9234_v22, 16  ;;  %v7872_v32 = vrot.slane %v1247_v63, 9  ;;  %v1334_v43 = vrot.slane %v816_v40, 5 }
  0x62   : > { %3008 = vrot.lane.b32.xlu0 %v7981_v30, %s8911_s16  ;;  %v945_v29 = vsel %vm9130_vm11, %v940_v31, %v944_v14  ;;  %v950_v37 = vrot.slane %v949_v35, 4  ;;  %v2097_v41 = vor.u32 %v2096_v46, %v2092_v28  ;;  %v1337_v42 = vrot.slane %v844_v20, 5 }
  0x63   : > { %v2102_v10 = vrot.slane %v2100_v16, 5  ;;  %v1335_v33 = vsel %vm9110_vm7, %v7872_v32, %v1334_v43  ;;  %v1336_v48 = vrot.slane %v1334_v43, 4  ;;  %v7871_v19 = vrot.slane %v1246_v58, 9 }
  0x64   : > { %v955_v22 = vsel %vm9130_vm11, %v950_v37, %v954_v27  ;;  %v2098_v40 = vrot.slane %v2097_v41, 4  ;;  %v1327_v15 = vrot.slane %v9276_v50, 5  ;;  %v1330_v45 = vrot.slane %v9285_v7, 5  ;;  %v9365_v27 = vld [vmem:[%s9108_s9 + $0x28] sm:$0xf] }
  0x65   : > { %v7936_v20 = vcombine.low %v945_v29, %v955_v22  ;;  %v1338_v51 = vsel %vm9110_vm7, %v1336_v48, %v1337_v42  ;;  %v425_v53 = vrot.slane %v423_v18, 7  ;;  %v433_v54 = vrot.slane %v431_v38, 7 }
  0x66   : > { %v2103_v49 = vsel %vm9130_vm11, %v2098_v40, %v2102_v10  ;;  %v7952_v55 = vcombine.low %v1335_v33, %v1338_v51  ;;  %v1328_v3 = vsel %vm9110_vm7, %v7871_v19, %v1327_v15  ;;  %v1329_v7 = vrot.slane %v1327_v15, 4 }
  0x67   : > { %2758 = vrot.lane.b32.xlu1 %v7936_v20, %s8906_s11  ;;  %v8029_v57 = vcombine.low %v2093_v47, %v2103_v49  ;;  %v428_v18 = vor.u32 %v426_v24, %v425_v53  ;;  %v429_v61 = vrot.slane %v425_v53, 4  ;;  %v434_v38 = vshll.u32 %v9175_v23, 16 }
  0x68   : > { %v1331_v63 = vsel %vm9110_vm7, %v1329_v7, %v1330_v45  ;;  %v1520_v2 = vshrl.u32 %v9329_v59, 16  ;;  %v1523_v4 = vshll.u32 %v9329_v59, 16  ;;  %v1533_v8 = vshrl.u32 %v9331_v60, 16  ;;  %v725_v45 = vld [vmem:[#allocation2 + $0x3c] sm:$0xf] }
  0x69   : > { %3264 = vrot.lane.b32.xlu0 %v8029_v57, %s8912_s17  ;;  %v7951_v6 = vcombine.low %v1328_v3, %v1331_v63  ;;  %v436_v24 = vor.u32 %v434_v38, %v433_v54  ;;  %v719_v23 = vsel %vm9124_vm10, %v428_v18, %v718_v39  ;;  %v7967_v9 = vcombine.low %v9329_v59, %v9331_v60 }
  0x6a   : > { %720 = vst [vmem:[#allocation2 + $0x30] sm:$0xf] %v719_v23  ;;  %v1522_v13 = vrot.slane %v1520_v2, 4  ;;  %v1525_v14 = vrot.slane %v1523_v4, 5  ;;  %v438_v12 = vrot.slane %v433_v54, 4  ;;  %v1529_v25 = vshll.u32 %v9331_v60, 16 }
  0x6b   : > { %2838 = vrot.lane.b32.xlu1 %v7952_v55, %s8905_s10  ;;  %v437_v28 = vsel %vm9138_vm12, %v429_v61, %v436_v24  ;;  %v1535_v58 = vrot.slane %v1533_v8, 4  ;;  %v1539_v30 = vshll.u32 %v1457_v52, 16  ;;  %v7887_v31 = vrot.slane %v1857_v56, 9 }
  0x6c   : > { %721 = vst.msk [vmem:[#allocation2 + $0x34] sm:$0xf] %vm224_vm0, %v437_v28  ;;  %v723_v35 = vsel %vm9154_vm13, %v438_v12, %v722_v62  ;;  %v1526_v46 = vor.u32 %v1525_v14, %v1522_v13  ;;  %v1531_v47 = vrot.slane %v1529_v25, 5  ;;  %v1935_v16 = vrot.slane %v9331_v60, 5 }
  0x6d   : > { %2836 = vrot.lane.b32.xlu0 %v7951_v6, %s8905_s10  ;;  %724 = vst [vmem:[#allocation2 + $0x38] sm:$0x1] %v723_v35  ;;  %v1541_v32 = vrot.slane %v1539_v30, 5  ;;  %v1938_v43 = vrot.slane %v1457_v52, 5  ;;  %v440_v29 = vshrl.u32 %v344_v11, 16  ;;  %v443_v37 = vshll.u32 %v344_v11, 16 }
  0x6e   : > { %v1527_v41 = vrot.slane %v1526_v46, 4  ;;  %v1536_v42 = vor.u32 %v1535_v58, %v1531_v47  ;;  %v1936_v10 = vsel %vm9110_vm7, %v7887_v31, %v1935_v16  ;;  %v1937_v33 = vrot.slane %v1935_v16, 4  ;;  %v729_v46 = vld [vmem:[#allocation2 + $0x44] sm:$0x1] }
  0x6f   : > { %v442_v48 = vrot.slane %v440_v29, 7  ;;  %v448_v19 = vshrl.u32 %v345_v26, 16  ;;  %v451_v59 = vshll.u32 %v345_v26, 16  ;;  %v457_v22 = vshrl.u32 %v9365_v27, 16 }
  0x70   : > { %v1532_v60 = vsel %vm9130_vm11, %v1527_v41, %v1531_v47  ;;  %v1537_v40 = vrot.slane %v1536_v42, 4  ;;  %v1939_v15 = vsel %vm9110_vm7, %v1937_v33, %v1938_v43  ;;  %v460_v39 = vshll.u32 %v9365_v27, 16 }
  0x71   : > { %v1429_v20 = vld [vmem:[#allocation2 + $0x30] sm:$0xf]  ;;  %2932 = vrot.lane.b32.xlu0 %v7967_v9, %s8907_s12  ;;  %v7999_v53 = vcombine.low %v1936_v10, %v1939_v15  ;;  %v445_v54 = vor.u32 %v443_v37, %v442_v48  ;;  %v446_v49 = vrot.slane %v442_v48, 4  ;;  %v450_v55 = vrot.slane %v448_v19, 7 }
  0x72   : > { %v1858_v51 = vld [vmem:[#allocation2 + $0x30] sm:$0xe]  ;;  %v1544_v3 = vshrl.u32 %v1429_v20, 16  ;;  %v1547_v7 = vshll.u32 %v1429_v20, 16  ;;  %v1542_v52 = vsel %vm9130_vm11, %v1537_v40, %v1541_v32  ;;  %vm3458_vm1 = vcmask 97280  }
  0x73   : > { %v7888_v56 = vrot.slane %v1858_v51, 9  ;;  %v2036_v57 = vld [vmem:[#allocation2 + $0x30] sm:$0xf]  ;;  %v1430_v18 = vld [vmem:[#allocation2 + $0x34] sm:$0xf]  ;;  %v7983_v61 = vcombine.low %v1532_v60, %v1542_v52  ;;  %v453_v38 = vor.u32 %v451_v59, %v450_v55  ;;  %v726_v62 = vsel %vm9124_vm10, %v445_v54, %v725_v45 }
  0x74   : > { %v2129_v63 = vshrl.u32 %v2036_v57, 16  ;;  %v1546_v2 = vrot.slane %v1544_v3, 4  ;;  %v1549_v4 = vrot.slane %v1547_v7, 5  ;;  %v1557_v8 = vshrl.u32 %v1430_v18, 16  ;;  %v1458_v6 = vld [vmem:[#allocation2 + $0x38] sm:$0x1] }
  0x75   : > { %v7968_v11 = vcombine.low %v1429_v20, %v1430_v18  ;;  %727 = vst [vmem:[#allocation2 + $0x3c] sm:$0xf] %v726_v62  ;;  %v1553_v24 = vshll.u32 %v1430_v18, 16  ;;  %v1563_v23 = vshll.u32 %v1458_v6, 16  ;;  %3012 = vrot.lane.b32.xlu0 %v7983_v61, %s8911_s16  ;;  %v1942_v9 = vrot.slane %v1430_v18, 5 }
  0x76   : > { %v1945_v13 = vrot.slane %v1458_v6, 5  ;;  %v9389_v14 = vld [vmem:[#allocation2 + $0x34] sm:$0xf]  ;;  %v1550_v12 = vor.u32 %v1549_v4, %v1546_v2  ;;  %v1559_v25 = vrot.slane %v1557_v8, 4  ;;  %v454_v26 = vsel %vm9138_vm12, %v446_v49, %v453_v38  ;;  %v9401_v29 = vld [vmem:[#allocation2 + $0x38] sm:$0x1] }
  0x77   : > { %2934 = vrot.lane.b32.xlu1 %v7968_v11, %s8907_s12  ;;  %v2131_v28 = vrot.slane %v2129_v63, 4  ;;  %v1555_v58 = vrot.slane %v1553_v24, 5  ;;  %v1565_v30 = vrot.slane %v1563_v23, 5  ;;  %v9396_v31 = vsel %vm9110_vm7, %v7888_v56, %v1942_v9  ;;  %728 = vst.msk [vmem:[#allocation2 + $0x40] sm:$0xf] %vm224_vm0, %v454_v26 }
  0x78   : > { %v1944_v35 = vrot.slane %v1942_v9, 4  ;;  %v1551_v47 = vrot.slane %v1550_v12, 4  ;;  %v2132_v16 = vshll.u32 %v2036_v57, 16  ;;  %v2142_v32 = vshrl.u32 %v9389_v14, 16  ;;  %v2466_v33 = vld [vmem:[#allocation2 + $0x30] sm:$0xe] }
  0x79   : > { %v8015_v43 = vcombine.low %v2036_v57, %v9389_v14  ;;  %v1560_v37 = vor.u32 %v1559_v25, %v1555_v58  ;;  %3092 = vrot.lane.b32.xlu0 %v7999_v53, %s8909_s14  ;;  %v455_v42 = vrot.slane %v450_v55, 4  ;;  %v2138_v10 = vshll.u32 %v9389_v14, 16 }
  0x7a   : > { %v1946_v41 = vsel %vm9110_vm7, %v1944_v35, %v1945_v13  ;;  %v1556_v48 = vsel %vm9130_vm11, %v1551_v47, %v1555_v58  ;;  %v2134_v59 = vrot.slane %v2132_v16, 5  ;;  %v2144_v60 = vrot.slane %v2142_v32, 4 }
  0x7b   : > { %v8000_v19 = vcombine.low %v9396_v31, %v1946_v41  ;;  %v1561_v40 = vrot.slane %v1560_v37, 4  ;;  %v730_v45 = vsel %vm9154_vm13, %v455_v42, %v729_v46  ;;  %v2140_v20 = vrot.slane %v2138_v10, 5 }
  0x7c   : > { %v9410_v15 = vld [vmem:[#allocation2 + $0x3c] sm:$0xf]  ;;  %v2148_v51 = vshll.u32 %v9401_v29, 16  ;;  %731 = vst [vmem:[#allocation2 + $0x44] sm:$0x1] %v730_v45  ;;  %v2135_v49 = vor.u32 %v2134_v59, %v2131_v28  ;;  %v7903_v3 = vrot.slane %v2466_v33, 9 }
  0x7d   : > { %v2153_v53 = vshrl.u32 %v9410_v15, 16  ;;  %v2156_v54 = vshll.u32 %v9410_v15, 16  ;;  %v2467_v55 = vld [vmem:[#allocation2 + $0x3c] sm:$0xe]  ;;  %v1566_v7 = vsel %vm9130_vm11, %v1561_v40, %v1565_v30  ;;  %3188 = vrot.lane.b32.xlu0 %v8015_v43, %s8908_s13  ;;  %v2145_v52 = vor.u32 %v2144_v60, %v2140_v20  ;;  %v817_v40 = vld [vmem:[#allocation2 + $0x30] sm:$0xf] }
  0x7e   : > { %v2150_v56 = vrot.slane %v2148_v51, 5  ;;  %v7904_v57 = vrot.slane %v2467_v55, 9  ;;  %v7984_v18 = vcombine.low %v1556_v48, %v1566_v7  ;;  %v2039_v61 = vld [vmem:[#allocation2 + $0x40] sm:$0xf]  ;;  %v2136_v63 = vrot.slane %v2135_v49, 4 }
  0x7f   : > { %v2155_v38 = vrot.slane %v2153_v53, 4  ;;  %v2158_v62 = vrot.slane %v2156_v54, 5  ;;  %v2166_v2 = vshrl.u32 %v2039_v61, 16  ;;  %v8016_v4 = vcombine.low %v9410_v15, %v2039_v61  ;;  %v9425_v13 = vld [vmem:[#allocation2 + $0x3c] sm:$0xf] }
  0x80   : > { %v2162_v8 = vshll.u32 %v2039_v61, 16  ;;  %v2146_v11 = vrot.slane %v2145_v52, 4  ;;  %3014 = vrot.lane.b32.xlu1 %v7984_v18, %s8911_s16  ;;  %v2141_v24 = vsel %vm9130_vm11, %v2136_v63, %v2140_v20  ;;  %v2551_v23 = vrot.slane %v2039_v61, 5  ;;  %v9434_v46 = vld [vmem:[#allocation2 + $0x40] sm:$0xf] }
  0x81   : > { %v2159_v6 = vor.u32 %v2158_v62, %v2155_v38  ;;  %v2544_v9 = vrot.slane %v9389_v14, 5  ;;  %v2168_v25 = vrot.slane %v2166_v2, 4  ;;  %v2547_v28 = vrot.slane %v9401_v29, 5  ;;  %v818_v51 = vld [vmem:[#allocation2 + $0x34] sm:$0xf] }
  0x82   : > { %v2164_v12 = vrot.slane %v2162_v8, 5  ;;  %v2151_v26 = vsel %vm9130_vm11, %v2146_v11, %v2150_v56  ;;  %v9432_v31 = vsel %vm9110_vm7, %v7904_v57, %v2551_v23  ;;  %v2553_v35 = vrot.slane %v2551_v23, 4  ;;  %v845_v52 = vld [vmem:[#allocation2 + $0x38] sm:$0x1]  ;;  %v1249_v18 = vld [vmem:[#allocation2 + $0x3c] sm:$0xe] }
  0x83   : > { %v2160_v58 = vrot.slane %v2159_v6, 4  ;;  %v8031_v30 = vcombine.low %v2141_v24, %v2151_v26  ;;  %v2067_v47 = vld [vmem:[#allocation2 + $0x44] sm:$0x1]  ;;  %v2545_v16 = vsel %vm9110_vm7, %v7903_v3, %v2544_v9  ;;  %v2546_v32 = vrot.slane %v2544_v9, 4  ;;  %v1248_v24 = vld [vmem:[#allocation2 + $0x30] sm:$0xe] }
  0x84   : > { %v2169_v14 = vor.u32 %v2168_v25, %v2164_v12  ;;  %v981_v43 = vshrl.u32 %v9425_v13, 16  ;;  %3094 = vrot.lane.b32.xlu1 %v8000_v19, %s8909_s14  ;;  %v2172_v37 = vshll.u32 %v2067_v47, 16  ;;  %v2554_v41 = vrot.slane %v2067_v47, 5  ;;  %v846_v42 = vld [vmem:[#allocation2 + $0x44] sm:$0x1] }
  0x85   : > { %v2165_v29 = vsel %vm9130_vm11, %v2160_v58, %v2164_v12  ;;  %3268 = vrot.lane.b32.xlu0 %v8031_v30, %s8912_s17  ;;  %v984_v10 = vshll.u32 %v9425_v13, 16  ;;  %v2548_v48 = vsel %vm9110_vm7, %v2546_v32, %v2547_v28  ;;  %v990_v60 = vshll.u32 %v9434_v46, 16 }
  0x86   : > { %v2170_v33 = vrot.slane %v2169_v14, 4  ;;  %v983_v59 = vrot.slane %v981_v43, 4  ;;  %v2174_v15 = vrot.slane %v2172_v37, 5  ;;  %v2555_v19 = vsel %vm9110_vm7, %v2553_v35, %v2554_v41 }
  0x87   : > { %v8047_v45 = vcombine.low %v2545_v16, %v2548_v48  ;;  %v986_v20 = vrot.slane %v984_v10, 5  ;;  %v8048_v53 = vcombine.low %v9432_v31, %v2555_v19  ;;  %v992_v54 = vrot.slane %v990_v60, 5  ;;  %v347_v10 = vld [vmem:[%s9108_s9 + $0x2c] sm:$0xf] }
  0x88   : > { %v994_v49 = vshrl.u32 %v9434_v46, 16  ;;  %v1000_v55 = vshll.u32 %v846_v42, 16  ;;  %3190 = vrot.lane.b32.xlu1 %v8016_v4, %s8908_s13  ;;  %v2175_v3 = vsel %vm9130_vm11, %v2170_v33, %v2174_v15  ;;  %v957_v56 = vshrl.u32 %v817_v40, 16  ;;  %v9471_v15 = vld [vmem:[#allocation2 + $0x3c] sm:$0xf] }
  0x89   : > { %3348 = vrot.lane.b32.xlu0 %v8047_v45, %s8910_s15  ;;  %v987_v7 = vor.u32 %v986_v20, %v983_v59  ;;  %v960_v57 = vshll.u32 %v817_v40, 16  ;;  %v8032_v61 = vcombine.low %v2165_v29, %v2175_v3  ;;  %v966_v63 = vshll.u32 %v818_v51, 16  ;;  %v732_v40 = vld [vmem:[#allocation2 + $0x48] sm:$0xf]  ;;  %v1459_v3 = vld [vmem:[#allocation2 + $0x44] sm:$0x1] }
  0x8a   : > { %v996_v38 = vrot.slane %v994_v49, 4  ;;  %v1002_v62 = vrot.slane %v1000_v55, 5  ;;  %v959_v8 = vrot.slane %v957_v56, 4  ;;  %v970_v6 = vshrl.u32 %v818_v51, 16 }
  0x8b   : > { %v988_v2 = vrot.slane %v987_v7, 4  ;;  %v962_v11 = vrot.slane %v960_v57, 5  ;;  %v968_v23 = vrot.slane %v966_v63, 5  ;;  %v976_v9 = vshll.u32 %v845_v52, 16 }
  0x8c   : > { %v997_v4 = vor.u32 %v996_v38, %v992_v54  ;;  %v7874_v12 = vrot.slane %v1249_v18, 9  ;;  %3270 = vrot.lane.b32.xlu1 %v8032_v61, %s8912_s17  ;;  %v972_v28 = vrot.slane %v970_v6, 4  ;;  %v1348_v58 = vrot.slane %v9434_v46, 5  ;;  %v1859_v38 = vld [vmem:[#allocation2 + $0x3c] sm:$0xe] }
  0x8d   : > { %v993_v25 = vsel %vm9130_vm11, %v988_v2, %v992_v54  ;;  %v963_v26 = vor.u32 %v962_v11, %v959_v8  ;;  %v978_v31 = vrot.slane %v976_v9, 5  ;;  %v1351_v35 = vrot.slane %v846_v42, 5  ;;  %v736_v2 = vld [vmem:[#allocation2 + $0x50] sm:$0x1] }
  0x8e   : > { %v998_v30 = vrot.slane %v997_v4, 4  ;;  %v7873_v47 = vrot.slane %v1248_v24, 9  ;;  %v973_v16 = vor.u32 %v972_v28, %v968_v23  ;;  %v1349_v32 = vsel %vm9110_vm7, %v7874_v12, %v1348_v58  ;;  %v348_v9 = vld [vmem:[%s9108_s9 + $0x30] sm:$0xf] }
  0x8f   : > { %v964_v14 = vrot.slane %v963_v26, 4  ;;  %v1350_v43 = vrot.slane %v1348_v58, 4  ;;  %v1341_v37 = vrot.slane %v818_v51, 5  ;;  %v1344_v41 = vrot.slane %v845_v52, 5  ;;  %v9477_v51 = vld [vmem:[#allocation2 + $0x40] sm:$0xf] }
  0x90   : > { %v1003_v29 = vsel %vm9130_vm11, %v998_v30, %v1002_v62  ;;  %v459_v33 = vrot.slane %v457_v22, 7  ;;  %3350 = vrot.lane.b32.xlu1 %v8048_v53, %s8910_s15  ;;  %v974_v59 = vrot.slane %v973_v16, 4  ;;  %v465_v49 = vshrl.u32 %v347_v10, 16  ;;  %v349_v58 = vld [vmem:[%s9108_s9 + $0x34] sm:$0xf] }
  0x91   : > { %v7938_v48 = vcombine.low %v993_v25, %v1003_v29  ;;  %v969_v42 = vsel %vm9130_vm11, %v964_v14, %v968_v23  ;;  %v1352_v60 = vsel %vm9110_vm7, %v1350_v43, %v1351_v35  ;;  %v1342_v45 = vsel %vm9110_vm7, %v7873_v47, %v1341_v37 }
  0x92   : > { %v7954_v19 = vcombine.low %v1349_v32, %v1352_v60  ;;  %v1343_v20 = vrot.slane %v1341_v37, 4  ;;  %v462_v22 = vor.u32 %v460_v39, %v459_v33  ;;  %v979_v53 = vsel %vm9130_vm11, %v974_v59, %v978_v31 }
  0x93   : > { %v463_v54 = vrot.slane %v459_v33, 4  ;;  %v468_v55 = vshll.u32 %v347_v10, 16  ;;  %v7937_v7 = vcombine.low %v969_v42, %v979_v53  ;;  %v1568_v57 = vshrl.u32 %v9471_v15, 16  ;;  %v739_v33 = vld [vmem:[#allocation2 + $0x54] sm:$0xf] }
  0x94   : > { %v1345_v52 = vsel %vm9110_vm7, %v1343_v20, %v1344_v41  ;;  %v733_v56 = vsel %vm9124_vm10, %v462_v22, %v732_v40  ;;  %2762 = vrot.lane.b32.xlu1 %v7938_v48, %s8906_s11  ;;  %v467_v39 = vrot.slane %v465_v49, 7  ;;  %v1571_v18 = vshll.u32 %v9471_v15, 16 }
  0x95   : > { %v7953_v27 = vcombine.low %v1342_v45, %v1345_v52  ;;  %734 = vst [vmem:[#allocation2 + $0x48] sm:$0xf] %v733_v56  ;;  %v1581_v61 = vshrl.u32 %v9477_v51, 16  ;;  %2760 = vrot.lane.b32.xlu0 %v7937_v7, %s8906_s11  ;;  %v1570_v62 = vrot.slane %v1568_v57, 4  ;;  %v7969_v63 = vcombine.low %v9471_v15, %v9477_v51  ;;  %v9509_v15 = vld [vmem:[#allocation2 + $0x4] sm:$0xf] }
  0x96   : > { %v1577_v8 = vshll.u32 %v9477_v51, 16  ;;  %v1587_v11 = vshll.u32 %v1459_v3, 16  ;;  %v470_v6 = vor.u32 %v468_v55, %v467_v39  ;;  %v1573_v24 = vrot.slane %v1571_v18, 5 }
  0x97   : > { %v472_v4 = vrot.slane %v467_v39, 4  ;;  %v1583_v23 = vrot.slane %v1581_v61, 4  ;;  %v7889_v26 = vrot.slane %v1859_v38, 9  ;;  %v1949_v28 = vrot.slane %v9477_v51, 5 }
  0x98   : > { %v1579_v12 = vrot.slane %v1577_v8, 5  ;;  %v1589_v25 = vrot.slane %v1587_v11, 5  ;;  %2842 = vrot.lane.b32.xlu1 %v7954_v19, %s8905_s10  ;;  %v471_v30 = vsel %vm9138_vm12, %v463_v54, %v470_v6  ;;  %v1574_v35 = vor.u32 %v1573_v24, %v1570_v62  ;;  %v9511_v19 = vld [vmem:[#allocation2] sm:$0xf]  ;;  %v9530_v6 = vld [vmem:[#allocation2 + $0x10] sm:$0xf] }
  0x99   : > { %v737_v31 = vsel %vm9154_vm13, %v472_v4, %v736_v2  ;;  %v1952_v47 = vrot.slane %v1459_v3, 5  ;;  %2840 = vrot.lane.b32.xlu0 %v7953_v27, %s8905_s10  ;;  %735 = vst.msk [vmem:[#allocation2 + $0x4c] sm:$0xf] %vm224_vm0, %v471_v30  ;;  %v9505_v16 = vsel %vm9110_vm7, %v7889_v26, %v1949_v28  ;;  %v1951_v32 = vrot.slane %v1949_v28, 4 }
  0x9a   : > { %738 = vst [vmem:[#allocation2 + $0x50] sm:$0x1] %v737_v31  ;;  %v1584_v14 = vor.u32 %v1583_v23, %v1579_v12  ;;  %v474_v43 = vshrl.u32 %v348_v9, 16  ;;  %v1575_v29 = vrot.slane %v1574_v35, 4  ;;  %v477_v37 = vshll.u32 %v348_v9, 16 }
  0x9b   : > { %v482_v41 = vshrl.u32 %v349_v58, 16  ;;  %v485_v10 = vshll.u32 %v349_v58, 16  ;;  %v1953_v60 = vsel %vm9110_vm7, %v1951_v32, %v1952_v47  ;;  %v7917_v45 = vcombine.low %v9511_v19, %v9509_v15  ;;  %v743_v32 = vld [vmem:[#allocation2 + $0x5c] sm:$0x1] }
  0x9c   : > { %v1433_v48 = vld [vmem:[#allocation2 + $0x48] sm:$0xf]  ;;  %v1585_v42 = vrot.slane %v1584_v14, 4  ;;  %v476_v40 = vrot.slane %v474_v43, 7  ;;  %v1580_v51 = vsel %vm9130_vm11, %v1575_v29, %v1579_v12  ;;  %v8001_v55 = vcombine.low %v9505_v16, %v1953_v60 }
  0x9d   : > { %v1860_v59 = vld [vmem:[#allocation2 + $0x48] sm:$0xe]  ;;  %v1592_v20 = vshrl.u32 %v1433_v48, 16  ;;  %v1595_v22 = vshll.u32 %v1433_v48, 16  ;;  %2936 = vrot.lane.b32.xlu0 %v7969_v63, %s8907_s12  ;;  %v484_v39 = vrot.slane %v482_v41, 7  ;;  %v7918_v24 = vcombine.low %v9260_v21, %v9530_v6 }
  0x9e   : > { %v7890_v53 = vrot.slane %v1860_v59, 9  ;;  %v9517_v54 = vld [vmem:[#allocation2 + $0x48] sm:$0xf]  ;;  %v1590_v49 = vsel %vm9130_vm11, %v1585_v42, %v1589_v25  ;;  %v479_v3 = vor.u32 %v477_v37, %v476_v40  ;;  %v480_v7 = vrot.slane %v476_v40, 4 }
  0x9f   : > { %v9523_v52 = vld [vmem:[#allocation2 + $0x48] sm:$0xe]  ;;  %v1594_v56 = vrot.slane %v1592_v20, 4  ;;  %v1597_v57 = vrot.slane %v1595_v22, 5  ;;  %v7985_v27 = vcombine.low %v1580_v51, %v1590_v49  ;;  %v2177_v61 = vshrl.u32 %v9517_v54, 16 }
  0xa0   : > { %v740_v18 = vsel %vm9124_vm10, %v479_v3, %v739_v33  ;;  %v2180_v38 = vshll.u32 %v9517_v54, 16  ;;  %v7905_v62 = vrot.slane %v9523_v52, 9  ;;  %v1434_v63 = vld [vmem:[#allocation2 + $0x4c] sm:$0xf]  ;;  %v487_v11 = vor.u32 %v485_v10, %v484_v39 }
  0xa1   : > { %v1460_v2 = vld [vmem:[#allocation2 + $0x50] sm:$0x1]  ;;  %v1598_v8 = vor.u32 %v1597_v57, %v1594_v56  ;;  %741 = vst [vmem:[#allocation2 + $0x54] sm:$0xf] %v740_v18  ;;  %v7919_v4 = vcombine.low %v9271_v17, %v9276_v50  ;;  %v1605_v23 = vshrl.u32 %v1434_v63, 16  ;;  %v7970_v9 = vcombine.low %v1433_v48, %v1434_v63  ;;  %3016 = vrot.lane.b32.xlu0 %v7985_v27, %s8911_s16 }
  0xa2   : > { %v1601_v12 = vshll.u32 %v1434_v63, 16  ;;  %v1611_v25 = vshll.u32 %v1460_v2, 16  ;;  %v2041_v26 = vld [vmem:[#allocation2 + $0x4c] sm:$0xf]  ;;  %v1956_v58 = vrot.slane %v1434_v63, 5  ;;  %v1959_v30 = vrot.slane %v1460_v2, 5 }
  0xa3   : > { %v1599_v28 = vrot.slane %v1598_v8, 4  ;;  %v488_v31 = vsel %vm9138_vm12, %v480_v7, %v487_v11  ;;  %2938 = vrot.lane.b32.xlu1 %v7970_v9, %s8907_s12  ;;  %v1607_v47 = vrot.slane %v1605_v23, 4  ;;  %v2179_v16 = vrot.slane %v2177_v61, 4  ;;  %v2068_v10 = vld [vmem:[#allocation2 + $0x50] sm:$0x1] }
  0xa4   : > { %v1603_v35 = vrot.slane %v1601_v12, 5  ;;  %v1613_v14 = vrot.slane %v1611_v25, 5  ;;  %742 = vst.msk [vmem:[#allocation2 + $0x58] sm:$0xf] %vm224_vm0, %v488_v31  ;;  %v1957_v43 = vsel %vm9110_vm7, %v7890_v53, %v1956_v58  ;;  %v1958_v29 = vrot.slane %v1956_v58, 4 }
  0xa5   : > { %v2182_v37 = vrot.slane %v2180_v38, 5  ;;  %v2190_v41 = vshrl.u32 %v2041_v26, 16  ;;  %3096 = vrot.lane.b32.xlu0 %v8001_v55, %s8909_s14  ;;  %v8017_v42 = vcombine.low %v9517_v54, %v2041_v26  ;;  %v489_v59 = vrot.slane %v484_v39, 4 }
  0xa6   : > { %v1604_v33 = vsel %vm9130_vm11, %v1599_v28, %v1603_v35  ;;  %v1608_v48 = vor.u32 %v1607_v47, %v1603_v35  ;;  %v1960_v60 = vsel %vm9110_vm7, %v1958_v29, %v1959_v30  ;;  %v2186_v20 = vshll.u32 %v2041_v26, 16 }
  0xa7   : > { %v2183_v40 = vor.u32 %v2182_v37, %v2179_v16  ;;  %v2192_v22 = vrot.slane %v2190_v41, 4  ;;  %v8002_v53 = vcombine.low %v1957_v43, %v1960_v60  ;;  %v744_v3 = vsel %vm9154_vm13, %v489_v59, %v743_v32 }
  0xa8   : > { %v1609_v51 = vrot.slane %v1608_v48, 4  ;;  %v9549_v49 = vld [vmem:[#allocation2 + $0x54] sm:$0xf]  ;;  %v2196_v7 = vshll.u32 %v2068_v10, 16  ;;  %745 = vst [vmem:[#allocation2 + $0x5c] sm:$0x1] %v744_v3  ;;  %v9579_v3 = vpop.permute.xlu1 %2832 }
  0xa9   : > { %v2469_v56 = vld [vmem:[#allocation2 + $0x54] sm:$0xe]  ;;  %v2201_v55 = vshrl.u32 %v9549_v49, 16  ;;  %v2204_v54 = vshll.u32 %v9549_v49, 16  ;;  %v2184_v57 = vrot.slane %v2183_v40, 4  ;;  %v2188_v27 = vrot.slane %v2186_v20, 5  ;;  %3192 = vrot.lane.b32.xlu0 %v8017_v42, %s8908_s13 }
  0xaa   : > { %v1614_v39 = vsel %vm9130_vm11, %v1609_v51, %v1613_v14  ;;  %v2198_v18 = vrot.slane %v2196_v7, 5  ;;  %v7906_v61 = vrot.slane %v2469_v56, 9  ;;  %v2558_v38 = vrot.slane %v2041_v26, 5  ;;  %v823_v58 = vld [vmem:[#allocation2 + $0x54] sm:$0xf] }
  0xab   : > { %v7986_v63 = vcombine.low %v1604_v33, %v1614_v39  ;;  %v2043_v2 = vld [vmem:[#allocation2 + $0x58] sm:$0xf]  ;;  %v2203_v8 = vrot.slane %v2201_v55, 4  ;;  %v2206_v11 = vrot.slane %v2204_v54, 5  ;;  %v2189_v23 = vsel %vm9130_vm11, %v2184_v57, %v2188_v27  ;;  %v9570_v33 = vpop.permute.xlu0 %2752 }
  0xac   : > { %v2214_v9 = vshrl.u32 %v2043_v2, 16  ;;  %v8018_v12 = vcombine.low %v9549_v49, %v2043_v2  ;;  %v2210_v25 = vshll.u32 %v2043_v2, 16  ;;  %v2193_v28 = vor.u32 %v2192_v22, %v2188_v27  ;;  %v824_v59 = vld [vmem:[#allocation2 + $0x58] sm:$0xf]  ;;  %v821_v49 = vld [vmem:[#allocation2 + $0x48] sm:$0xf] }
  0xad   : > { %3018 = vrot.lane.b32.xlu1 %v7986_v63, %s8911_s16  ;;  %v2207_v30 = vor.u32 %v2206_v11, %v2203_v8  ;;  %v2565_v31 = vrot.slane %v2043_v2, 5  ;;  %v2559_v26 = vsel %vm9110_vm7, %v7905_v62, %v2558_v38  ;;  %v2560_v35 = vrot.slane %v2558_v38, 4  ;;  %v822_v63 = vld [vmem:[#allocation2 + $0x4c] sm:$0xf]  ;;  %v9585_v2 = vld [vmem:[#allocation2 + $0x50] sm:$0x1] }
  0xae   : > { %v2212_v47 = vrot.slane %v2210_v25, 5  ;;  %v2216_v14 = vrot.slane %v2214_v9, 4  ;;  %v2194_v16 = vrot.slane %v2193_v28, 4  ;;  %v2561_v32 = vrot.slane %v2068_v10, 5  ;;  %v1251_v28 = vld [vmem:[#allocation2 + $0x54] sm:$0xe] }
  0xaf   : > { %v2208_v43 = vrot.slane %v2207_v30, 4  ;;  %v9568_v29 = vsel %vm9110_vm7, %v7906_v61, %v2565_v31  ;;  %v2567_v37 = vrot.slane %v2565_v31, 4  ;;  %v1029_v41 = vshrl.u32 %v823_v58, 16  ;;  %v2069_v48 = vld [vmem:[#allocation2 + $0x5c] sm:$0x1] }
  0xb0   : > { %v2217_v42 = vor.u32 %v2216_v14, %v2212_v47  ;;  %v2199_v52 = vsel %vm9130_vm11, %v2194_v16, %v2198_v18  ;;  %v2562_v62 = vsel %vm9110_vm7, %v2560_v35, %v2561_v32  ;;  %v1032_v60 = vshll.u32 %v823_v58, 16  ;;  %v848_v51 = vld [vmem:[#allocation2 + $0x5c] sm:$0x1] }
  0xb1   : > { %3098 = vrot.lane.b32.xlu1 %v8002_v53, %s8909_s14  ;;  %v2213_v10 = vsel %vm9130_vm11, %v2208_v43, %v2212_v47  ;;  %v2220_v40 = vshll.u32 %v2069_v48, 16  ;;  %v8033_v20 = vcombine.low %v2189_v23, %v2199_v52  ;;  %v2568_v22 = vrot.slane %v2069_v48, 5  ;;  %v1250_v48 = vld [vmem:[#allocation2 + $0x48] sm:$0xe] }
  0xb2   : > { %v2218_v7 = vrot.slane %v2217_v42, 4  ;;  %v8049_v56 = vcombine.low %v2559_v26, %v2562_v62  ;;  %v1031_v55 = vrot.slane %v1029_v41, 4  ;;  %v1034_v54 = vrot.slane %v1032_v60, 5 }
  0xb3   : > { %v2222_v57 = vrot.slane %v2220_v40, 5  ;;  %3272 = vrot.lane.b32.xlu0 %v8033_v20, %s8912_s17  ;;  %v2569_v53 = vsel %vm9110_vm7, %v2567_v37, %v2568_v22  ;;  %v1038_v27 = vshll.u32 %v824_v59, 16  ;;  %v1042_v39 = vshrl.u32 %v824_v59, 16 }
  0xb4   : > { %v8050_v18 = vcombine.low %v9568_v29, %v2569_v53  ;;  %v1035_v61 = vor.u32 %v1034_v54, %v1031_v55  ;;  %v1048_v38 = vshll.u32 %v848_v51, 16  ;;  %v1005_v8 = vshrl.u32 %v821_v49, 16  ;;  %v9590_v58 = vpop.permute.xlu0 %2928 }
  0xb5   : > { %3194 = vrot.lane.b32.xlu1 %v8018_v12, %s8908_s13  ;;  %v2223_v11 = vsel %vm9130_vm11, %v2218_v7, %v2222_v57  ;;  %v1040_v23 = vrot.slane %v1038_v27, 5  ;;  %v1044_v9 = vrot.slane %v1042_v39, 4  ;;  %v1008_v25 = vshll.u32 %v821_v49, 16  ;;  %v9593_v12 = vpop.permute.xlu1 %2930  ;;  %v350_v7 = vld [vmem:[%s9108_s9 + $0x38] sm:$0xf] }
  0xb6   : > { %v8034_v30 = vcombine.low %v2213_v10, %v2223_v11  ;;  %v1036_v31 = vrot.slane %v1035_v61, 4  ;;  %v1050_v26 = vrot.slane %v1048_v38, 5  ;;  %v1007_v35 = vrot.slane %v1005_v8, 4  ;;  %v351_v57 = vld [vmem:[%s9108_s9 + $0x3c] sm:$0xf] }
  0xb7   : > { %3352 = vrot.lane.b32.xlu0 %v8049_v56, %s8910_s15  ;;  %v1045_v47 = vor.u32 %v1044_v9, %v1040_v23  ;;  %v1010_v14 = vrot.slane %v1008_v25, 5  ;;  %v1014_v16 = vshll.u32 %v822_v63, 16  ;;  %v1018_v32 = vshrl.u32 %v822_v63, 16  ;;  %v9610_v38 = vld [vmem:[#allocation2 + $0x54] sm:$0xf] }
  0xb8   : > { %v1041_v43 = vsel %vm9130_vm11, %v1036_v31, %v1040_v23  ;;  %v1024_v29 = vshll.u32 %v9585_v2, 16  ;;  %v7876_v37 = vrot.slane %v1251_v28, 9  ;;  %v1362_v41 = vrot.slane %v824_v59, 5  ;;  %v9599_v10 = vpop.permute.xlu0 %3184 }
  0xb9   : > { %3274 = vrot.lane.b32.xlu1 %v8034_v30, %s8912_s17  ;;  %v1046_v42 = vrot.slane %v1045_v47, 4  ;;  %v1011_v52 = vor.u32 %v1010_v14, %v1007_v35  ;;  %v1016_v62 = vrot.slane %v1014_v16, 5  ;;  %v1020_v60 = vrot.slane %v1018_v32, 4  ;;  %v9615_v9 = vpop.permute.xlu1 %3186  ;;  %v1436_v35 = vld [vmem:[#allocation2 + $0x58] sm:$0xf] }
  0xba   : > { %v1026_v40 = vrot.slane %v1024_v29, 5  ;;  %v1363_v20 = vsel %vm9110_vm7, %v7876_v37, %v1362_v41  ;;  %v1364_v22 = vrot.slane %v1362_v41, 4  ;;  %v1365_v49 = vrot.slane %v848_v51, 5  ;;  %v1461_v37 = vld [vmem:[#allocation2 + $0x5c] sm:$0x1] }
  0xbb   : > { %v1051_v59 = vsel %vm9130_vm11, %v1046_v42, %v1050_v26  ;;  %v1012_v56 = vrot.slane %v1011_v52, 4  ;;  %v1021_v55 = vor.u32 %v1020_v60, %v1016_v62  ;;  %v7875_v54 = vrot.slane %v1250_v48, 9 }
  0xbc   : > { %v7940_v53 = vcombine.low %v1041_v43, %v1051_v59  ;;  %v1366_v27 = vsel %vm9110_vm7, %v1364_v22, %v1365_v49  ;;  %v1355_v39 = vrot.slane %v822_v63, 5  ;;  %v1358_v61 = vrot.slane %v9585_v2, 5  ;;  %v9619_v31 = vpop.permute.xlu0 %3088  ;;  %v746_v43 = vld [vmem:[#allocation2 + $0x60] sm:$0xf]  ;;  %v750_v49 = vld [vmem:[#allocation2 + $0x68] sm:$0x1] }
  0xbd   : > { %3354 = vrot.lane.b32.xlu1 %v8050_v18, %s8910_s15  ;;  %v1017_v51 = vsel %vm9130_vm11, %v1012_v56, %v1016_v62  ;;  %v1022_v8 = vrot.slane %v1021_v55, 4  ;;  %v7956_v11 = vcombine.low %v1363_v20, %v1366_v27  ;;  %v491_v23 = vshrl.u32 %v350_v7, 16  ;;  %v1861_v62 = vld [vmem:[#allocation2 + $0x54] sm:$0xe] }
  0xbe   : > { %v1356_v25 = vsel %vm9110_vm7, %v7875_v54, %v1355_v39  ;;  %v1357_v28 = vrot.slane %v1355_v39, 4  ;;  %v494_v30 = vshll.u32 %v350_v7, 16  ;;  %v499_v63 = vshrl.u32 %v351_v57, 16  ;;  %v352_v54 = vld [vmem:[%s9108_s9 + $0x40] sm:$0xf] }
  0xbf   : > { %v1027_v2 = vsel %vm9130_vm11, %v1022_v8, %v1026_v40  ;;  %v493_v18 = vrot.slane %v491_v23, 7  ;;  %v502_v26 = vshll.u32 %v351_v57, 16  ;;  %v1616_v47 = vshrl.u32 %v9610_v38, 16  ;;  %v9633_v57 = vpop.permute.xlu1 %2834 }
  0xc0   : > { %v7939_v14 = vcombine.low %v1017_v51, %v1027_v2  ;;  %v1359_v16 = vsel %vm9110_vm7, %v1357_v28, %v1358_v61  ;;  %v501_v32 = vrot.slane %v499_v63, 7  ;;  %v1619_v29 = vshll.u32 %v9610_v38, 16  ;;  %v9637_v51 = vpop.permute.xlu0 %3344  ;;  %v353_v28 = vld [vmem:[%s9108_s9 + $0x44] sm:$0xf] }
  0xc1   : > { %2766 = vrot.lane.b32.xlu1 %v7940_v53, %s8906_s11  ;;  %v7955_v41 = vcombine.low %v1356_v25, %v1359_v16  ;;  %v496_v48 = vor.u32 %v494_v30, %v493_v18  ;;  %v497_v42 = vrot.slane %v493_v18, 4  ;;  %v1618_v52 = vrot.slane %v1616_v47, 4 }
  0xc2   : > { %2764 = vrot.lane.b32.xlu0 %v7939_v14, %s8906_s11  ;;  %v504_v60 = vor.u32 %v502_v26, %v501_v32  ;;  %v1621_v40 = vrot.slane %v1619_v29, 5  ;;  %v1629_v20 = vshrl.u32 %v1436_v35, 16  ;;  %v7971_v22 = vcombine.low %v9610_v38, %v1436_v35 }
  0xc3   : > { %v747_v7 = vsel %vm9124_vm10, %v496_v48, %v746_v43  ;;  %v506_v59 = vrot.slane %v501_v32, 4  ;;  %v1625_v56 = vshll.u32 %v1436_v35, 16  ;;  %v1635_v55 = vshll.u32 %v1461_v37, 16 }
  0xc4   : > { %v505_v53 = vsel %vm9138_vm12, %v497_v42, %v504_v60  ;;  %748 = vst [vmem:[#allocation2 + $0x60] sm:$0xf] %v747_v7  ;;  %v1622_v27 = vor.u32 %v1621_v40, %v1618_v52  ;;  %v1631_v39 = vrot.slane %v1629_v20, 4  ;;  %v7891_v61 = vrot.slane %v1861_v62, 9  ;;  %v753_v60 = vld [vmem:[#allocation2 + $0x6c] sm:$0xf] }
  0xc5   : > { %2846 = vrot.lane.b32.xlu1 %v7956_v11, %s8905_s10  ;;  %749 = vst.msk [vmem:[#allocation2 + $0x64] sm:$0xf] %vm224_vm0, %v505_v53  ;;  %v751_v38 = vsel %vm9154_vm13, %v506_v59, %v750_v49  ;;  %v1627_v8 = vrot.slane %v1625_v56, 5  ;;  %v1637_v23 = vrot.slane %v1635_v55, 5  ;;  %v1963_v25 = vrot.slane %v1436_v35, 5 }
  0xc6   : > { %2844 = vrot.lane.b32.xlu0 %v7955_v41, %s8905_s10  ;;  %752 = vst [vmem:[#allocation2 + $0x68] sm:$0x1] %v751_v38  ;;  %v1623_v30 = vrot.slane %v1622_v27, 4  ;;  %v1966_v63 = vrot.slane %v1461_v37, 5  ;;  %v508_v2 = vshrl.u32 %v352_v54, 16  ;;  %v3379_v47 = vsel %vm3376_vm14, %v7917_v45, %v9570_v33  ;;  %v9656_v41 = vpop.permute.xlu1 %3090  ;;  %v9661_v33 = vpop.permute.xlu0 %3346 }
  0xc7   : > { %v1632_v18 = vor.u32 %v1631_v39, %v1627_v8  ;;  %v1964_v11 = vsel %vm9110_vm7, %v7891_v61, %v1963_v25  ;;  %v1965_v26 = vrot.slane %v1963_v25, 4  ;;  %v511_v16 = vshll.u32 %v352_v54, 16  ;;  %v9667_v20 = vld [vmem:[#allocation2 + $0x24] sm:$0xf]  ;;  %v9669_v49 = vld [vmem:[#allocation2 + $0x28] sm:$0xf] }
  0xc8   : > { %v1628_v35 = vsel %vm9130_vm11, %v1623_v30, %v1627_v8  ;;  %v510_v14 = vrot.slane %v508_v2, 7  ;;  %v516_v32 = vshrl.u32 %v353_v28, 16  ;;  %v519_v37 = vshll.u32 %v353_v28, 16 }
  0xc9   : > { %v1633_v43 = vrot.slane %v1632_v18, 4  ;;  %v1967_v29 = vsel %vm9110_vm7, %v1965_v26, %v1966_v63  ;;  %v3427_v40 = vsel %vm3425_vm15, %v3379_v47, %v9579_v3  ;;  %vm3716_vm2 = vcmask 1041408  }
  0xca   : > { %2940 = vrot.lane.b32.xlu0 %v7971_v22, %s8907_s12  ;;  %v8003_v48 = vcombine.low %v1964_v11, %v1967_v29  ;;  %v513_v15 = vor.u32 %v511_v16, %v510_v14  ;;  %v514_v19 = vrot.slane %v510_v14, 4  ;;  %v9659_v45 = vrot.slane %v516_v32, 7  ;;  %v9681_v47 = vpop.permute.xlu1 %3010 }
  0xcb   : > { %v1437_v42 = vld [vmem:[#allocation2 + $0x60] sm:$0xf]  ;;  %v1638_v52 = vsel %vm9130_vm11, %v1633_v43, %v1637_v23  ;;  %v7920_v22 = vcombine.low %v9667_v20, %v9669_v49  ;;  %vm3491_vm3 = vcmask 130048   ;;  %vm3524_vm4 = vcmask 162816  }
  0xcc   : > { %v1862_v62 = vld [vmem:[#allocation2 + $0x60] sm:$0xe]  ;;  %v1438_v59 = vld [vmem:[#allocation2 + $0x64] sm:$0xf]  ;;  %v1640_v56 = vshrl.u32 %v1437_v42, 16  ;;  %v1643_v55 = vshll.u32 %v1437_v42, 16  ;;  %v7987_v54 = vcombine.low %v1628_v35, %v1638_v52  ;;  %v521_v16 = vor.u32 %v519_v37, %v9659_v45 }
  0xcd   : > { %v7892_v53 = vrot.slane %v1862_v62, 9  ;;  %v1653_v27 = vshrl.u32 %v1438_v59, 16  ;;  %v7972_v39 = vcombine.low %v1437_v42, %v1438_v59  ;;  %v1462_v61 = vld [vmem:[#allocation2 + $0x68] sm:$0x1]  ;;  %v1649_v38 = vshll.u32 %v1438_v59, 16 }
  0xce   : > { %v1970_v3 = vrot.slane %v1438_v59, 5  ;;  %v1642_v8 = vrot.slane %v1640_v56, 4  ;;  %v1645_v23 = vrot.slane %v1643_v55, 5  ;;  %v1659_v25 = vshll.u32 %v1462_v61, 16  ;;  %3020 = vrot.lane.b32.xlu0 %v7987_v54, %s8911_s16  ;;  %v2044_v30 = vld [vmem:[#allocation2 + $0x60] sm:$0xf]  ;;  %v2755_v43 = vpop.permute.xlu0 %2754 }
  0xcf   : > { %v1973_v28 = vrot.slane %v1462_v61, 5  ;;  %2942 = vrot.lane.b32.xlu1 %v7972_v39, %s8907_s12  ;;  %v1651_v63 = vrot.slane %v1649_v38, 5  ;;  %v1655_v2 = vrot.slane %v1653_v27, 4  ;;  %v2045_v26 = vld [vmem:[#allocation2 + $0x64] sm:$0xf]  ;;  %v754_v32 = vsel %vm9124_vm10, %v513_v15, %v753_v60 }
  0xd0   : > { %v9679_v18 = vsel %vm9110_vm7, %v7892_v53, %v1970_v3  ;;  %v1972_v11 = vrot.slane %v1970_v3, 4  ;;  %v1646_v35 = vor.u32 %v1645_v23, %v1642_v8  ;;  %v1661_v14 = vrot.slane %v1659_v25, 5  ;;  %755 = vst [vmem:[#allocation2 + $0x6c] sm:$0xf] %v754_v32  ;;  %v757_v54 = vld [vmem:[#allocation2 + $0x74] sm:$0x1] }
  0xd1   : > { %v1656_v29 = vor.u32 %v1655_v2, %v1651_v63  ;;  %v2225_v52 = vshrl.u32 %v2044_v30, 16  ;;  %v2228_v62 = vshll.u32 %v2044_v30, 16  ;;  %v522_v55 = vsel %vm9138_vm12, %v514_v19, %v521_v16  ;;  %v2070_v39 = vld [vmem:[#allocation2 + $0x68] sm:$0x1] }
  0xd2   : > { %v1974_v42 = vsel %vm9110_vm7, %v1972_v11, %v1973_v28  ;;  %v1647_v59 = vrot.slane %v1646_v35, 4  ;;  %3100 = vrot.lane.b32.xlu0 %v8003_v48, %s8909_s14  ;;  %v2238_v37 = vshrl.u32 %v2045_v26, 16  ;;  %756 = vst.msk [vmem:[#allocation2 + $0x70] sm:$0xf] %vm224_vm0, %v522_v55  ;;  %v8019_v27 = vcombine.low %v2044_v30, %v2045_v26  ;;  %v2470_v48 = vld [vmem:[#allocation2 + $0x60] sm:$0xe]  ;;  %v9704_v30 = vpop.permute.xlu1 %3266 }
  0xd3   : > { %v8004_v56 = vcombine.low %v9679_v18, %v1974_v42  ;;  %v1657_v53 = vrot.slane %v1656_v29, 4  ;;  %v2227_v15 = vrot.slane %v2225_v52, 4  ;;  %v2230_v60 = vrot.slane %v2228_v62, 5  ;;  %v9702_v28 = vld [vmem:[#allocation2 + $0x60] sm:$0xf] }
  0xd4   : > { %v1652_v61 = vsel %vm9130_vm11, %v1647_v59, %v1651_v63  ;;  %v523_v38 = vrot.slane %v9659_v45, 4  ;;  %v2234_v3 = vshll.u32 %v2045_v26, 16  ;;  %v9700_v8 = vsel %vm3458_vm1, %v3427_v40, %v9590_v58  ;;  %v9709_v11 = vpop.permute.xlu0 %3008 }
  0xd5   : > { %v1662_v19 = vsel %vm9130_vm11, %v1657_v53, %v1661_v14  ;;  %v2231_v23 = vor.u32 %v2230_v60, %v2227_v15  ;;  %v2240_v25 = vrot.slane %v2238_v37, 4  ;;  %v2244_v18 = vshll.u32 %v2070_v39, 16 }
  0xd6   : > { %v7988_v2 = vcombine.low %v1652_v61, %v1662_v19  ;;  %3196 = vrot.lane.b32.xlu0 %v8019_v27, %s8908_s13  ;;  %v758_v45 = vsel %vm9154_vm13, %v523_v38, %v757_v54  ;;  %v2236_v63 = vrot.slane %v2234_v3, 5  ;;  %v7907_v58 = vrot.slane %v2470_v48, 9 }
  0xd7   : > { %759 = vst [vmem:[#allocation2 + $0x74] sm:$0x1] %v758_v45  ;;  %v2232_v35 = vrot.slane %v2231_v23, 4  ;;  %v2572_v40 = vrot.slane %v2045_v26, 5  ;;  %v2575_v14 = vrot.slane %v2070_v39, 5  ;;  %v2246_v29 = vrot.slane %v2244_v18, 5 }
  0xd8   : > { %3022 = vrot.lane.b32.xlu1 %v7988_v2, %s8911_s16  ;;  %v2046_v16 = vld [vmem:[#allocation2 + $0x6c] sm:$0xf]  ;;  %v2241_v32 = vor.u32 %v2240_v25, %v2236_v63  ;;  %v1053_v52 = vshrl.u32 %v9702_v28, 16  ;;  %v3382_v62 = vsel %vm3376_vm14, %v7918_v24, %v2755_v43  ;;  %v9725_v43 = vpop.permute.xlu1 %2756  ;;  %vm3557_vm5 = vcmask 195584  }
  0xd9   : > { %v2471_v42 = vld [vmem:[#allocation2 + $0x6c] sm:$0xe]  ;;  %v2249_v59 = vshrl.u32 %v2046_v16, 16  ;;  %v2252_v55 = vshll.u32 %v2046_v16, 16  ;;  %v2237_v37 = vsel %vm9130_vm11, %v2232_v35, %v2236_v63  ;;  %v2047_v54 = vld [vmem:[#allocation2 + $0x70] sm:$0xf]  ;;  %v2573_v15 = vsel %vm9110_vm7, %v7907_v58, %v2572_v40 }
  0xda   : > { %v7908_v26 = vrot.slane %v2471_v42, 9  ;;  %v2242_v53 = vrot.slane %v2241_v32, 4  ;;  %v2574_v60 = vrot.slane %v2572_v40, 4  ;;  %v9723_v27 = vsel %vm3425_vm15, %v3382_v62, %v9633_v57  ;;  %v827_v19 = vld [vmem:[#allocation2 + $0x6c] sm:$0xf] }
  0xdb   : > { %v2251_v39 = vrot.slane %v2249_v59, 4  ;;  %v2254_v21 = vrot.slane %v2252_v55, 5  ;;  %v2262_v6 = vshrl.u32 %v2047_v54, 16  ;;  %v8020_v24 = vcombine.low %v2046_v16, %v2047_v54  ;;  %v9732_v23 = vld [vmem:[#allocation2 + $0x70] sm:$0xf]  ;;  %v9734_v57 = vpop.permute.xlu0 %3264 }
  0xdc   : > { %3102 = vrot.lane.b32.xlu1 %v8004_v56, %s8909_s14  ;;  %v2258_v61 = vshll.u32 %v2047_v54, 16  ;;  %v2247_v38 = vsel %vm9130_vm11, %v2242_v53, %v2246_v29  ;;  %v2579_v3 = vrot.slane %v2047_v54, 5  ;;  %v2576_v48 = vsel %vm9110_vm7, %v2574_v60, %v2575_v14  ;;  %v9736_v18 = vld [vmem:[#allocation2 + $0x6c] sm:$0xf]  ;;  %v9738_v56 = vld [vmem:[#allocation2 + $0x70] sm:$0xf] }
  0xdd   : > { %v2255_v25 = vor.u32 %v2254_v21, %v2251_v39  ;;  %v2264_v2 = vrot.slane %v2262_v6, 4  ;;  %v8035_v45 = vcombine.low %v2237_v37, %v2247_v38  ;;  %v8051_v63 = vcombine.low %v2573_v15, %v2576_v48  ;;  %v826_v6 = vld [vmem:[#allocation2 + $0x64] sm:$0xf] }
  0xde   : > { %v2071_v35 = vld [vmem:[#allocation2 + $0x74] sm:$0x1]  ;;  %v2260_v58 = vrot.slane %v2258_v61, 5  ;;  %v9742_v40 = vsel %vm9110_vm7, %v7908_v26, %v2579_v3  ;;  %v2581_v14 = vrot.slane %v2579_v3, 4  ;;  %v7973_v16 = vcombine.low %v9736_v18, %v9738_v56  ;;  %v9756_v61 = vpop.permute.xlu1 %2758 }
  0xdf   : > { %v2256_v32 = vrot.slane %v2255_v25, 4  ;;  %v2268_v29 = vshll.u32 %v2071_v35, 16  ;;  %3276 = vrot.lane.b32.xlu0 %v8035_v45, %s8912_s17  ;;  %v2582_v42 = vrot.slane %v2071_v35, 5  ;;  %v1077_v62 = vshrl.u32 %v827_v19, 16  ;;  %v850_v55 = vld [vmem:[#allocation2 + $0x74] sm:$0x1]  ;;  %v9750_v53 = vpop.permute.xlu0 %2836 }
  0xe0   : > { %3198 = vrot.lane.b32.xlu1 %v8020_v24, %s8908_s13  ;;  %v2265_v59 = vor.u32 %v2264_v2, %v2260_v58  ;;  %v1080_v37 = vshll.u32 %v827_v19, 16  ;;  %v1086_v54 = vshll.u32 %v9732_v23, 16  ;;  %v1090_v26 = vshrl.u32 %v9732_v23, 16  ;;  %v849_v2 = vld [vmem:[#allocation2 + $0x68] sm:$0x1] }
  0xe1   : > { %v2261_v15 = vsel %vm9130_vm11, %v2256_v32, %v2260_v58  ;;  %v2270_v60 = vrot.slane %v2268_v29, 5  ;;  %v2583_v39 = vsel %vm9110_vm7, %v2581_v14, %v2582_v42  ;;  %v1079_v21 = vrot.slane %v1077_v62, 4  ;;  %v1253_v42 = vld [vmem:[#allocation2 + $0x6c] sm:$0xe] }
  0xe2   : > { %v2266_v24 = vrot.slane %v2265_v59, 4  ;;  %v8052_v38 = vcombine.low %v9742_v40, %v2583_v39  ;;  %v1082_v3 = vrot.slane %v1080_v37, 5  ;;  %v1088_v48 = vrot.slane %v1086_v54, 5 }
  0xe3   : > { %3356 = vrot.lane.b32.xlu0 %v8051_v63, %s8910_s15  ;;  %v1092_v19 = vrot.slane %v1090_v26, 4  ;;  %v1096_v25 = vshll.u32 %v850_v55, 16  ;;  %v1055_v45 = vrot.slane %v1053_v52, 4  ;;  %v1056_v35 = vshll.u32 %v9702_v28, 16  ;;  %v9763_v62 = vpop.permute.xlu0 %2932 }
  0xe4   : > { %v2271_v58 = vsel %vm9130_vm11, %v2266_v24, %v2270_v60  ;;  %v1083_v14 = vor.u32 %v1082_v3, %v1079_v21  ;;  %v1062_v32 = vshll.u32 %v826_v6, 16  ;;  %v1066_v29 = vshrl.u32 %v826_v6, 16  ;;  %v1252_v24 = vld [vmem:[#allocation2 + $0x60] sm:$0xe]  ;;  %v9767_v3 = vpop.permute.xlu1 %2838 }
  0xe5   : > { %v8036_v40 = vcombine.low %v2261_v15, %v2271_v58  ;;  %v1093_v59 = vor.u32 %v1092_v19, %v1088_v48  ;;  %v1098_v37 = vrot.slane %v1096_v25, 5  ;;  %v1058_v54 = vrot.slane %v1056_v35, 5  ;;  %v354_v58 = vld [vmem:[%s9108_s9 + $0x48] sm:$0xf] }
  0xe6   : > { %v1084_v63 = vrot.slane %v1083_v14, 4  ;;  %v1064_v26 = vrot.slane %v1062_v32, 5  ;;  %v1068_v39 = vrot.slane %v1066_v29, 4  ;;  %v1072_v52 = vshll.u32 %v849_v2, 16 }
  0xe7   : > { %3278 = vrot.lane.b32.xlu1 %v8036_v40, %s8912_s17  ;;  %v1094_v28 = vrot.slane %v1093_v59, 4  ;;  %v1059_v0 = vor.u32 %v1058_v54, %v1055_v45  ;;  %v7878_v60 = vrot.slane %v1253_v42, 9  ;;  %v1376_v21 = vrot.slane %v9732_v23, 5  ;;  %v355_v54 = vld [vmem:[%s9108_s9 + $0x4c] sm:$0xf]  ;;  %v9777_v7 = vpop.permute.xlu0 %3012 }
  0xe8   : > { %v1089_v15 = vsel %vm9130_vm11, %v1084_v63, %v1088_v48  ;;  %v1069_v19 = vor.u32 %v1068_v39, %v1064_v26  ;;  %v1074_v25 = vrot.slane %v1072_v52, 5  ;;  %v1379_v35 = vrot.slane %v850_v55, 5 }
  0xe9   : > { %v1099_v14 = vsel %vm9130_vm11, %v1094_v28, %v1098_v37  ;;  %v1060_v32 = vrot.slane %v1059_v0, 4  ;;  %v1377_v45 = vsel %vm9110_vm7, %v7878_v60, %v1376_v21  ;;  %v1378_v29 = vrot.slane %v1376_v21, 4 }
  0xea   : > { %v7942_v23 = vcombine.low %v1089_v15, %v1099_v14  ;;  %v1070_v42 = vrot.slane %v1069_v19, 4  ;;  %v7877_v40 = vrot.slane %v1252_v24, 9  ;;  %v1369_v59 = vrot.slane %v826_v6, 5  ;;  %v9791_v24 = vpop.permute.xlu1 %2934  ;;  %v760_v19 = vld [vmem:[#allocation2 + $0x78] sm:$0xf] }
  0xeb   : > { %3358 = vrot.lane.b32.xlu1 %v8052_v38, %s8910_s15  ;;  %v1065_v55 = vsel %vm9130_vm11, %v1060_v32, %v1064_v26  ;;  %v1380_v48 = vsel %vm9110_vm7, %v1378_v29, %v1379_v35  ;;  %v1372_v0 = vrot.slane %v849_v2, 5  ;;  %v525_v37 = vshrl.u32 %v354_v58, 16  ;;  %v8688_v26 = vld [vmem:[%s13070_s1 + $0x10] ss:$0 sps:$4 sm:$0x33]  }
  0xec   : > { %v1075_v63 = vsel %vm9130_vm11, %v1070_v42, %v1074_v25  ;;  %v7958_v39 = vcombine.low %v1377_v45, %v1380_v48  ;;  %v1370_v6 = vsel %vm9110_vm7, %v7877_v40, %v1369_v59  ;;  %v1371_v52 = vrot.slane %v1369_v59, 4  ;;  %v9800_v59 = vld [vmem:[#allocation2 + $0x74] sm:$0x1]  ;;  %8618 = vmatprep.subr.msk.bf16.mxu0 %vm3716_vm2, %v8688_v26 }
  0xed   : > { %v7941_v28 = vcombine.low %v1065_v55, %v1075_v63  ;;  %v527_v60 = vrot.slane %v525_v37, 7  ;;  %v528_v21 = vshll.u32 %v354_v58, 16  ;;  %v533_v38 = vshrl.u32 %v355_v54, 16  ;;  %v8689_v37 = vld [vmem:[%s13070_s1 + $0x8] sm:$0xff]  }
  0xee   : > { %v1373_v2 = vsel %vm9110_vm7, %v1371_v52, %v1372_v0  ;;  %v536_v15 = vshll.u32 %v355_v54, 16  ;;  %v1664_v25 = vshrl.u32 %v9736_v18, 16  ;;  %v1667_v35 = vshll.u32 %v9736_v18, 16  ;;  %v9802_v54 = vpop.permute.xlu0 %3092  ;;  %v764_v0 = vld [vmem:[#allocation2 + $0x80] sm:$0x1] }
  0xef   : > { %2770 = vrot.lane.b32.xlu1 %v7942_v23, %s8906_s11  ;;  %2768 = vrot.lane.b32.xlu0 %v7941_v28, %s8906_s11  ;;  %v7957_v58 = vcombine.low %v1370_v6, %v1373_v2  ;;  %v530_v14 = vor.u32 %v528_v21, %v527_v60  ;;  %v531_v32 = vrot.slane %v527_v60, 4  ;;  %v535_v45 = vrot.slane %v533_v38, 7  ;;  %v1863_v60 = vld [vmem:[#allocation2 + $0x6c] sm:$0xe] }
  0xf0   : > { %v1666_v29 = vrot.slane %v1664_v25, 4  ;;  %v1669_v42 = vrot.slane %v1667_v35, 5  ;;  %v1677_v40 = vshrl.u32 %v9738_v56, 16  ;;  %v3462_v23 = vsel %vm3458_vm1, %v9723_v27, %v9593_v12 }
  0xf1   : > { %v538_v55 = vor.u32 %v536_v15, %v535_v45  ;;  %v761_v48 = vsel %vm9124_vm10, %v530_v14, %v760_v19  ;;  %v9814_v63 = vsel %vm3491_vm3, %v3462_v23, %v9681_v47  ;;  %v3718_v6 = vsel %vm3716_vm2, %v8688_v26, 0  ;;  %v356_v14 = vld [vmem:[%s9108_s9 + $0x50] sm:$0xf] }
  0xf2   : > { %762 = vst [vmem:[#allocation2 + $0x78] sm:$0xf] %v761_v48  ;;  %v540_v52 = vrot.slane %v535_v45, 4  ;;  %v1670_v28 = vor.u32 %v1669_v42, %v1666_v29  ;;  %v1673_v27 = vshll.u32 %v9738_v56, 16  ;;  %v1679_v21 = vrot.slane %v1677_v40, 4  ;;  %v9822_v2 = vpop.permute.xlu1 %3014  ;;  %8529 = vmatpush3.bf16.msra.mxu0 %v3718_v6 }
  0xf3   : > { %2850 = vrot.lane.b32.xlu1 %v7958_v39, %s8905_s10  ;;  %2848 = vrot.lane.b32.xlu0 %v7957_v58, %s8905_s10  ;;  %v539_v12 = vsel %vm9138_vm12, %v531_v32, %v538_v55  ;;  %v1683_v38 = vshll.u32 %v9800_v59, 16  ;;  %v9832_v26 = vsel %vm3376_vm14, %v7919_v4, %v9725_v43  ;;  %v3493_v25 = vsel %vm3491_vm3, %v9700_v8, %v9709_v11  ;;  %v8690_v58 = vld [vmem:[%s13070_s1] sm:$0xff]   ;;  %v9850_v11 = vpop.permute.xlu0 %3188 }
  0xf4   : > { %763 = vst.msk [vmem:[#allocation2 + $0x7c] sm:$0xf] %vm224_vm0, %v539_v12  ;;  %v765_v47 = vsel %vm9154_vm13, %v540_v52, %v764_v0  ;;  %v1671_v39 = vrot.slane %v1670_v28, 4  ;;  %v1675_v15 = vrot.slane %v1673_v27, 5  ;;  %8530 = vmatprep.subr.bf16.mxu0 %v8689_v37  ;;  %v7893_v35 = vrot.slane %v1863_v60, 9 }
  0xf5   : > { %766 = vst [vmem:[#allocation2 + $0x80] sm:$0x1] %v765_v47  ;;  %v1685_v19 = vrot.slane %v1683_v38, 5  ;;  %v3526_v17 = vsel %vm3524_vm4, %v3493_v25, %v9619_v31  ;;  %v1977_v50 = vrot.slane %v9738_v56, 5  ;;  %v1980_v4 = vrot.slane %v9800_v59, 5 }
  0xf6   : > { %v3388_v8 = vsel %vm3376_vm14, %v7920_v22, %v9756_v61  ;;  %v1676_v31 = vsel %vm9130_vm11, %v1671_v39, %v1675_v15  ;;  %v1680_v43 = vor.u32 %v1679_v21, %v1675_v15  ;;  %vm3590_vm8 = vcmask 228352   ;;  %v9858_v32 = vpop.permute.xlu1 %3094  ;;  %8531 = vmatpush3.bf16.msra.mxu0 %v8689_v37  ;;  %v357_v61 = vld [vmem:[%s9108_s9 + $0x54] sm:$0xf] }
  0xf7   : > { %2944 = vrot.lane.b32.xlu0 %v7973_v16, %s8907_s12  ;;  %v1978_v20 = vsel %vm9110_vm7, %v7893_v35, %v1977_v50  ;;  %v1979_v49 = vrot.slane %v1977_v50, 4  ;;  %v3559_v22 = vsel %vm3557_vm5, %v3526_v17, %v9599_v10  ;;  %v542_v45 = vshrl.u32 %v356_v14, 16  ;;  %8532 = vmatprep.subr.bf16.mxu0 %v8690_v58  ;;  %v9879_v21 = vpop.permute.xlu0 %3268  ;;  %v767_v17 = vld [vmem:[#allocation2 + $0x84] sm:$0xf] }
  0xf8   : > { %v1681_v56 = vrot.slane %v1680_v43, 4  ;;  %v9867_v29 = vsel %vm3590_vm8, %v3559_v22, %v9734_v57  ;;  %v545_v42 = vshll.u32 %v356_v14, 16  ;;  %v9871_v40 = vsel %vm3425_vm15, %v3388_v8, %v9767_v3 }
  0xf9   : > { %v1441_v18 = vld [vmem:[#allocation2 + $0x78] sm:$0xf]  ;;  %v1981_v10 = vsel %vm9110_vm7, %v1979_v49, %v1980_v4  ;;  %v544_v6 = vrot.slane %v542_v45, 7  ;;  %v550_v52 = vshrl.u32 %v357_v61, 16  ;;  %v553_v22 = vshll.u32 %v357_v61, 16 }
  0xfa   : > { %v1864_v16 = vld [vmem:[#allocation2 + $0x78] sm:$0xe]  ;;  %v1688_v59 = vshrl.u32 %v1441_v18, 16  ;;  %v1691_v55 = vshll.u32 %v1441_v18, 16  ;;  %v1686_v0 = vsel %vm9130_vm11, %v1681_v56, %v1685_v19  ;;  %v8005_v37 = vcombine.low %v1978_v20, %v1981_v10  ;;  %v9877_v57 = vpop.permute.xlu1 %3190  ;;  %8533 = vmatpush3.bf16.msra.mxu0 %v8690_v58 }
  0xfb   : > { %v7894_v48 = vrot.slane %v1864_v16, 9  ;;  %v1442_v23 = vld [vmem:[#allocation2 + $0x7c] sm:$0xf]  ;;  %v7989_v39 = vcombine.low %v1676_v31, %v1686_v0  ;;  %v547_v14 = vor.u32 %v545_v42, %v544_v6  ;;  %v2048_v50 = vld [vmem:[#allocation2 + $0x78] sm:$0xf]  ;;  %v548_v31 = vrot.slane %v544_v6, 4 }
  0xfc   : > { %v1690_v28 = vrot.slane %v1688_v59, 4  ;;  %v1693_v60 = vrot.slane %v1691_v55, 5  ;;  %v1701_v12 = vshrl.u32 %v1442_v23, 16  ;;  %v7974_v3 = vcombine.low %v1441_v18, %v1442_v23  ;;  %v1464_v27 = vld [vmem:[#allocation2 + $0x80] sm:$0x1] }
  0xfd   : > { %v1697_v38 = vshll.u32 %v1442_v23, 16  ;;  %v1707_v47 = vshll.u32 %v1464_v27, 16  ;;  %v1984_v15 = vrot.slane %v1442_v23, 5  ;;  %v1987_v35 = vrot.slane %v1464_v27, 5  ;;  %3024 = vrot.lane.b32.xlu0 %v7989_v39, %s8911_s16  ;;  %v9887_v45 = vld [vmem:[#allocation2 + $0x7c] sm:$0xf]  ;;  %v9898_v23 = vpop.permute.xlu0 %3348 }
  0xfe   : > { %2946 = vrot.lane.b32.xlu1 %v7974_v3, %s8907_s12  ;;  %v1694_v19 = vor.u32 %v1693_v60, %v1690_v28  ;;  %v1703_v25 = vrot.slane %v1701_v12, 4  ;;  %v552_v49 = vrot.slane %v550_v52, 7  ;;  %v768_v16 = vsel %vm9124_vm10, %v547_v14, %v767_v17  ;;  %v9893_v59 = vpop.permute.xlu1 %3270  ;;  %v9905_v3 = vld [vmem:[#allocation2 + $0x80] sm:$0x1]  ;;  %v771_v39 = vld [vmem:[#allocation2 + $0x8c] sm:$0x1] }
  0xff   : > { %v1699_v4 = vrot.slane %v1697_v38, 5  ;;  %v1709_v8 = vrot.slane %v1707_v47, 5  ;;  %v9885_v58 = vsel %vm9110_vm7, %v7894_v48, %v1984_v15  ;;  %v1986_v43 = vrot.slane %v1984_v15, 4  ;;  %769 = vst [vmem:[#allocation2 + $0x84] sm:$0xf] %v768_v16 }
 0x100   : > { %v1695_v20 = vrot.slane %v1694_v19, 4  ;;  %v2273_v42 = vshrl.u32 %v2048_v50, 16  ;;  %v555_v10 = vor.u32 %v553_v22, %v552_v49  ;;  %v2276_v61 = vshll.u32 %v2048_v50, 16 }
 0x101   : > { %v1704_v18 = vor.u32 %v1703_v25, %v1699_v4  ;;  %v1988_v56 = vsel %vm9110_vm7, %v1986_v43, %v1987_v35  ;;  %3104 = vrot.lane.b32.xlu0 %v8005_v37, %s8909_s14  ;;  %v2286_v52 = vshrl.u32 %v9887_v45, 16  ;;  %v8021_v28 = vcombine.low %v2048_v50, %v9887_v45 }
 0x102   : > { %v1700_v55 = vsel %vm9130_vm11, %v1695_v20, %v1699_v4  ;;  %v8006_v48 = vcombine.low %v9885_v58, %v1988_v56  ;;  %v2275_v6 = vrot.slane %v2273_v42, 4  ;;  %v556_v60 = vsel %vm9138_vm12, %v548_v31, %v555_v10 }
 0x103   : > { %v1705_v0 = vrot.slane %v1704_v18, 4  ;;  %v2278_v12 = vrot.slane %v2276_v61, 5  ;;  %vm3623_vm2 = vcmask 261120   ;;  %vm13078_vm6 = vcmask 293888   ;;  %770 = vst.msk [vmem:[#allocation2 + $0x88] sm:$0xf] %vm224_vm0, %v556_v60 }
 0x104   : > { %v3625_v37 = vsel %vm3623_vm2, %v9867_v29, %v9637_v51  ;;  %v3528_v38 = vsel %vm3524_vm4, %v9814_v63, %v9656_v41  ;;  %v3431_v47 = vsel %vm3425_vm15, %v9832_v26, %v9750_v53  ;;  %v557_v25 = vrot.slane %v552_v49, 4  ;;  %v2472_v53 = vld [vmem:[#allocation2 + $0x78] sm:$0xe]  ;;  %v9927_v26 = vpop.permute.xlu1 %3350 }
 0x105   : > { %v1710_v27 = vsel %vm9130_vm11, %v1705_v0, %v1709_v8  ;;  %8534 = vmatprep.mubr.msk.bf16.mxu0 %vm13078_vm6, %v3625_v37  ;;  %v3561_v19 = vsel %vm3557_vm5, %v3528_v38, %v9615_v9  ;;  %v2279_v35 = vor.u32 %v2278_v12, %v2275_v6  ;;  %3200 = vrot.lane.b32.xlu0 %v8021_v28, %s8908_s13  ;;  %v2282_v41 = vshll.u32 %v9887_v45, 16 }
 0x106   : > { %v7990_v15 = vcombine.low %v1700_v55, %v1710_v27  ;;  %v3594_v51 = vsel %vm3590_vm8, %v3561_v19, %v9704_v30  ;;  %v2288_v63 = vrot.slane %v2286_v52, 4  ;;  %v2292_v29 = vshll.u32 %v9905_v3, 16  ;;  %v2050_v4 = vld [vmem:[#allocation2 + $0x84] sm:$0xf] }
 0x107   : > { %v3627_v9 = vsel %vm3623_vm2, %v3594_v51, %v9661_v33  ;;  %v772_v14 = vsel %vm9154_vm13, %v557_v25, %v771_v39  ;;  %v2280_v17 = vrot.slane %v2279_v35, 4  ;;  %v3466_v30 = vsel %vm3458_vm1, %v9871_v40, %v9791_v24  ;;  %v9937_v50 = vpop.permute.xlu0 %2760  ;;  %v2473_v33 = vld [vmem:[#allocation2 + $0x84] sm:$0xe] }
 0x108   : > { %3026 = vrot.lane.b32.xlu1 %v7990_v15, %s8911_s16  ;;  %8535 = vmatmul.mubr.msk.bf16.vlgmr.msra.gmra.mxu0 %vm13078_vm6, %v3627_v9  ;;  %773 = vst [vmem:[#allocation2 + $0x8c] sm:$0x1] %v772_v14  ;;  %v2284_v8 = vrot.slane %v2282_v41, 5  ;;  %v2294_v58 = vrot.slane %v2292_v29, 5  ;;  %v3464_v43 = vsel %vm3458_vm1, %v3431_v47, %v9763_v62  ;;  %v3499_v20 = vsel %vm3491_vm3, %v3466_v30, %v9822_v2  ;;  %v831_v10 = vld [vmem:[#allocation2 + $0x84] sm:$0xf]  ;;  %v9959_v60 = vpop.permute.xlu1 %2762 }
 0x109   : > { %v2297_v31 = vshrl.u32 %v2050_v4, 16  ;;  %v2300_v49 = vshll.u32 %v2050_v4, 16  ;;  %v7910_v22 = vrot.slane %v2473_v33, 9  ;;  %v7909_v18 = vrot.slane %v2472_v53, 9 }
 0x10a   : > { %v2285_v24 = vsel %vm9130_vm11, %v2280_v17, %v2284_v8  ;;  %v2289_v40 = vor.u32 %v2288_v63, %v2284_v8  ;;  %v2586_v56 = vrot.slane %v9887_v45, 5  ;;  %v2589_v16 = vrot.slane %v9905_v3, 5  ;;  %v2051_v42 = vld [vmem:[#allocation2 + $0x88] sm:$0xf]  ;;  %v829_v8 = vld [vmem:[#allocation2 + $0x78] sm:$0xf] }
 0x10b   : > { %v2299_v62 = vrot.slane %v2297_v31, 4  ;;  %v2302_v55 = vrot.slane %v2300_v49, 5  ;;  %v9951_v2 = vsel %vm3491_vm3, %v3464_v43, %v9777_v7  ;;  %v9955_v61 = vsel %vm3524_vm4, %v3499_v20, %v9858_v32  ;;  %v9957_v0 = vpop.permute.xlu0 %2840  ;;  %v832_v35 = vld [vmem:[#allocation2 + $0x88] sm:$0xf] }
 0x10c   : > { %3106 = vrot.lane.b32.xlu1 %v8006_v48, %s8909_s14  ;;  %v2310_v6 = vshrl.u32 %v2051_v42, 16  ;;  %v8022_v45 = vcombine.low %v2050_v4, %v2051_v42  ;;  %v2306_v52 = vshll.u32 %v2051_v42, 16  ;;  %v2290_v28 = vrot.slane %v2289_v40, 4  ;;  %v9979_v31 = vpop.permute.xlu1 %2842  ;;  %v830_v40 = vld [vmem:[#allocation2 + $0x7c] sm:$0xf] }
 0x10d   : > { %v2303_v48 = vor.u32 %v2302_v55, %v2299_v62  ;;  %v2593_v12 = vrot.slane %v2051_v42, 5  ;;  %v2587_v3 = vsel %vm9110_vm7, %v7909_v18, %v2586_v56  ;;  %v2588_v7 = vrot.slane %v2586_v56, 4  ;;  %v851_v42 = vld [vmem:[#allocation2 + $0x80] sm:$0x1] }
 0x10e   : > { %v2308_v27 = vrot.slane %v2306_v52, 5  ;;  %v2312_v37 = vrot.slane %v2310_v6, 4  ;;  %v2295_v32 = vsel %vm9130_vm11, %v2290_v28, %v2294_v58  ;;  %v1125_v38 = vshrl.u32 %v831_v10, 16  ;;  %v1255_v28 = vld [vmem:[#allocation2 + $0x84] sm:$0xe] }
 0x10f   : > { %v2073_v47 = vld [vmem:[#allocation2 + $0x8c] sm:$0x1]  ;;  %v2304_v39 = vrot.slane %v2303_v48, 4  ;;  %v8037_v15 = vcombine.low %v2285_v24, %v2295_v32  ;;  %v2594_v19 = vsel %vm9110_vm7, %v7910_v22, %v2593_v12  ;;  %v2595_v25 = vrot.slane %v2593_v12, 4  ;;  %v9968_v51 = vpop.permute.xlu0 %2936 }
 0x110   : > { %3202 = vrot.lane.b32.xlu1 %v8022_v45, %s8908_s13  ;;  %v2313_v41 = vor.u32 %v2312_v37, %v2308_v27  ;;  %v2316_v63 = vshll.u32 %v2073_v47, 16  ;;  %v2596_v29 = vrot.slane %v2073_v47, 5  ;;  %v2590_v53 = vsel %vm9110_vm7, %v2588_v7, %v2589_v16  ;;  %v9972_v9 = vld [vmem:[#allocation2 + $0x8c] sm:$0x1] }
 0x111   : > { %v2309_v14 = vsel %vm9130_vm11, %v2304_v39, %v2308_v27  ;;  %3280 = vrot.lane.b32.xlu0 %v8037_v15, %s8912_s17  ;;  %v8053_v17 = vcombine.low %v2587_v3, %v2590_v53  ;;  %v1127_v30 = vrot.slane %v1125_v38, 4  ;;  %v1128_v4 = vshll.u32 %v831_v10, 16  ;;  %v1254_v39 = vld [vmem:[#allocation2 + $0x78] sm:$0xe] }
 0x112   : > { %v2314_v58 = vrot.slane %v2313_v41, 4  ;;  %v2318_v43 = vrot.slane %v2316_v63, 5  ;;  %v2597_v33 = vsel %vm9110_vm7, %v2595_v25, %v2596_v29  ;;  %v1134_v20 = vshll.u32 %v832_v35, 16 }
 0x113   : > { %v8054_v49 = vcombine.low %v2594_v19, %v2597_v33  ;;  %v1130_v22 = vrot.slane %v1128_v4, 5  ;;  %v1138_v18 = vshrl.u32 %v832_v35, 16  ;;  %v1144_v24 = vshll.u32 %v9972_v9, 16  ;;  %v9985_v48 = vpop.permute.xlu0 %3016 }
 0x114   : > { %v2319_v56 = vsel %vm9130_vm11, %v2314_v58, %v2318_v43  ;;  %v1136_v16 = vrot.slane %v1134_v20, 5  ;;  %v1101_v62 = vshrl.u32 %v829_v8, 16  ;;  %v1104_v55 = vshll.u32 %v829_v8, 16  ;;  %v358_v20 = vld [vmem:[%s9108_s9 + $0x58] sm:$0xf] }
 0x115   : > { %v8038_v10 = vcombine.low %v2309_v14, %v2319_v56  ;;  %3360 = vrot.lane.b32.xlu0 %v8053_v17, %s8910_s15  ;;  %v1131_v6 = vor.u32 %v1130_v22, %v1127_v30  ;;  %v1140_v45 = vrot.slane %v1138_v18, 4  ;;  %v1146_v52 = vrot.slane %v1144_v24, 5  ;;  %v9991_v63 = vpop.permute.xlu1 %2938  ;;  %v359_v56 = vld [vmem:[%s9108_s9 + $0x5c] sm:$0xf] }
 0x116   : > { %v1103_v12 = vrot.slane %v1101_v62, 4  ;;  %v1106_v3 = vrot.slane %v1104_v55, 5  ;;  %v1110_v7 = vshll.u32 %v830_v40, 16  ;;  %v1114_v27 = vshrl.u32 %v830_v40, 16  ;;  %v10014_v55 = vld [vmem:[#allocation2 + $0x84] sm:$0xf] }
 0x117   : > { %3282 = vrot.lane.b32.xlu1 %v8038_v10, %s8912_s17  ;;  %v1132_v37 = vrot.slane %v1131_v6, 4  ;;  %v1141_v32 = vor.u32 %v1140_v45, %v1136_v16  ;;  %v1120_v38 = vshll.u32 %v851_v42, 16  ;;  %v3530_v47 = vsel %vm3524_vm4, %v9951_v2, %v9802_v54  ;;  %v10002_v22 = vpop.permute.xlu0 %3096 }
 0x118   : > { %v1107_v15 = vor.u32 %v1106_v3, %v1103_v12  ;;  %v1112_v19 = vrot.slane %v1110_v7, 5  ;;  %v1116_v25 = vrot.slane %v1114_v27, 4  ;;  %v7880_v41 = vrot.slane %v1255_v28, 9 }
 0x119   : > { %v1137_v29 = vsel %vm9130_vm11, %v1132_v37, %v1136_v16  ;;  %v1142_v53 = vrot.slane %v1141_v32, 4  ;;  %v1122_v14 = vrot.slane %v1120_v38, 5  ;;  %v1390_v17 = vrot.slane %v832_v35, 5  ;;  %v774_v32 = vld [vmem:[#allocation2 + $0x90] sm:$0xf] }
 0x11a   : > { %v1108_v30 = vrot.slane %v1107_v15, 4  ;;  %v1117_v4 = vor.u32 %v1116_v25, %v1112_v19  ;;  %v1393_v8 = vrot.slane %v9972_v9, 5  ;;  %v7879_v54 = vrot.slane %v1254_v39, 9 }
 0x11b   : > { %3362 = vrot.lane.b32.xlu1 %v8054_v49, %s8910_s15  ;;  %v1147_v2 = vsel %vm9130_vm11, %v1142_v53, %v1146_v52  ;;  %v1391_v58 = vsel %vm9110_vm7, %v7880_v41, %v1390_v17  ;;  %v1392_v43 = vrot.slane %v1390_v17, 4  ;;  %v1383_v33 = vrot.slane %v830_v40, 5  ;;  %v10020_v52 = vld [vmem:[#allocation2 + $0x88] sm:$0xf]  ;;  %v10033_v25 = vpop.permute.xlu0 %3192  ;;  %v778_v17 = vld [vmem:[#allocation2 + $0x98] sm:$0x1] }
 0x11c   : > { %v7944_v35 = vcombine.low %v1137_v29, %v1147_v2  ;;  %v1113_v18 = vsel %vm9130_vm11, %v1108_v30, %v1112_v19  ;;  %v1118_v24 = vrot.slane %v1117_v4, 4  ;;  %v1386_v9 = vrot.slane %v851_v42, 5  ;;  %v1465_v19 = vld [vmem:[#allocation2 + $0x8c] sm:$0x1] }
 0x11d   : > { %v1394_v49 = vsel %vm9110_vm7, %v1392_v43, %v1393_v8  ;;  %v1384_v16 = vsel %vm9110_vm7, %v7879_v54, %v1383_v33  ;;  %v1385_v62 = vrot.slane %v1383_v33, 4  ;;  %v3565_v40 = vsel %vm3557_vm5, %v9955_v61, %v9877_v57 }
 0x11e   : > { %v1123_v10 = vsel %vm9130_vm11, %v1118_v24, %v1122_v14  ;;  %v7960_v6 = vcombine.low %v1391_v58, %v1394_v49  ;;  %v3563_v42 = vsel %vm3557_vm5, %v3530_v47, %v9850_v11  ;;  %v559_v45 = vshrl.u32 %v358_v20, 16  ;;  %v1865_v58 = vld [vmem:[#allocation2 + $0x84] sm:$0xe] }
 0x11f   : > { %v10022_v28 = vpop.permute.xlu1 %3018  ;;  %2774 = vrot.lane.b32.xlu1 %v7944_v35, %s8906_s11  ;;  %v7943_v12 = vcombine.low %v1113_v18, %v1123_v10  ;;  %v1387_v57 = vsel %vm9110_vm7, %v1385_v62, %v1386_v9  ;;  %v562_v61 = vshll.u32 %v358_v20, 16  ;;  %v567_v3 = vshrl.u32 %v359_v56, 16  ;;  %v360_v9 = vld [vmem:[%s9108_s9 + $0x60] sm:$0xf] }
 0x120   : > { %v7959_v7 = vcombine.low %v1384_v16, %v1387_v57  ;;  %v561_v27 = vrot.slane %v559_v45, 7  ;;  %v570_v37 = vshll.u32 %v359_v56, 16  ;;  %v1712_v38 = vshrl.u32 %v10014_v55, 16 }
 0x121   : > { %2772 = vrot.lane.b32.xlu0 %v7943_v12, %s8906_s11  ;;  %v569_v11 = vrot.slane %v567_v3, 7  ;;  %v1715_v47 = vshll.u32 %v10014_v55, 16  ;;  %v1725_v39 = vshrl.u32 %v10020_v52, 16  ;;  %v7975_v15 = vcombine.low %v10014_v55, %v10020_v52 }
 0x122   : > { %v564_v41 = vor.u32 %v562_v61, %v561_v27  ;;  %v565_v29 = vrot.slane %v561_v27, 4  ;;  %v1714_v53 = vrot.slane %v1712_v38, 4  ;;  %v3598_v14 = vsel %vm3590_vm8, %v3565_v40, %v9893_v59  ;;  %v361_v40 = vld [vmem:[%s9108_s9 + $0x64] sm:$0xf]  ;;  %v8763_v61 = vld [vmem:[#allocation2 + $0x34] sm:$0xf] }
 0x123   : > { %v10037_v30 = vpop.permute.xlu1 %3098  ;;  %2854 = vrot.lane.b32.xlu1 %v7960_v6, %s8905_s10  ;;  %v572_v4 = vor.u32 %v570_v37, %v569_v11  ;;  %v1717_v8 = vrot.slane %v1715_v47, 5  ;;  %v3596_v54 = vsel %vm3590_vm8, %v3563_v42, %v9879_v21  ;;  %v574_v2 = vrot.slane %v569_v11, 4 }
 0x124   : > { %v775_v43 = vsel %vm9124_vm10, %v564_v41, %v774_v32  ;;  %v1721_v33 = vshll.u32 %v10020_v52, 16  ;;  %v1727_v59 = vrot.slane %v1725_v39, 4  ;;  %v1731_v20 = vshll.u32 %v1465_v19, 16 }
 0x125   : > { %2852 = vrot.lane.b32.xlu0 %v7959_v7, %s8905_s10  ;;  %v573_v35 = vsel %vm9138_vm12, %v565_v29, %v572_v4  ;;  %776 = vst [vmem:[#allocation2 + $0x90] sm:$0xf] %v775_v43  ;;  %v779_v18 = vsel %vm9154_vm13, %v574_v2, %v778_v17  ;;  %v1718_v21 = vor.u32 %v1717_v8, %v1714_v53  ;;  %v7895_v62 = vrot.slane %v1865_v58, 9  ;;  %v10066_v12 = vpop.permute.xlu0 %3272 }
 0x126   : > { %v3631_v24 = vsel %vm3623_vm2, %v3598_v14, %v9927_v26  ;;  %777 = vst.msk [vmem:[#allocation2 + $0x94] sm:$0xf] %vm224_vm0, %v573_v35  ;;  %780 = vst [vmem:[#allocation2 + $0x98] sm:$0x1] %v779_v18  ;;  %v1723_v56 = vrot.slane %v1721_v33, 5  ;;  %v1733_v49 = vrot.slane %v1731_v20, 5  ;;  %v3629_v16 = vsel %vm3623_vm2, %v3596_v54, %v9898_v23 }
 0x127   : > { %v1719_v55 = vrot.slane %v1718_v21, 4  ;;  %v1991_v10 = vrot.slane %v10020_v52, 5  ;;  %v1994_v6 = vrot.slane %v1465_v19, 5  ;;  %8538 = vmatprep.mubr.msk.bf16.mxu0 %vm13078_vm6, %v3629_v16  ;;  %v13119_v26 = vcombine.low %v9425_v13, %v9434_v46  ;;  %v10064_v45 = vpop.permute.xlu1 %3194  ;;  %v8762_v23 = vld [vmem:[#allocation2 + $0x30] sm:$0xf] }
 0x128   : > { %v1728_v57 = vor.u32 %v1727_v59, %v1723_v56  ;;  %8539 = vmatmul.mubr.msk.bf16.gmra.mxu0 %vm13078_vm6, %v3631_v24  ;;  %v7921_v3 = vcombine.low %v8762_v23, %v8763_v61  ;;  %v576_v52 = vshrl.u32 %v360_v9, 16  ;;  %v579_v7 = vshll.u32 %v360_v9, 16  ;;  %v781_v18 = vld [vmem:[#allocation2 + $0x9c] sm:$0xf] }
 0x129   : > { %v3394_v42 = vsel %vm3376_vm14, %v13119_v26, %v9959_v60  ;;  %2948 = vrot.lane.b32.xlu0 %v7975_v15, %s8907_s12  ;;  %v1724_v27 = vsel %vm9130_vm11, %v1719_v55, %v1723_v56  ;;  %v1992_v13 = vsel %vm9110_vm7, %v7895_v62, %v1991_v10  ;;  %v1993_v46 = vrot.slane %v1991_v10, 4  ;;  %v10093_v33 = vpop.permute.xlu0 %3352 }
 0x12a   : > { %v584_v60 = vshrl.u32 %v361_v40, 16  ;;  %v1729_v37 = vrot.slane %v1728_v57, 4  ;;  %v3391_v32 = vsel %vm3376_vm14, %v7921_v3, %v9937_v50  ;;  %v578_v38 = vrot.slane %v576_v52, 7 }
 0x12b   : > { %v587_v11 = vshll.u32 %v361_v40, 16  ;;  %v1995_v47 = vsel %vm9110_vm7, %v1993_v46, %v1994_v6  ;;  %v10082_v15 = vsel %vm3425_vm15, %v3394_v42, %v9979_v31  ;;  %v10086_v19 = vsel %vm3425_vm15, %v3391_v32, %v9957_v0  ;;  %v10091_v43 = vpop.permute.xlu1 %3274 }
 0x12c   : > { %v10078_v39 = vrot.slane %v584_v60, 7  ;;  %v1445_v41 = vld [vmem:[#allocation2 + $0x90] sm:$0xf]  ;;  %v1734_v29 = vsel %vm9130_vm11, %v1729_v37, %v1733_v49  ;;  %v8007_v53 = vcombine.low %v1992_v13, %v1995_v47  ;;  %v581_v14 = vor.u32 %v579_v7, %v578_v38 }
 0x12d   : > { %v1866_v50 = vld [vmem:[#allocation2 + $0x90] sm:$0xe]  ;;  %v582_v17 = vrot.slane %v578_v38, 4  ;;  %v1446_v4 = vld [vmem:[#allocation2 + $0x94] sm:$0xf]  ;;  %v1736_v8 = vshrl.u32 %v1445_v41, 16  ;;  %v7991_v58 = vcombine.low %v1724_v27, %v1734_v29 }
 0x12e   : > { %v1739_v54 = vshll.u32 %v1445_v41, 16  ;;  %v1466_v2 = vld [vmem:[#allocation2 + $0x98] sm:$0x1]  ;;  %v589_v31 = vor.u32 %v587_v11, %v10078_v39  ;;  %v1749_v0 = vshrl.u32 %v1446_v4, 16  ;;  %v7976_v59 = vcombine.low %v1445_v41, %v1446_v4  ;;  %v2052_v49 = vld [vmem:[#allocation2 + $0x90] sm:$0xf] }
 0x12f   : > { %v1745_v20 = vshll.u32 %v1446_v4, 16  ;;  %v1755_v35 = vshll.u32 %v1466_v2, 16  ;;  %v1738_v21 = vrot.slane %v1736_v8, 4  ;;  %3028 = vrot.lane.b32.xlu0 %v7991_v58, %s8911_s16  ;;  %v7896_v9 = vrot.slane %v1866_v50, 9  ;;  %v10097_v10 = vld [vmem:[#allocation2 + $0x94] sm:$0xf]  ;;  %v10115_v37 = vpop.permute.xlu1 %3354 }
 0x130   : > { %v1741_v24 = vrot.slane %v1739_v54, 5  ;;  %v1998_v56 = vrot.slane %v1446_v4, 5  ;;  %2950 = vrot.lane.b32.xlu1 %v7976_v59, %s8907_s12  ;;  %v1751_v62 = vrot.slane %v1749_v0, 4  ;;  %v2001_v55 = vrot.slane %v1466_v2, 5  ;;  %v10113_v60 = vld [vmem:[#allocation2 + $0x98] sm:$0x1] }
 0x131   : > { %v1747_v16 = vrot.slane %v1745_v20, 5  ;;  %v1757_v40 = vrot.slane %v1755_v35, 5  ;;  %v590_v57 = vsel %vm9138_vm12, %v582_v17, %v589_v31  ;;  %v782_v61 = vsel %vm9124_vm10, %v581_v14, %v781_v18  ;;  %v785_v29 = vld [vmem:[#allocation2 + $0xa4] sm:$0x1]  ;;  %v2474_v4 = vld [vmem:[#allocation2 + $0x90] sm:$0xe] }
 0x132   : > { %v1742_v6 = vor.u32 %v1741_v24, %v1738_v21  ;;  %v10101_v26 = vsel %vm9110_vm7, %v7896_v9, %v1998_v56  ;;  %v2000_v42 = vrot.slane %v1998_v56, 4  ;;  %784 = vst.msk [vmem:[#allocation2 + $0xa0] sm:$0xf] %vm224_vm0, %v590_v57  ;;  %v2321_v3 = vshrl.u32 %v2052_v49, 16  ;;  %783 = vst [vmem:[#allocation2 + $0x9c] sm:$0xf] %v782_v61 }
 0x133   : > { %v1752_v23 = vor.u32 %v1751_v62, %v1747_v16  ;;  %v2324_v52 = vshll.u32 %v2052_v49, 16  ;;  %3108 = vrot.lane.b32.xlu0 %v8007_v53, %s8909_s14  ;;  %v2334_v13 = vshrl.u32 %v10097_v10, 16  ;;  %v8023_v46 = vcombine.low %v2052_v49, %v10097_v10 }
 0x134   : > { %v1743_v7 = vrot.slane %v1742_v6, 4  ;;  %v2002_v27 = vsel %vm9110_vm7, %v2000_v42, %v2001_v55  ;;  %v10117_v32 = vpop.permute.xlu0 %2764  ;;  %v2323_v47 = vrot.slane %v2321_v3, 4  ;;  %v591_v53 = vrot.slane %v10078_v39, 4 }
 0x135   : > { %v1753_v38 = vrot.slane %v1752_v23, 4  ;;  %v8008_v11 = vcombine.low %v10101_v26, %v2002_v27  ;;  %v2326_v41 = vrot.slane %v2324_v52, 5  ;;  %v2330_v14 = vshll.u32 %v10097_v10, 16 }
 0x136   : > { %v1748_v50 = vsel %vm9130_vm11, %v1743_v7, %v1747_v16  ;;  %v2336_v17 = vrot.slane %v2334_v13, 4  ;;  %v2340_v2 = vshll.u32 %v10113_v60, 16  ;;  %v3470_v58 = vsel %vm3458_vm1, %v10082_v15, %v9991_v63 }
 0x137   : > { %v1758_v8 = vsel %vm9130_vm11, %v1753_v38, %v1757_v40  ;;  %v2327_v54 = vor.u32 %v2326_v41, %v2323_v47  ;;  %3204 = vrot.lane.b32.xlu0 %v8023_v46, %s8908_s13  ;;  %v786_v39 = vsel %vm9154_vm13, %v591_v53, %v785_v29  ;;  %v2332_v0 = vrot.slane %v2330_v14, 5 }
 0x138   : > { %v7992_v31 = vcombine.low %v1748_v50, %v1758_v8  ;;  %v3468_v59 = vsel %vm3458_vm1, %v10086_v19, %v9968_v51  ;;  %787 = vst [vmem:[#allocation2 + $0xa4] sm:$0x1] %v786_v39  ;;  %v2342_v35 = vrot.slane %v2340_v2, 5  ;;  %v7911_v18 = vrot.slane %v2474_v4, 9  ;;  %v10147_v51 = vpop.permute.xlu1 %2766  ;;  %v10149_v19 = vpop.permute.xlu0 %2844 }
 0x139   : > { %v2328_v20 = vrot.slane %v2327_v54, 4  ;;  %v2600_v21 = vrot.slane %v10097_v10, 5  ;;  %v2055_v63 = vld [vmem:[#allocation2 + $0xa0] sm:$0xf]  ;;  %v2337_v15 = vor.u32 %v2336_v17, %v2332_v0  ;;  %v2603_v24 = vrot.slane %v10113_v60, 5 }
 0x13a   : > { %3030 = vrot.lane.b32.xlu1 %v7992_v31, %s8911_s16  ;;  %v10141_v9 = vsel %vm3491_vm3, %v3470_v58, %v10022_v28  ;;  %v10145_v56 = vsel %vm3491_vm3, %v3468_v59, %v9985_v48  ;;  %v2054_v49 = vld [vmem:[#allocation2 + $0x9c] sm:$0xf]  ;;  %v2358_v16 = vshrl.u32 %v2055_v63, 16  ;;  %v2354_v62 = vshll.u32 %v2055_v63, 16  ;;  %v10162_v41 = vld [vmem:[#allocation2 + $0xa0] sm:$0xf] }
 0x13b   : > { %v2333_v40 = vsel %vm9130_vm11, %v2328_v20, %v2332_v0  ;;  %v2475_v55 = vld [vmem:[#allocation2 + $0x9c] sm:$0xe]  ;;  %v2601_v10 = vsel %vm9110_vm7, %v7911_v18, %v2600_v21  ;;  %v2345_v28 = vshrl.u32 %v2054_v49, 16  ;;  %v2348_v6 = vshll.u32 %v2054_v49, 16 }
 0x13c   : > { %v8024_v26 = vcombine.low %v2054_v49, %v2055_v63  ;;  %v2338_v42 = vrot.slane %v2337_v15, 4  ;;  %v2356_v48 = vrot.slane %v2354_v62, 5  ;;  %v2360_v57 = vrot.slane %v2358_v16, 4  ;;  %v835_v3 = vld [vmem:[#allocation2 + $0x9c] sm:$0xf]  ;;  %v10168_v4 = vpop.permute.xlu1 %2846  ;;  %v10170_v8 = vpop.permute.xlu0 %2940 }
 0x13d   : > { %v7912_v23 = vrot.slane %v2475_v55, 9  ;;  %v2607_v61 = vrot.slane %v2055_v63, 5  ;;  %v2347_v52 = vrot.slane %v2345_v28, 4  ;;  %v2350_v7 = vrot.slane %v2348_v6, 5  ;;  %v833_v15 = vld [vmem:[#allocation2 + $0x90] sm:$0xf] }
 0x13e   : > { %3110 = vrot.lane.b32.xlu1 %v8008_v11, %s8909_s14  ;;  %v2343_v27 = vsel %vm9130_vm11, %v2338_v42, %v2342_v35  ;;  %v2602_v13 = vrot.slane %v2600_v21, 4  ;;  %v2361_v46 = vor.u32 %v2360_v57, %v2356_v48  ;;  %v1173_v14 = vshrl.u32 %v835_v3, 16  ;;  %v10182_v55 = vld [vmem:[#allocation2 + $0x98] sm:$0x1] }
 0x13f   : > { %v8039_v60 = vcombine.low %v2333_v40, %v2343_v27  ;;  %v10160_v38 = vsel %vm9110_vm7, %v7912_v23, %v2607_v61  ;;  %v2609_v47 = vrot.slane %v2607_v61, 4  ;;  %v2075_v29 = vld [vmem:[#allocation2 + $0xa4] sm:$0x1]  ;;  %v2351_v50 = vor.u32 %v2350_v7, %v2347_v52  ;;  %v834_v40 = vld [vmem:[#allocation2 + $0x94] sm:$0xf] }
 0x140   : > { %v2604_v11 = vsel %vm9110_vm7, %v2602_v13, %v2603_v24  ;;  %v10166_v53 = vld [vmem:[#allocation2 + $0xa4] sm:$0x1]  ;;  %v1176_v17 = vshll.u32 %v835_v3, 16  ;;  %v2362_v54 = vrot.slane %v2361_v46, 4  ;;  %v2364_v2 = vshll.u32 %v2075_v29, 16  ;;  %v10190_v3 = vpop.permute.xlu0 %3020 }
 0x141   : > { %3284 = vrot.lane.b32.xlu0 %v8039_v60, %s8912_s17  ;;  %v2610_v58 = vrot.slane %v2075_v29, 5  ;;  %v8055_v31 = vcombine.low %v2601_v10, %v2604_v11  ;;  %v2352_v39 = vrot.slane %v2351_v50, 4  ;;  %v1175_v0 = vrot.slane %v1173_v14, 4  ;;  %v10188_v61 = vpop.permute.xlu1 %2942  ;;  %v1257_v46 = vld [vmem:[#allocation2 + $0x9c] sm:$0xe] }
 0x142   : > { %3206 = vrot.lane.b32.xlu1 %v8024_v26, %s8908_s13  ;;  %v1178_v59 = vrot.slane %v1176_v17, 5  ;;  %v1182_v20 = vshll.u32 %v10162_v41, 16  ;;  %v2366_v35 = vrot.slane %v2364_v2, 5  ;;  %v1186_v21 = vshrl.u32 %v10162_v41, 16  ;;  %v1256_v50 = vld [vmem:[#allocation2 + $0x90] sm:$0xe] }
 0x143   : > { %v2611_v18 = vsel %vm9110_vm7, %v2609_v47, %v2610_v58  ;;  %v1192_v63 = vshll.u32 %v10166_v53, 16  ;;  %v2357_v24 = vsel %vm9130_vm11, %v2352_v39, %v2356_v48  ;;  %v1407_v26 = vrot.slane %v10166_v53, 5 }
 0x144   : > { %v8056_v49 = vcombine.low %v10160_v38, %v2611_v18  ;;  %v1179_v16 = vor.u32 %v1178_v59, %v1175_v0  ;;  %v1184_v62 = vrot.slane %v1182_v20, 5  ;;  %v2367_v10 = vsel %vm9130_vm11, %v2362_v54, %v2366_v35  ;;  %v362_v35 = vld [vmem:[%s9108_s9 + $0x68] sm:$0xf] }
 0x145   : > { %3364 = vrot.lane.b32.xlu0 %v8055_v31, %s8910_s15  ;;  %v1188_v28 = vrot.slane %v1186_v21, 4  ;;  %v1194_v6 = vrot.slane %v1192_v63, 5  ;;  %v8040_v42 = vcombine.low %v2357_v24, %v2367_v10  ;;  %v1149_v23 = vshrl.u32 %v833_v15, 16 }
 0x146   : > { %v1180_v57 = vrot.slane %v1179_v16, 4  ;;  %v1152_v48 = vshll.u32 %v833_v15, 16  ;;  %v1158_v7 = vshll.u32 %v834_v40, 16  ;;  %v1162_v27 = vshrl.u32 %v834_v40, 16 }
 0x147   : > { %v1189_v52 = vor.u32 %v1188_v28, %v1184_v62  ;;  %v1168_v13 = vshll.u32 %v10182_v55, 16  ;;  %3286 = vrot.lane.b32.xlu1 %v8040_v42, %s8912_s17  ;;  %v1151_v38 = vrot.slane %v1149_v23, 4  ;;  %v1400_v29 = vrot.slane %v10182_v55, 5  ;;  %v10223_v55 = vld [vmem:[#allocation2 + $0x9c] sm:$0xf] }
 0x148   : > { %v1185_v60 = vsel %vm9130_vm11, %v1180_v57, %v1184_v62  ;;  %v1154_v47 = vrot.slane %v1152_v48, 5  ;;  %v1160_v53 = vrot.slane %v1158_v7, 5  ;;  %v1164_v14 = vrot.slane %v1162_v27, 4  ;;  %v10229_v57 = vld [vmem:[#allocation2 + $0xa0] sm:$0xf] }
 0x149   : > { %v1190_v11 = vrot.slane %v1189_v52, 4  ;;  %v1170_v17 = vrot.slane %v1168_v13, 5  ;;  %v3536_v2 = vsel %vm3524_vm4, %v10141_v9, %v10037_v30  ;;  %v3534_v58 = vsel %vm3524_vm4, %v10145_v56, %v10002_v22  ;;  %v363_v9 = vld [vmem:[%s9108_s9 + $0x6c] sm:$0xf]  ;;  %v10213_v22 = vpop.permute.xlu0 %3100 }
 0x14a   : > { %v1155_v54 = vor.u32 %v1154_v47, %v1151_v38  ;;  %v7882_v31 = vrot.slane %v1257_v46, 9  ;;  %v1165_v0 = vor.u32 %v1164_v14, %v1160_v53  ;;  %v1404_v59 = vrot.slane %v10162_v41, 5  ;;  %v10211_v15 = vpop.permute.xlu1 %3022  ;;  %v788_v46 = vld [vmem:[#allocation2 + $0xa8] sm:$0xf] }
 0x14b   : > { %v1195_v39 = vsel %vm9130_vm11, %v1190_v11, %v1194_v6  ;;  %v7881_v20 = vrot.slane %v1256_v50, 9  ;;  %3366 = vrot.lane.b32.xlu1 %v8056_v49, %s8910_s15  ;;  %v1397_v63 = vrot.slane %v834_v40, 5  ;;  %v3569_v30 = vsel %vm3557_vm5, %v3536_v2, %v10064_v45  ;;  %v1467_v11 = vld [vmem:[#allocation2 + $0xa4] sm:$0x1] }
 0x14c   : > { %v7946_v18 = vcombine.low %v1185_v60, %v1195_v39  ;;  %v1156_v21 = vrot.slane %v1155_v54, 4  ;;  %v1166_v56 = vrot.slane %v1165_v0, 4  ;;  %v1405_v24 = vsel %vm9110_vm7, %v7882_v31, %v1404_v59 }
 0x14d   : > { %v1406_v41 = vrot.slane %v1404_v59, 4  ;;  %v3567_v16 = vsel %vm3557_vm5, %v3534_v58, %v10033_v25  ;;  %v1398_v62 = vsel %vm9110_vm7, %v7881_v20, %v1397_v63  ;;  %v1399_v45 = vrot.slane %v1397_v63, 4  ;;  %v10240_v14 = vpop.permute.xlu0 %3196  ;;  %v792_v58 = vld [vmem:[#allocation2 + $0xb0] sm:$0x1]  ;;  %v1867_v20 = vld [vmem:[#allocation2 + $0x9c] sm:$0xe] }
 0x14e   : > { %v1161_v49 = vsel %vm9130_vm11, %v1156_v21, %v1160_v53  ;;  %v593_v40 = vshrl.u32 %v362_v35, 16  ;;  %v1171_v10 = vsel %vm9130_vm11, %v1166_v56, %v1170_v17  ;;  %v596_v6 = vshll.u32 %v362_v35, 16  ;;  %v10238_v53 = vpop.permute.xlu1 %3102  ;;  %v364_v56 = vld [vmem:[%s9108_s9 + $0x70] sm:$0xf] }
 0x14f   : > { %v1408_v28 = vsel %vm9110_vm7, %v1406_v41, %v1407_v26  ;;  %v601_v42 = vshrl.u32 %v363_v9, 16  ;;  %2778 = vrot.lane.b32.xlu1 %v7946_v18, %s8906_s11  ;;  %v7945_v25 = vcombine.low %v1161_v49, %v1171_v10  ;;  %v1401_v48 = vsel %vm9110_vm7, %v1399_v45, %v1400_v29  ;;  %v8766_v10 = vld [vmem:[#allocation2 + $0x48] sm:$0xf] }
 0x150   : > { %v7962_v23 = vcombine.low %v1405_v24, %v1408_v28  ;;  %v595_v52 = vrot.slane %v593_v40, 7  ;;  %v7961_v7 = vcombine.low %v1398_v62, %v1401_v48  ;;  %v604_v13 = vshll.u32 %v363_v9, 16  ;;  %v8764_v40 = vld [vmem:[#allocation2 + $0x54] sm:$0xf]  ;;  %v8767_v28 = vld [vmem:[#allocation2 + $0x4c] sm:$0xf] }
 0x151   : > { %v603_v27 = vrot.slane %v601_v42, 7  ;;  %v1760_v60 = vshrl.u32 %v10223_v55, 16  ;;  %2776 = vrot.lane.b32.xlu0 %v7945_v25, %s8906_s11  ;;  %v1763_v47 = vshll.u32 %v10223_v55, 16  ;;  %v1773_v50 = vshrl.u32 %v10229_v57, 16  ;;  %v10271_v25 = vpop.permute.xlu0 %3276 }
 0x152   : > { %v598_v26 = vor.u32 %v596_v6, %v595_v52  ;;  %v599_v38 = vrot.slane %v595_v52, 4  ;;  %v7977_v54 = vcombine.low %v10223_v55, %v10229_v57  ;;  %v3602_v2 = vsel %vm3590_vm8, %v3569_v30, %v10091_v43  ;;  %v8765_v55 = vld [vmem:[#allocation2 + $0x58] sm:$0xf]  ;;  %v10267_v6 = vld [vmem:[%s9108_s9 + $0x74] sm:$0xf]  ;;  %v10269_v42 = vpop.permute.xlu1 %3198 }
 0x153   : > { %v606_v29 = vor.u32 %v604_v13, %v603_v27  ;;  %v1762_v17 = vrot.slane %v1760_v60, 4  ;;  %2858 = vrot.lane.b32.xlu1 %v7962_v23, %s8905_s10  ;;  %v1765_v39 = vrot.slane %v1763_v47, 5  ;;  %v3600_v0 = vsel %vm3590_vm8, %v3567_v16, %v10066_v12 }
 0x154   : > { %v789_v31 = vsel %vm9124_vm10, %v598_v26, %v788_v46  ;;  %v608_v59 = vrot.slane %v603_v27, 4  ;;  %v1769_v18 = vshll.u32 %v10229_v57, 16  ;;  %v1775_v43 = vrot.slane %v1773_v50, 4 }
 0x155   : > { %v607_v35 = vsel %vm9138_vm12, %v599_v38, %v606_v29  ;;  %790 = vst [vmem:[#allocation2 + $0xa8] sm:$0xf] %v789_v31  ;;  %v1779_v21 = vshll.u32 %v1467_v11, 16  ;;  %2856 = vrot.lane.b32.xlu0 %v7961_v7, %s8905_s10  ;;  %v1766_v30 = vor.u32 %v1765_v39, %v1762_v17  ;;  %v3635_v12 = vsel %vm3623_vm2, %v3602_v2, %v10115_v37 }
 0x156   : > { %791 = vst.msk [vmem:[#allocation2 + $0xac] sm:$0xf] %vm224_vm0, %v607_v35  ;;  %v793_v63 = vsel %vm9154_vm13, %v608_v59, %v792_v58  ;;  %v3633_v9 = vsel %vm3623_vm2, %v3600_v0, %v10093_v33  ;;  %v1771_v24 = vrot.slane %v1769_v18, 5  ;;  %v7897_v16 = vrot.slane %v1867_v20, 9 }
 0x157   : > { %794 = vst [vmem:[#allocation2 + $0xb0] sm:$0x1] %v793_v63  ;;  %v1781_v41 = vrot.slane %v1779_v21, 5  ;;  %v2005_v49 = vrot.slane %v10229_v57, 5  ;;  %8542 = vmatprep.mubr.msk.bf16.mxu0 %vm13078_vm6, %v3633_v9  ;;  %v1767_v62 = vrot.slane %v1766_v30, 4  ;;  %v2008_v45 = vrot.slane %v1467_v11, 5 }
 0x158   : > { %8543 = vmatmul.mubr.msk.bf16.gmra.mxu0 %vm13078_vm6, %v3635_v12  ;;  %v7924_v37 = vcombine.low %v8764_v40, %v8765_v55  ;;  %v7923_v33 = vcombine.low %v8766_v10, %v8767_v28  ;;  %v1776_v23 = vor.u32 %v1775_v43, %v1771_v24  ;;  %v610_v52 = vshrl.u32 %v364_v56, 16  ;;  %v795_v12 = vld [vmem:[#allocation2 + $0xb4] sm:$0xf] }
 0x159   : > { %v2006_v57 = vsel %vm9110_vm7, %v7897_v16, %v2005_v49  ;;  %v2007_v48 = vrot.slane %v2005_v49, 4  ;;  %2952 = vrot.lane.b32.xlu0 %v7977_v54, %s8907_s12  ;;  %v1772_v7 = vsel %vm9130_vm11, %v1767_v62, %v1771_v24  ;;  %v613_v46 = vshll.u32 %v364_v56, 16  ;;  %v10296_v43 = vpop.permute.xlu1 %3278 }
 0x15a   : > { %v3400_v27 = vsel %vm3376_vm14, %v7924_v37, %v10147_v51  ;;  %v3397_v13 = vsel %vm3376_vm14, %v7923_v33, %v10117_v32  ;;  %v1777_v60 = vrot.slane %v1776_v23, 4  ;;  %v612_v38 = vrot.slane %v610_v52, 7 }
 0x15b   : > { %v2009_v26 = vsel %vm9110_vm7, %v2007_v48, %v2008_v45  ;;  %v618_v47 = vshrl.u32 %v10267_v6, 16  ;;  %v621_v17 = vshll.u32 %v10267_v6, 16  ;;  %v10288_v54 = vsel %vm3425_vm15, %v3400_v27, %v10168_v4  ;;  %v10298_v4 = vpop.permute.xlu0 %3356 }
 0x15c   : > { %v1449_v50 = vld [vmem:[#allocation2 + $0xa8] sm:$0xf]  ;;  %v8009_v29 = vcombine.low %v2006_v57, %v2009_v26  ;;  %v10292_v32 = vsel %vm3425_vm15, %v3397_v13, %v10149_v19  ;;  %v1782_v31 = vsel %vm9130_vm11, %v1777_v60, %v1781_v41  ;;  %v615_v41 = vor.u32 %v613_v46, %v612_v38 }
 0x15d   : > { %v1868_v11 = vld [vmem:[#allocation2 + $0xa8] sm:$0xe]  ;;  %v1450_v51 = vld [vmem:[#allocation2 + $0xac] sm:$0xf]  ;;  %v1784_v2 = vshrl.u32 %v1449_v50, 16  ;;  %v1787_v58 = vshll.u32 %v1449_v50, 16  ;;  %v7993_v18 = vcombine.low %v1772_v7, %v1782_v31  ;;  %v10312_v60 = vpop.permute.xlu1 %3358 }
 0x15e   : > { %v7898_v39 = vrot.slane %v1868_v11, 9  ;;  %v1797_v0 = vshrl.u32 %v1450_v51, 16  ;;  %v7978_v59 = vcombine.low %v1449_v50, %v1450_v51  ;;  %v1468_v20 = vld [vmem:[#allocation2 + $0xb0] sm:$0x1]  ;;  %v1793_v35 = vshll.u32 %v1450_v51, 16 }
 0x15f   : > { %v1786_v21 = vrot.slane %v1784_v2, 4  ;;  %v1789_v63 = vrot.slane %v1787_v58, 5  ;;  %v1803_v19 = vshll.u32 %v1468_v20, 16  ;;  %v2012_v30 = vrot.slane %v1450_v51, 5  ;;  %3032 = vrot.lane.b32.xlu0 %v7993_v18, %s8911_s16  ;;  %v2056_v16 = vld [vmem:[#allocation2 + $0xa8] sm:$0xf] }
 0x160   : > { %2954 = vrot.lane.b32.xlu1 %v7978_v59, %s8907_s12  ;;  %v1795_v9 = vrot.slane %v1793_v35, 5  ;;  %v1799_v56 = vrot.slane %v1797_v0, 4  ;;  %v2015_v24 = vrot.slane %v1468_v20, 5  ;;  %v2057_v55 = vld [vmem:[#allocation2 + $0xac] sm:$0xf]  ;;  %v616_v10 = vrot.slane %v612_v38, 4 }
 0x161   : > { %v1790_v49 = vor.u32 %v1789_v63, %v1786_v21  ;;  %v1805_v62 = vrot.slane %v1803_v19, 5  ;;  %v10304_v45 = vsel %vm9110_vm7, %v7898_v39, %v2012_v30  ;;  %v2014_v40 = vrot.slane %v2012_v30, 4  ;;  %v2076_v46 = vld [vmem:[#allocation2 + $0xb0] sm:$0x1]  ;;  %v10314_v26 = vpop.permute.xlu0 %2768  ;;  %v799_v51 = vld [vmem:[#allocation2 + $0xbc] sm:$0x1] }
 0x162   : > { %v1800_v37 = vor.u32 %v1799_v56, %v1795_v9  ;;  %v620_v28 = vrot.slane %v618_v47, 7  ;;  %v796_v33 = vsel %vm9124_vm10, %v615_v41, %v795_v12  ;;  %v2369_v57 = vshrl.u32 %v2056_v16, 16  ;;  %v2476_v31 = vld [vmem:[#allocation2 + $0xa8] sm:$0xe] }
 0x163   : > { %v1791_v6 = vrot.slane %v1790_v49, 4  ;;  %v2016_v23 = vsel %vm9110_vm7, %v2014_v40, %v2015_v24  ;;  %797 = vst [vmem:[#allocation2 + $0xb4] sm:$0xf] %v796_v33  ;;  %v2372_v48 = vshll.u32 %v2056_v16, 16  ;;  %3112 = vrot.lane.b32.xlu0 %v8009_v29, %s8909_s14  ;;  %v2382_v13 = vshrl.u32 %v2057_v55, 16 }
 0x164   : > { %v1801_v52 = vrot.slane %v1800_v37, 4  ;;  %v8010_v7 = vcombine.low %v10304_v45, %v2016_v23  ;;  %v623_v27 = vor.u32 %v621_v17, %v620_v28  ;;  %v2371_v47 = vrot.slane %v2369_v57, 4  ;;  %v10333_v56 = vld [vmem:[#allocation2 + $0xa8] sm:$0xf] }
 0x165   : > { %v1796_v38 = vsel %vm9130_vm11, %v1791_v6, %v1795_v9  ;;  %v2374_v50 = vrot.slane %v2372_v48, 5  ;;  %v8025_v11 = vcombine.low %v2056_v16, %v2057_v55  ;;  %v625_v17 = vrot.slane %v620_v28, 4 }
 0x166   : > { %v1806_v2 = vsel %vm9130_vm11, %v1801_v52, %v1805_v62  ;;  %v624_v29 = vsel %vm9138_vm12, %v616_v10, %v623_v27  ;;  %v2378_v58 = vshll.u32 %v2057_v55, 16  ;;  %v2384_v59 = vrot.slane %v2382_v13, 4 }
 0x167   : > { %v7994_v39 = vcombine.low %v1796_v38, %v1806_v2  ;;  %798 = vst.msk [vmem:[#allocation2 + $0xb8] sm:$0xf] %vm224_vm0, %v624_v29  ;;  %v2375_v0 = vor.u32 %v2374_v50, %v2371_v47  ;;  %v2388_v20 = vshll.u32 %v2076_v46, 16  ;;  %3208 = vrot.lane.b32.xlu0 %v8025_v11, %s8908_s13  ;;  %v800_v35 = vsel %vm9154_vm13, %v625_v17, %v799_v51 }
 0x168   : > { %v2380_v18 = vrot.slane %v2378_v58, 5  ;;  %v3474_v21 = vsel %vm3458_vm1, %v10288_v54, %v10188_v61  ;;  %v3472_v63 = vsel %vm3458_vm1, %v10292_v32, %v10170_v8  ;;  %801 = vst [vmem:[#allocation2 + $0xbc] sm:$0x1] %v800_v35  ;;  %v7913_v12 = vrot.slane %v2476_v31, 9  ;;  %v10343_v54 = vpop.permute.xlu1 %2770  ;;  %v10345_v32 = vpop.permute.xlu0 %2848 }
 0x169   : > { %3034 = vrot.lane.b32.xlu1 %v7994_v39, %s8911_s16  ;;  %v2376_v19 = vrot.slane %v2375_v0, 4  ;;  %v2390_v30 = vrot.slane %v2388_v20, 5  ;;  %v2614_v9 = vrot.slane %v2057_v55, 5  ;;  %v2617_v49 = vrot.slane %v2076_v46, 5 }
 0x16a   : > { %v2058_v24 = vld [vmem:[#allocation2 + $0xb4] sm:$0xf]  ;;  %v2385_v41 = vor.u32 %v2384_v59, %v2380_v18  ;;  %v10337_v61 = vsel %vm3491_vm3, %v3474_v21, %v10211_v15  ;;  %v10341_v8 = vsel %vm3491_vm3, %v3472_v63, %v10190_v3  ;;  %v1197_v57 = vshrl.u32 %v10333_v56, 16 }
 0x16b   : > { %v2477_v16 = vld [vmem:[#allocation2 + $0xb4] sm:$0xe]  ;;  %v2393_v62 = vshrl.u32 %v2058_v24, 16  ;;  %v2396_v45 = vshll.u32 %v2058_v24, 16  ;;  %v2381_v40 = vsel %vm9130_vm11, %v2376_v19, %v2380_v18  ;;  %v2615_v15 = vsel %vm9110_vm7, %v7913_v12, %v2614_v9 }
 0x16c   : > { %v7914_v55 = vrot.slane %v2477_v16, 9  ;;  %v10349_v37 = vld [vmem:[#allocation2 + $0xb4] sm:$0xf]  ;;  %v2386_v10 = vrot.slane %v2385_v41, 4  ;;  %v2616_v28 = vrot.slane %v2614_v9, 4  ;;  %v1200_v46 = vshll.u32 %v10333_v56, 16  ;;  %v10364_v31 = vpop.permute.xlu1 %2850  ;;  %v10366_v39 = vpop.permute.xlu0 %2944 }
 0x16d   : > { %v1221_v3 = vshrl.u32 %v10349_v37, 16  ;;  %3114 = vrot.lane.b32.xlu1 %v8010_v7, %s8909_s14  ;;  %v2395_v33 = vrot.slane %v2393_v62, 4  ;;  %v2398_v6 = vrot.slane %v2396_v45, 5  ;;  %v1224_v23 = vshll.u32 %v10349_v37, 16  ;;  %v10377_v16 = vld [vmem:[#allocation2 + $0xac] sm:$0xf] }
 0x16e   : > { %v2059_v48 = vld [vmem:[#allocation2 + $0xb8] sm:$0xf]  ;;  %v2391_v52 = vsel %vm9130_vm11, %v2386_v10, %v2390_v30  ;;  %v2618_v27 = vsel %vm9110_vm7, %v2616_v28, %v2617_v49 }
 0x16f   : > { %v1223_v13 = vrot.slane %v1221_v3, 4  ;;  %v2406_v38 = vshrl.u32 %v2059_v48, 16  ;;  %v8026_v47 = vcombine.low %v2058_v24, %v2059_v48  ;;  %v2399_v50 = vor.u32 %v2398_v6, %v2395_v33  ;;  %v2077_v11 = vld [vmem:[#allocation2 + $0xbc] sm:$0x1]  ;;  %v10362_v17 = vld [vmem:[#allocation2 + $0xb8] sm:$0xf] }
 0x170   : > { %v2402_v7 = vshll.u32 %v2059_v48, 16  ;;  %v8041_v51 = vcombine.low %v2381_v40, %v2391_v52  ;;  %v2621_v2 = vrot.slane %v2059_v48, 5  ;;  %v8057_v29 = vcombine.low %v2615_v15, %v2618_v27  ;;  %v10369_v18 = vld [vmem:[#allocation2 + $0xbc] sm:$0x1]  ;;  %v10385_v52 = vpop.permute.xlu1 %2946  ;;  %v10387_v27 = vpop.permute.xlu0 %3024 }
 0x171   : > { %v1226_v58 = vrot.slane %v1224_v23, 5  ;;  %3210 = vrot.lane.b32.xlu1 %v8026_v47, %s8908_s13  ;;  %v2400_v0 = vrot.slane %v2399_v50, 4  ;;  %v2408_v20 = vrot.slane %v2406_v38, 4  ;;  %v2412_v35 = vshll.u32 %v2077_v11, 16  ;;  %v1259_v50 = vld [vmem:[#allocation2 + $0xb4] sm:$0xe] }
 0x172   : > { %v2404_v59 = vrot.slane %v2402_v7, 5  ;;  %3288 = vrot.lane.b32.xlu0 %v8041_v51, %s8912_s17  ;;  %v2622_v21 = vsel %vm9110_vm7, %v7914_v55, %v2621_v2  ;;  %v2623_v63 = vrot.slane %v2621_v2, 4  ;;  %v2624_v19 = vrot.slane %v2077_v11, 5  ;;  %v855_v55 = vld [vmem:[#allocation2 + $0xb0] sm:$0x1] }
 0x173   : > { %v1227_v30 = vor.u32 %v1226_v58, %v1223_v13  ;;  %v2414_v24 = vrot.slane %v2412_v35, 5  ;;  %v1230_v41 = vshll.u32 %v10362_v17, 16  ;;  %v1234_v45 = vshrl.u32 %v10362_v17, 16  ;;  %v1258_v2 = vld [vmem:[#allocation2 + $0xa8] sm:$0xe] }
 0x174   : > { %v2405_v12 = vsel %vm9130_vm11, %v2400_v0, %v2404_v59  ;;  %v2409_v9 = vor.u32 %v2408_v20, %v2404_v59  ;;  %v2625_v49 = vsel %vm9110_vm7, %v2623_v63, %v2624_v19  ;;  %v1240_v40 = vshll.u32 %v10369_v18, 16 }
 0x175   : > { %v1228_v62 = vrot.slane %v1227_v30, 4  ;;  %v8058_v15 = vcombine.low %v2622_v21, %v2625_v49  ;;  %v1232_v28 = vrot.slane %v1230_v41, 5  ;;  %v1199_v3 = vrot.slane %v1197_v57, 4  ;;  %v10413_v49 = vpop.permute.xlu0 %3104 }
 0x176   : > { %v2410_v10 = vrot.slane %v2409_v9, 4  ;;  %3368 = vrot.lane.b32.xlu0 %v8057_v29, %s8910_s15  ;;  %v1236_v33 = vrot.slane %v1234_v45, 4  ;;  %v1242_v6 = vrot.slane %v1240_v40, 5  ;;  %v1202_v23 = vrot.slane %v1200_v46, 5 }
 0x177   : > { %v1206_v48 = vshll.u32 %v10377_v16, 16  ;;  %v1233_v38 = vsel %vm9130_vm11, %v1228_v62, %v1232_v28  ;;  %v1210_v47 = vshrl.u32 %v10377_v16, 16  ;;  %v1216_v57 = vshll.u32 %v855_v55, 16 }
 0x178   : > { %v2415_v13 = vsel %vm9130_vm11, %v2410_v10, %v2414_v24  ;;  %v1237_v11 = vor.u32 %v1236_v33, %v1232_v28  ;;  %v1203_v51 = vor.u32 %v1202_v23, %v1199_v3  ;;  %v3540_v0 = vsel %vm3524_vm4, %v10337_v61, %v10238_v53  ;;  %v366_v24 = vld [vmem:[%s9108_s9 + $0x78] sm:$0xf]  ;;  %v367_v10 = vld [vmem:[%s9108_s9 + $0x7c] sm:$0xf]  ;;  %v10425_v23 = vld [vmem:[#allocation2 + $0xb4] sm:$0xf] }
 0x179   : > { %v8042_v7 = vcombine.low %v2405_v12, %v2415_v13  ;;  %v1208_v46 = vrot.slane %v1206_v48, 5  ;;  %v1212_v29 = vrot.slane %v1210_v47, 4  ;;  %v1218_v58 = vrot.slane %v1216_v57, 5  ;;  %v10429_v57 = vld [vmem:[#allocation2 + $0xb8] sm:$0xf] }
 0x17a   : > { %v3538_v59 = vsel %vm3524_vm4, %v10341_v8, %v10213_v22  ;;  %v1238_v20 = vrot.slane %v1237_v11, 4  ;;  %v1204_v35 = vrot.slane %v1203_v51, 4  ;;  %v7884_v21 = vrot.slane %v1259_v50, 9  ;;  %v10411_v41 = vpop.permute.xlu1 %3026 }
 0x17b   : > { %3290 = vrot.lane.b32.xlu1 %v8042_v7, %s8912_s17  ;;  %v1418_v63 = vrot.slane %v10362_v17, 5  ;;  %v1213_v19 = vor.u32 %v1212_v29, %v1208_v46  ;;  %v1421_v30 = vrot.slane %v10369_v18, 5  ;;  %v7883_v12 = vrot.slane %v1258_v2, 9  ;;  %v802_v2 = vld [vmem:[#allocation2 + $0xc0] sm:$0xf] }
 0x17c   : > { %v1411_v9 = vrot.slane %v10377_v16, 5  ;;  %v1243_v53 = vsel %vm9130_vm11, %v1238_v20, %v1242_v6  ;;  %v1209_v22 = vsel %vm9130_vm11, %v1204_v35, %v1208_v46  ;;  %v1414_v3 = vrot.slane %v855_v55, 5  ;;  %v10444_v35 = vpop.permute.xlu0 %3200 }
 0x17d   : > { %v1419_v61 = vsel %vm9110_vm7, %v7884_v21, %v1418_v63  ;;  %v1420_v8 = vrot.slane %v1418_v63, 4  ;;  %v7948_v62 = vcombine.low %v1233_v38, %v1243_v53  ;;  %v1214_v18 = vrot.slane %v1213_v19, 4 }
 0x17e   : > { %v1412_v45 = vsel %vm9110_vm7, %v7883_v12, %v1411_v9  ;;  %v1413_v40 = vrot.slane %v1411_v9, 4  ;;  %v3573_v33 = vsel %vm3557_vm5, %v3540_v0, %v10269_v42  ;;  %v3571_v6 = vsel %vm3557_vm5, %v3538_v59, %v10240_v14  ;;  %v1469_v59 = vld [vmem:[#allocation2 + $0xbc] sm:$0x1]  ;;  %v10442_v20 = vpop.permute.xlu1 %3106  ;;  %v806_v12 = vld [vmem:[#allocation2 + $0xc8] sm:$0x1] }
 0x17f   : > { %3370 = vrot.lane.b32.xlu1 %v8058_v15, %s8910_s15  ;;  %v1422_v28 = vsel %vm9110_vm7, %v1420_v8, %v1421_v30  ;;  %v1219_v48 = vsel %vm9130_vm11, %v1214_v18, %v1218_v58  ;;  %v627_v38 = vshrl.u32 %v366_v24, 16  ;;  %v630_v47 = vshll.u32 %v366_v24, 16  ;;  %v1869_v8 = vld [vmem:[#allocation2 + $0xb4] sm:$0xe] }
 0x180   : > { %v7964_v13 = vcombine.low %v1419_v61, %v1422_v28  ;;  %v7947_v15 = vcombine.low %v1209_v22, %v1219_v48  ;;  %v1415_v55 = vsel %vm9110_vm7, %v1413_v40, %v1414_v3  ;;  %v635_v50 = vshrl.u32 %v367_v10, 16 }
 0x181   : > { %v638_v7 = vshll.u32 %v367_v10, 16  ;;  %v7963_v42 = vcombine.low %v1412_v45, %v1415_v55  ;;  %v629_v11 = vrot.slane %v627_v38, 7  ;;  %v1808_v14 = vshrl.u32 %v10425_v23, 16  ;;  %v8769_v38 = vld [vmem:[#allocation2 + $0x70] sm:$0xf] }
 0x182   : > { %v1811_v51 = vshll.u32 %v10425_v23, 16  ;;  %2780 = vrot.lane.b32.xlu0 %v7947_v15, %s8906_s11  ;;  %v637_v46 = vrot.slane %v635_v50, 7  ;;  %v1821_v29 = vshrl.u32 %v10429_v57, 16  ;;  %v7979_v58 = vcombine.low %v10425_v23, %v10429_v57  ;;  %v8770_v55 = vld [vmem:[#allocation2 + $0x60] sm:$0xf] }
 0x183   : > { %2782 = vrot.lane.b32.xlu1 %v7948_v62, %s8906_s11  ;;  %v3606_v0 = vsel %vm3590_vm8, %v3573_v33, %v10296_v43  ;;  %v632_v21 = vor.u32 %v630_v47, %v629_v11  ;;  %v633_v63 = vrot.slane %v629_v11, 4  ;;  %v1810_v19 = vrot.slane %v1808_v14, 4  ;;  %v10466_v47 = vpop.permute.xlu1 %3202  ;;  %v10468_v15 = vpop.permute.xlu0 %3280  ;;  %v8771_v50 = vld [vmem:[#allocation2 + $0x64] sm:$0xf] }
 0x184   : > { %v1813_v30 = vrot.slane %v1811_v51, 5  ;;  %v640_v9 = vor.u32 %v638_v7, %v637_v46  ;;  %v3604_v53 = vsel %vm3590_vm8, %v3571_v6, %v10271_v25  ;;  %v642_v22 = vrot.slane %v637_v46, 4  ;;  %v10476_v51 = vld [vmem:[#allocation2 + $0xd0] sm:$0xf] }
 0x185   : > { %v1817_v61 = vshll.u32 %v10429_v57, 16  ;;  %v803_v43 = vsel %vm9124_vm10, %v632_v21, %v802_v2  ;;  %v1823_v62 = vrot.slane %v1821_v29, 4  ;;  %v1827_v18 = vshll.u32 %v1469_v59, 16 }
 0x186   : > { %v1814_v24 = vor.u32 %v1813_v30, %v1810_v19  ;;  %2860 = vrot.lane.b32.xlu0 %v7963_v42, %s8905_s10  ;;  %v641_v45 = vsel %vm9138_vm12, %v633_v63, %v640_v9  ;;  %804 = vst [vmem:[#allocation2 + $0xc0] sm:$0xf] %v803_v43  ;;  %v807_v25 = vsel %vm9154_vm13, %v642_v22, %v806_v12  ;;  %v7899_v6 = vrot.slane %v1869_v8, 9 }
 0x187   : > { %2862 = vrot.lane.b32.xlu1 %v7964_v13, %s8905_s10  ;;  %v1819_v40 = vrot.slane %v1817_v61, 5  ;;  %v3639_v10 = vsel %vm3623_vm2, %v3606_v0, %v10312_v60  ;;  %805 = vst.msk [vmem:[#allocation2 + $0xc4] sm:$0xf] %vm224_vm0, %v641_v45  ;;  %808 = vst [vmem:[#allocation2 + $0xc8] sm:$0x1] %v807_v25  ;;  %v1829_v3 = vrot.slane %v1827_v18, 5  ;;  %v3637_v33 = vsel %vm3623_vm2, %v3604_v53, %v10298_v4 }
 0x188   : > { %v1815_v28 = vrot.slane %v1814_v24, 4  ;;  %v2019_v48 = vrot.slane %v10429_v57, 5  ;;  %v2022_v5 = vrot.slane %v1469_v59, 5  ;;  %8546 = vmatprep.mubr.msk.bf16.mxu0 %vm13078_vm6, %v3637_v33  ;;  %v8768_v13 = vld [vmem:[#allocation2 + $0x6c] sm:$0xf]  ;;  %v7925_v7 = vcombine.low %v8770_v55, %v8771_v50 }
 0x189   : > { %v1824_v23 = vor.u32 %v1823_v62, %v1819_v40  ;;  %v7926_v60 = vcombine.low %v8768_v13, %v8769_v38  ;;  %8547 = vmatmul.mubr.msk.bf16.gmra.mxu0 %vm13078_vm6, %v3639_v10  ;;  %v2441_v4 = vshrl.u32 %v10459_v34, 16  ;;  %v2444_v42 = vshll.u32 %v10459_v34, 16  ;;  %v10493_v24 = vpop.permute.xlu1 %3282 }
 0x18a   : > { %2956 = vrot.lane.b32.xlu0 %v7979_v58, %s8907_s12  ;;  %v1820_v57 = vsel %vm9130_vm11, %v1815_v28, %v1819_v40  ;;  %v2021_v14 = vrot.slane %v2019_v48, 4  ;;  %v2020_v46 = vsel %vm9110_vm7, %v7899_v6, %v2019_v48  ;;  %v3403_v58 = vsel %vm3376_vm14, %v7925_v7, %v10314_v26  ;;  %v10495_v26 = vpop.permute.xlu0 %3360 }
 0x18b   : > { %v1825_v11 = vrot.slane %v1824_v23, 4  ;;  %v3406_v2 = vsel %vm3376_vm14, %v7926_v60, %v10343_v54  ;;  %v2443_v59 = vrot.slane %v2441_v4, 4  ;;  %v2446_v30 = vrot.slane %v2444_v42, 5 }
 0x18c   : > { %v2023_v0 = vsel %vm9110_vm7, %v2021_v14, %v2022_v5  ;;  %v2454_v12 = vshrl.u32 %v10476_v51, 16  ;;  %v8028_v9 = vcombine.low %v10459_v34, %v10476_v51  ;;  %v3445_v43 = vsel %vm3425_vm15, %v3406_v2, %v10364_v31 }
 0x18d   : > { %v1830_v29 = vsel %vm9130_vm11, %v1825_v11, %v1829_v3  ;;  %v1453_v21 = vld [vmem:[#allocation2 + $0xc0] sm:$0xf]  ;;  %v8011_v8 = vcombine.low %v2020_v46, %v2023_v0  ;;  %v3443_v5 = vsel %vm3425_vm15, %v3403_v58, %v10345_v32  ;;  %v2447_v32 = vor.u32 %v2446_v30, %v2443_v59  ;;  %v10510_v2 = vpop.permute.xlu1 %3362 }
 0x18e   : > { %v7995_v63 = vcombine.low %v1820_v57, %v1830_v29  ;;  %v1870_v19 = vld [vmem:[#allocation2 + $0xc0] sm:$0xe]  ;;  %v1454_v54 = vld [vmem:[#allocation2 + $0xc4] sm:$0xf]  ;;  %v1832_v53 = vshrl.u32 %v1453_v21, 16  ;;  %v1835_v22 = vshll.u32 %v1453_v21, 16 }
 0x18f   : > { %v1470_v61 = vld [vmem:[#allocation2 + $0xc8] sm:$0x1]  ;;  %v1845_v62 = vshrl.u32 %v1454_v54, 16  ;;  %v7980_v18 = vcombine.low %v1453_v21, %v1454_v54  ;;  %v1841_v45 = vshll.u32 %v1454_v54, 16  ;;  %v2060_v40 = vld [vmem:[#allocation2 + $0xc0] sm:$0xf] }
 0x190   : > { %v1851_v25 = vshll.u32 %v1470_v61, 16  ;;  %3036 = vrot.lane.b32.xlu0 %v7995_v63, %s8911_s16  ;;  %v1834_v10 = vrot.slane %v1832_v53, 4  ;;  %v1837_v28 = vrot.slane %v1835_v22, 5  ;;  %v7900_v3 = vrot.slane %v1870_v19, 9  ;;  %v10498_v6 = vld [vmem:[#allocation2 + $0xc4] sm:$0xf] }
 0x191   : > { %v2026_v33 = vrot.slane %v1454_v54, 5  ;;  %2958 = vrot.lane.b32.xlu1 %v7980_v18, %s8907_s12  ;;  %v1843_v31 = vrot.slane %v1841_v45, 5  ;;  %v1847_v23 = vrot.slane %v1845_v62, 4  ;;  %v2029_v48 = vrot.slane %v1470_v61, 5  ;;  %v10506_v57 = vld [vmem:[#allocation2 + $0xd4] sm:$0x1] }
 0x192   : > { %v1838_v13 = vor.u32 %v1837_v28, %v1834_v10  ;;  %v1853_v38 = vrot.slane %v1851_v25, 5  ;;  %v2417_v55 = vshrl.u32 %v2060_v40, 16  ;;  %v2420_v7 = vshll.u32 %v2060_v40, 16  ;;  %v2078_v19 = vld [vmem:[#allocation2 + $0xc8] sm:$0x1]  ;;  %s8914_s12 = smov 96  }
 0x193   : > { %v2028_v60 = vrot.slane %v2026_v33, 4  ;;  %v1848_v50 = vor.u32 %v1847_v23, %v1843_v31  ;;  %v2430_v4 = vshrl.u32 %v10498_v6, 16  ;;  %v8027_v42 = vcombine.low %v2060_v40, %v10498_v6  ;;  %v10512_v29 = vpop.permute.xlu0 %2772  ;;  %v2478_v10 = vld [vmem:[#allocation2 + $0xc0] sm:$0xe] }
 0x194   : > { %3116 = vrot.lane.b32.xlu0 %v8011_v8, %s8909_s14  ;;  %v1839_v11 = vrot.slane %v1838_v13, 4  ;;  %v2027_v14 = vsel %vm9110_vm7, %v7900_v3, %v2026_v33  ;;  %v2419_v46 = vrot.slane %v2417_v55, 4  ;;  %v2422_v21 = vrot.slane %v2420_v7, 5  ;;  %v10530_v55 = vpop.permute.xlu1 %2774 }
 0x195   : > { %v1849_v0 = vrot.slane %v1848_v50, 4  ;;  %v2030_v58 = vsel %vm9110_vm7, %v2028_v60, %v2029_v48  ;;  %v2450_v63 = vshll.u32 %v10476_v51, 16  ;;  %v2456_v53 = vrot.slane %v2454_v12, 4 }
 0x196   : > { %v1844_v54 = vsel %vm9130_vm11, %v1839_v11, %v1843_v31  ;;  %v2460_v22 = vshll.u32 %v10506_v57, 16  ;;  %v2426_v59 = vshll.u32 %v10498_v6, 16  ;;  %v2423_v8 = vor.u32 %v2422_v21, %v2419_v46 }
 0x197   : > { %v1854_v30 = vsel %vm9130_vm11, %v1849_v0, %v1853_v38  ;;  %v2452_v61 = vrot.slane %v2450_v63, 5  ;;  %v2432_v62 = vrot.slane %v2430_v4, 4  ;;  %v2448_v45 = vrot.slane %v2447_v32, 4  ;;  %v10524_v28 = vpop.permute.xlu0 %2852  ;;  %v2479_v38 = vld [vmem:[#allocation2 + $0xcc] sm:$0xe] }
 0x198   : > { %3212 = vrot.lane.b32.xlu0 %v8027_v42, %s8908_s13  ;;  %v7996_v18 = vcombine.low %v1844_v54, %v1854_v30  ;;  %v2428_v25 = vrot.slane %v2426_v59, 5  ;;  %v2436_v40 = vshll.u32 %v2078_v19, 16  ;;  %v8012_v12 = vcombine.low %v2027_v14, %v2030_v58  ;;  %v10561_v30 = vpop.permute.xlu1 %2854 }
 0x199   : > { %v2457_v3 = vor.u32 %v2456_v53, %v2452_v61  ;;  %v2424_v33 = vrot.slane %v2423_v8, 4  ;;  %v3478_v31 = vsel %vm3458_vm1, %v3445_v43, %v10385_v52  ;;  %v2462_v23 = vrot.slane %v2460_v22, 5 }
 0x19a   : > { %3038 = vrot.lane.b32.xlu1 %v7996_v18, %s8911_s16  ;;  %v2433_v48 = vor.u32 %v2432_v62, %v2428_v25  ;;  %v2438_v13 = vrot.slane %v2436_v40, 5  ;;  %v2635_v60 = vrot.slane %v10476_v51, 5  ;;  %v3476_v7 = vsel %vm3458_vm1, %v3443_v5, %v10366_v39  ;;  %v8772_v18 = vld [vmem:[#allocation2 + $0x78] sm:$0xf]  ;;  %s8915_s16 = smov [#allocation4]  }
 0x19b   : > { %v2458_v50 = vrot.slane %v2457_v3, 4  ;;  %v7915_v4 = vrot.slane %v2478_v10, 9  ;;  %v2628_v42 = vrot.slane %v10498_v6, 5  ;;  %v2453_v52 = vsel %vm9130_vm11, %v2448_v45, %v2452_v61  ;;  %v10539_v46 = vpop.permute.xlu0 %2948  ;;  %v8773_v45 = vld [vmem:[#allocation2 + $0x7c] sm:$0xf] }
 0x19c   : > { %v2429_v43 = vsel %vm9130_vm11, %v2424_v33, %v2428_v25  ;;  %v2434_v11 = vrot.slane %v2433_v48, 4  ;;  %v2631_v14 = vrot.slane %v2078_v19, 5  ;;  %v7916_v32 = vrot.slane %v2479_v38, 9 }
 0x19d   : > { %v2637_v0 = vrot.slane %v2635_v60, 4  ;;  %v2638_v58 = vrot.slane %v10506_v57, 5  ;;  %v2630_v21 = vrot.slane %v2628_v42, 4  ;;  %v2463_v39 = vsel %vm9130_vm11, %v2458_v50, %v2462_v23 }
 0x19e   : > { %3118 = vrot.lane.b32.xlu1 %v8012_v12, %s8909_s14  ;;  %v2439_v6 = vsel %vm9130_vm11, %v2434_v11, %v2438_v13  ;;  %v2629_v5 = vsel %vm9110_vm7, %v7915_v4, %v2628_v42  ;;  %v3511_v63 = vsel %vm3491_vm3, %v3478_v31, %v10411_v41  ;;  %v3509_v57 = vsel %vm3491_vm3, %v3476_v7, %v10387_v27 }
 0x19f   : > { %v8043_v19 = vcombine.low %v2429_v43, %v2439_v6  ;;  %v2632_v54 = vsel %vm9110_vm7, %v2630_v21, %v2631_v14  ;;  %v3544_v53 = vsel %vm3524_vm4, %v3511_v63, %v10442_v20  ;;  %v3542_v22 = vsel %vm3524_vm4, %v3509_v57, %v10413_v49  ;;  %v8774_v63 = vld [vmem:[#allocation2 + $0x84] sm:$0xf] }
 0x1a0   : > { %v3577_v59 = vsel %vm3557_vm5, %v3544_v53, %v10466_v47  ;;  %v8059_v41 = vcombine.low %v2629_v5, %v2632_v54  ;;  %v3575_v61 = vsel %vm3557_vm5, %v3542_v22, %v10444_v35  ;;  %v8044_v49 = vcombine.low %v2453_v52, %v2463_v39 }
 0x1a1   : > { %3292 = vrot.lane.b32.xlu0 %v8043_v19, %s8912_s17  ;;  %v3610_v27 = vsel %vm3590_vm8, %v3577_v59, %v10493_v24  ;;  %v3608_v20 = vsel %vm3590_vm8, %v3575_v61, %v10468_v15  ;;  %v10576_v8 = vpop.permute.xlu0 %3028  ;;  %v10580_v35 = vsel %vm9110_vm7, %v7916_v32, %v2635_v60  ;;  %v10584_v24 = vsel %vm9110_vm7, %v2637_v0, %v2638_v58  ;;  %v8775_v19 = vld [vmem:[#allocation2 + $0x88] sm:$0xf] }
 0x1a2   : > { %3214 = vrot.lane.b32.xlu1 %v8028_v9, %s8908_s13  ;;  %v3643_v47 = vsel %vm3623_vm2, %v3610_v27, %v10510_v2  ;;  %v3641_v34 = vsel %vm3623_vm2, %v3608_v20, %v10495_v26  ;;  %v7932_v51 = vcombine.low %v10349_v37, %v10362_v17  ;;  %v7931_v15 = vcombine.low %v10333_v56, %v10377_v16  ;;  %v10670_v2 = vpop.permute.xlu1 %2950  ;;  %s13020_s13 = scalar_lea.hbm %s13074_s5, %s8378_s6 }
 0x1a3   : > { %8550 = vmatprep.mubr.msk.bf16.mxu0 %vm13078_vm6, %v3641_v34  ;;  %vm280_vm0 = vcmask 257024   ;;  %v13120_v9 = vmov 0   ;;  %vm283_vm10 = vcmask 253952   ;;  %v8060_v26 = vcombine.low %v10580_v35, %v10584_v24 }
 0x1a4   : > { %8551 = vmatmul.mubr.msk.bf16.gmra.mxu0 %vm13078_vm6, %v3643_v47  ;;  %288 = vst.msk [vmem:[#allocation3 + $0x18] sm:$0xf] %vm280_vm0, %v13120_v9  ;;  %281 = vst.msk [vmem:[#allocation3] sm:$0xf] %vm280_vm0, %v13120_v9  ;;  %v7927_v25 = vcombine.low %v8772_v18, %v8773_v45  ;;  %v7928_v54 = vcombine.low %v8774_v63, %v8775_v19 }
 0x1a5   : > { %3372 = vrot.lane.b32.xlu0 %v8059_v41, %s8910_s15  ;;  %282 = vst.msk [vmem:[#allocation3 + $0x4] sm:$0xf] %vm280_vm0, %v13120_v9  ;;  %285 = vst.msk [vmem:[#allocation3 + $0xc] sm:$0xf] %vm280_vm0, %v13120_v9  ;;  %v3109_v62 = vpop.permute.xlu0 %3108 }
 0x1a6   : > { %286 = vst.msk [vmem:[#allocation3 + $0x10] sm:$0xf] %vm280_vm0, %v13120_v9  ;;  %289 = vst.msk [vmem:[#allocation3 + $0x1c] sm:$0xf] %vm280_vm0, %v13120_v9  ;;  %3294 = vrot.lane.b32.xlu1 %v8044_v49, %s8912_s17  ;;  %v3409_v12 = vsel %vm3376_vm14, %v7927_v25, %v10512_v29  ;;  %v3412_v35 = vsel %vm3376_vm14, %v7928_v54, %v10530_v55  ;;  %s8846_s17 = sshll.u32 %s8915_s16, 4  ;;  %s8847_s17 = int_to_ptr.vmem [resolvable:$false] %s8846_s17 }
 0x1a7   : > { %291 = vst.msk [vmem:[#allocation3 + $0x24] sm:$0xf] %vm280_vm0, %v13120_v9  ;;  %292 = vst.msk [vmem:[#allocation3 + $0x28] sm:$0xf] %vm280_vm0, %v13120_v9  ;;  %v3447_v60 = vsel %vm3425_vm15, %v3409_v12, %v10524_v28  ;;  %v3449_v34 = vsel %vm3425_vm15, %v3412_v35, %v10561_v30  ;;  %s8848_s23 = scalar_lea.vmem %s8847_s17, 8192 }
 0x1a8   : > { %294 = vst.msk [vmem:[#allocation3 + $0x30] sm:$0xf] %vm280_vm0, %v13120_v9  ;;  %295 = vst.msk [vmem:[#allocation3 + $0x34] sm:$0xf] %vm280_vm0, %v13120_v9  ;;  %v3480_v14 = vsel %vm3458_vm1, %v3447_v60, %v10539_v46 }
 0x1a9   : > { %297 = vst.msk [vmem:[#allocation3 + $0x3c] sm:$0xf] %vm280_vm0, %v13120_v9  ;;  %298 = vst.msk [vmem:[#allocation3 + $0x40] sm:$0xf] %vm280_vm0, %v13120_v9  ;;  %v3205_v3 = vpop.permute.xlu0 %3204  ;;  %v3513_v28 = vsel %vm3491_vm3, %v3480_v14, %v10576_v8 }
 0x1aa   : > { %300 = vst.msk [vmem:[#allocation3 + $0x48] sm:$0xf] %vm280_vm0, %v13120_v9  ;;  %301 = vst.msk [vmem:[#allocation3 + $0x4c] sm:$0xf] %vm280_vm0, %v13120_v9  ;;  %3374 = vrot.lane.b32.xlu1 %v8060_v26, %s8910_s15  ;;  %v3546_v57 = vsel %vm3524_vm4, %v3513_v28, %v3109_v62  ;;  %v3482_v26 = vsel %vm3458_vm1, %v3449_v34, %v10670_v2  ;;  %v10758_v2 = vld [vmem:[%s13071_s2] ss:$0 sm:$0xff] }
 0x1ab   : > { %303 = vst.msk [vmem:[#allocation3 + $0x54] sm:$0xf] %vm280_vm0, %v13120_v9  ;;  %304 = vst.msk [vmem:[#allocation3 + $0x58] sm:$0xf] %vm280_vm0, %v13120_v9  ;;  %v10709_v10 = vld [vmem:[#allocation3] sm:$0xf]  ;;  %v3579_v46 = vsel %vm3557_vm5, %v3546_v57, %v3205_v3 }
 0x1ac   : > { %306 = vst.msk [vmem:[#allocation3 + $0x60] sm:$0xf] %vm280_vm0, %v13120_v9  ;;  %307 = vst.msk [vmem:[#allocation3 + $0x64] sm:$0xf] %vm280_vm0, %v13120_v9  ;;  %v3031_v40 = vpop.permute.xlu1 %3030  ;;  %v10713_v33 = vld [vmem:[#allocation3 + $0x4] sm:$0xf] }
 0x1ad   : > { %309 = vst.msk [vmem:[#allocation3 + $0x6c] sm:$0xf] %vm280_vm0, %v13120_v9  ;;  %310 = vst.msk [vmem:[#allocation3 + $0x70] sm:$0xf] %vm280_vm0, %v13120_v9  ;;  %v4495_v23 = vshrl.u32 %v10709_v10, 16  ;;  %v4498_v48 = vshll.u32 %v10709_v10, 16  ;;  %v3515_v18 = vsel %vm3491_vm3, %v3482_v26, %v3031_v40 }
 0x1ae   : > { %312 = vst.msk [vmem:[#allocation3 + $0x78] sm:$0xf] %vm280_vm0, %v13120_v9  ;;  %313 = vst.msk [vmem:[#allocation3 + $0x7c] sm:$0xf] %vm280_vm0, %v13120_v9  ;;  %v4504_v13 = vshll.u32 %v10713_v33, 16  ;;  %v4508_v38 = vshrl.u32 %v10713_v33, 16 }
 0x1af   : > { %315 = vst.msk [vmem:[#allocation3 + $0x84] sm:$0xf] %vm280_vm0, %v13120_v9  ;;  %316 = vst.msk [vmem:[#allocation3 + $0x88] sm:$0xf] %vm280_vm0, %v13120_v9  ;;  %v4878_v7 = vld [vmem:[#allocation3] sm:$0xe] }
 0x1b0   : > { %318 = vst.msk [vmem:[#allocation3 + $0x90] sm:$0xf] %vm280_vm0, %v13120_v9  ;;  %319 = vst.msk [vmem:[#allocation3 + $0x94] sm:$0xf] %vm280_vm0, %v13120_v9  ;;  %v4944_v4 = vrot.slane %v10713_v33, 5  ;;  %v3111_v29 = vpop.permute.xlu1 %3110  ;;  %v4497_v42 = vrot.slane %v4495_v23, 4 }
 0x1b1   : > { %321 = vst.msk [vmem:[#allocation3 + $0x9c] sm:$0xf] %vm280_vm0, %v13120_v9  ;;  %322 = vst.msk [vmem:[#allocation3 + $0xa0] sm:$0xf] %vm280_vm0, %v13120_v9  ;;  %v4500_v52 = vrot.slane %v4498_v48, 5  ;;  %v4506_v43 = vrot.slane %v4504_v13, 5  ;;  %v3548_v45 = vsel %vm3524_vm4, %v3515_v18, %v3111_v29 }
 0x1b2   : > { %324 = vst.msk [vmem:[#allocation3 + $0xa8] sm:$0xf] %vm280_vm0, %v13120_v9  ;;  %325 = vst.msk [vmem:[#allocation3 + $0xac] sm:$0xf] %vm280_vm0, %v13120_v9  ;;  %v4510_v11 = vrot.slane %v4508_v38, 4  ;;  %v8113_v39 = vrot.slane %v4878_v7, 9 }
 0x1b3   : > { %327 = vst.msk [vmem:[#allocation3 + $0xb4] sm:$0xf] %vm280_vm0, %v13120_v9  ;;  %328 = vst.msk [vmem:[#allocation3 + $0xb8] sm:$0xf] %vm280_vm0, %v13120_v9  ;;  %v4501_v58 = vor.u32 %v4500_v52, %v4497_v42  ;;  %v4946_v6 = vrot.slane %v4944_v4, 4  ;;  %v3285_v5 = vpop.permute.xlu0 %3284 }
 0x1b4   : > { %330 = vst.msk [vmem:[#allocation3 + $0xc0] sm:$0xf] %vm280_vm0, %v13120_v9  ;;  %331 = vst.msk [vmem:[#allocation3 + $0xc4] sm:$0xf] %vm280_vm0, %v13120_v9  ;;  %v4511_v21 = vor.u32 %v4510_v11, %v4506_v43  ;;  %v3207_v53 = vpop.permute.xlu1 %3206  ;;  %v4945_v27 = vsel %vm9110_vm7, %v8113_v39, %v4944_v4  ;;  %v3612_v20 = vsel %vm3590_vm8, %v3579_v46, %v3285_v5  ;;  %v4341_v63 = vld [vmem:[#allocation3 + $0x18] sm:$0xf] }
 0x1b5   : > { %333 = vst.msk [vmem:[#allocation3 + $0xcc] sm:$0xf] %vm280_vm0, %v13120_v9  ;;  %334 = vst.msk [vmem:[#allocation3 + $0xd0] sm:$0xf] %vm280_vm0, %v13120_v9  ;;  %v4502_v22 = vrot.slane %v4501_v58, 4  ;;  %v3581_v55 = vsel %vm3557_vm5, %v3548_v45, %v3207_v53 }
 0x1b6   : > { %290 = vst.msk [vmem:[#allocation3 + $0x20] sm:$0x1] %vm283_vm10, %v13120_v9  ;;  %284 = vst.msk [vmem:[#allocation3 + $0x8] sm:$0x1] %vm283_vm10, %v13120_v9  ;;  %v4512_v59 = vrot.slane %v4511_v21, 4 }
 0x1b7   : > { %287 = vst.msk [vmem:[#allocation3 + $0x14] sm:$0x1] %vm283_vm10, %v13120_v9  ;;  %293 = vst.msk [vmem:[#allocation3 + $0x2c] sm:$0x1] %vm283_vm10, %v13120_v9  ;;  %v4507_v41 = vsel %vm9130_vm11, %v4502_v22, %v4506_v43  ;;  %v3365_v47 = vpop.permute.xlu0 %3364  ;;  %v4332_v46 = vld [vmem:[#allocation3 + $0xc] sm:$0xf] }
 0x1b8   : > { %296 = vst.msk [vmem:[#allocation3 + $0x38] sm:$0x1] %vm283_vm10, %v13120_v9  ;;  %299 = vst.msk [vmem:[#allocation3 + $0x44] sm:$0x1] %vm283_vm10, %v13120_v9  ;;  %v3645_v24 = vsel %vm3623_vm2, %v3612_v20, %v3365_v47 }
 0x1b9   : > { %302 = vst.msk [vmem:[#allocation3 + $0x50] sm:$0x1] %vm283_vm10, %v13120_v9  ;;  %305 = vst.msk [vmem:[#allocation3 + $0x5c] sm:$0x1] %vm283_vm10, %v13120_v9  ;;  %8554 = vmatprep.mubr.msk.bf16.mxu0 %vm13078_vm6, %v3645_v24  ;;  %v3287_v62 = vpop.permute.xlu1 %3286 }
 0x1ba   : > { %308 = vst.msk [vmem:[#allocation3 + $0x68] sm:$0x1] %vm283_vm10, %v13120_v9  ;;  %311 = vst.msk [vmem:[#allocation3 + $0x74] sm:$0x1] %vm283_vm10, %v13120_v9  ;;  %v3614_v30 = vsel %vm3590_vm8, %v3581_v55, %v3287_v62 }
 0x1bb   : > { %314 = vst.msk [vmem:[#allocation3 + $0x80] sm:$0x1] %vm283_vm10, %v13120_v9  ;;  %317 = vst.msk [vmem:[#allocation3 + $0x8c] sm:$0x1] %vm283_vm10, %v13120_v9 }
 0x1bc   : > { %320 = vst.msk [vmem:[#allocation3 + $0x98] sm:$0x1] %vm283_vm10, %v13120_v9  ;;  %323 = vst.msk [vmem:[#allocation3 + $0xa4] sm:$0x1] %vm283_vm10, %v13120_v9 }
 0x1bd   : > { %326 = vst.msk [vmem:[#allocation3 + $0xb0] sm:$0x1] %vm283_vm10, %v13120_v9  ;;  %329 = vst.msk [vmem:[#allocation3 + $0xbc] sm:$0x1] %vm283_vm10, %v13120_v9  ;;  %v4478_v31 = vld [vmem:[#allocation3 + $0x8] sm:$0x1]  ;;  %v3367_v25 = vpop.permute.xlu1 %3366 }
 0x1be   : > { %332 = vst.msk [vmem:[#allocation3 + $0xc8] sm:$0x1] %vm283_vm10, %v13120_v9  ;;  %335 = vst.msk [vmem:[#allocation3 + $0xd4] sm:$0x1] %vm283_vm10, %v13120_v9  ;;  %v4514_v50 = vshll.u32 %v4478_v31, 16  ;;  %v4947_v0 = vrot.slane %v4478_v31, 5  ;;  %v3647_v12 = vsel %vm3623_vm2, %v3614_v30, %v3367_v25 }
 0x1bf   : > { %8555 = vmatmul.mubr.msk.bf16.gmra.mxu0 %vm13078_vm6, %v3647_v12  ;;  %vm10776_vm13 = vmand %vm280_vm0, %vm693_vm9  ;;  %vm13123_vm9 = vsmask.f32 256  ;;  %v4338_v25 = vld [vmem:[#allocation3 + $0x14] sm:$0x1] }
 0x1c0   : > { %v4516_v32 = vrot.slane %v4514_v50, 5  ;;  %v4948_v49 = vsel %vm9110_vm7, %v4946_v6, %v4947_v0  ;;  %vm10786_vm6 = vmand %vm283_vm10, %vm13123_vm9  ;;  %vm13128_vm10 = vcmask 293888  }
 0x1c1   : > { %v8193_v9 = vcombine.low %v4945_v27, %v4948_v49  ;;  %v10762_v31 = vpop.permute.xlu1 %2778  ;;  %vm13130_vm9 = vmmov %vm13128_vm10 }
 0x1c2   : > { %v4517_v61 = vsel %vm9130_vm11, %v4512_v59, %v4516_v32 }
 0x1c3   : > { %v8177_v8 = vcombine.low %v4507_v41, %v4517_v61  ;;  %v10753_v3 = vpop.permute.xlu0 %2776 }
 0x1c5   : > { %6383 = vrot.lane.b32.xlu1 %v8177_v8, %s8910_s15  ;;  %v10769_v52 = vpop.permute.xlu1 %2858  ;;  %v4345_v8 = vld [vmem:[#allocation3 + $0x20] sm:$0x1] }
 0x1c7   : > { %v10760_v40 = vpop.permute.xlu0 %2856 }
 0x1c8   : > { %v8536_v23 = vpop.f32.mrf.mxu0 }
 0x1c9   : > { %6463 = vrot.lane.b32.xlu1 %v8193_v9, %s8913_s8  ;;  %v3763_v48 = vadd.f32 %v8536_v23, %v10758_v2 }
 0x1ca   : > { %v3754_v13 = vpop.f32.mrf.mxu0 }
 0x1cb   : > { %v10765_v38 = vpop.permute.xlu0 %2952  ;;  %v3883_v60 = vmax.f32 %v3763_v48, 0.0  ;;  %v3755_v50 = vadd.f32 %v10758_v2, %v3754_v13 }
 0x1cc   : > { %v8537_v7 = vpop.f32.mrf.mxu0 }
 0x1cd   : > { %v8348_v4 = vpack.c.bf16 %v3883_v60, %v3883_v60  ;;  %v3881_v29 = vmax.f32 %v3755_v50, 0.0  ;;  %v3766_v42 = vadd.f32 %v8537_v7, %v10758_v2  ;;  %v8776_v60 = vld [vmem:[#allocation2 + $0x90] sm:$0xf]  ;;  %v8777_v50 = vld [vmem:[#allocation2 + $0x94] sm:$0xf] }
 0x1ce   : > { %v3757_v43 = vpop.f32.mrf.mxu0  ;;  %v7929_v7 = vcombine.low %v8776_v60, %v8777_v50 }
 0x1cf   : > { %v4027_v11 = vshrl.u32 %v8348_v4, 16  ;;  %v8346_v14 = vpack.c.bf16 %v3881_v29, %v3881_v29  ;;  %v3884_v32 = vmax.f32 %v3766_v42, 0.0  ;;  %v3758_v0 = vadd.f32 %v10758_v2, %v3757_v43  ;;  %v8778_v42 = vld [vmem:[#allocation2 + $0x9c] sm:$0xf]  ;;  %v8779_v43 = vld [vmem:[#allocation2 + $0xa0] sm:$0xf] }
 0x1d0   : > { %v4030_v39 = vshll.u32 %v8348_v4, 16 }
 0x1d1   : > { %v10772_v58 = vpop.permute.xlu0 %3032  ;;  %v4029_v21 = vrot.slane %v4027_v11, 7  ;;  %v4010_v6 = vshrl.u32 %v8346_v14, 16  ;;  %v8349_v28 = vpack.c.bf16 %v3884_v32, %v3884_v32  ;;  %v3882_v19 = vmax.f32 %v3758_v0, 0.0 }
 0x1d2   : > { %v4013_v53 = vshll.u32 %v8346_v14, 16  ;;  %v10780_v59 = vpop.permute.xlu1 %2954  ;;  %v7930_v11 = vcombine.low %v8778_v42, %v8779_v43  ;;  %v3415_v32 = vsel %vm3376_vm14, %v7929_v7, %v10753_v3 }
 0x1d3   : > { %v4032_v54 = vor.u32 %v4030_v39, %v4029_v21  ;;  %v4012_v57 = vrot.slane %v4010_v6, 7  ;;  %v4035_v22 = vshrl.u32 %v8349_v28, 16  ;;  %v8347_v41 = vpack.c.bf16 %v3882_v19, %v3882_v19 }
 0x1d4   : > { %v4038_v20 = vshll.u32 %v8349_v28, 16  ;;  %v4033_v34 = vrot.slane %v4029_v21, 4  ;;  %v3451_v21 = vsel %vm3425_vm15, %v3415_v32, %v10760_v40 }
 0x1d5   : > { %v4342_v61 = vsel %vm10776_vm13, %v4032_v54, %v4341_v63  ;;  %v4015_v27 = vor.u32 %v4013_v53, %v4012_v57  ;;  %v4037_v49 = vrot.slane %v4035_v22, 7  ;;  %v4018_v35 = vshrl.u32 %v8347_v41, 16  ;;  %v3113_v24 = vpop.permute.xlu0 %3112 }
 0x1d6   : > { %4343 = vst [vmem:[#allocation3 + $0x18] sm:$0xf] %v4342_v61  ;;  %v4021_v45 = vshll.u32 %v8347_v41, 16  ;;  %v4016_v23 = vrot.slane %v4012_v57, 4  ;;  %v3418_v63 = vsel %vm3376_vm14, %v7930_v11, %v10762_v31  ;;  %v3484_v19 = vsel %vm3458_vm1, %v3451_v21, %v10765_v38 }
 0x1d7   : > { %v4333_v9 = vsel %vm10776_vm13, %v4015_v27, %v4332_v46  ;;  %v4040_v26 = vor.u32 %v4038_v20, %v4037_v49  ;;  %v4042_v62 = vrot.slane %v4037_v49, 4  ;;  %v4020_v18 = vrot.slane %v4018_v35, 7 }
 0x1d8   : > { %4334 = vst [vmem:[#allocation3 + $0xc] sm:$0xf] %v4333_v9  ;;  %v3517_v53 = vsel %vm3491_vm3, %v3484_v19, %v10772_v58  ;;  %v3453_v38 = vsel %vm3425_vm15, %v3418_v63, %v10769_v52 }
 0x1d9   : > { %v4041_v55 = vsel %vm9138_vm12, %v4033_v34, %v4040_v26  ;;  %v4346_v30 = vsel %vm10786_vm6, %v4042_v62, %v4345_v8  ;;  %v4023_v48 = vor.u32 %v4021_v45, %v4020_v18  ;;  %v4025_v13 = vrot.slane %v4020_v18, 4  ;;  %v3209_v14 = vpop.permute.xlu0 %3208 }
 0x1da   : > { %4344 = vst.msk [vmem:[#allocation3 + $0x1c] sm:$0xf] %vm280_vm0, %v4041_v55  ;;  %4347 = vst [vmem:[#allocation3 + $0x20] sm:$0x1] %v4346_v30  ;;  %v3550_v61 = vsel %vm3524_vm4, %v3517_v53, %v3113_v24  ;;  %v3486_v35 = vsel %vm3458_vm1, %v3453_v38, %v10780_v59 }
 0x1db   : > { %v3035_v12 = vpop.permute.xlu1 %3034  ;;  %v4024_v4 = vsel %vm9138_vm12, %v4016_v23, %v4023_v48  ;;  %v4339_v29 = vsel %vm10786_vm6, %v4025_v13, %v4338_v25  ;;  %v3583_v34 = vsel %vm3557_vm5, %v3550_v61, %v3209_v14 }
 0x1dc   : > { %4335 = vst.msk [vmem:[#allocation3 + $0x10] sm:$0xf] %vm280_vm0, %v4024_v4  ;;  %4340 = vst [vmem:[#allocation3 + $0x14] sm:$0x1] %v4339_v29  ;;  %v3519_v62 = vsel %vm3491_vm3, %v3486_v35, %v3035_v12 }
 0x1dd   : > { %v10808_v39 = vld [vmem:[#allocation3 + $0x18] sm:$0xf] }
 0x1de   : > { %v10810_v6 = vld [vmem:[#allocation3 + $0x18] sm:$0xf] }
 0x1df   : > { %v10804_v0 = vpop.permute.xlu1 %3114  ;;  %v5487_v28 = vld [vmem:[#allocation3 + $0x18] sm:$0xe]  ;;  %v10834_v49 = vld [vmem:[#allocation3 + $0xc] sm:$0xf] }
 0x1e0   : > { %v4880_v3 = vld [vmem:[#allocation3 + $0x18] sm:$0xe]  ;;  %v8130_v58 = vrot.slane %v5487_v28, 9  ;;  %v5486_v59 = vld [vmem:[#allocation3 + $0xc] sm:$0xe] }
 0x1e1   : > { %v10816_v54 = vld [vmem:[#allocation3 + $0x1c] sm:$0xf]  ;;  %v10826_v46 = vld [vmem:[#allocation3 + $0x20] sm:$0x1]  ;;  %v8115_v55 = vrot.slane %v4880_v3, 9  ;;  %v8129_v32 = vrot.slane %v5486_v59, 9 }
 0x1e2   : > { %v10818_v57 = vld [vmem:[#allocation3 + $0x1c] sm:$0xf]  ;;  %v8210_v40 = vcombine.low %v10808_v39, %v10816_v54  ;;  %v5559_v31 = vrot.slane %v10816_v54, 5  ;;  %v5562_v20 = vrot.slane %v10826_v46, 5  ;;  %v10837_v8 = vld [vmem:[#allocation3 + $0x20] sm:$0x1] }
 0x1e3   : > { %v8257_v22 = vcombine.low %v10810_v6, %v10818_v57  ;;  %v10829_v41 = vld [vmem:[#allocation3 + $0x1c] sm:$0xf]  ;;  %v5055_v52 = vld [vmem:[#allocation3 + $0x10] sm:$0xf]  ;;  %v5086_v26 = vld [vmem:[#allocation3 + $0x14] sm:$0x1]  ;;  %v3211_v18 = vpop.permute.xlu1 %3210 }
 0x1e4   : > { %13126 = vst [vmem:[#allocation8_spill] sm:$0xff] %v10829_v41  ;;  %v3289_v27 = vpop.permute.xlu0 %3288  ;;  %6561 = vrot.lane.b32.xlu1 %v8210_v40, %s8914_s12  ;;  %v5561_v24 = vrot.slane %v5559_v31, 4  ;;  %v4958_v9 = vrot.slane %v10829_v41, 5  ;;  %v5560_v45 = vsel %vm9110_vm7, %v8130_v58, %v5559_v31  ;;  %v5552_v30 = vrot.slane %v5055_v52, 5  ;;  %v10848_v25 = vld [vmem:[#allocation3 + $0x10] sm:$0xf] }
 0x1e5   : > { %6783 = vrot.lane.b32.xlu0 %v8257_v22, %s8913_s8  ;;  %13127 = vst [vmem:[#allocation9_spill] sm:$0xff] %v10848_v25  ;;  %v8209_v23 = vcombine.low %v10834_v49, %v5055_v52  ;;  %v4961_v60 = vrot.slane %v10837_v8, 5  ;;  %v3616_v50 = vsel %vm3590_vm8, %v3583_v34, %v3289_v27  ;;  %v5555_v29 = vrot.slane %v5086_v26, 5  ;;  %v10855_v42 = vld [vmem:[#allocation3 + $0x14] sm:$0x1] }
 0x1e6   : > { %v5563_v48 = vsel %vm9110_vm7, %v5561_v24, %v5562_v20  ;;  %v4960_v13 = vrot.slane %v4958_v9, 4  ;;  %v5554_v4 = vrot.slane %v5552_v30, 4  ;;  %v4879_v21 = vld [vmem:[#allocation3 + $0xc] sm:$0xe]  ;;  %v4951_v28 = vrot.slane %v10848_v25, 5 }
 0x1e7   : > { %v8242_v7 = vcombine.low %v5560_v45, %v5563_v48  ;;  %v4959_v19 = vsel %vm9110_vm7, %v8115_v55, %v4958_v9  ;;  %v5553_v22 = vsel %vm9110_vm7, %v8129_v32, %v5552_v30  ;;  %v4954_v38 = vrot.slane %v10855_v42, 5  ;;  %v10883_v30 = vld [vmem:[#allocation3 + $0x18] sm:$0xf] }
 0x1e8   : > { %v3369_v12 = vpop.permute.xlu0 %3368  ;;  %v8540_v11 = vpop.f32.mrf.mxu0  ;;  %6559 = vrot.lane.b32.xlu1 %v8209_v23, %s8914_s12  ;;  %v4962_v14 = vsel %vm9110_vm7, %v4960_v13, %v4961_v60  ;;  %v5556_v3 = vsel %vm9110_vm7, %v5554_v4, %v5555_v29  ;;  %v4953_v31 = vrot.slane %v4951_v28, 4  ;;  %v8114_v35 = vrot.slane %v4879_v21, 9  ;;  %13129 = vst [vmem:[#allocation10_spill] sm:$0xff] %v10883_v30  ;;  %v4355_v21 = vld [vmem:[#allocation3 + $0x30] sm:$0xf] }
 0x1e9   : > { %v3649_v43 = vsel %vm3623_vm2, %v3616_v50, %v3369_v12  ;;  %v3779_v63 = vadd.f32 %v8540_v11, %v10758_v2  ;;  %6689 = vrot.lane.b32.xlu0 %v8242_v7, %s8910_s15  ;;  %v8195_v40 = vcombine.low %v4959_v19, %v4962_v14  ;;  %v8241_v20 = vcombine.low %v5553_v22, %v5556_v3 }
 0x1ea   : > { %8558 = vmatprep.mubr.msk.bf16.mxu0 %vm13128_vm10, %v3649_v43  ;;  %v3770_v53 = vpop.f32.mrf.mxu0  ;;  %v3552_v34 = vsel %vm3524_vm4, %v3519_v62, %v10804_v0  ;;  %v5712_v52 = vshrl.u32 %v10810_v6, 16  ;;  %v4955_v9 = vsel %vm9110_vm7, %v4953_v31, %v4954_v38  ;;  %v4952_v59 = vsel %vm9110_vm7, %v8114_v35, %v4951_v28 }
 0x1eb   : > { %v3887_v27 = vmax.f32 %v3779_v63, 0.0  ;;  %v3771_v58 = vadd.f32 %v10758_v2, %v3770_v53  ;;  %v3585_v0 = vsel %vm3557_vm5, %v3552_v34, %v3211_v18  ;;  %v5715_v62 = vshll.u32 %v10810_v6, 16 }
 0x1ec   : > { %v8541_v24 = vpop.f32.mrf.mxu0  ;;  %6467 = vrot.lane.b32.xlu1 %v8195_v40, %s8913_s8  ;;  %v8194_v48 = vcombine.low %v4952_v59, %v4955_v9  ;;  %v10889_v29 = vrot.slane %v5712_v52, 4  ;;  %v4543_v18 = vshrl.u32 %v10883_v30, 16  ;;  %v4546_v63 = vshll.u32 %v10883_v30, 16 }
 0x1ed   : > { %v3291_v61 = vpop.permute.xlu1 %3290  ;;  %v8352_v26 = vpack.c.bf16 %v3887_v27, %v3887_v27  ;;  %v3885_v45 = vmax.f32 %v3771_v58, 0.0  ;;  %v3782_v55 = vadd.f32 %v8541_v24, %v10758_v2  ;;  %6687 = vrot.lane.b32.xlu0 %v8241_v20, %s8910_s15  ;;  %v4552_v19 = vshll.u32 %v10829_v41, 16  ;;  %v4348_v58 = vld [vmem:[#allocation3 + $0x24] sm:$0xf] }
 0x1ee   : > { %v3773_v23 = vpop.f32.mrf.mxu0  ;;  %v3618_v13 = vsel %vm3590_vm8, %v3585_v0, %v3291_v61  ;;  %v4556_v3 = vshrl.u32 %v10829_v41, 16  ;;  %v10900_v61 = vrot.slane %v5715_v62, 5  ;;  %v5725_v27 = vshrl.u32 %v10818_v57, 16 }
 0x1ef   : > { %v4061_v50 = vshrl.u32 %v8352_v26, 16  ;;  %v8350_v12 = vpack.c.bf16 %v3885_v45, %v3885_v45  ;;  %v3888_v7 = vmax.f32 %v3782_v55, 0.0  ;;  %v3774_v43 = vadd.f32 %v10758_v2, %v3773_v23 }
 0x1f0   : > { %6465 = vrot.lane.b32.xlu1 %v8194_v48, %s8913_s8  ;;  %v4064_v11 = vshll.u32 %v8352_v26, 16  ;;  %v4545_v35 = vrot.slane %v4543_v18, 4  ;;  %v4359_v26 = vld [vmem:[#allocation3 + $0x38] sm:$0x1]  ;;  %v4548_v55 = vrot.slane %v4546_v63, 5  ;;  %v10905_v59 = vrot.slane %v4552_v19, 5 }
 0x1f1   : > { %v3371_v60 = vpop.permute.xlu1 %3370  ;;  %v4063_v6 = vrot.slane %v4061_v50, 7  ;;  %v4044_v14 = vshrl.u32 %v8350_v12, 16  ;;  %v8353_v32 = vpack.c.bf16 %v3888_v7, %v3888_v7  ;;  %v3886_v28 = vmax.f32 %v3774_v43, 0.0  ;;  %v4352_v7 = vld [vmem:[#allocation3 + $0x2c] sm:$0x1] }
 0x1f2   : > { %v3651_v4 = vsel %vm3623_vm2, %v3618_v13, %v3371_v60  ;;  %v4047_v31 = vshll.u32 %v8350_v12, 16  ;;  %v4558_v0 = vrot.slane %v4556_v3, 4  ;;  %v4549_v3 = vor.u32 %v4548_v55, %v4545_v35 }
 0x1f3   : > { %8559 = vmatmul.mubr.msk.bf16.gmra.mxu0 %vm13130_vm9, %v3651_v4  ;;  %v4066_v40 = vor.u32 %v4064_v11, %v4063_v6  ;;  %v4046_v22 = vrot.slane %v4044_v14, 7  ;;  %v4069_v38 = vshrl.u32 %v8353_v32, 16  ;;  %v8351_v20 = vpack.c.bf16 %v3886_v28, %v3886_v28  ;;  %v5695_v11 = vld [vmem:[#allocation3 + $0x20] sm:$0x1] }
 0x1f4   : > { %v10898_v53 = vpop.permute.xlu0 %2780  ;;  %v4072_v9 = vshll.u32 %v8353_v32, 16  ;;  %v4067_v23 = vrot.slane %v4063_v6, 4  ;;  %v5721_v6 = vshll.u32 %v10818_v57, 16  ;;  %v5727_v14 = vrot.slane %v5725_v27, 4  ;;  %v8720_v32 = vld [vmem:[%s13072_s3 + $0x78] sm:$0xff]   ;;  %v8722_v57 = vld [vmem:[%s13072_s3 + $0x70] sm:$0xff]  }
 0x1f5   : > { %v4356_v34 = vsel %vm10776_vm13, %v4066_v40, %v4355_v21  ;;  %v4049_v52 = vor.u32 %v4047_v31, %v4046_v22  ;;  %v4071_v24 = vrot.slane %v4069_v38, 7  ;;  %v4052_v45 = vshrl.u32 %v8351_v20, 16  ;;  %v10911_v4 = vpop.permute.xlu1 %2782  ;;  %v8721_v21 = vld [vmem:[%s13072_s3 + $0x38] sm:$0xff]   ;;  %v10925_v40 = vld [vmem:[#allocation3 + $0xc] sm:$0xf]  ;;  %8398 = vmatprep.subr.bf16.mxu0 %v8720_v32  ;;  %8602 = vmatprep.subr.bf16.mxu1 %v8720_v32  ;;  %v8726_v32 = vld [vmem:[%s13072_s3 + $0x68] sm:$0xff]  }
 0x1f6   : > { %4357 = vst [vmem:[#allocation3 + $0x30] sm:$0xf] %v4356_v34  ;;  %v4055_v12 = vshll.u32 %v8351_v20, 16  ;;  %v4050_v28 = vrot.slane %v4046_v22, 4  ;;  %13131 = vst [vmem:[#allocation11_spill] sm:$0xff] %v10925_v40  ;;  %v4559_v38 = vor.u32 %v4558_v0, %v10905_v59  ;;  %v4562_v27 = vshll.u32 %v10837_v8, 16  ;;  %8399 = vmatpush3.bf16.msra.mxu0 %v8721_v21  ;;  %8610 = vmatpush3.bf16.msra.mxu1 %v8721_v21 }
 0x1f7   : > { %v4349_v48 = vsel %vm10776_vm13, %v4049_v52, %v4348_v58  ;;  %v4074_v13 = vor.u32 %v4072_v9, %v4071_v24  ;;  %v4076_v60 = vrot.slane %v4071_v24, 4  ;;  %v4054_v50 = vrot.slane %v4052_v45, 7  ;;  %v8723_v52 = vld [vmem:[%s13072_s3 + $0x30] sm:$0xff]   ;;  %8400 = vmatprep.subr.bf16.mxu0 %v8722_v57  ;;  %8603 = vmatprep.subr.bf16.mxu1 %v8722_v57 }
 0x1f8   : > { %v10907_v62 = vpop.permute.xlu0 %2860  ;;  %4350 = vst [vmem:[#allocation3 + $0x24] sm:$0xf] %v4349_v48  ;;  %v5718_v22 = vor.u32 %v10900_v61, %v10889_v29  ;;  %v5723_v58 = vrot.slane %v5721_v6, 5  ;;  %v5731_v34 = vshll.u32 %v5695_v11, 16  ;;  %v4519_v29 = vshrl.u32 %v10925_v40, 16 }
 0x1f9   : > { %v4075_v43 = vsel %vm9138_vm12, %v4067_v23, %v4074_v13  ;;  %v4360_v18 = vsel %vm10786_vm6, %v4076_v60, %v4359_v26  ;;  %v4057_v63 = vor.u32 %v4055_v12, %v4054_v50  ;;  %v4059_v19 = vrot.slane %v4054_v50, 4  ;;  %v10947_v26 = vpop.permute.xlu1 %2862 }
 0x1fa   : > { %4358 = vst.msk [vmem:[#allocation3 + $0x34] sm:$0xf] %vm280_vm0, %v4075_v43  ;;  %4361 = vst [vmem:[#allocation3 + $0x38] sm:$0x1] %v4360_v18  ;;  %v5728_v8 = vor.u32 %v5727_v14, %v5723_v58  ;;  %v4522_v61 = vshll.u32 %v10925_v40, 16  ;;  %v5127_v24 = vshrl.u32 %v10808_v39, 16  ;;  %8401 = vmatpush3.bf16.msra.mxu0 %v8723_v52  ;;  %8611 = vmatpush3.bf16.msra.mxu1 %v8723_v52 }
 0x1fb   : > { %v4058_v20 = vsel %vm9138_vm12, %v4050_v28, %v4057_v63  ;;  %v4353_v35 = vsel %vm10786_vm6, %v4059_v19, %v4352_v7  ;;  %v4550_v9 = vrot.slane %v4549_v3, 4  ;;  %v4560_v45 = vrot.slane %v4559_v38, 4  ;;  %v8727_v3 = vld [vmem:[%s13072_s3 + $0x28] sm:$0xff]   ;;  %8402 = vmatprep.subr.bf16.mxu0 %v8726_v32  ;;  %8604 = vmatprep.subr.bf16.mxu1 %v8726_v32 }
 0x1fc   : > { %v10930_v31 = vpop.permute.xlu0 %2956  ;;  %4351 = vst.msk [vmem:[#allocation3 + $0x28] sm:$0xf] %vm280_vm0, %v4058_v20  ;;  %4354 = vst [vmem:[#allocation3 + $0x2c] sm:$0x1] %v4353_v35  ;;  %v4564_v55 = vrot.slane %v4562_v27, 5  ;;  %v5719_v0 = vrot.slane %v5718_v22, 4 }
 0x1fd   : > { %v5729_v23 = vrot.slane %v5728_v8, 4  ;;  %v10951_v13 = vld [vmem:[#allocation3 + $0x30] sm:$0xf]  ;;  %v5733_v50 = vrot.slane %v5731_v34, 5  ;;  %v4528_v12 = vshll.u32 %v10848_v25, 16  ;;  %v4521_v18 = vrot.slane %v4519_v29, 4 }
 0x1fe   : > { %v10953_v60 = vld [vmem:[#allocation3 + $0x30] sm:$0xf]  ;;  %v4524_v11 = vrot.slane %v4522_v61, 5  ;;  %v5130_v21 = vshll.u32 %v10808_v39, 16  ;;  %v4565_v28 = vsel %vm9130_vm11, %v4560_v45, %v4564_v55  ;;  %v4532_v19 = vshrl.u32 %v10848_v25, 16  ;;  %8403 = vmatpush3.bf16.msra.mxu0 %v8727_v3  ;;  %8612 = vmatpush3.bf16.msra.mxu1 %v8727_v3 }
 0x1ff   : > { %v5734_v63 = vsel %vm9130_vm11, %v5729_v23, %v5733_v50  ;;  %v10976_v57 = vrot.slane %v5127_v24, 4  ;;  %v5103_v38 = vshrl.u32 %v10834_v49, 16  ;;  %v4555_v27 = vsel %vm9130_vm11, %v4550_v9, %v10905_v59  ;;  %v5489_v45 = vld [vmem:[#allocation3 + $0x30] sm:$0xe]  ;;  %v11016_v37 = vld [vmem:[#allocation3 + $0x24] sm:$0xf] }
 0x200   : > { %v5724_v22 = vsel %vm9130_vm11, %v5719_v0, %v5723_v58  ;;  %v4525_v20 = vor.u32 %v4524_v11, %v4521_v18  ;;  %v4530_v35 = vrot.slane %v4528_v12, 5  ;;  %v8179_v8 = vcombine.low %v4555_v27, %v4565_v28  ;;  %v11010_v18 = vld [vmem:[#allocation3 + $0x24] sm:$0xf] }
 0x201   : > { %v10956_v7 = vld [vmem:[#allocation3 + $0x34] sm:$0xf]  ;;  %v8273_v29 = vcombine.low %v5724_v22, %v5734_v63  ;;  %v5089_v24 = vld [vmem:[#allocation3 + $0x38] sm:$0x1]  ;;  %v10994_v59 = vrot.slane %v5130_v21, 5  ;;  %v4534_v58 = vrot.slane %v4532_v19, 4  ;;  %v3424_v23 = vsel %vm3376_vm14, %v7932_v51, %v10911_v4 }
 0x202   : > { %v10949_v48 = vpop.permute.xlu0 %3036  ;;  %v10958_v43 = vld [vmem:[#allocation3 + $0x34] sm:$0xf]  ;;  %v8212_v6 = vcombine.low %v10951_v13, %v10956_v7  ;;  %v4538_v55 = vshll.u32 %v10855_v42, 16  ;;  %v5573_v0 = vrot.slane %v10956_v7, 5  ;;  %v11005_v50 = vrot.slane %v5103_v38, 4 }
 0x203   : > { %v8259_v14 = vcombine.low %v10953_v60, %v10958_v43  ;;  %v10981_v39 = vpop.permute.xlu1 %2958  ;;  %v10988_v34 = vld [vmem:[#allocation3 + $0x34] sm:$0xf]  ;;  %v10992_v61 = vld [vmem:[#allocation3 + $0x28] sm:$0xf]  ;;  %v5106_v12 = vshll.u32 %v10834_v49, 16  ;;  %v5760_v7 = vshrl.u32 %v10953_v60, 16  ;;  %v4535_v51 = vor.u32 %v4534_v58, %v4530_v35 }
 0x204   : > { %6565 = vrot.lane.b32.xlu1 %v8212_v6, %s8914_s12  ;;  %13132 = vst [vmem:[#allocation12_spill] sm:$0xff] %v10988_v34  ;;  %v10996_v9 = vld [vmem:[#allocation3 + $0x28] sm:$0xf]  ;;  %v4972_v42 = vrot.slane %v10988_v34, 5  ;;  %v8211_v11 = vcombine.low %v11010_v18, %v10992_v61  ;;  %v4526_v17 = vrot.slane %v4525_v20, 4  ;;  %v8132_v6 = vrot.slane %v5489_v45, 9 }
 0x205   : > { %6787 = vrot.lane.b32.xlu0 %v8259_v14, %s8913_s8  ;;  %v11018_v4 = vld [vmem:[#allocation3 + $0x28] sm:$0xf]  ;;  %v8258_v49 = vcombine.low %v11016_v37, %v10996_v9  ;;  %v5575_v14 = vrot.slane %v5573_v0, 4  ;;  %v5576_v32 = vrot.slane %v5089_v24, 5  ;;  %v11022_v21 = vld [vmem:[#allocation3 + $0x38] sm:$0x1]  ;;  %v3421_v22 = vsel %vm3376_vm14, %v7931_v15, %v10898_v53  ;;  %vm13136_vm14 = vmmov %vm13130_vm9 }
 0x206   : > { %v10990_v52 = vpop.permute.xlu0 %3116  ;;  %13133 = vst [vmem:[#allocation13_spill] sm:$0xff] %v11018_v4  ;;  %v4536_v63 = vrot.slane %v4535_v51, 4  ;;  %v4540_v19 = vrot.slane %v4538_v55, 5  ;;  %v4974_v3 = vrot.slane %v4972_v42, 4  ;;  %v5088_v38 = vld [vmem:[#allocation3 + $0x2c] sm:$0x1]  ;;  %v4531_v58 = vsel %vm9130_vm11, %v4526_v17, %v4530_v35 }
 0x207   : > { %v5566_v27 = vrot.slane %v10992_v61, 5  ;;  %v4882_v24 = vld [vmem:[#allocation3 + $0x30] sm:$0xe]  ;;  %v5488_v45 = vld [vmem:[#allocation3 + $0x24] sm:$0xe]  ;;  %v4965_v61 = vrot.slane %v11018_v4, 5  ;;  %v5574_v16 = vsel %vm9110_vm7, %v8132_v6, %v5573_v0 }
 0x208   : > { %6387 = vrot.lane.b32.xlu1 %v8179_v8, %s8910_s15  ;;  %v5763_v8 = vshll.u32 %v10953_v60, 16  ;;  %v4541_v56 = vsel %vm9130_vm11, %v4536_v63, %v4540_v19  ;;  %v4975_v15 = vrot.slane %v11022_v21, 5  ;;  %v8728_v53 = vld [vmem:[%s13072_s3 + $0x60] sm:$0xff]   ;;  %v5569_v51 = vrot.slane %v5088_v38, 5 }
 0x209   : > { %6863 = vrot.lane.b32.xlu0 %v8273_v29, %s8914_s12  ;;  %v5577_v29 = vsel %vm9110_vm7, %v5575_v14, %v5576_v32  ;;  %v8178_v60 = vcombine.low %v4531_v58, %v4541_v56  ;;  %v8117_v35 = vrot.slane %v4882_v24, 9  ;;  %v8131_v32 = vrot.slane %v5488_v45, 9  ;;  %8404 = vmatprep.subr.bf16.mxu0 %v8728_v53  ;;  %v8729_v6 = vld [vmem:[%s13072_s3 + $0x20] sm:$0xff]  }
 0x20a   : > { %v3213_v20 = vpop.permute.xlu0 %3212  ;;  %v8244_v55 = vcombine.low %v5574_v16, %v5577_v29  ;;  %v4976_v17 = vsel %vm9110_vm7, %v4974_v3, %v4975_v15  ;;  %v4967_v0 = vrot.slane %v4965_v61, 4  ;;  %8605 = vmatprep.subr.bf16.mxu1 %v8728_v53  ;;  %v3457_v63 = vsel %vm3425_vm15, %v3424_v23, %v10947_v26  ;;  %v4881_v29 = vld [vmem:[#allocation3 + $0x24] sm:$0xe]  ;;  %8405 = vmatpush3.bf16.msra.mxu0 %v8729_v6 }
 0x20b   : > { %v3455_v19 = vsel %vm3425_vm15, %v3421_v22, %v10907_v62  ;;  %v11061_v38 = vrot.slane %v5106_v12, 5  ;;  %v5175_v24 = vshrl.u32 %v10951_v13, 16  ;;  %v4973_v45 = vsel %vm9110_vm7, %v8117_v35, %v4972_v42  ;;  %v8732_v23 = vld [vmem:[%s13072_s3 + $0x58] sm:$0xff]   ;;  %8613 = vmatpush3.bf16.msra.mxu1 %v8729_v6  ;;  %vm13138_vm15 = vmmov %vm13130_vm9 }
 0x20c   : > { %v11024_v28 = vpop.permute.xlu1 %3038  ;;  %6563 = vrot.lane.b32.xlu1 %v8211_v11, %s8914_s12  ;;  %v5568_v11 = vrot.slane %v5566_v27, 4  ;;  %v5567_v26 = vsel %vm9110_vm7, %v8131_v32, %v5566_v27  ;;  %v3488_v12 = vsel %vm3458_vm1, %v3455_v19, %v10930_v31  ;;  %v11078_v58 = vrot.slane %v5760_v7, 4  ;;  %8406 = vmatprep.subr.bf16.mxu0 %v8732_v23 }
 0x20d   : > { %6785 = vrot.lane.b32.xlu0 %v8258_v49, %s8913_s8  ;;  %v11048_v49 = vld [vmem:[#allocation3 + $0x2c] sm:$0x1]  ;;  %v8197_v56 = vcombine.low %v4973_v45, %v4976_v17  ;;  %v3521_v42 = vsel %vm3491_vm3, %v3488_v12, %v10949_v48  ;;  %v11082_v15 = vrot.slane %v5763_v8, 5  ;;  %v8116_v53 = vrot.slane %v4881_v29, 9  ;;  %8606 = vmatprep.subr.bf16.mxu1 %v8732_v23  ;;  %v8733_v8 = vld [vmem:[%s13072_s3 + $0x18] sm:$0xff]  }
 0x20e   : > { %v5570_v3 = vsel %vm9110_vm7, %v5568_v11, %v5569_v51  ;;  %v4968_v62 = vrot.slane %v11048_v49, 5  ;;  %v3554_v31 = vsel %vm3524_vm4, %v3521_v42, %v10990_v52  ;;  %v11098_v51 = vrot.slane %v5175_v24, 4  ;;  %v11103_v17 = vld [vmem:[#allocation3 + $0x30] sm:$0xf]  ;;  %8407 = vmatpush3.bf16.msra.mxu0 %v8733_v8  ;;  %v8735_v42 = vld [vmem:[%s13072_s3 + $0x10] sm:$0xff]  }
 0x20f   : > { %v8243_v16 = vcombine.low %v5567_v26, %v5570_v3  ;;  %v3587_v11 = vsel %vm3557_vm5, %v3554_v31, %v3213_v20  ;;  %v4966_v35 = vsel %vm9110_vm7, %v8116_v53, %v4965_v61  ;;  %13135 = vst [vmem:[#allocation15_spill] sm:$0xff] %v11103_v17  ;;  %v5773_v6 = vshrl.u32 %v10958_v43, 16  ;;  %8614 = vmatpush3.bf16.msra.mxu1 %v8733_v8 }
 0x210   : > { %v11050_v14 = vpop.permute.xlu1 %3118  ;;  %6385 = vrot.lane.b32.xlu1 %v8178_v60, %s8910_s15  ;;  %v4969_v60 = vsel %vm9110_vm7, %v4967_v0, %v4968_v62  ;;  %13134 = vst [vmem:[#allocation14_spill] sm:$0xff] %v11098_v51  ;;  %v3490_v20 = vsel %vm3458_vm1, %v3457_v63, %v10981_v39  ;;  %v5739_v61 = vshll.u32 %v11016_v37, 16  ;;  %v4591_v39 = vshrl.u32 %v11103_v17, 16 }
 0x211   : > { %6693 = vrot.lane.b32.xlu0 %v8244_v55, %s8910_s15  ;;  %v5736_v55 = vshrl.u32 %v11016_v37, 16  ;;  %v8196_v3 = vcombine.low %v4966_v35, %v4969_v60  ;;  %v3523_v62 = vsel %vm3491_vm3, %v3490_v20, %v11024_v28  ;;  %v4604_v28 = vshrl.u32 %v10988_v34, 16 }
 0x212   : > { %v3556_v63 = vsel %vm3524_vm4, %v3523_v62, %v11050_v14  ;;  %v5745_v52 = vshll.u32 %v10996_v9, 16  ;;  %vm6991_vm1 = vcmask 523264   ;;  %vm7024_vm3 = vcmask 785408  }
 0x213   : > { %v3293_v22 = vpop.permute.xlu0 %3292  ;;  %v11118_v12 = vrot.slane %v5736_v55, 4 }
 0x214   : > { %v3215_v27 = vpop.permute.xlu1 %3214  ;;  %6471 = vrot.lane.b32.xlu1 %v8197_v56, %s8913_s8  ;;  %v3620_v32 = vsel %vm3590_vm8, %v3587_v11, %v3293_v22  ;;  %v4594_v22 = vshll.u32 %v11103_v17, 16  ;;  %v4600_v56 = vshll.u32 %v10988_v34, 16  ;;  %v11137_v11 = vrot.slane %v5739_v61, 5 }
 0x215   : > { %6691 = vrot.lane.b32.xlu0 %v8243_v16, %s8910_s15  ;;  %v8734_v16 = vld [vmem:[%s13072_s3 + $0x50] sm:$0xff]   ;;  %v3589_v53 = vsel %vm3557_vm5, %v3556_v63, %v3215_v27  ;;  %v11146_v61 = vrot.slane %v4591_v39, 4  ;;  %v8736_v63 = vld [vmem:[%s13072_s3 + $0x48] sm:$0xff]  }
 0x216   : > { %8408 = vmatprep.subr.bf16.mxu0 %v8734_v16  ;;  %8607 = vmatprep.subr.bf16.mxu1 %v8734_v16  ;;  %v11148_v62 = vrot.slane %v4594_v22, 5 }
 0x217   : > { %v3373_v0 = vpop.permute.xlu0 %3372  ;;  %8409 = vmatpush3.bf16.msra.mxu0 %v8735_v42  ;;  %8615 = vmatpush3.bf16.msra.mxu1 %v8735_v42 }
 0x218   : > { %v3295_v29 = vpop.permute.xlu1 %3294  ;;  %v3653_v24 = vsel %vm3623_vm2, %v3620_v32, %v3373_v0  ;;  %v8544_v45 = vpop.f32.mrf.mxu0  ;;  %6469 = vrot.lane.b32.xlu1 %v8196_v3, %s8913_s8  ;;  %v5769_v0 = vshll.u32 %v10958_v43, 16  ;;  %v11150_v43 = vrot.slane %v4600_v56, 5  ;;  %8410 = vmatprep.subr.bf16.mxu0 %v8736_v63 }
 0x219   : > { %8562 = vmatprep.mubr.msk.bf16.mxu0 %vm13136_vm14, %v3653_v24  ;;  %v3795_v23 = vadd.f32 %v8544_v45, %v10758_v2  ;;  %v3622_v55 = vsel %vm3590_vm8, %v3589_v53, %v3295_v29  ;;  %v11143_v45 = vld [vmem:[#allocation3 + $0x24] sm:$0xf]  ;;  %8608 = vmatprep.subr.bf16.mxu1 %v8736_v63 }
 0x21a   : > { %v3786_v37 = vpop.f32.mrf.mxu0  ;;  %13137 = vst [vmem:[#allocation16_spill] sm:$0xff] %v11143_v45  ;;  %v11163_v22 = vrot.slane %v5769_v0, 5  ;;  %v4567_v56 = vshrl.u32 %v11143_v45, 16  ;;  %v4580_v0 = vshrl.u32 %v11018_v4, 16 }
 0x21b   : > { %v3891_v60 = vmax.f32 %v3795_v23, 0.0  ;;  %v3787_v14 = vadd.f32 %v10758_v2, %v3786_v37  ;;  %v11152_v23 = vrot.slane %v4604_v28, 4  ;;  %v8737_v37 = vld [vmem:[%s13072_s3 + $0x8] sm:$0xff]   ;;  %v4570_v28 = vshll.u32 %v11143_v45, 16 }
 0x21c   : > { %v3375_v8 = vpop.permute.xlu1 %3374  ;;  %v8545_v35 = vpop.f32.mrf.mxu0  ;;  %8411 = vmatpush3.bf16.msra.mxu0 %v8737_v37  ;;  %8616 = vmatpush3.bf16.msra.mxu1 %v8737_v37  ;;  %v4569_v19 = vrot.slane %v4567_v56, 4 }
 0x21d   : > { %v3655_v3 = vsel %vm3623_vm2, %v3622_v55, %v3375_v8  ;;  %v8356_v27 = vpack.c.bf16 %v3891_v60, %v3891_v60  ;;  %v3889_v20 = vmax.f32 %v3787_v14, 0.0  ;;  %v3798_v24 = vadd.f32 %v8545_v35, %v10758_v2  ;;  %v4369_v8 = vld [vmem:[#allocation3 + $0x48] sm:$0xf] }
 0x21e   : > { %8563 = vmatmul.mubr.msk.bf16.gmra.mxu0 %vm13138_vm15, %v3655_v3  ;;  %v3789_v29 = vpop.f32.mrf.mxu0  ;;  %v11160_v60 = vrot.slane %v5773_v6, 4  ;;  %v4607_v6 = vor.u32 %v11152_v23, %v11150_v43 }
 0x21f   : > { %v4095_v16 = vshrl.u32 %v8356_v27, 16  ;;  %v8354_v42 = vpack.c.bf16 %v3889_v20, %v3889_v20  ;;  %v3892_v53 = vmax.f32 %v3798_v24, 0.0  ;;  %v3790_v39 = vadd.f32 %v10758_v2, %v3789_v29  ;;  %v8738_v24 = vld [vmem:[%s13072_s3 + $0x40] sm:$0xff]   ;;  %v8740_v29 = vld [vmem:[%s13072_s3 + $0x88] sm:$0xff]  }
 0x220   : > { %v4098_v55 = vshll.u32 %v8356_v27, 16  ;;  %v4576_v2 = vshll.u32 %v11018_v4, 16  ;;  %v8739_v27 = vld [vmem:[%s13072_s3] sm:$0xff]   ;;  %v5776_v48 = vor.u32 %v11160_v60, %v11163_v22  ;;  %8412 = vmatprep.subr.bf16.mxu0 %v8738_v24  ;;  %8609 = vmatprep.subr.bf16.mxu1 %v8738_v24  ;;  %v4582_v60 = vrot.slane %v4580_v0, 4 }
 0x221   : > { %v4097_v14 = vrot.slane %v4095_v16, 7  ;;  %v4078_v35 = vshrl.u32 %v8354_v42, 16  ;;  %v8357_v3 = vpack.c.bf16 %v3892_v53, %v3892_v53  ;;  %v3890_v20 = vmax.f32 %v3790_v39, 0.0  ;;  %v4362_v53 = vld [vmem:[#allocation3 + $0x3c] sm:$0xf]  ;;  %8413 = vmatpush3.bf16.msra.mxu0 %v8739_v27  ;;  %8617 = vmatpush3.bf16.msra.mxu1 %v8739_v27 }
 0x222   : > { %v4081_v16 = vshll.u32 %v8354_v42, 16  ;;  %v11185_v1 = vrot.slane %v4576_v2, 5  ;;  %8566 = vmatprep.subr.bf16.mxu0 %v8740_v29 }
 0x223   : > { %v4100_v63 = vor.u32 %v4098_v55, %v4097_v14  ;;  %v4080_v37 = vrot.slane %v4078_v35, 7  ;;  %v4103_v23 = vshrl.u32 %v8357_v3, 16  ;;  %v8355_v39 = vpack.c.bf16 %v3890_v20, %v3890_v20  ;;  %v4373_v55 = vld [vmem:[#allocation3 + $0x50] sm:$0x1]  ;;  %v5697_v35 = vld [vmem:[#allocation3 + $0x38] sm:$0x1] }
 0x224   : > { %v4106_v31 = vshll.u32 %v8357_v3, 16  ;;  %v4572_v20 = vrot.slane %v4570_v28, 5  ;;  %v4101_v56 = vrot.slane %v4097_v14, 4  ;;  %v4366_v14 = vld [vmem:[#allocation3 + $0x44] sm:$0x1]  ;;  %v4583_v29 = vor.u32 %v4582_v60, %v11185_v1 }
 0x225   : > { %v4370_v26 = vsel %vm10776_vm13, %v4100_v63, %v4369_v8  ;;  %v4083_v32 = vor.u32 %v4081_v16, %v4080_v37  ;;  %v4105_v7 = vrot.slane %v4103_v23, 7  ;;  %v4086_v42 = vshrl.u32 %v8355_v39, 16 }
 0x226   : > { %4371 = vst [vmem:[#allocation3 + $0x48] sm:$0xf] %v4370_v26  ;;  %v4089_v3 = vshll.u32 %v8355_v39, 16  ;;  %v11189_v16 = vrot.slane %v5745_v52, 5  ;;  %v13139_v26 = vshrl.u32 %v10996_v9, 16  ;;  %v4608_v23 = vrot.slane %v4607_v6, 4 }
 0x227   : > { %v4363_v24 = vsel %vm10776_vm13, %v4083_v32, %v4362_v53  ;;  %v4108_v51 = vor.u32 %v4106_v31, %v4105_v7  ;;  %v4110_v8 = vrot.slane %v4105_v7, 4  ;;  %v4088_v63 = vrot.slane %v4086_v42, 7  ;;  %v11202_v42 = vld [vmem:[#allocation3 + $0x2c] sm:$0x1] }
 0x228   : > { %4364 = vst [vmem:[#allocation3 + $0x3c] sm:$0xf] %v4363_v24  ;;  %v5751_v27 = vrot.slane %v13139_v26, 4  ;;  %v4597_v32 = vor.u32 %v11148_v62, %v11146_v61  ;;  %v5779_v31 = vshll.u32 %v5697_v35, 16  ;;  %v4084_v7 = vrot.slane %v4080_v37, 4 }
 0x229   : > { %v4109_v28 = vsel %vm9138_vm12, %v4101_v56, %v4108_v51  ;;  %v4374_v2 = vsel %vm10786_vm6, %v4110_v8, %v4373_v55  ;;  %v4091_v52 = vor.u32 %v4089_v3, %v4088_v63  ;;  %v4093_v0 = vrot.slane %v4088_v63, 4 }
 0x22a   : > { %4372 = vst.msk [vmem:[#allocation3 + $0x4c] sm:$0xf] %vm280_vm0, %v4109_v28  ;;  %4375 = vst [vmem:[#allocation3 + $0x50] sm:$0x1] %v4374_v2  ;;  %v5777_v53 = vrot.slane %v5776_v48, 4  ;;  %v4573_v39 = vor.u32 %v4572_v20, %v4569_v19  ;;  %v4586_v51 = vshll.u32 %v11048_v49, 16  ;;  %v5742_v62 = vor.u32 %v11137_v11, %v11118_v12 }
 0x22b   : > { %v4092_v55 = vsel %vm9138_vm12, %v4084_v7, %v4091_v52  ;;  %v4367_v61 = vsel %vm10786_vm6, %v4093_v0, %v4366_v14  ;;  %v5752_v37 = vor.u32 %v5751_v27, %v11189_v16  ;;  %v13140_v35 = vshll.u32 %v10951_v13, 16 }
 0x22c   : > { %4365 = vst.msk [vmem:[#allocation3 + $0x40] sm:$0xf] %vm280_vm0, %v4092_v55  ;;  %4368 = vst [vmem:[#allocation3 + $0x44] sm:$0x1] %v4367_v61  ;;  %v4598_v49 = vrot.slane %v4597_v32, 4  ;;  %v13141_v48 = vshll.u32 %v11022_v21, 16  ;;  %v13142_v20 = vor.u32 %v11082_v15, %v11078_v58  ;;  %v5133_v52 = vor.u32 %v10994_v59, %v10976_v57 }
 0x22d   : > { %v11213_v6 = vrot.slane %v13140_v35, 5  ;;  %v13143_v56 = vshrl.u32 %v11010_v18, 16  ;;  %v5781_v11 = vrot.slane %v5779_v31, 5  ;;  %v4584_v24 = vrot.slane %v4583_v29, 4  ;;  %v5671_v15 = vld [vmem:[#allocation3 + $0x48] sm:$0xf] }
 0x22e   : > { %v4612_v19 = vrot.slane %v13141_v48, 5  ;;  %v5767_v60 = vrot.slane %v13142_v20, 4  ;;  %v5755_v13 = vshll.u32 %v11202_v42, 16  ;;  %v13145_v8 = vshll.u32 %v11010_v18, 16  ;;  %v5064_v32 = vld [vmem:[#allocation3 + $0x48] sm:$0xf] }
 0x22f   : > { %v11223_v12 = vrot.slane %v13143_v56, 4  ;;  %v4574_v3 = vrot.slane %v4573_v39, 4  ;;  %v5782_v26 = vsel %vm9130_vm11, %v5777_v53, %v5781_v11  ;;  %v4588_v27 = vrot.slane %v4586_v51, 5  ;;  %v4884_v48 = vld [vmem:[#allocation3 + $0x48] sm:$0xe]  ;;  %v13149_v58 = vld [vmem:[#allocation14_spill] sm:$0xff] }
 0x230   : > { %v11228_v63 = vrot.slane %v13145_v8, 5  ;;  %v4613_v21 = vsel %vm9130_vm11, %v4608_v23, %v4612_v19  ;;  %v5743_v28 = vrot.slane %v5742_v62, 4  ;;  %v5753_v2 = vrot.slane %v5752_v37, 4  ;;  %v11269_v19 = vld [vmem:[#allocation3 + $0x48] sm:$0xe] }
 0x231   : > { %13144 = vst [vmem:[#allocation17_spill] sm:$0xff] %v11223_v12  ;;  %v11236_v14 = vld [vmem:[#allocation3 + $0x4c] sm:$0xf]  ;;  %v4603_v31 = vsel %vm9130_vm11, %v4598_v49, %v11150_v43  ;;  %v5772_v7 = vsel %vm9130_vm11, %v5767_v60, %v11163_v22  ;;  %v4589_v53 = vsel %vm9130_vm11, %v4584_v24, %v4588_v27  ;;  %v5757_v39 = vrot.slane %v5755_v13, 5  ;;  %v11277_v8 = vld [vmem:[#allocation3 + $0x3c] sm:$0xf] }
 0x232   : > { %13146 = vst [vmem:[#allocation18_spill] sm:$0xff] %v11228_v63  ;;  %v11238_v18 = vld [vmem:[#allocation3 + $0x4c] sm:$0xf]  ;;  %v8261_v29 = vcombine.low %v5671_v15, %v11236_v14  ;;  %v8181_v51 = vcombine.low %v4603_v31, %v4613_v21  ;;  %v8275_v55 = vcombine.low %v5772_v7, %v5782_v26  ;;  %v4579_v22 = vsel %vm9130_vm11, %v4574_v3, %v11185_v1  ;;  %v5490_v27 = vld [vmem:[#allocation3 + $0x3c] sm:$0xe] }
 0x233   : > { %v8214_v23 = vcombine.low %v5064_v32, %v11238_v18  ;;  %v5808_v57 = vshrl.u32 %v5671_v15, 16  ;;  %v5758_v59 = vsel %vm9130_vm11, %v5753_v2, %v5757_v39  ;;  %v11263_v62 = vld [vmem:[#allocation3 + $0x4c] sm:$0xf]  ;;  %v5136_v37 = vshll.u32 %v10816_v54, 16  ;;  %v11273_v11 = vld [vmem:[#allocation3 + $0x40] sm:$0xf] }
 0x234   : > { %6791 = vrot.lane.b32.xlu0 %v8261_v29, %s8913_s8  ;;  %v5811_v35 = vshll.u32 %v5671_v15, 16  ;;  %v8180_v49 = vcombine.low %v4579_v22, %v4589_v53  ;;  %v5748_v1 = vsel %vm9130_vm11, %v5743_v28, %v11189_v16  ;;  %v11271_v20 = vrot.slane %v5133_v52, 4  ;;  %v11279_v21 = vld [vmem:[#allocation3 + $0x40] sm:$0xf]  ;;  %v11291_v2 = vld [vmem:[#allocation3 + $0x3c] sm:$0xf] }
 0x235   : > { %6569 = vrot.lane.b32.xlu1 %v8214_v23, %s8914_s12  ;;  %v5223_v60 = vshrl.u32 %v5064_v32, 16  ;;  %v5226_v56 = vshll.u32 %v5064_v32, 16  ;;  %v11281_v3 = vld [vmem:[#allocation3 + $0x40] sm:$0xf]  ;;  %v8274_v16 = vcombine.low %v5748_v1, %v5758_v59  ;;  %v4986_v15 = vrot.slane %v11263_v62, 5 }
 0x236   : > { %v5587_v26 = vrot.slane %v11238_v18, 5  ;;  %v11287_v28 = vrot.slane %v5808_v57, 4  ;;  %v8119_v32 = vrot.slane %v4884_v48, 9  ;;  %v8134_v31 = vrot.slane %v11269_v19, 9  ;;  %v11298_v18 = vld [vmem:[#allocation3 + $0x50] sm:$0x1] }
 0x237   : > { %v6384_v7 = vpop.permute.xlu1 %6383  ;;  %v11294_v52 = vrot.slane %v5136_v37, 5  ;;  %v11296_v29 = vrot.slane %v5811_v35, 5  ;;  %v5091_v23 = vld [vmem:[#allocation3 + $0x50] sm:$0x1]  ;;  %v4979_v53 = vrot.slane %v11273_v11, 5  ;;  %v13147_v39 = vcombine.low %v10709_v10, %v10713_v33 }
 0x238   : > { %6867 = vrot.lane.b32.xlu0 %v8275_v55, %s8914_s12  ;;  %v11309_v22 = vrot.slane %v5223_v60, 4  ;;  %v11311_v57 = vrot.slane %v5226_v56, 5  ;;  %v8213_v59 = vcombine.low %v11277_v8, %v11279_v21  ;;  %v8260_v37 = vcombine.low %v11291_v2, %v11281_v3  ;;  %v4883_v33 = vld [vmem:[#allocation3 + $0x3c] sm:$0xe]  ;;  %v11322_v56 = vld [vmem:[#allocation3 + $0x44] sm:$0x1] }
 0x239   : > { %6391 = vrot.lane.b32.xlu1 %v8181_v51, %s8910_s15  ;;  %v11305_v51 = vsel %vm3623_vm2, %v13147_v39, %v6384_v7  ;;  %v5821_v35 = vshrl.u32 %v11236_v14, 16  ;;  %v4988_v1 = vrot.slane %v4986_v15, 4  ;;  %v5589_v10 = vrot.slane %v5587_v26, 4  ;;  %v5090_v7 = vld [vmem:[#allocation3 + $0x44] sm:$0x1] }
 0x23a   : > { %13148 = vst [vmem:[#allocation19_spill] sm:$0xff] %v11309_v22  ;;  %v5580_v48 = vrot.slane %v11279_v21, 5  ;;  %v4989_v19 = vrot.slane %v11298_v18, 5  ;;  %v5590_v60 = vrot.slane %v5091_v23, 5  ;;  %v4981_v55 = vrot.slane %v4979_v53, 4 }
 0x23b   : > { %v5817_v21 = vshll.u32 %v11236_v14, 16  ;;  %v5199_v61 = vshrl.u32 %v11277_v8, 16  ;;  %v5202_v39 = vshll.u32 %v11277_v8, 16  ;;  %v4987_v0 = vsel %vm9110_vm7, %v8119_v32, %v4986_v15  ;;  %v4429_v22 = vld [vmem:[#allocation3 + $0xb0] sm:$0x1] }
 0x23c   : > { %6789 = vrot.lane.b32.xlu0 %v8260_v37, %s8913_s8  ;;  %v8118_v13 = vrot.slane %v4883_v33, 9  ;;  %v4990_v14 = vsel %vm9110_vm7, %v4988_v1, %v4989_v19  ;;  %v5591_v24 = vsel %vm9110_vm7, %v5589_v10, %v5590_v60  ;;  %v4982_v34 = vrot.slane %v11322_v56, 5 }
 0x23d   : > { %6567 = vrot.lane.b32.xlu1 %v8213_v59, %s8914_s12  ;;  %v4458_v59 = vld [vmem:[#allocation3 + $0x48] sm:$0xf]  ;;  %v5582_v23 = vrot.slane %v5580_v48, 4  ;;  %v5588_v8 = vsel %vm9110_vm7, %v8134_v31, %v5587_v26  ;;  %v8133_v37 = vrot.slane %v5490_v27, 9  ;;  %v5583_v17 = vrot.slane %v5090_v7, 5 }
 0x23e   : > { %v4639_v15 = vshrl.u32 %v4458_v59, 16  ;;  %v4983_v32 = vsel %vm9110_vm7, %v4981_v55, %v4982_v34  ;;  %v11350_v1 = vrot.slane %v5817_v21, 5  ;;  %v5823_v33 = vrot.slane %v5821_v35, 4  ;;  %v5699_v31 = vld [vmem:[#allocation3 + $0x50] sm:$0x1] }
 0x23f   : > { %v4642_v10 = vshll.u32 %v4458_v59, 16  ;;  %v8199_v19 = vcombine.low %v4987_v0, %v4990_v14  ;;  %v8246_v60 = vcombine.low %v5588_v8, %v5591_v24  ;;  %v4648_v4 = vshll.u32 %v11263_v62, 16 }
 0x240   : > { %6865 = vrot.lane.b32.xlu0 %v8274_v16, %s8914_s12  ;;  %v4456_v16 = vld [vmem:[#allocation3 + $0x3c] sm:$0xf]  ;;  %v5784_v45 = vshrl.u32 %v11291_v2, 16  ;;  %v5787_v26 = vshll.u32 %v11291_v2, 16  ;;  %v4980_v27 = vsel %vm9110_vm7, %v8118_v13, %v4979_v53  ;;  %v5584_v34 = vsel %vm9110_vm7, %v5582_v23, %v5583_v17  ;;  %v6464_v23 = vpop.permute.xlu1 %6463 }
 0x241   : > { %6389 = vrot.lane.b32.xlu1 %v8180_v49, %s8910_s15  ;;  %v4652_v49 = vshrl.u32 %v11263_v62, 16  ;;  %v8198_v0 = vcombine.low %v4980_v27, %v4983_v32  ;;  %v5581_v62 = vsel %vm9110_vm7, %v8133_v37, %v5580_v48  ;;  %v5814_v24 = vor.u32 %v11296_v29, %v11287_v28 }
 0x242   : > { %v4641_v55 = vrot.slane %v4639_v15, 4  ;;  %v5824_v2 = vor.u32 %v5823_v33, %v11350_v1  ;;  %v4644_v35 = vrot.slane %v4642_v10, 5  ;;  %v4615_v13 = vshrl.u32 %v4456_v16, 16 }
 0x243   : > { %v4618_v53 = vshll.u32 %v4456_v16, 16  ;;  %v8245_v7 = vcombine.low %v5581_v62, %v5584_v34  ;;  %v5827_v17 = vshll.u32 %v5699_v31, 16  ;;  %v11367_v21 = vrot.slane %v4648_v4, 5 }
 0x244   : > { %6697 = vrot.lane.b32.xlu0 %v8246_v60, %s8910_s15  ;;  %v4654_v59 = vrot.slane %v4652_v49, 4  ;;  %v11369_v14 = vrot.slane %v5199_v61, 4  ;;  %v4624_v8 = vshll.u32 %v11273_v11, 16  ;;  %v4628_v48 = vshrl.u32 %v11273_v11, 16 }
 0x245   : > { %6475 = vrot.lane.b32.xlu1 %v8199_v19, %s8913_s8  ;;  %v11375_v28 = vsel %vm6991_vm1, %v11305_v51, %v6464_v23  ;;  %v11377_v29 = vrot.slane %v5202_v39, 5  ;;  %v11379_v37 = vrot.slane %v5784_v45, 4  ;;  %v11383_v4 = vrot.slane %v5814_v24, 4  ;;  %v11391_v51 = vld [vmem:[%s13071_s2] ss:$0 sm:$0xff] }
 0x246   : > { %13151 = vst [vmem:[#allocation14_spill] sm:$0xff] %v11369_v14  ;;  %v4658_v61 = vshll.u32 %v11298_v18, 16  ;;  %v11386_v32 = vrot.slane %v5824_v2, 4  ;;  %v4645_v11 = vor.u32 %v4644_v35, %v4641_v55  ;;  %v4617_v33 = vrot.slane %v4615_v13, 4  ;;  %v8781_v2 = vld [vmem:[#allocation3 + $0x10] sm:$0xf] }
 0x247   : > { %13152 = vst [vmem:[#allocation7_spill] sm:$0xff] %v11377_v29  ;;  %v4620_v10 = vrot.slane %v4618_v53, 5  ;;  %v11394_v39 = vrot.slane %v5787_v26, 5  ;;  %v11396_v19 = vrot.slane %v5827_v17, 5  ;;  %v4655_v60 = vor.u32 %v4654_v59, %v11367_v21  ;;  %v11421_v59 = vld [vmem:[#allocation3 + $0x44] sm:$0x1] }
 0x248   : > { %6695 = vrot.lane.b32.xlu0 %v8245_v7, %s8910_s15  ;;  %v11399_v49 = vrot.slane %v4624_v8, 5  ;;  %v4630_v16 = vrot.slane %v4628_v48, 4  ;;  %v4634_v27 = vshll.u32 %v11322_v56, 16  ;;  %v13153_v34 = vshrl.u32 %v10816_v54, 16 }
 0x249   : > { %6473 = vrot.lane.b32.xlu1 %v8198_v0, %s8913_s8  ;;  %v8548_v15 = vpop.f32.mrf.mxu0  ;;  %v5797_v24 = vshrl.u32 %v11281_v3, 16  ;;  %v11414_v56 = vrot.slane %v4645_v11, 4  ;;  %v11416_v54 = vrot.slane %v4658_v61, 5  ;;  %v4621_v35 = vor.u32 %v4620_v10, %v4617_v33 }
 0x24a   : > { %v3811_v45 = vadd.f32 %v11391_v51, %v8548_v15  ;;  %v5142_v31 = vrot.slane %v13153_v34, 4  ;;  %v11419_v17 = vrot.slane %v4655_v60, 4  ;;  %v4631_v8 = vor.u32 %v4630_v16, %v11399_v49  ;;  %v4383_v15 = vld [vmem:[#allocation3 + $0x60] sm:$0xf] }
 0x24b   : > { %v3802_v18 = vpop.f32.mrf.mxu0  ;;  %v11424_v48 = vrot.slane %v4634_v27, 5  ;;  %v11433_v34 = vrot.slane %v5797_v24, 4 }
 0x24c   : > { %v3895_v0 = vmax.f32 %v3811_v45, 0.0  ;;  %v3803_v62 = vadd.f32 %v11391_v51, %v3802_v18  ;;  %v5143_v61 = vor.u32 %v5142_v31, %v11294_v52  ;;  %v5793_v45 = vshll.u32 %v11281_v3, 16 }
 0x24d   : > { %v8549_v55 = vpop.f32.mrf.mxu0  ;;  %v11431_v18 = vrot.slane %v4621_v35, 4  ;;  %v4376_v35 = vld [vmem:[#allocation3 + $0x54] sm:$0xf]  ;;  %v11436_v24 = vrot.slane %v4631_v8, 4 }
 0x24e   : > { %v8360_v13 = vpack.c.bf16 %v3895_v0, %v3895_v0  ;;  %v3893_v53 = vmax.f32 %v3803_v62, 0.0  ;;  %v3814_v7 = vadd.f32 %v11391_v51, %v8549_v55  ;;  %v5144_v31 = vrot.slane %v5143_v61, 4 }
 0x24f   : > { %v3805_v23 = vpop.f32.mrf.mxu0  ;;  %v11438_v63 = vrot.slane %v5793_v45, 5 }
 0x250   : > { %v4129_v11 = vshrl.u32 %v8360_v13, 16  ;;  %v8358_v33 = vpack.c.bf16 %v3893_v53, %v3893_v53  ;;  %v3896_v10 = vmax.f32 %v3814_v7, 0.0  ;;  %v3806_v60 = vadd.f32 %v11391_v51, %v3805_v23 }
 0x251   : > { %v4132_v0 = vshll.u32 %v8360_v13, 16  ;;  %v5112_v53 = vshll.u32 %v8781_v2, 16  ;;  %v5116_v7 = vshrl.u32 %v8781_v2, 16  ;;  %v13154_v13 = vshll.u32 %v10826_v46, 16  ;;  %v4387_v2 = vld [vmem:[#allocation3 + $0x68] sm:$0x1] }
 0x252   : > { %v4131_v27 = vrot.slane %v4129_v11, 7  ;;  %v4112_v62 = vshrl.u32 %v8358_v33, 16  ;;  %v8361_v55 = vpack.c.bf16 %v3896_v10, %v3896_v10  ;;  %v3894_v26 = vmax.f32 %v3806_v60, 0.0 }
 0x253   : > { %v4115_v30 = vshll.u32 %v8358_v33, 16  ;;  %v5148_v11 = vrot.slane %v13154_v13, 5  ;;  %v11448_v8 = vrot.slane %v5112_v53, 5  ;;  %v5118_v45 = vrot.slane %v5116_v7, 4 }
 0x254   : > { %v4134_v41 = vor.u32 %v4132_v0, %v4131_v27  ;;  %v4114_v3 = vrot.slane %v4112_v62, 7  ;;  %v4137_v23 = vshrl.u32 %v8361_v55, 16  ;;  %v8359_v12 = vpack.c.bf16 %v3894_v26, %v3894_v26  ;;  %v6096_v62 = vld [vmem:[#allocation3 + $0x24] sm:$0xe] }
 0x255   : > { %v4140_v16 = vshll.u32 %v8361_v55, 16  ;;  %v5149_v26 = vsel %vm9130_vm11, %v5144_v31, %v5148_v11  ;;  %v4135_v46 = vrot.slane %v4131_v27, 4  ;;  %v4380_v27 = vld [vmem:[#allocation3 + $0x5c] sm:$0x1]  ;;  %v8146_v7 = vrot.slane %v6096_v62, 9 }
 0x256   : > { %v4384_v10 = vsel %vm10776_vm13, %v4134_v41, %v4383_v15  ;;  %v4117_v61 = vor.u32 %v4115_v30, %v4114_v3  ;;  %v4139_v60 = vrot.slane %v4137_v23, 7  ;;  %v4120_v0 = vshrl.u32 %v8359_v12, 16 }
 0x257   : > { %4385 = vst [vmem:[#allocation3 + $0x60] sm:$0xf] %v4384_v10  ;;  %v11444_v33 = vpop.permute.xlu0 %6783  ;;  %v4123_v55 = vshll.u32 %v8359_v12, 16  ;;  %v5800_v23 = vor.u32 %v11433_v34, %v11438_v63  ;;  %v8782_v10 = vld [vmem:[#allocation3 + $0x14] sm:$0x1]  ;;  %v4118_v11 = vrot.slane %v4114_v3, 4  ;;  %v13156_v34 = vsel %vm9130_vm11, %v11271_v20, %v11294_v52 }
 0x258   : > { %v4377_v13 = vsel %vm10776_vm13, %v4117_v61, %v4376_v35  ;;  %v4142_v41 = vor.u32 %v4140_v16, %v4139_v60  ;;  %v4144_v30 = vrot.slane %v4139_v60, 4  ;;  %v4122_v15 = vrot.slane %v4120_v0, 7 }
 0x259   : > { %4378 = vst [vmem:[#allocation3 + $0x54] sm:$0xf] %v4377_v13  ;;  %v5122_v25 = vshll.u32 %v8782_v10, 16  ;;  %v13155_v35 = vrot.slane %v10996_v9, 5  ;;  %v8226_v60 = vcombine.low %v13156_v34, %v5149_v26  ;;  %v11489_v9 = vld [vmem:[#allocation3 + $0x18] sm:$0xe] }
 0x25a   : > { %v4143_v31 = vsel %vm9138_vm12, %v4135_v46, %v4142_v41  ;;  %v4388_v53 = vsel %vm10786_vm6, %v4144_v30, %v4387_v2  ;;  %v4125_v12 = vor.u32 %v4123_v55, %v4122_v15  ;;  %v4127_v61 = vrot.slane %v4122_v15, 4  ;;  %v11467_v46 = vld [vmem:[#allocation3 + $0x1c] sm:$0xf] }
 0x25b   : > { %v6170_v16 = vrot.slane %v13155_v35, 4  ;;  %4386 = vst.msk [vmem:[#allocation3 + $0x64] sm:$0xf] %vm280_vm0, %v4143_v31  ;;  %4389 = vst [vmem:[#allocation3 + $0x68] sm:$0x1] %v4388_v53  ;;  %v6690_v0 = vpop.permute.xlu0 %6689  ;;  %v5119_v2 = vor.u32 %v5118_v45, %v11448_v8  ;;  %v13091_v62 = vrot.slane %v11467_v46, 5  ;;  %v13157_v3 = vmov %v13155_v35 }
 0x25c   : > { %v11474_v13 = vsel %vm9110_vm7, %v8146_v7, %v13157_v3  ;;  %v13159_v41 = vrot.slane %v11202_v42, 5  ;;  %v4126_v20 = vsel %vm9138_vm12, %v4118_v11, %v4125_v12  ;;  %v4381_v52 = vsel %vm10786_vm6, %v4127_v61, %v4380_v27 }
 0x25d   : > { %13158 = vst [vmem:[#allocation20_spill] sm:$0xff] %v11474_v13  ;;  %v11487_v26 = vsel %vm3623_vm2, %v8226_v60, %v6690_v0  ;;  %4379 = vst.msk [vmem:[#allocation3 + $0x58] sm:$0xf] %vm280_vm0, %v4126_v20  ;;  %v13162_v15 = vsel %vm9130_vm11, %v11386_v32, %v11396_v19  ;;  %v13163_v55 = vsel %vm9130_vm11, %v11383_v4, %v11350_v1  ;;  %v5801_v7 = vrot.slane %v5800_v23, 4  ;;  %v4390_v13 = vld [vmem:[#allocation3 + $0x6c] sm:$0xf] }
 0x25e   : > { %v11480_v30 = vsel %vm9110_vm7, %v6170_v16, %v13159_v41  ;;  %13161 = vst [vmem:[#allocation22_spill] sm:$0xff] %v11487_v26  ;;  %4382 = vst [vmem:[#allocation3 + $0x5c] sm:$0x1] %v4381_v52  ;;  %v5675_v42 = vld [vmem:[#allocation3 + $0x60] sm:$0xf]  ;;  %v11504_v10 = vcombine.low %v13163_v55, %v13162_v15  ;;  %v4661_v31 = vsel %vm9130_vm11, %v11419_v17, %v11416_v54  ;;  %v13165_v1 = vshll.u32 %v11421_v59, 16 }
 0x25f   : > { %13160 = vst [vmem:[#allocation21_spill] sm:$0xff] %v11480_v30  ;;  %v13164_v53 = vor.u32 %v11394_v39, %v11379_v37  ;;  %v5856_v35 = vshrl.u32 %v5675_v42, 16  ;;  %v5859_v16 = vshll.u32 %v5675_v42, 16  ;;  %v4637_v32 = vsel %vm9130_vm11, %v11436_v24, %v11424_v48  ;;  %v11529_v17 = vld [vmem:[#allocation3 + $0x60] sm:$0xf] }
 0x260   : > { %v5805_v4 = vrot.slane %v13165_v1, 5  ;;  %v13166_v19 = vor.u32 %v11061_v38, %v11005_v50  ;;  %v11524_v54 = vrot.slane %v5119_v2, 4  ;;  %v11526_v37 = vrot.slane %v5122_v25, 5  ;;  %v4886_v38 = vld [vmem:[#allocation3 + $0x60] sm:$0xe] }
 0x261   : > { %v5791_v27 = vrot.slane %v13164_v53, 4  ;;  %v4651_v48 = vsel %vm9130_vm11, %v11414_v56, %v11367_v21  ;;  %v4627_v50 = vsel %vm9130_vm11, %v11431_v18, %v11399_v49  ;;  %v6163_v59 = vrot.slane %v13091_v62, 4  ;;  %v8784_v25 = vld [vmem:[#allocation3 + $0x20] sm:$0x1]  ;;  %v5493_v49 = vld [vmem:[#allocation3 + $0x60] sm:$0xe] }
 0x262   : > { %v11522_v11 = vrot.slane %v13166_v19, 4  ;;  %v6164_v24 = vrot.slane %v8784_v25, 5  ;;  %v11541_v23 = vld [vmem:[#allocation3 + $0x64] sm:$0xf]  ;;  %v8183_v61 = vcombine.low %v4651_v48, %v4661_v31  ;;  %v11543_v34 = vcombine.low %v4627_v50, %v4637_v32  ;;  %v11556_v3 = vld [vmem:[#allocation3 + $0x54] sm:$0xf] }
 0x263   : > { %v5069_v12 = vld [vmem:[#allocation3 + $0x64] sm:$0xf]  ;;  %v5796_v21 = vsel %vm9130_vm11, %v5791_v27, %v11438_v63  ;;  %v5806_v56 = vsel %vm9130_vm11, %v5801_v7, %v5805_v4  ;;  %v11550_v18 = vrot.slane %v5856_v35, 4  ;;  %v11552_v60 = vrot.slane %v5859_v16, 5  ;;  %v11560_v20 = vld [vmem:[#allocation3 + $0x68] sm:$0x1] }
 0x264   : > { %v8263_v0 = vcombine.low %v5675_v42, %v11541_v23  ;;  %v8216_v2 = vcombine.low %v11529_v17, %v5069_v12  ;;  %v11558_v41 = vld [vmem:[#allocation3 + $0x64] sm:$0xf]  ;;  %v13167_v52 = vor.u32 %v11213_v6, %v13149_v58  ;;  %v11568_v55 = vld [vmem:[#allocation3 + $0x34] sm:$0xf]  ;;  %v8552_v53 = vpop.f32.mrf.mxu0  ;;  %v11574_v27 = vld [vmem:[#allocation3 + $0x58] sm:$0xf]  ;;  %v11578_v35 = vcombine.low %v5796_v21, %v5806_v56 }
 0x265   : > { %v5000_v63 = vrot.slane %v11558_v41, 5  ;;  %v11576_v7 = vld [vmem:[#allocation3 + $0x58] sm:$0xf]  ;;  %v8121_v6 = vrot.slane %v4886_v38, 9  ;;  %v8136_v58 = vrot.slane %v5493_v49, 9  ;;  %v3827_v1 = vadd.f32 %v11391_v51, %v8552_v53 }
 0x266   : > { %v11566_v15 = vrot.slane %v13167_v52, 4  ;;  %6795 = vrot.lane.b32.xlu0 %v8263_v0, %s8913_s8  ;;  %6573 = vrot.lane.b32.xlu1 %v8216_v2, %s8914_s12  ;;  %v5093_v19 = vld [vmem:[#allocation3 + $0x68] sm:$0x1]  ;;  %v11587_v48 = vld [vmem:[#allocation3 + $0x58] sm:$0xf]  ;;  %v11591_v50 = vsel %vm9110_vm7, %v6163_v59, %v6164_v24  ;;  %v3818_v38 = vpop.f32.mrf.mxu0  ;;  %v5003_v56 = vrot.slane %v11560_v20, 5  ;;  %v8262_v53 = vcombine.low %v11556_v3, %v11574_v27 }
 0x267   : > { %v11593_v25 = vld [vmem:[#allocation3 + $0x54] sm:$0xf]  ;;  %v5002_v21 = vrot.slane %v5000_v63, 4  ;;  %v5601_v49 = vrot.slane %v5069_v12, 5  ;;  %v3899_v2 = vmax.f32 %v3827_v1, 0.0  ;;  %v3819_v52 = vadd.f32 %v11391_v51, %v3818_v38 }
 0x268   : > { %v8215_v59 = vcombine.low %v11593_v25, %v11576_v7  ;;  %v4885_v24 = vld [vmem:[#allocation3 + $0x54] sm:$0xe]  ;;  %v8553_v45 = vpop.f32.mrf.mxu0  ;;  %v11608_v12 = vsel %vm9110_vm7, %v8121_v6, %v5000_v63  ;;  %v5604_v16 = vrot.slane %v5093_v19, 5  ;;  %v11610_v38 = vld [vmem:[#allocation3 + $0x5c] sm:$0x1]  ;;  %v4993_v39 = vrot.slane %v11587_v48, 5 }
 0x269   : > { %v5603_v1 = vrot.slane %v5601_v49, 4  ;;  %v8364_v62 = vpack.c.bf16 %v3899_v2, %v3899_v2  ;;  %v3897_v0 = vmax.f32 %v3819_v52, 0.0  ;;  %v3830_v4 = vadd.f32 %v11391_v51, %v8553_v45  ;;  %v5492_v52 = vld [vmem:[#allocation3 + $0x54] sm:$0xe] }
 0x26a   : > { %6871 = vrot.lane.b32.xlu0 %v11504_v10, %s8914_s12  ;;  %6395 = vrot.lane.b32.xlu1 %v8183_v61, %s8910_s15  ;;  %v5004_v10 = vsel %vm9110_vm7, %v5002_v21, %v5003_v56  ;;  %v3821_v42 = vpop.f32.mrf.mxu0  ;;  %v5602_v61 = vsel %vm9110_vm7, %v8136_v58, %v5601_v49  ;;  %v8120_v6 = vrot.slane %v4885_v24, 9  ;;  %v4995_v19 = vrot.slane %v4993_v39, 4 }
 0x26b   : > { %v5605_v63 = vsel %vm9110_vm7, %v5603_v1, %v5604_v16  ;;  %v4163_v31 = vshrl.u32 %v8364_v62, 16  ;;  %v8362_v32 = vpack.c.bf16 %v3897_v0, %v3897_v0  ;;  %v3900_v26 = vmax.f32 %v3830_v4, 0.0  ;;  %v5092_v0 = vld [vmem:[#allocation3 + $0x5c] sm:$0x1] }
 0x26c   : > { %v4996_v2 = vrot.slane %v11610_v38, 5  ;;  %v4166_v40 = vshll.u32 %v8364_v62, 16  ;;  %v3822_v45 = vadd.f32 %v11391_v51, %v3821_v42  ;;  %v8201_v58 = vcombine.low %v11608_v12, %v5004_v10  ;;  %v4397_v62 = vld [vmem:[#allocation3 + $0x78] sm:$0xf] }
 0x26d   : > { %v11627_v16 = vsel %vm9110_vm7, %v8120_v6, %v4993_v39  ;;  %v4165_v21 = vrot.slane %v4163_v31, 7  ;;  %v4146_v56 = vshrl.u32 %v8362_v32, 16  ;;  %v8365_v49 = vpack.c.bf16 %v3900_v26, %v3900_v26 }
 0x26e   : > { %6793 = vrot.lane.b32.xlu0 %v8262_v53, %s8913_s8  ;;  %6571 = vrot.lane.b32.xlu1 %v8215_v59, %s8914_s12  ;;  %v4997_v4 = vsel %vm9110_vm7, %v4995_v19, %v4996_v2  ;;  %v3898_v24 = vmax.f32 %v3822_v45, 0.0  ;;  %v8248_v53 = vcombine.low %v5602_v61, %v5605_v63  ;;  %v8135_v1 = vrot.slane %v5492_v52, 9  ;;  %v4462_v45 = vld [vmem:[#allocation3 + $0x60] sm:$0xf] }
 0x26f   : > { %v5594_v59 = vrot.slane %v11576_v7, 5  ;;  %v4168_v42 = vor.u32 %v4166_v40, %v4165_v21  ;;  %v4148_v30 = vrot.slane %v4146_v56, 7  ;;  %v4149_v12 = vshll.u32 %v8362_v32, 16  ;;  %v4401_v32 = vld [vmem:[#allocation3 + $0x80] sm:$0x1] }
 0x270   : > { %v4171_v10 = vshrl.u32 %v8365_v49, 16  ;;  %v8363_v39 = vpack.c.bf16 %v3898_v24, %v3898_v24  ;;  %v8200_v26 = vcombine.low %v11627_v16, %v4997_v4  ;;  %v5597_v6 = vrot.slane %v5092_v0, 5 }
 0x271   : > { %v5596_v31 = vrot.slane %v5594_v59, 4  ;;  %v4398_v61 = vsel %vm10776_vm13, %v4168_v42, %v4397_v62  ;;  %v4151_v7 = vor.u32 %v4149_v12, %v4148_v30  ;;  %v4174_v63 = vshll.u32 %v8365_v49, 16 }
 0x272   : > { %6393 = vrot.lane.b32.xlu1 %v11543_v34, %s8910_s15  ;;  %6869 = vrot.lane.b32.xlu0 %v11578_v35, %s8914_s12  ;;  %v4173_v40 = vrot.slane %v4171_v10, 7  ;;  %v4169_v19 = vrot.slane %v4165_v21, 4  ;;  %4399 = vst [vmem:[#allocation3 + $0x78] sm:$0xf] %v4398_v61  ;;  %v4152_v2 = vrot.slane %v4148_v30, 4  ;;  %v4154_v52 = vshrl.u32 %v8363_v39, 16 }
 0x273   : > { %v5595_v34 = vsel %vm9110_vm7, %v8135_v1, %v5594_v59  ;;  %v4391_v35 = vsel %vm10776_vm13, %v4151_v7, %v4390_v13  ;;  %v5598_v4 = vsel %vm9110_vm7, %v5596_v31, %v5597_v6  ;;  %v4157_v49 = vshll.u32 %v8363_v39, 16  ;;  %v4394_v1 = vld [vmem:[#allocation3 + $0x74] sm:$0x1]  ;;  %v11654_v59 = vld [vmem:[#allocation3 + $0x68] sm:$0x1]  ;;  %v11657_v39 = vpop.permute.xlu1 %6561 }
 0x274   : > { %v4176_v16 = vor.u32 %v4174_v63, %v4173_v40  ;;  %v4178_v56 = vrot.slane %v4173_v40, 4  ;;  %4392 = vst [vmem:[#allocation3 + $0x6c] sm:$0xf] %v4391_v35  ;;  %v4156_v0 = vrot.slane %v4154_v52, 7  ;;  %v5865_v30 = vshll.u32 %v11541_v23, 16 }
 0x275   : > { %v13168_v21 = vshrl.u32 %v11541_v23, 16  ;;  %v4687_v42 = vshrl.u32 %v4462_v45, 16  ;;  %v4690_v12 = vshll.u32 %v4462_v45, 16  ;;  %v8247_v10 = vcombine.low %v5595_v34, %v5598_v4  ;;  %v8786_v4 = vld [vmem:[#allocation3 + $0x38] sm:$0x1] }
 0x276   : > { %6479 = vrot.lane.b32.xlu1 %v8201_v58, %s8913_s8  ;;  %6701 = vrot.lane.b32.xlu0 %v8248_v53, %s8910_s15  ;;  %v4177_v13 = vsel %vm9138_vm12, %v4169_v19, %v4176_v16  ;;  %v4402_v24 = vsel %vm10786_vm6, %v4178_v56, %v4401_v32  ;;  %v4159_v58 = vor.u32 %v4157_v49, %v4156_v0  ;;  %v4161_v53 = vrot.slane %v4156_v0, 4 }
 0x277   : > { %v5871_v62 = vrot.slane %v13168_v21, 4  ;;  %4400 = vst.msk [vmem:[#allocation3 + $0x7c] sm:$0xf] %vm280_vm0, %v4177_v13  ;;  %4403 = vst [vmem:[#allocation3 + $0x80] sm:$0x1] %v4402_v24  ;;  %v5867_v23 = vrot.slane %v5865_v30, 5  ;;  %v13172_v30 = vor.u32 %v11552_v60, %v11550_v18  ;;  %v6560_v24 = vpop.permute.xlu1 %6559 }
 0x278   : > { %v4689_v31 = vrot.slane %v4687_v42, 4  ;;  %v4692_v6 = vrot.slane %v4690_v12, 5  ;;  %v4696_v61 = vshll.u32 %v11558_v41, 16  ;;  %v4700_v7 = vshrl.u32 %v11558_v41, 16 }
 0x279   : > { %v4160_v40 = vsel %vm9138_vm12, %v4152_v2, %v4159_v58  ;;  %v4395_v63 = vsel %vm10786_vm6, %v4161_v53, %v4394_v1  ;;  %v5875_v32 = vshll.u32 %v11654_v59, 16  ;;  %v4706_v19 = vshll.u32 %v11560_v20, 16  ;;  %v11686_v1 = vld [vmem:[#allocation3 + $0x78] sm:$0xf] }
 0x27a   : > { %6477 = vrot.lane.b32.xlu1 %v8200_v26, %s8913_s8  ;;  %6699 = vrot.lane.b32.xlu0 %v8247_v10, %s8910_s15  ;;  %4393 = vst.msk [vmem:[#allocation3 + $0x70] sm:$0xf] %vm280_vm0, %v4160_v40  ;;  %4396 = vst [vmem:[#allocation3 + $0x74] sm:$0x1] %v4395_v63  ;;  %v5872_v52 = vor.u32 %v5871_v62, %v5867_v23  ;;  %v4693_v34 = vor.u32 %v4692_v6, %v4689_v31  ;;  %v4698_v41 = vrot.slane %v4696_v61, 5 }
 0x27b   : > { %v4702_v45 = vrot.slane %v4700_v7, 4  ;;  %v5835_v2 = vshll.u32 %v11556_v3, 16  ;;  %v13169_v35 = vshll.u32 %v11568_v55, 16  ;;  %v13170_v26 = vshrl.u32 %v11568_v55, 16  ;;  %v11688_v42 = vld [vmem:[#allocation3 + $0x78] sm:$0xf] }
 0x27c   : > { %v5194_v0 = vshll.u32 %v8786_v4, 16  ;;  %v13171_v20 = vshrl.u32 %v11556_v3, 16  ;;  %v5863_v21 = vrot.slane %v13172_v30, 4  ;;  %v5873_v62 = vrot.slane %v5872_v52, 4 }
 0x27d   : > { %v11673_v16 = vrot.slane %v13169_v35, 5  ;;  %v11677_v56 = vrot.slane %v13170_v26, 4  ;;  %v4703_v13 = vor.u32 %v4702_v45, %v4698_v41  ;;  %v5115_v55 = vsel %vm9130_vm11, %v11522_v11, %v11448_v8 }
 0x27e   : > { %v11681_v49 = vrot.slane %v13171_v20, 4  ;;  %v5877_v12 = vrot.slane %v5875_v32, 5  ;;  %v4694_v3 = vrot.slane %v4693_v34, 4  ;;  %v13173_v58 = vrot.slane %v11467_v46, 5  ;;  %v11702_v60 = vld [vmem:[#allocation3 + $0x7c] sm:$0xf] }
 0x27f   : > { %v13174_v53 = vrot.slane %v11489_v9, 9  ;;  %v11704_v10 = vld [vmem:[#allocation3 + $0x7c] sm:$0xf]  ;;  %v13175_v31 = vsel %vm9130_vm11, %v11524_v54, %v11526_v37  ;;  %v4704_v11 = vrot.slane %v4703_v13, 4  ;;  %v4708_v6 = vrot.slane %v4706_v19, 5  ;;  %v8556_v32 = vpop.f32.mrf.mxu0 }
 0x280   : > { %v11711_v8 = vcombine.low %v5115_v55, %v13175_v31  ;;  %v5837_v9 = vrot.slane %v5835_v2, 5  ;;  %v8265_v61 = vcombine.low %v11686_v1, %v11702_v60  ;;  %v8218_v7 = vcombine.low %v11688_v42, %v11704_v10  ;;  %v4460_v55 = vld [vmem:[#allocation3 + $0x54] sm:$0xf] }
 0x281   : > { %v11700_v18 = vsel %vm9110_vm7, %v13174_v53, %v13173_v58  ;;  %v5878_v40 = vsel %vm9130_vm11, %v5873_v62, %v5877_v12  ;;  %v5845_v63 = vshrl.u32 %v11574_v27, 16  ;;  %v11724_v54 = vsel %vm7024_vm3, %v11375_v28, %v6560_v24  ;;  %v11737_v28 = vld [vmem:[#allocation3 + $0x5c] sm:$0x1]  ;;  %v3834_v20 = vpop.f32.mrf.mxu0  ;;  %v11746_v30 = vld [vmem:[#allocation3 + $0x70] sm:$0xf] }
 0x282   : > { %v4709_v37 = vsel %vm9130_vm11, %v4704_v11, %v4708_v6  ;;  %6799 = vrot.lane.b32.xlu0 %v8265_v61, %s8913_s8  ;;  %6577 = vrot.lane.b32.xlu1 %v8218_v7, %s8914_s12  ;;  %v5868_v52 = vsel %vm9130_vm11, %v5863_v21, %v5867_v23  ;;  %v3843_v34 = vadd.f32 %v11391_v51, %v8556_v32  ;;  %v11741_v2 = vrot.slane %v5194_v0, 5  ;;  %v11751_v24 = vld [vmem:[#allocation3 + $0x70] sm:$0xf]  ;;  %v11755_v58 = vld [vmem:[#allocation3 + $0x6c] sm:$0xf]  ;;  %v6688_v32 = vpop.permute.xlu0 %6687 }
 0x283   : > { %v8279_v26 = vcombine.low %v5868_v52, %v5878_v40  ;;  %v4699_v4 = vsel %vm9130_vm11, %v4694_v3, %v4698_v41  ;;  %v3835_v13 = vadd.f32 %v11391_v51, %v3834_v20  ;;  %v5838_v0 = vor.u32 %v5837_v9, %v11681_v49  ;;  %v8557_v41 = vpop.f32.mrf.mxu0  ;;  %v11763_v9 = vld [vmem:[#allocation3 + $0x6c] sm:$0xf] }
 0x284   : > { %v8185_v21 = vcombine.low %v4699_v4, %v4709_v37  ;;  %v3903_v62 = vmax.f32 %v3843_v34, 0.0  ;;  %v5841_v3 = vshll.u32 %v11574_v27, 16  ;;  %v5847_v53 = vrot.slane %v5845_v63, 4 }
 0x285   : > { %v5851_v31 = vshll.u32 %v11737_v28, 16  ;;  %v3901_v6 = vmax.f32 %v3835_v13, 0.0  ;;  %v8264_v49 = vcombine.low %v11755_v58, %v11746_v30  ;;  %v3846_v61 = vadd.f32 %v11391_v51, %v8557_v41  ;;  %v3837_v27 = vpop.f32.mrf.mxu0 }
 0x286   : > { %6875 = vrot.lane.b32.xlu0 %v8279_v26, %s8914_s12  ;;  %6399 = vrot.lane.b32.xlu1 %v8185_v21, %s8910_s15  ;;  %v8368_v11 = vpack.c.bf16 %v3903_v62, %v3903_v62  ;;  %v8217_v7 = vcombine.low %v11763_v9, %v11751_v24  ;;  %v5843_v40 = vrot.slane %v5841_v3, 5  ;;  %v4663_v63 = vshrl.u32 %v4460_v55, 16 }
 0x287   : > { %v4666_v37 = vshll.u32 %v4460_v55, 16  ;;  %v8366_v34 = vpack.c.bf16 %v3901_v6, %v3901_v6  ;;  %v3904_v26 = vmax.f32 %v3846_v61, 0.0  ;;  %v5839_v4 = vrot.slane %v5838_v0, 4  ;;  %v4411_v55 = vld [vmem:[#allocation3 + $0x90] sm:$0xf] }
 0x288   : > { %v4197_v52 = vshrl.u32 %v8368_v11, 16  ;;  %v3838_v20 = vadd.f32 %v11391_v51, %v3837_v27  ;;  %v5848_v21 = vor.u32 %v5847_v53, %v5843_v40  ;;  %v5853_v62 = vrot.slane %v5851_v31, 5  ;;  %v11772_v31 = vpop.permute.xlu0 %6787  ;;  %v4404_v27 = vld [vmem:[#allocation3 + $0x84] sm:$0xf] }
 0x289   : > { %v4672_v13 = vshll.u32 %v11587_v48, 16  ;;  %v4200_v41 = vshll.u32 %v8368_v11, 16  ;;  %v4180_v19 = vshrl.u32 %v8366_v34, 16  ;;  %v8369_v3 = vpack.c.bf16 %v3904_v26, %v3904_v26  ;;  %v11780_v26 = vpop.permute.xlu1 %6467 }
 0x28a   : > { %v4199_v23 = vrot.slane %v4197_v52, 7  ;;  %6797 = vrot.lane.b32.xlu0 %v8264_v49, %s8913_s8  ;;  %6575 = vrot.lane.b32.xlu1 %v8217_v7, %s8914_s12  ;;  %v3902_v46 = vmax.f32 %v3838_v20, 0.0  ;;  %v5849_v45 = vrot.slane %v5848_v21, 4  ;;  %v4665_v6 = vrot.slane %v4663_v63, 4  ;;  %13176 = vst [vmem:[#allocation23_spill] sm:$0xff] %v11780_v26 }
 0x28b   : > { %v4668_v61 = vrot.slane %v4666_v37, 5  ;;  %v4182_v12 = vrot.slane %v4180_v19, 7  ;;  %v4183_v51 = vshll.u32 %v8366_v34, 16  ;;  %v4205_v53 = vshrl.u32 %v8369_v3, 16  ;;  %v4415_v21 = vld [vmem:[#allocation3 + $0x98] sm:$0x1] }
 0x28c   : > { %v4202_v0 = vor.u32 %v4200_v41, %v4199_v23  ;;  %v8367_v52 = vpack.c.bf16 %v3902_v46, %v3902_v46  ;;  %v5844_v11 = vsel %vm9130_vm11, %v5839_v4, %v5843_v40  ;;  %v5854_v49 = vsel %vm9130_vm11, %v5849_v45, %v5853_v62 }
 0x28d   : > { %v11778_v7 = vrot.slane %v4672_v13, 5  ;;  %v4185_v19 = vor.u32 %v4183_v51, %v4182_v12  ;;  %v4207_v37 = vrot.slane %v4205_v53, 7  ;;  %v4208_v34 = vshll.u32 %v8369_v3, 16  ;;  %v5495_v13 = vld [vmem:[#allocation3 + $0x78] sm:$0xe] }
 0x28e   : > { %v4412_v63 = vsel %vm10776_vm13, %v4202_v0, %v4411_v55  ;;  %v4203_v20 = vrot.slane %v4199_v23, 4  ;;  %v4188_v46 = vshrl.u32 %v8367_v52, 16  ;;  %v8278_v41 = vcombine.low %v5844_v11, %v5854_v49  ;;  %v5095_v51 = vld [vmem:[#allocation3 + $0x80] sm:$0x1]  ;;  %v4408_v53 = vld [vmem:[#allocation3 + $0x8c] sm:$0x1] }
 0x28f   : > { %4413 = vst [vmem:[#allocation3 + $0x90] sm:$0xf] %v4412_v63  ;;  %v4669_v35 = vor.u32 %v4668_v61, %v4665_v6  ;;  %v4405_v40 = vsel %vm10776_vm13, %v4185_v19, %v4404_v27  ;;  %v4210_v45 = vor.u32 %v4208_v34, %v4207_v37  ;;  %v4212_v4 = vrot.slane %v4207_v37, 4  ;;  %v11796_v11 = vld [vmem:[#allocation3 + $0x7c] sm:$0xf]  ;;  %v11801_v19 = vpop.permute.xlu1 %6465 }
 0x290   : > { %v4676_v62 = vshrl.u32 %v11587_v48, 16  ;;  %v7075_v55 = vsel %vm3623_vm2, %v11711_v8, %v6688_v32  ;;  %4406 = vst [vmem:[#allocation3 + $0x84] sm:$0xf] %v4405_v40  ;;  %v4190_v0 = vrot.slane %v4188_v46, 7  ;;  %v4191_v3 = vshll.u32 %v8367_v52, 16  ;;  %6873 = vrot.lane.b32.xlu0 %v8278_v41, %s8914_s12  ;;  %v6864_v8 = vpop.permute.xlu0 %6863 }
 0x291   : > { %v4682_v23 = vshll.u32 %v11610_v38, 16  ;;  %v4211_v6 = vsel %vm9138_vm12, %v4203_v20, %v4210_v45  ;;  %v4416_v61 = vsel %vm10786_vm6, %v4212_v4, %v4415_v21  ;;  %v5615_v27 = vrot.slane %v11704_v10, 5  ;;  %v11799_v63 = vld [vmem:[#allocation3 + $0x70] sm:$0xf]  ;;  %v11804_v10 = vld [vmem:[#allocation3 + $0x80] sm:$0x1] }
 0x292   : > { %v4678_v48 = vrot.slane %v4676_v62, 4  ;;  %v4186_v32 = vrot.slane %v4182_v12, 4  ;;  %4414 = vst.msk [vmem:[#allocation3 + $0x94] sm:$0xf] %vm280_vm0, %v4211_v6  ;;  %4417 = vst [vmem:[#allocation3 + $0x98] sm:$0x1] %v4416_v61  ;;  %v4193_v52 = vor.u32 %v4191_v3, %v4190_v0 }
 0x293   : > { %v4195_v38 = vrot.slane %v4190_v0, 4  ;;  %v4670_v49 = vrot.slane %v4669_v35, 4  ;;  %v8138_v34 = vrot.slane %v5495_v13, 9  ;;  %v5617_v20 = vrot.slane %v5615_v27, 4  ;;  %v4888_v40 = vld [vmem:[#allocation3 + $0x78] sm:$0xe] }
 0x294   : > { %v4679_v37 = vor.u32 %v4678_v48, %v11778_v7  ;;  %v5618_v21 = vrot.slane %v5095_v51, 5  ;;  %v4194_v12 = vsel %vm9138_vm12, %v4186_v32, %v4193_v52  ;;  %v4684_v41 = vrot.slane %v4682_v23, 5  ;;  %v11818_v23 = vld [vmem:[#allocation3 + $0x74] sm:$0x1]  ;;  %v5494_v52 = vld [vmem:[#allocation3 + $0x6c] sm:$0xe] }
 0x295   : > { %v4409_v46 = vsel %vm10786_vm6, %v4195_v38, %v4408_v53  ;;  %v5014_v35 = vrot.slane %v11796_v11, 5  ;;  %4407 = vst.msk [vmem:[#allocation3 + $0x88] sm:$0xf] %vm280_vm0, %v4194_v12  ;;  %v5616_v4 = vsel %vm9110_vm7, %v8138_v34, %v5615_v27  ;;  %v5007_v13 = vrot.slane %v11799_v63, 5  ;;  %v11827_v27 = vpop.permute.xlu1 %6565  ;;  %v5094_v32 = vld [vmem:[#allocation3 + $0x74] sm:$0x1] }
 0x296   : > { %4410 = vst [vmem:[#allocation3 + $0x8c] sm:$0x1] %v4409_v46  ;;  %v4680_v45 = vrot.slane %v4679_v37, 4  ;;  %v5619_v62 = vsel %vm9110_vm7, %v5617_v20, %v5618_v21  ;;  %v5017_v51 = vrot.slane %v11804_v10, 5  ;;  %v4675_v61 = vsel %vm9130_vm11, %v4670_v49, %v11778_v7  ;;  %13177 = vst [vmem:[#allocation24_spill] sm:$0xff] %v11827_v27  ;;  %v11831_v37 = vpop.permute.xlu0 %6785 }
 0x297   : > { %v8250_v0 = vcombine.low %v5616_v4, %v5619_v62  ;;  %v5016_v3 = vrot.slane %v5014_v35, 4  ;;  %v8123_v48 = vrot.slane %v4888_v40, 9  ;;  %v7122_v38 = vsel %vm6991_vm1, %v7075_v55, %v11444_v33  ;;  %v8741_v55 = vld [vmem:[%s13072_s3 + $0x80] sm:$0xff]  }
 0x298   : > { %v4685_v53 = vsel %vm9130_vm11, %v4680_v45, %v4684_v41  ;;  %v5009_v7 = vrot.slane %v5007_v13, 4  ;;  %v5608_v49 = vrot.slane %v11751_v24, 5  ;;  %v5904_v21 = vshrl.u32 %v11686_v1, 16  ;;  %v4887_v41 = vld [vmem:[#allocation3 + $0x6c] sm:$0xe] }
 0x299   : > { %v8184_v34 = vcombine.low %v4675_v61, %v4685_v53  ;;  %6705 = vrot.lane.b32.xlu0 %v8250_v0, %s8910_s15  ;;  %v5018_v20 = vsel %vm9110_vm7, %v5016_v3, %v5017_v51  ;;  %v5907_v12 = vshll.u32 %v11686_v1, 16  ;;  %v5015_v46 = vsel %vm9110_vm7, %v8123_v48, %v5014_v35 }
 0x29a   : > { %v7154_v33 = vsel %vm7024_vm3, %v7122_v38, %v6864_v8  ;;  %v5010_v40 = vrot.slane %v11818_v23, 5  ;;  %v8137_v45 = vrot.slane %v5494_v52, 9  ;;  %v5610_v24 = vrot.slane %v5608_v49, 4 }
 0x29b   : > { %6397 = vrot.lane.b32.xlu1 %v8184_v34, %s8910_s15  ;;  %v5611_v4 = vrot.slane %v5094_v32, 5  ;;  %7432 = vmatprep.mubr.bf16.mxu0 %v7154_v33  ;;  %v13178_v1 = vshrl.u32 %v11529_v17, 16  ;;  %v13180_v35 = vshll.u32 %v11529_v17, 16  ;;  %v8203_v8 = vcombine.low %v5015_v46, %v5018_v20  ;;  %v8787_v17 = vld [vmem:[%s13072_s3 + $0x88] sm:$0xff]   ;;  %v11874_v20 = vpop.permute.xlu1 %6387 }
 0x29c   : > { %7433 = vmatmul.mubr.bf16.vlgmr.msra.gmra.mxu0 %v11724_v54  ;;  %v13182_v3 = vor.u32 %v11677_v56, %v11673_v16  ;;  %v8122_v61 = vrot.slane %v4887_v41, 9  ;;  %v5011_v53 = vsel %vm9110_vm7, %v5009_v7, %v5010_v40  ;;  %v5609_v48 = vsel %vm9110_vm7, %v8137_v45, %v5608_v49  ;;  %v11872_v56 = vld [vmem:[#allocation3 + $0x94] sm:$0xf]  ;;  %v6694_v49 = vpop.permute.xlu0 %6693  ;;  %v11891_v33 = vld [vmem:[#allocation3 + $0x90] sm:$0xf] }
 0x29d   : > { %v11849_v62 = vrot.slane %v13178_v1, 4  ;;  %v11853_v0 = vrot.slane %v13180_v35, 5  ;;  %v5612_v32 = vsel %vm9110_vm7, %v5610_v24, %v5611_v4  ;;  %8567 = vmatpush3.bf16.msra.mxu0 %v8787_v17  ;;  %v13183_v54 = vcombine.low %v11700_v18, %v11591_v50  ;;  %v11879_v46 = vld [vmem:[#allocation3 + $0x94] sm:$0xf]  ;;  %v5076_v4 = vld [vmem:[#allocation3 + $0x90] sm:$0xf] }
 0x29e   : > { %v5192_v51 = vrot.slane %v13182_v3, 4  ;;  %v5906_v52 = vrot.slane %v5904_v21, 4  ;;  %v5909_v38 = vrot.slane %v5907_v12, 5  ;;  %v8249_v34 = vcombine.low %v5609_v48, %v5612_v32  ;;  %8568 = vmatprep.subr.bf16.mxu0 %v8741_v55  ;;  %v8788_v1 = vld [vmem:[#allocation3 + $0x34] sm:$0xf] }
 0x29f   : > { %13179 = vst [vmem:[#allocation25_spill] sm:$0xff] %v11849_v62  ;;  %13181 = vst [vmem:[#allocation26_spill] sm:$0xff] %v11853_v0  ;;  %8570 = vmatprep.mubr.msk.bf16.mxu0 %vm3623_vm2, %v13183_v54  ;;  %v5247_v41 = vshrl.u32 %v11593_v25, 16  ;;  %v5917_v50 = vshrl.u32 %v11702_v60, 16  ;;  %6483 = vrot.lane.b32.xlu1 %v8203_v8, %s8913_s8  ;;  %v5008_v18 = vsel %vm9110_vm7, %v8122_v61, %v5007_v13  ;;  %v5250_v40 = vshll.u32 %v11593_v25, 16 }
 0x2a0   : > { %v5197_v7 = vsel %vm9130_vm11, %v5192_v51, %v11741_v2  ;;  %v13184_v21 = vsel %vm9130_vm11, %v11566_v15, %v11673_v16  ;;  %v6097_v2 = vld [vmem:[#allocation3 + $0x30] sm:$0xe]  ;;  %v8202_v45 = vcombine.low %v5008_v18, %v5011_v53  ;;  %6703 = vrot.lane.b32.xlu0 %v8249_v34, %s8910_s15  ;;  %v8267_v24 = vcombine.low %v11891_v33, %v11872_v56  ;;  %v8789_v16 = vld [vmem:[#allocation3 + $0x28] sm:$0xf]  ;;  %v8790_v61 = vld [vmem:[#allocation3 + $0x38] sm:$0x1]  ;;  %v12008_v29 = vpop.permute.xlu0 %6691 }
 0x2a1   : > { %v8228_v12 = vcombine.low %v13184_v21, %v5197_v7  ;;  %v6175_v13 = vrot.slane %v8788_v1, 5  ;;  %8569 = vmatpush3.bf16.msra.mxu0 %v8741_v55  ;;  %v8220_v15 = vcombine.low %v5076_v4, %v11879_v46  ;;  %v5160_v8 = vshll.u32 %v8789_v16, 16  ;;  %v11901_v48 = vld [vmem:[#allocation3 + $0x80] sm:$0x1]  ;;  %v4466_v7 = vld [vmem:[#allocation3 + $0x78] sm:$0xf]  ;;  %v11911_v21 = vpop.permute.xlu1 %6563 }
 0x2a2   : > { %v5164_v3 = vshrl.u32 %v8789_v16, 16  ;;  %v8147_v51 = vrot.slane %v6097_v2, 9  ;;  %v6178_v53 = vrot.slane %v8790_v61, 5  ;;  %v5910_v32 = vor.u32 %v5909_v38, %v5906_v52  ;;  %13187 = vst [vmem:[#allocation29_spill] sm:$0xff] %v11911_v21  ;;  %v13189_v2 = vld [vmem:[#allocation21_spill] sm:$0xff] }
 0x2a3   : > { %v11898_v35 = vsel %vm3623_vm2, %v8228_v12, %v6694_v49  ;;  %v6177_v25 = vrot.slane %v6175_v13, 4  ;;  %6481 = vrot.lane.b32.xlu1 %v8202_v45, %s8913_s8  ;;  %v11904_v17 = vrot.slane %v5160_v8, 5  ;;  %v5913_v54 = vshll.u32 %v11702_v60, 16  ;;  %v13188_v12 = vld [vmem:[#allocation20_spill] sm:$0xff]  ;;  %v8791_v61 = vld [vmem:[#allocation3 + $0x2c] sm:$0x1] }
 0x2a4   : > { %v5166_v55 = vrot.slane %v5164_v3, 4  ;;  %v5919_v34 = vrot.slane %v5917_v50, 4  ;;  %v11907_v49 = vrot.slane %v5247_v41, 4  ;;  %v11909_v18 = vrot.slane %v5250_v40, 5  ;;  %6803 = vrot.lane.b32.xlu0 %v8267_v24, %s8913_s8 }
 0x2a5   : > { %v13190_v52 = vcombine.low %v13188_v12, %v13189_v2  ;;  %v6176_v38 = vsel %vm9110_vm7, %v8147_v51, %v6175_v13  ;;  %v6179_v50 = vsel %vm9110_vm7, %v6177_v25, %v6178_v53  ;;  %v5880_v41 = vshrl.u32 %v11755_v58, 16 }
 0x2a6   : > { %13185 = vst [vmem:[#allocation27_spill] sm:$0xff] %v11907_v49  ;;  %13186 = vst [vmem:[#allocation28_spill] sm:$0xff] %v11909_v18  ;;  %v8291_v45 = vcombine.low %v6176_v38, %v6179_v50  ;;  %v5915_v40 = vrot.slane %v5913_v54, 5  ;;  %v5923_v4 = vshll.u32 %v11901_v48, 16  ;;  %v5167_v1 = vor.u32 %v5166_v55, %v11904_v17  ;;  %v6386_v50 = vpop.permute.xlu1 %6385  ;;  %v11974_v18 = vld [vmem:[#allocation3 + $0x74] sm:$0x1] }
 0x2a7   : > { %8571 = vmatmul.mubr.msk.bf16.vlgmr.msra.gmra.mxu0 %vm3623_vm2, %v13190_v52  ;;  %v4735_v24 = vshrl.u32 %v4466_v7, 16  ;;  %v4738_v16 = vshll.u32 %v4466_v7, 16  ;;  %v4744_v8 = vshll.u32 %v11796_v11, 16  ;;  %v5883_v3 = vshll.u32 %v11755_v58, 16  ;;  %6581 = vrot.lane.b32.xlu1 %v8220_v15, %s8914_s12  ;;  %v13195_v15 = vld [vmem:[#allocation17_spill] sm:$0xff] }
 0x2a8   : > { %8574 = vmatprep.mubr.msk.bf16.mxu0 %vm3623_vm2, %v8291_v45  ;;  %v5911_v13 = vrot.slane %v5910_v32, 4  ;;  %v5920_v51 = vor.u32 %v5919_v34, %v5915_v40  ;;  %v4748_v25 = vshrl.u32 %v11796_v11, 16  ;;  %v5170_v53 = vshll.u32 %v8791_v61, 16  ;;  %v11944_v61 = vld [vmem:[#allocation3 + $0x88] sm:$0xf] }
 0x2a9   : > { %v4737_v54 = vrot.slane %v4735_v24, 4  ;;  %v4740_v12 = vrot.slane %v4738_v16, 5  ;;  %v4746_v2 = vrot.slane %v4744_v8, 5  ;;  %v5925_v52 = vrot.slane %v5923_v4, 5  ;;  %v6098_v16 = vld [vmem:[#allocation3 + $0x3c] sm:$0xe] }
 0x2aa   : > { %v5921_v55 = vrot.slane %v5920_v51, 4  ;;  %v4750_v7 = vrot.slane %v4748_v25, 4  ;;  %v4754_v38 = vshll.u32 %v11804_v10, 16  ;;  %v11933_v45 = vrot.slane %v5167_v1, 4  ;;  %v6099_v1 = vld [vmem:[#allocation3 + $0x48] sm:$0xe] }
 0x2ab   : > { %v4741_v32 = vor.u32 %v4740_v12, %v4737_v54  ;;  %v11935_v34 = vrot.slane %v5880_v41, 4  ;;  %v5916_v11 = vsel %vm9130_vm11, %v5911_v13, %v5915_v40  ;;  %v5893_v10 = vshrl.u32 %v11746_v30, 16  ;;  %v13191_v41 = vld [vmem:[#allocation11_spill] sm:$0xff]  ;;  %v13192_v12 = vld [vmem:[#allocation9_spill] sm:$0xff]  ;;  %v8793_v58 = vld [vmem:[#allocation3 + $0x44] sm:$0x1] }
 0x2ac   : > { %v5926_v24 = vsel %vm9130_vm11, %v5921_v55, %v5925_v52  ;;  %v4751_v4 = vor.u32 %v4750_v7, %v4746_v2  ;;  %v11942_v8 = vrot.slane %v5170_v53, 5  ;;  %v5885_v54 = vrot.slane %v5883_v3, 5  ;;  %v11952_v52 = vld [vmem:[#allocation3 + $0x88] sm:$0xf]  ;;  %v13194_v53 = vld [vmem:[#allocation18_spill] sm:$0xff] }
 0x2ad   : > { %v8281_v51 = vcombine.low %v5916_v11, %v5926_v24  ;;  %v4742_v25 = vrot.slane %v4741_v32, 4  ;;  %v13193_v6 = vcombine.low %v13191_v41, %v13192_v12  ;;  %v4756_v55 = vrot.slane %v4754_v38, 5  ;;  %v5074_v41 = vld [vmem:[#allocation3 + $0x84] sm:$0xf] }
 0x2ae   : > { %v4752_v13 = vrot.slane %v4751_v4, 4  ;;  %v13196_v11 = vor.u32 %v13194_v53, %v13195_v15  ;;  %v8148_v12 = vrot.slane %v6098_v16, 9  ;;  %v4464_v53 = vld [vmem:[#allocation3 + $0x6c] sm:$0xf]  ;;  %v8219_v7 = vcombine.low %v5074_v41, %v11952_v52 }
 0x2af   : > { %v11950_v40 = vsel %vm3623_vm2, %v13193_v6, %v6386_v50  ;;  %6879 = vrot.lane.b32.xlu0 %v8281_v51, %s8914_s12  ;;  %v11965_v6 = vld [vmem:[#allocation3 + $0x84] sm:$0xf]  ;;  %v8792_v50 = vld [vmem:[#allocation3 + $0x40] sm:$0xf]  ;;  %v4747_v24 = vsel %vm9130_vm11, %v4742_v25, %v4746_v2  ;;  %v6185_v3 = vrot.slane %v8793_v58, 5  ;;  %v8149_v25 = vrot.slane %v6099_v1, 9 }
 0x2b0   : > { %v11958_v32 = vrot.slane %v13196_v11, 4  ;;  %v6182_v38 = vrot.slane %v8792_v50, 5  ;;  %v4757_v4 = vsel %vm9130_vm11, %v4752_v13, %v4756_v55  ;;  %v8266_v15 = vcombine.low %v11965_v6, %v11944_v61  ;;  %v8794_v50 = vld [vmem:[#allocation3 + $0x4c] sm:$0xf] }
 0x2b1   : > { %v8187_v11 = vcombine.low %v4747_v24, %v4757_v4  ;;  %v6189_v13 = vrot.slane %v8794_v50, 5  ;;  %v5889_v55 = vshll.u32 %v11746_v30, 16  ;;  %v8795_v24 = vld [vmem:[#allocation3 + $0x50] sm:$0x1]  ;;  %v5886_v58 = vor.u32 %v5885_v54, %v11935_v34 }
 0x2b2   : > { %v6184_v51 = vrot.slane %v6182_v38, 4  ;;  %v6183_v2 = vsel %vm9110_vm7, %v8148_v12, %v6182_v38  ;;  %v6192_v4 = vrot.slane %v8795_v24, 5  ;;  %v4711_v41 = vshrl.u32 %v4464_v53, 16 }
 0x2b3   : > { %6403 = vrot.lane.b32.xlu1 %v8187_v11, %s8910_s15  ;;  %6801 = vrot.lane.b32.xlu0 %v8266_v15, %s8913_s8  ;;  %v8560_v49 = vpop.f32.mrf.mxu0  ;;  %v6191_v38 = vrot.slane %v6189_v13, 4  ;;  %v5895_v1 = vrot.slane %v5893_v10, 4  ;;  %v5899_v12 = vshll.u32 %v11974_v18, 16  ;;  %v11988_v11 = vld [vmem:[%s13071_s2] ss:$0 sm:$0xff]  ;;  %v4714_v54 = vshll.u32 %v4464_v53, 16 }
 0x2b4   : > { %v6186_v16 = vsel %vm9110_vm7, %v6184_v51, %v6185_v3  ;;  %v3859_v15 = vadd.f32 %v11988_v11, %v8560_v49  ;;  %v6190_v3 = vsel %vm9110_vm7, %v8149_v25, %v6189_v13  ;;  %v5891_v51 = vrot.slane %v5889_v55, 5 }
 0x2b5   : > { %v8292_v0 = vcombine.low %v6183_v2, %v6186_v16  ;;  %v4713_v50 = vrot.slane %v4711_v41, 4  ;;  %v3850_v34 = vpop.f32.mrf.mxu0  ;;  %v6193_v10 = vsel %vm9110_vm7, %v6191_v38, %v6192_v4  ;;  %v4720_v2 = vshll.u32 %v11799_v63, 16 }
 0x2b6   : > { %v4724_v16 = vshrl.u32 %v11799_v63, 16  ;;  %v3907_v24 = vmax.f32 %v3859_v15, 0.0  ;;  %v3851_v62 = vadd.f32 %v11988_v11, %v3850_v34  ;;  %v8293_v49 = vcombine.low %v6190_v3, %v6193_v10 }
 0x2b7   : > { %8575 = vmatmul.mubr.msk.bf16.gmra.mxu0 %vm3623_vm2, %v8292_v0  ;;  %6579 = vrot.lane.b32.xlu1 %v8219_v7, %s8914_s12  ;;  %v5887_v25 = vrot.slane %v5886_v58, 4  ;;  %v8561_v13 = vpop.f32.mrf.mxu0  ;;  %v5896_v55 = vor.u32 %v5895_v1, %v5891_v51  ;;  %v4716_v41 = vrot.slane %v4714_v54, 5  ;;  %v4722_v27 = vrot.slane %v4720_v2, 5  ;;  %v5497_v54 = vld [vmem:[#allocation3 + $0x90] sm:$0xe] }
 0x2b8   : > { %v4726_v0 = vrot.slane %v4724_v16, 4  ;;  %v8372_v21 = vpack.c.bf16 %v3907_v24, %v3907_v24  ;;  %v3905_v26 = vmax.f32 %v3851_v62, 0.0  ;;  %v3862_v53 = vadd.f32 %v11988_v11, %v8561_v13  ;;  %8578 = vmatprep.mubr.msk.bf16.mxu0 %vm3623_vm2, %v8293_v49 }
 0x2b9   : > { %v5901_v4 = vrot.slane %v5899_v12, 5  ;;  %v3853_v63 = vpop.f32.mrf.mxu0  ;;  %v5897_v38 = vrot.slane %v5896_v55, 4  ;;  %v4717_v15 = vor.u32 %v4716_v41, %v4713_v50  ;;  %v4730_v7 = vshll.u32 %v11818_v23, 16  ;;  %v4425_v55 = vld [vmem:[#allocation3 + $0xa8] sm:$0xf] }
 0x2ba   : > { %v4727_v34 = vor.u32 %v4726_v0, %v4722_v27  ;;  %v4231_v3 = vshrl.u32 %v8372_v21, 16  ;;  %v8370_v58 = vpack.c.bf16 %v3905_v26, %v3905_v26  ;;  %v3908_v10 = vmax.f32 %v3862_v53, 0.0 }
 0x2bb   : > { %v5892_v1 = vsel %vm9130_vm11, %v5887_v25, %v5891_v51  ;;  %v3854_v62 = vadd.f32 %v11988_v11, %v3853_v63  ;;  %v5902_v2 = vsel %vm9130_vm11, %v5897_v38, %v5901_v4  ;;  %v4718_v16 = vrot.slane %v4717_v15, 4  ;;  %v4418_v63 = vld [vmem:[#allocation3 + $0x9c] sm:$0xf] }
 0x2bc   : > { %v4728_v12 = vrot.slane %v4727_v34, 4  ;;  %v4233_v24 = vrot.slane %v4231_v3, 7  ;;  %v4234_v49 = vshll.u32 %v8372_v21, 16  ;;  %v4214_v50 = vshrl.u32 %v8370_v58, 16 }
 0x2bd   : > { %v8373_v13 = vpack.c.bf16 %v3908_v10, %v3908_v10  ;;  %v3906_v23 = vmax.f32 %v3854_v62, 0.0  ;;  %v8280_v41 = vcombine.low %v5892_v1, %v5902_v2  ;;  %v4732_v26 = vrot.slane %v4730_v7, 5  ;;  %v5097_v10 = vld [vmem:[#allocation3 + $0x98] sm:$0x1]  ;;  %v12018_v1 = vld [vmem:[#allocation3 + $0x94] sm:$0xf] }
 0x2be   : > { %v8140_v0 = vrot.slane %v5497_v54, 9  ;;  %v4236_v53 = vor.u32 %v4234_v49, %v4233_v24  ;;  %v4216_v14 = vrot.slane %v4214_v50, 7  ;;  %v4217_v51 = vshll.u32 %v8370_v58, 16 }
 0x2bf   : > { %v4239_v25 = vshrl.u32 %v8373_v13, 16  ;;  %v8371_v4 = vpack.c.bf16 %v3906_v23, %v3906_v23  ;;  %6877 = vrot.lane.b32.xlu0 %v8280_v41, %s8914_s12  ;;  %v4723_v21 = vsel %vm9130_vm11, %v4718_v16, %v4722_v27  ;;  %v4733_v38 = vsel %vm9130_vm11, %v4728_v12, %v4732_v26  ;;  %v4890_v27 = vld [vmem:[#allocation3 + $0x90] sm:$0xe]  ;;  %v12022_v23 = vld [vmem:[#allocation3 + $0x98] sm:$0x1]  ;;  %v12026_v26 = vpop.permute.xlu0 %6791 }
 0x2c0   : > { %v5629_v15 = vrot.slane %v11879_v46, 5  ;;  %v4426_v34 = vsel %vm10776_vm13, %v4236_v53, %v4425_v55  ;;  %v4219_v7 = vor.u32 %v4217_v51, %v4216_v14  ;;  %v4242_v58 = vshll.u32 %v8373_v13, 16 }
 0x2c1   : > { %v4241_v3 = vrot.slane %v4239_v25, 7  ;;  %v4237_v54 = vrot.slane %v4233_v24, 4  ;;  %4427 = vst [vmem:[#allocation3 + $0xa8] sm:$0xf] %v4426_v34  ;;  %v4220_v62 = vrot.slane %v4216_v14, 4  ;;  %v4222_v2 = vshrl.u32 %v8371_v4, 16 }
 0x2c2   : > { %v8186_v49 = vcombine.low %v4723_v21, %v4733_v38  ;;  %v4419_v16 = vsel %vm10776_vm13, %v4219_v7, %v4418_v63  ;;  %v5631_v50 = vrot.slane %v5629_v15, 4  ;;  %v4225_v13 = vshll.u32 %v8371_v4, 16  ;;  %v6100_v14 = vld [vmem:[#allocation3 + $0x54] sm:$0xe]  ;;  %v4422_v25 = vld [vmem:[#allocation3 + $0xa4] sm:$0x1] }
 0x2c3   : > { %v4244_v12 = vor.u32 %v4242_v58, %v4241_v3  ;;  %v4246_v46 = vrot.slane %v4241_v3, 4  ;;  %4420 = vst [vmem:[#allocation3 + $0x9c] sm:$0xf] %v4419_v16  ;;  %v4224_v55 = vrot.slane %v4222_v2, 7  ;;  %v5632_v41 = vrot.slane %v5097_v10, 5 }
 0x2c4   : > { %6401 = vrot.lane.b32.xlu1 %v8186_v49, %s8910_s15  ;;  %v5028_v24 = vrot.slane %v12018_v1, 5  ;;  %v5630_v63 = vsel %vm9110_vm7, %v8140_v0, %v5629_v15  ;;  %v8125_v21 = vrot.slane %v4890_v27, 9  ;;  %v5031_v7 = vrot.slane %v12022_v23, 5  ;;  %v6101_v3 = vld [vmem:[#allocation3 + $0x60] sm:$0xe] }
 0x2c5   : > { %v4245_v53 = vsel %vm9138_vm12, %v4237_v54, %v4244_v12  ;;  %v4430_v51 = vsel %vm10786_vm6, %v4246_v46, %v4429_v22  ;;  %v4227_v4 = vor.u32 %v4225_v13, %v4224_v55  ;;  %v4229_v38 = vrot.slane %v4224_v55, 4  ;;  %v8797_v22 = vld [vmem:[#allocation3 + $0x58] sm:$0xf]  ;;  %v8798_v27 = vld [vmem:[#allocation3 + $0x64] sm:$0xf] }
 0x2c6   : > { %4428 = vst.msk [vmem:[#allocation3 + $0xac] sm:$0xf] %vm280_vm0, %v4245_v53  ;;  %4431 = vst [vmem:[#allocation3 + $0xb0] sm:$0x1] %v4430_v51  ;;  %v5633_v34 = vsel %vm9110_vm7, %v5631_v50, %v5632_v41  ;;  %v5030_v10 = vrot.slane %v5028_v24, 4  ;;  %v8150_v54 = vrot.slane %v6100_v14, 9  ;;  %v5029_v49 = vsel %vm9110_vm7, %v8125_v21, %v5028_v24  ;;  %v12056_v21 = vpop.permute.xlu0 %6867 }
 0x2c7   : > { %v8252_v58 = vcombine.low %v5630_v63, %v5633_v34  ;;  %v6196_v2 = vrot.slane %v8797_v22, 5  ;;  %v4228_v0 = vsel %vm9138_vm12, %v4220_v62, %v4227_v4  ;;  %v4423_v15 = vsel %vm10786_vm6, %v4229_v38, %v4422_v25  ;;  %v5096_v12 = vld [vmem:[#allocation3 + $0x8c] sm:$0x1]  ;;  %v5496_v46 = vld [vmem:[#allocation3 + $0x84] sm:$0xe] }
 0x2c8   : > { %v6203_v16 = vrot.slane %v8798_v27, 5  ;;  %4421 = vst.msk [vmem:[#allocation3 + $0xa0] sm:$0xf] %vm280_vm0, %v4228_v0  ;;  %4424 = vst [vmem:[#allocation3 + $0xa4] sm:$0x1] %v4423_v15  ;;  %v5032_v50 = vsel %vm9110_vm7, %v5030_v10, %v5031_v7  ;;  %v6199_v62 = vrot.slane %v11737_v28, 5 }
 0x2c9   : > { %6709 = vrot.lane.b32.xlu0 %v8252_v58, %s8910_s15  ;;  %v6198_v55 = vrot.slane %v6196_v2, 4  ;;  %v8151_v13 = vrot.slane %v6101_v3, 9  ;;  %v12049_v41 = vld [vmem:[#allocation3 + $0x88] sm:$0xf]  ;;  %v8205_v14 = vcombine.low %v5029_v49, %v5032_v50  ;;  %v6197_v24 = vsel %vm9110_vm7, %v8150_v54, %v6196_v2  ;;  %v12054_v25 = vld [vmem:[#allocation3 + $0x8c] sm:$0x1]  ;;  %v12063_v3 = vpop.permute.xlu1 %6471 }
 0x2ca   : > { %v6205_v53 = vrot.slane %v6203_v16, 4  ;;  %v6206_v51 = vrot.slane %v11654_v59, 5  ;;  %v4889_v63 = vld [vmem:[#allocation3 + $0x84] sm:$0xe]  ;;  %v8139_v38 = vrot.slane %v5496_v46, 9  ;;  %v5622_v34 = vrot.slane %v11952_v52, 5 }
 0x2cb   : > { %v6200_v4 = vsel %vm9110_vm7, %v6198_v55, %v6199_v62  ;;  %v6204_v28 = vsel %vm9110_vm7, %v8151_v13, %v6203_v16  ;;  %v4470_v7 = vld [vmem:[#allocation3 + $0x90] sm:$0xf]  ;;  %6487 = vrot.lane.b32.xlu1 %v8205_v14, %s8913_s8  ;;  %v5625_v10 = vrot.slane %v5096_v12, 5  ;;  %v5021_v54 = vrot.slane %v12049_v41, 5 }
 0x2cc   : > { %v8294_v59 = vcombine.low %v6197_v24, %v6200_v4  ;;  %v6207_v58 = vsel %vm9110_vm7, %v6205_v53, %v6206_v51  ;;  %v5624_v2 = vrot.slane %v5622_v34, 4  ;;  %v8124_v0 = vrot.slane %v4889_v63, 9  ;;  %v6102_v53 = vld [vmem:[#allocation3 + $0x6c] sm:$0xe]  ;;  %v12082_v51 = vpop.permute.xlu0 %6789 }
 0x2cd   : > { %v8295_v22 = vcombine.low %v6204_v28, %v6207_v58  ;;  %v5024_v15 = vrot.slane %v12054_v25, 5  ;;  %v5623_v52 = vsel %vm9110_vm7, %v8139_v38, %v5622_v34  ;;  %v5023_v49 = vrot.slane %v5021_v54, 4  ;;  %v6103_v34 = vld [vmem:[#allocation3 + $0x78] sm:$0xe] }
 0x2ce   : > { %8579 = vmatmul.mubr.msk.bf16.gmra.mxu0 %vm3623_vm2, %v8294_v59  ;;  %v4783_v27 = vshrl.u32 %v4470_v7, 16  ;;  %v4786_v16 = vshll.u32 %v4470_v7, 16  ;;  %v5626_v12 = vsel %vm9110_vm7, %v5624_v2, %v5625_v10  ;;  %v5022_v46 = vsel %vm9110_vm7, %v8124_v0, %v5021_v54  ;;  %v12090_v59 = vpop.permute.xlu1 %6469 }
 0x2cf   : > { %8582 = vmatprep.mubr.msk.bf16.mxu0 %vm3623_vm2, %v8295_v22  ;;  %v4792_v50 = vshll.u32 %v12018_v1, 16  ;;  %v4796_v55 = vshrl.u32 %v12018_v1, 16  ;;  %v8251_v62 = vcombine.low %v5623_v52, %v5626_v12  ;;  %v5025_v13 = vsel %vm9110_vm7, %v5023_v49, %v5024_v15  ;;  %v12102_v49 = vld [vmem:[#allocation3 + $0xac] sm:$0xf] }
 0x2d0   : > { %v4785_v14 = vrot.slane %v4783_v27, 4  ;;  %v4788_v24 = vrot.slane %v4786_v16, 5  ;;  %v8204_v63 = vcombine.low %v5022_v46, %v5025_v13  ;;  %v4802_v38 = vshll.u32 %v12022_v23, 16 }
 0x2d1   : > { %v4794_v4 = vrot.slane %v4792_v50, 5  ;;  %v4798_v28 = vrot.slane %v4796_v55, 4  ;;  %v5955_v7 = vshll.u32 %v11891_v33, 16  ;;  %v5163_v1 = vsel %vm9130_vm11, %v11958_v32, %v11904_v17  ;;  %6707 = vrot.lane.b32.xlu0 %v8251_v62, %s8910_s15  ;;  %v6866_v50 = vpop.permute.xlu0 %6865  ;;  %v12115_v55 = vld [vmem:[#allocation3 + $0xa8] sm:$0xf] }
 0x2d2   : > { %v4789_v58 = vor.u32 %v4788_v24, %v4785_v14  ;;  %v6210_v10 = vrot.slane %v11746_v30, 5  ;;  %v13197_v23 = vsel %vm9130_vm11, %v11933_v45, %v11942_v8  ;;  %6485 = vrot.lane.b32.xlu1 %v8204_v63, %s8913_s8  ;;  %v8152_v2 = vrot.slane %v6102_v53, 9  ;;  %v12105_v45 = vpop.permute.xlu1 %6569  ;;  %v12123_v24 = vld [vmem:[#allocation3 + $0xa0] sm:$0xf]  ;;  %v13198_v53 = vld [vmem:[#allocation22_spill] sm:$0xff] }
 0x2d3   : > { %v8227_v54 = vcombine.low %v5163_v1, %v13197_v23  ;;  %v4799_v22 = vor.u32 %v4798_v28, %v4794_v4  ;;  %v6217_v0 = vrot.slane %v11702_v60, 5  ;;  %v6213_v15 = vrot.slane %v11974_v18, 5 }
 0x2d4   : > { %v4790_v17 = vrot.slane %v4789_v58, 4  ;;  %v6212_v32 = vrot.slane %v6210_v10, 4  ;;  %v8153_v52 = vrot.slane %v6103_v34, 9  ;;  %v4804_v27 = vrot.slane %v4802_v38, 5  ;;  %v6104_v34 = vld [vmem:[#allocation3 + $0x84] sm:$0xe] }
 0x2d5   : > { %v4800_v30 = vrot.slane %v4799_v22, 4  ;;  %v6219_v16 = vrot.slane %v6217_v0, 4  ;;  %v6220_v12 = vrot.slane %v11901_v48, 5  ;;  %v6211_v60 = vsel %vm9110_vm7, %v8152_v2, %v6210_v10  ;;  %v5078_v22 = vld [vmem:[#allocation3 + $0x9c] sm:$0xf] }
 0x2d6   : > { %v4795_v8 = vsel %vm9130_vm11, %v4790_v17, %v4794_v4  ;;  %v6214_v46 = vsel %vm9110_vm7, %v6212_v32, %v6213_v15  ;;  %v6218_v18 = vsel %vm9110_vm7, %v8153_v52, %v6217_v0  ;;  %v8269_v14 = vcombine.low %v12115_v55, %v12102_v49  ;;  %v6105_v32 = vld [vmem:[#allocation3 + $0x90] sm:$0xe] }
 0x2d7   : > { %v4805_v48 = vsel %vm9130_vm11, %v4800_v30, %v4804_v27  ;;  %v8296_v62 = vcombine.low %v6211_v60, %v6214_v46  ;;  %v6221_v13 = vsel %vm9110_vm7, %v6219_v16, %v6220_v12  ;;  %v7124_v63 = vsel %vm6991_vm1, %v13198_v53, %v11831_v37  ;;  %v5705_v27 = vld [vmem:[#allocation3 + $0x98] sm:$0x1]  ;;  %v12157_v16 = vpop.permute.xlu1 %6391 }
 0x2d8   : > { %v7081_v4 = vsel %vm3623_vm2, %v8227_v54, %v12008_v29  ;;  %v8189_v28 = vcombine.low %v4795_v8, %v4805_v48  ;;  %v8297_v38 = vcombine.low %v6218_v18, %v6221_v13  ;;  %v13199_v1 = vshrl.u32 %v11688_v42, 16  ;;  %6807 = vrot.lane.b32.xlu0 %v8269_v14, %s8913_s8  ;;  %v12144_v54 = vld [vmem:[#allocation3 + $0x8c] sm:$0x1] }
 0x2d9   : > { %v13201_v10 = vshll.u32 %v11688_v42, 16  ;;  %8583 = vmatmul.mubr.msk.bf16.gmra.mxu0 %vm3623_vm2, %v8296_v62  ;;  %v7157_v37 = vsel %vm7024_vm3, %v7124_v63, %v6866_v50  ;;  %v6995_v29 = vsel %vm6991_vm1, %v11950_v40, %v11801_v19  ;;  %v5965_v2 = vshrl.u32 %v11872_v56, 16  ;;  %v8799_v14 = vld [vmem:[#allocation3 + $0x4c] sm:$0xf] }
 0x2da   : > { %v12132_v58 = vrot.slane %v13199_v1, 4  ;;  %6407 = vrot.lane.b32.xlu1 %v8189_v28, %s8910_s15  ;;  %8586 = vmatprep.mubr.msk.bf16.mxu0 %vm3623_vm2, %v8297_v38  ;;  %v7029_v42 = vsel %vm7024_vm3, %v6995_v29, %v11657_v39  ;;  %v6224_v0 = vrot.slane %v11944_v61, 5  ;;  %v8221_v17 = vcombine.low %v5078_v22, %v12123_v24  ;;  %v13205_v29 = vld [vmem:[#allocation8_spill] sm:$0xff] }
 0x2db   : > { %v12136_v23 = vrot.slane %v13201_v10, 5  ;;  %v13203_v15 = vshrl.u32 %v11891_v33, 16  ;;  %v5957_v40 = vrot.slane %v5955_v7, 5  ;;  %7440 = vmatprep.mubr.bf16.mxu1 %v7157_v37  ;;  %v8154_v52 = vrot.slane %v6104_v34, 9  ;;  %v4468_v10 = vld [vmem:[#allocation3 + $0x84] sm:$0xf] }
 0x2dc   : > { %13200 = vst [vmem:[#allocation20_spill] sm:$0xff] %v12132_v58  ;;  %v7126_v30 = vsel %vm6991_vm1, %v7081_v4, %v11772_v31  ;;  %7441 = vmatmul.mubr.bf16.vlgmr.msra.gmra.mxu1 %v7029_v42  ;;  %v6226_v12 = vrot.slane %v6224_v0, 4  ;;  %v6227_v39 = vrot.slane %v12144_v54, 5  ;;  %v6231_v60 = vrot.slane %v11872_v56, 5  ;;  %v13204_v37 = vld [vmem:[#allocation10_spill] sm:$0xff] }
 0x2dd   : > { %13202 = vst [vmem:[#allocation21_spill] sm:$0xff] %v12136_v23  ;;  %v5954_v19 = vrot.slane %v13203_v15, 4  ;;  %v7160_v8 = vsel %vm7024_vm3, %v7126_v30, %v12056_v21  ;;  %v5928_v46 = vshrl.u32 %v11965_v6, 16  ;;  %v8155_v31 = vrot.slane %v6105_v32, 9  ;;  %v6107_v33 = vld [vmem:[#allocation3 + $0xa8] sm:$0xe] }
 0x2de   : > { %7448 = vmatprep.mubr.bf16.mxu1 %v7160_v8  ;;  %v6225_v18 = vsel %vm9110_vm7, %v8154_v52, %v6224_v0  ;;  %v6228_v50 = vsel %vm9110_vm7, %v6226_v12, %v6227_v39  ;;  %6583 = vrot.lane.b32.xlu1 %v8221_v17, %s8914_s12  ;;  %v6233_v48 = vrot.slane %v6231_v60, 4  ;;  %v6234_v21 = vrot.slane %v5705_v27, 5  ;;  %v8564_v1 = vpop.f32.mrf.mxu0  ;;  %v12303_v0 = vld [vmem:[#allocation3 + $0xb0] sm:$0x1] }
 0x2df   : > { %v8298_v62 = vcombine.low %v6225_v18, %v6228_v50  ;;  %v6232_v13 = vsel %vm9110_vm7, %v8155_v31, %v6231_v60  ;;  %v5232_v53 = vshll.u32 %v8799_v14, 16  ;;  %v5236_v63 = vshrl.u32 %v8799_v14, 16 }
 0x2e0   : > { %v6235_v4 = vsel %vm9110_vm7, %v6233_v48, %v6234_v21  ;;  %v5958_v28 = vor.u32 %v5957_v40, %v5954_v19  ;;  %v5961_v38 = vshll.u32 %v11872_v56, 16  ;;  %v5967_v34 = vrot.slane %v5965_v2, 4  ;;  %v12188_v56 = vpop.permute.xlu1 %6567  ;;  %v12190_v2 = vpop.permute.xlu0 %6697 }
 0x2e1   : > { %v13206_v22 = vcombine.low %v13204_v37, %v13205_v29  ;;  %v5931_v17 = vshll.u32 %v11965_v6, 16  ;;  %8587 = vmatmul.mubr.msk.bf16.gmra.mxu0 %vm3623_vm2, %v8298_v62  ;;  %v8299_v32 = vcombine.low %v6232_v13, %v6235_v4  ;;  %v12186_v15 = vrot.slane %v5928_v46, 4  ;;  %v3866_v31 = vpop.f32.mrf.mxu0 }
 0x2e2   : > { %v5963_v19 = vrot.slane %v5961_v38, 5  ;;  %v5971_v40 = vshll.u32 %v5705_v27, 16  ;;  %v3875_v52 = vadd.f32 %v11988_v11, %v8564_v1  ;;  %v4759_v30 = vshrl.u32 %v4468_v10, 16 }
 0x2e3   : > { %v12181_v42 = vsel %vm3623_vm2, %v13206_v22, %v11874_v20  ;;  %8590 = vmatprep.mubr.msk.bf16.mxu0 %vm3623_vm2, %v8299_v32  ;;  %v12194_v20 = vrot.slane %v5232_v53, 5  ;;  %v4762_v12 = vshll.u32 %v4468_v10, 16  ;;  %v4768_v6 = vshll.u32 %v12049_v41, 16  ;;  %v8800_v32 = vld [vmem:[#allocation3 + $0x50] sm:$0x1] }
 0x2e4   : > { %v5238_v39 = vrot.slane %v5236_v63, 4  ;;  %v5959_v8 = vrot.slane %v5958_v28, 4  ;;  %v5968_v60 = vor.u32 %v5967_v34, %v5963_v19  ;;  %v3911_v46 = vmax.f32 %v3875_v52, 0.0  ;;  %v6390_v28 = vpop.permute.xlu1 %6389  ;;  %v12208_v29 = vpop.permute.xlu0 %6695 }
 0x2e5   : > { %v12197_v18 = vrot.slane %v5931_v17, 5  ;;  %v6000_v50 = vshrl.u32 %v12115_v55, 16  ;;  %v4761_v27 = vrot.slane %v4759_v30, 4  ;;  %v4764_v48 = vrot.slane %v4762_v12, 5  ;;  %v13207_v12 = vld [vmem:[#allocation16_spill] sm:$0xff] }
 0x2e6   : > { %v5969_v21 = vrot.slane %v5968_v60, 4  ;;  %v5973_v62 = vrot.slane %v5971_v40, 5  ;;  %v8376_v13 = vpack.c.bf16 %v3911_v46, %v3911_v46  ;;  %v4772_v14 = vshrl.u32 %v12049_v41, 16 }
 0x2e7   : > { %v6003_v53 = vshll.u32 %v12115_v55, 16  ;;  %v4765_v4 = vor.u32 %v4764_v48, %v4761_v27  ;;  %v4770_v38 = vrot.slane %v4768_v6, 5  ;;  %v3867_v63 = vadd.f32 %v11988_v11, %v3866_v31  ;;  %v13208_v6 = vld [vmem:[#allocation13_spill] sm:$0xff] }
 0x2e8   : > { %v5239_v34 = vor.u32 %v5238_v39, %v12194_v20  ;;  %v5964_v1 = vsel %vm9130_vm11, %v5959_v8, %v5963_v19  ;;  %v5974_v10 = vsel %vm9130_vm11, %v5969_v21, %v5973_v62  ;;  %v4265_v37 = vshrl.u32 %v8376_v13, 16  ;;  %v12232_v21 = vld [vmem:[#allocation3 + $0xa0] sm:$0xf]  ;;  %v12234_v62 = vpop.permute.xlu0 %6795 }
 0x2e9   : > { %v12213_v41 = vsel %vm6991_vm1, %v11898_v35, %v12082_v51  ;;  %v8283_v55 = vcombine.low %v5964_v1, %v5974_v10  ;;  %v4774_v22 = vrot.slane %v4772_v14, 4  ;;  %v4778_v17 = vshll.u32 %v12054_v25, 16  ;;  %v4439_v35 = vld [vmem:[#allocation3 + $0xc0] sm:$0xf]  ;;  %13210 = vst [vmem:[#allocation11_spill] sm:$0xff] %v12234_v62  ;;  %v8565_v1 = vpop.f32.mrf.mxu0 }
 0x2ea   : > { %v5242_v40 = vshll.u32 %v8800_v32, 16  ;;  %v12216_v52 = vrot.slane %v4265_v37, 7  ;;  %v4268_v19 = vshll.u32 %v8376_v13, 16  ;;  %v3909_v30 = vmax.f32 %v3867_v63, 0.0  ;;  %v12241_v37 = vld [vmem:[#allocation3 + $0x9c] sm:$0xf] }
 0x2eb   : > { %v13209_v39 = vcombine.low %v13207_v12, %v13208_v6  ;;  %v12224_v60 = vrot.slane %v6000_v50, 4  ;;  %6883 = vrot.lane.b32.xlu0 %v8283_v55, %s8914_s12  ;;  %v4766_v51 = vrot.slane %v4765_v4, 4  ;;  %v4775_v46 = vor.u32 %v4774_v22, %v4770_v38  ;;  %v8801_v50 = vld [vmem:[#allocation3 + $0x40] sm:$0xf]  ;;  %v4432_v6 = vld [vmem:[#allocation3 + $0xb4] sm:$0xf] }
 0x2ec   : > { %v12227_v25 = vrot.slane %v6003_v53, 5  ;;  %v12229_v31 = vrot.slane %v5239_v34, 4  ;;  %v4270_v27 = vor.u32 %v4268_v19, %v12216_v52  ;;  %v8374_v48 = vpack.c.bf16 %v3909_v30, %v3909_v30 }
 0x2ed   : > { %v12222_v8 = vsel %vm3623_vm2, %v13209_v39, %v6390_v28  ;;  %v4776_v13 = vrot.slane %v4775_v46, 4  ;;  %v4780_v14 = vrot.slane %v4778_v17, 5  ;;  %v5208_v63 = vshll.u32 %v8801_v50, 16  ;;  %v8802_v17 = vld [vmem:[#allocation3 + $0x44] sm:$0x1] }
 0x2ee   : > { %v5212_v28 = vshrl.u32 %v8801_v50, 16  ;;  %v12237_v10 = vrot.slane %v5242_v40, 5  ;;  %v4440_v53 = vsel %vm10776_vm13, %v4270_v27, %v4439_v35  ;;  %v4248_v34 = vshrl.u32 %v8374_v48, 16  ;;  %v13211_v35 = vld [vmem:[#allocation19_spill] sm:$0xff] }
 0x2ef   : > { %4441 = vst [vmem:[#allocation3 + $0xc0] sm:$0xf] %v4440_v53  ;;  %v4771_v55 = vsel %vm9130_vm11, %v4766_v51, %v4770_v38  ;;  %v4781_v22 = vsel %vm9130_vm11, %v4776_v13, %v4780_v14  ;;  %v5218_v32 = vshll.u32 %v8802_v17, 16  ;;  %v8268_v19 = vcombine.low %v12241_v37, %v12232_v21  ;;  %v13213_v50 = vld [vmem:[#allocation7_spill] sm:$0xff]  ;;  %v12280_v17 = vpop.permute.xlu0 %6871  ;;  %v12291_v38 = vld [vmem:[#allocation3 + $0xa4] sm:$0x1] }
 0x2f0   : > { %v8188_v40 = vcombine.low %v4771_v55, %v4781_v22  ;;  %v12249_v30 = vrot.slane %v4248_v34, 7  ;;  %v4251_v12 = vshll.u32 %v8374_v48, 16  ;;  %v3878_v39 = vadd.f32 %v11988_v11, %v8565_v1  ;;  %v6106_v48 = vld [vmem:[#allocation3 + $0x9c] sm:$0xe]  ;;  %v12276_v22 = vld [vmem:[#allocation3 + $0xa4] sm:$0x1] }
 0x2f1   : > { %v13212_v46 = vor.u32 %v11311_v57, %v13211_v35  ;;  %v12261_v51 = vrot.slane %v5208_v63, 5  ;;  %v12263_v13 = vrot.slane %v5212_v28, 4  ;;  %6805 = vrot.lane.b32.xlu0 %v8268_v19, %s8913_s8  ;;  %v13214_v57 = vld [vmem:[#allocation14_spill] sm:$0xff]  ;;  %v13216_v55 = vld [vmem:[#allocation23_spill] sm:$0xff]  ;;  %v12278_v28 = vld [vmem:[#allocation3 + $0xa0] sm:$0xf] }
 0x2f2   : > { %6405 = vrot.lane.b32.xlu1 %v8188_v40, %s8910_s15  ;;  %v4253_v14 = vor.u32 %v4251_v12, %v12249_v30  ;;  %v13215_v1 = vor.u32 %v13213_v50, %v13214_v57  ;;  %v3912_v34 = vmax.f32 %v3878_v39, 0.0  ;;  %v6997_v63 = vsel %vm6991_vm1, %v12181_v42, %v13216_v55  ;;  %v13217_v12 = vld [vmem:[#allocation29_spill] sm:$0xff]  ;;  %v4891_v39 = vld [vmem:[#allocation3 + $0x9c] sm:$0xe]  ;;  %v3869_v50 = vpop.f32.mrf.mxu0 }
 0x2f3   : > { %v12255_v27 = vrot.slane %v13212_v46, 4  ;;  %v4271_v19 = vrot.slane %v12216_v52, 4  ;;  %v12283_v40 = vrot.slane %v5218_v32, 5  ;;  %v7032_v35 = vsel %vm7024_vm3, %v6997_v63, %v13217_v12  ;;  %v12306_v58 = vpop.permute.xlu0 %6793 }
 0x2f4   : > { %v12271_v53 = vrot.slane %v13215_v1, 4  ;;  %v6238_v46 = vrot.slane %v12232_v21, 5  ;;  %v4433_v42 = vsel %vm10776_vm13, %v4253_v14, %v4432_v6  ;;  %v8377_v1 = vpack.c.bf16 %v3912_v34, %v3912_v34  ;;  %7449 = vmatmul.mubr.bf16.gmra.mxu1 %v7032_v35 }
 0x2f5   : > { %v8156_v55 = vrot.slane %v6106_v48, 9  ;;  %4434 = vst [vmem:[#allocation3 + $0xb4] sm:$0xf] %v4433_v42  ;;  %v6241_v63 = vrot.slane %v12276_v22, 5  ;;  %v5035_v12 = vrot.slane %v12278_v28, 5  ;;  %v8126_v6 = vrot.slane %v4891_v39, 9 }
 0x2f6   : > { %v6240_v32 = vrot.slane %v6238_v46, 4  ;;  %v4273_v7 = vshrl.u32 %v8377_v1, 16  ;;  %v3870_v14 = vadd.f32 %v11988_v11, %v3869_v50  ;;  %v4276_v34 = vshll.u32 %v8377_v1, 16 }
 0x2f7   : > { %v6239_v5 = vsel %vm9110_vm7, %v8156_v55, %v6238_v46  ;;  %v5037_v35 = vrot.slane %v5035_v12, 4  ;;  %v5038_v42 = vrot.slane %v12291_v38, 5  ;;  %v6245_v23 = vrot.slane %v12102_v49, 5  ;;  %v4443_v46 = vld [vmem:[#allocation3 + $0xc8] sm:$0x1] }
 0x2f8   : > { %v6242_v48 = vsel %vm9110_vm7, %v6240_v32, %v6241_v63  ;;  %v4275_v57 = vrot.slane %v4273_v7, 7  ;;  %v3910_v52 = vmax.f32 %v3870_v14, 0.0  ;;  %v5036_v11 = vsel %vm9110_vm7, %v8126_v6, %v5035_v12 }
 0x2f9   : > { %v8300_v4 = vcombine.low %v6239_v5, %v6242_v48  ;;  %v5039_v39 = vsel %vm9110_vm7, %v5037_v35, %v5038_v42  ;;  %v5934_v50 = vor.u32 %v12197_v18, %v12186_v15  ;;  %v5937_v7 = vshll.u32 %v11944_v61, 16  ;;  %v5080_v35 = vld [vmem:[#allocation3 + $0xa8] sm:$0xf] }
 0x2fa   : > { %v4278_v1 = vor.u32 %v4276_v34, %v4275_v57  ;;  %v4280_v55 = vrot.slane %v4275_v57, 4  ;;  %v8206_v32 = vcombine.low %v5036_v11, %v5039_v39  ;;  %v8375_v63 = vpack.c.bf16 %v3910_v52, %v3910_v52  ;;  %v5081_v57 = vld [vmem:[#allocation3 + $0xac] sm:$0xf]  ;;  %v5499_v42 = vld [vmem:[#allocation3 + $0xa8] sm:$0xe] }
 0x2fb   : > { %8591 = vmatmul.mubr.msk.bf16.gmra.mxu0 %vm3623_vm2, %v8300_v4  ;;  %v8157_v5 = vrot.slane %v6107_v33, 9  ;;  %v6247_v14 = vrot.slane %v6245_v23, 4  ;;  %v6248_v48 = vrot.slane %v12303_v0, 5  ;;  %v5939_v62 = vrot.slane %v5937_v7, 5  ;;  %v4474_v7 = vld [vmem:[#allocation3 + $0xa8] sm:$0xf] }
 0x2fc   : > { %v4279_v12 = vsel %vm9138_vm12, %v4271_v19, %v4278_v1  ;;  %v4444_v6 = vsel %vm10786_vm6, %v4280_v55, %v4443_v46  ;;  %6489 = vrot.lane.b32.xlu1 %v8206_v32, %s8913_s8  ;;  %v4256_v15 = vshrl.u32 %v8375_v63, 16  ;;  %v5935_v18 = vrot.slane %v5934_v50, 4  ;;  %v12331_v1 = vpop.permute.xlu0 %6869  ;;  %v4436_v32 = vld [vmem:[#allocation3 + $0xbc] sm:$0x1] }
 0x2fd   : > { %4442 = vst.msk [vmem:[#allocation3 + $0xc4] sm:$0xf] %vm280_vm0, %v4279_v12  ;;  %4445 = vst [vmem:[#allocation3 + $0xc8] sm:$0x1] %v4444_v6  ;;  %v6246_v33 = vsel %vm9110_vm7, %v8157_v5, %v6245_v23  ;;  %v6249_v4 = vsel %vm9110_vm7, %v6247_v14, %v6248_v48  ;;  %v13218_v52 = vshrl.u32 %v11944_v61, 16  ;;  %v5947_v34 = vshll.u32 %v12144_v54, 16 }
 0x2fe   : > { %v5976_v46 = vshrl.u32 %v12241_v37, 16  ;;  %v4258_v11 = vrot.slane %v4256_v15, 7  ;;  %v4259_v39 = vshll.u32 %v8375_v63, 16  ;;  %v8301_v50 = vcombine.low %v6246_v33, %v6249_v4  ;;  %v12335_v14 = vld [vmem:[#allocation3 + $0xac] sm:$0xf] }
 0x2ff   : > { %v5943_v19 = vrot.slane %v13218_v52, 4  ;;  %v4254_v23 = vrot.slane %v12249_v30, 4  ;;  %v8222_v61 = vcombine.low %v5080_v35, %v5081_v57  ;;  %v5940_v63 = vsel %vm9130_vm11, %v5935_v18, %v5939_v62  ;;  %v5099_v6 = vld [vmem:[#allocation3 + $0xb0] sm:$0x1] }
 0x300   : > { %v4261_v54 = vor.u32 %v4259_v39, %v4258_v11  ;;  %v4263_v48 = vrot.slane %v4258_v11, 4  ;;  %8594 = vmatprep.mubr.msk.bf16.mxu0 %vm3623_vm2, %v8301_v50  ;;  %v5949_v12 = vrot.slane %v5947_v34, 5  ;;  %v8142_v30 = vrot.slane %v5499_v42, 9  ;;  %v12345_v35 = vld [vmem:[#allocation3 + $0xb0] sm:$0x1] }
 0x301   : > { %v5944_v5 = vor.u32 %v5943_v19, %v5939_v62  ;;  %6585 = vrot.lane.b32.xlu1 %v8222_v61, %s8914_s12  ;;  %v5643_v33 = vrot.slane %v5081_v57, 5  ;;  %v4831_v4 = vshrl.u32 %v4474_v7, 16  ;;  %v4834_v11 = vshll.u32 %v4474_v7, 16  ;;  %v5498_v42 = vld [vmem:[#allocation3 + $0x9c] sm:$0xe]  ;;  %v12354_v7 = vpop.permute.xlu0 %6701 }
 0x302   : > { %v4262_v52 = vsel %vm9138_vm12, %v4254_v23, %v4261_v54  ;;  %v4437_v19 = vsel %vm10786_vm6, %v4263_v48, %v4436_v32  ;;  %v4840_v39 = vshll.u32 %v12335_v14, 16  ;;  %v5646_v57 = vrot.slane %v5099_v6, 5  ;;  %v12352_v32 = vld [vmem:[#allocation3 + $0xa4] sm:$0x1]  ;;  %v12365_v6 = vpop.permute.xlu1 %6475 }
 0x303   : > { %v5945_v15 = vrot.slane %v5944_v5, 4  ;;  %4435 = vst.msk [vmem:[#allocation3 + $0xb8] sm:$0xf] %vm280_vm0, %v4262_v52  ;;  %4438 = vst [vmem:[#allocation3 + $0xbc] sm:$0x1] %v4437_v19  ;;  %v5645_v18 = vrot.slane %v5643_v33, 4  ;;  %v13220_v5 = vor.u32 %v12263_v13, %v12261_v51 }
 0x304   : > { %v4833_v34 = vrot.slane %v4831_v4, 4  ;;  %v4836_v50 = vrot.slane %v4834_v11, 5  ;;  %v4842_v23 = vrot.slane %v4840_v39, 5  ;;  %v4844_v47 = vshrl.u32 %v12335_v14, 16  ;;  %13219 = vst [vmem:[#allocation9_spill] sm:$0xff] %v12352_v32 }
 0x305   : > { %v5950_v62 = vsel %vm9130_vm11, %v5945_v15, %v5949_v12  ;;  %v12359_v61 = vrot.slane %v13220_v5, 4  ;;  %v5647_v54 = vsel %vm9110_vm7, %v5645_v18, %v5646_v57  ;;  %v4850_v48 = vshll.u32 %v12345_v35, 16  ;;  %v4472_v12 = vld [vmem:[#allocation3 + $0x9c] sm:$0xf] }
 0x306   : > { %v8282_v44 = vcombine.low %v5940_v63, %v5950_v62  ;;  %v5636_v63 = vrot.slane %v12123_v24, 5  ;;  %v5644_v15 = vsel %vm9110_vm7, %v8142_v30, %v5643_v33  ;;  %v4837_v4 = vor.u32 %v4836_v50, %v4833_v34 }
 0x307   : > { %v4846_v52 = vrot.slane %v4844_v47, 4  ;;  %v8141_v13 = vrot.slane %v5498_v42, 9  ;;  %v8254_v19 = vcombine.low %v5644_v15, %v5647_v54  ;;  %v4852_v11 = vrot.slane %v4850_v48, 5  ;;  %v12380_v54 = vpop.permute.xlu0 %6699 }
 0x308   : > { %6881 = vrot.lane.b32.xlu0 %v8282_v44, %s8914_s12  ;;  %v5638_v39 = vrot.slane %v5636_v63, 4  ;;  %v5639_v62 = vrot.slane %v12352_v32, 5  ;;  %v4838_v18 = vrot.slane %v4837_v4, 4  ;;  %v4807_v5 = vshrl.u32 %v4472_v12, 16  ;;  %v12383_v4 = vpop.permute.xlu1 %6473 }
 0x309   : > { %v4847_v57 = vor.u32 %v4846_v52, %v4842_v23  ;;  %v4810_v24 = vshll.u32 %v4472_v12, 16  ;;  %v5637_v55 = vsel %vm9110_vm7, %v8141_v13, %v5636_v63  ;;  %v4816_v30 = vshll.u32 %v12278_v28, 16 }
 0x30a   : > { %v5640_v44 = vsel %vm9110_vm7, %v5638_v39, %v5639_v62  ;;  %v4820_v33 = vshrl.u32 %v12278_v28, 16  ;;  %v4843_v34 = vsel %vm9130_vm11, %v4838_v18, %v4842_v23  ;;  %v4809_v47 = vrot.slane %v4807_v5, 4 }
 0x30b   : > { %v4848_v42 = vrot.slane %v4847_v57, 4  ;;  %v8253_v50 = vcombine.low %v5637_v55, %v5640_v44  ;;  %v4812_v48 = vrot.slane %v4810_v24, 5  ;;  %v4818_v12 = vrot.slane %v4816_v30, 5 }
 0x30c   : > { %6713 = vrot.lane.b32.xlu0 %v8254_v19, %s8910_s15  ;;  %v4822_v63 = vrot.slane %v4820_v33, 4  ;;  %v4826_v15 = vshll.u32 %v12291_v38, 16  ;;  %v6006_v52 = vor.u32 %v12227_v25, %v12224_v60  ;;  %v6009_v23 = vshll.u32 %v12102_v49, 16  ;;  %v12402_v25 = vpop.permute.xlu0 %6799  ;;  %v4892_v33 = vld [vmem:[#allocation3 + $0xa8] sm:$0xe] }
 0x30d   : > { %v4853_v28 = vsel %vm9130_vm11, %v4848_v42, %v4852_v11  ;;  %v13221_v55 = vshrl.u32 %v12102_v49, 16  ;;  %v5211_v19 = vsel %vm9130_vm11, %v12271_v53, %v12261_v51  ;;  %v4813_v38 = vor.u32 %v4812_v48, %v4809_v47 }
 0x30e   : > { %v8191_v39 = vcombine.low %v4843_v34, %v4853_v28  ;;  %v4823_v62 = vor.u32 %v4822_v63, %v4818_v12  ;;  %v5978_v18 = vrot.slane %v5976_v46, 4  ;;  %v13222_v11 = vshll.u32 %v12241_v37, 16  ;;  %v12410_v46 = vpop.permute.xlu1 %6573 }
 0x30f   : > { %v6015_v13 = vrot.slane %v13221_v55, 4  ;;  %v6011_v60 = vrot.slane %v6009_v23, 5  ;;  %v6019_v49 = vshll.u32 %v12303_v0, 16  ;;  %v4814_v5 = vrot.slane %v4813_v38, 4 }
 0x310   : > { %v5981_v57 = vrot.slane %v13222_v11, 5  ;;  %6711 = vrot.lane.b32.xlu0 %v8253_v50, %s8910_s15  ;;  %6411 = vrot.lane.b32.xlu1 %v8191_v39, %s8910_s15  ;;  %v4824_v51 = vrot.slane %v4823_v62, 4  ;;  %v4828_v53 = vrot.slane %v4826_v15, 5  ;;  %v5042_v24 = vrot.slane %v12335_v14, 5  ;;  %v12428_v39 = vpop.permute.xlu0 %6875 }
 0x311   : > { %v5221_v37 = vsel %vm9130_vm11, %v12359_v61, %v12283_v40  ;;  %v6007_v44 = vrot.slane %v6006_v52, 4  ;;  %v6016_v30 = vor.u32 %v6015_v13, %v6011_v60  ;;  %v5045_v0 = vrot.slane %v12345_v35, 5 }
 0x312   : > { %v4819_v34 = vsel %vm9130_vm11, %v4814_v5, %v4818_v12  ;;  %v4829_v42 = vsel %vm9130_vm11, %v4824_v51, %v4828_v53  ;;  %v6021_v50 = vrot.slane %v6019_v49, 5  ;;  %v5044_v14 = vrot.slane %v5042_v24, 4  ;;  %v6396_v11 = vpop.permute.xlu1 %6395  ;;  %v12446_v51 = vld [vmem:[#allocation3 + $0x84] sm:$0xf] }
 0x313   : > { %v8190_v47 = vcombine.low %v4819_v34, %v4829_v42  ;;  %v6017_v48 = vrot.slane %v6016_v30, 4  ;;  %v5982_v63 = vor.u32 %v5981_v57, %v5978_v18  ;;  %v5985_v40 = vshll.u32 %v12232_v21, 16  ;;  %v12437_v18 = vld [vmem:[#allocation3 + $0xb8] sm:$0xf] }
 0x314   : > { %v8229_v61 = vcombine.low %v5211_v19, %v5221_v37  ;;  %v8127_v15 = vrot.slane %v4892_v33, 9  ;;  %v5046_v28 = vsel %vm9110_vm7, %v5044_v14, %v5045_v0  ;;  %v13223_v35 = vshrl.u32 %v12232_v21, 16  ;;  %13224 = vst [vmem:[#allocation18_spill] sm:$0xff] %v12437_v18  ;;  %v12452_v37 = vld [vmem:[#allocation3 + $0xb4] sm:$0xf] }
 0x315   : > { %6409 = vrot.lane.b32.xlu1 %v8190_v47, %s8910_s15  ;;  %v6012_v12 = vsel %vm9130_vm11, %v6007_v44, %v6011_v60  ;;  %v6022_v23 = vsel %vm9130_vm11, %v6017_v48, %v6021_v50  ;;  %v5987_v55 = vrot.slane %v5985_v40, 5  ;;  %v5995_v13 = vshll.u32 %v12276_v22, 16  ;;  %v8804_v40 = vld [vmem:[#allocation3 + $0x4c] sm:$0xf] }
 0x316   : > { %v5991_v52 = vrot.slane %v13223_v35, 4  ;;  %v7087_v19 = vsel %vm3623_vm2, %v8229_v61, %v12208_v29  ;;  %v8285_v38 = vcombine.low %v6012_v12, %v6022_v23  ;;  %v5043_v21 = vsel %vm9110_vm7, %v8127_v15, %v5042_v24  ;;  %v5689_v24 = vld [vmem:[#allocation3 + $0xb4] sm:$0xf]  ;;  %v12487_v12 = vpop.permute.xlu1 %6571 }
 0x317   : > { %v7163_v62 = vsel %vm7024_vm3, %v12213_v41, %v12331_v1  ;;  %v8207_v57 = vcombine.low %v5043_v21, %v5046_v28  ;;  %v5983_v60 = vrot.slane %v5982_v63, 4  ;;  %v6999_v22 = vsel %vm6991_vm1, %v12222_v8, %v12090_v59  ;;  %v13226_v41 = vld [vmem:[#allocation24_spill] sm:$0xff]  ;;  %v12481_v63 = vpop.permute.xlu0 %6797 }
 0x318   : > { %v5992_v49 = vor.u32 %v5991_v52, %v5987_v55  ;;  %7456 = vmatprep.mubr.bf16.mxu1 %v7163_v62  ;;  %v13225_v29 = vshrl.u32 %v11763_v9, 16  ;;  %v5343_v53 = vshrl.u32 %v12446_v51, 16  ;;  %6887 = vrot.lane.b32.xlu0 %v8285_v38, %s8914_s12  ;;  %v7035_v1 = vsel %vm7024_vm3, %v6999_v22, %v13226_v41  ;;  %v13231_v38 = vld [vmem:[#allocation15_spill] sm:$0xff]  ;;  %v13232_v21 = vld [vmem:[#allocation12_spill] sm:$0xff] }
 0x319   : > { %v5235_v59 = vsel %vm9130_vm11, %v12255_v27, %v12194_v20  ;;  %6491 = vrot.lane.b32.xlu1 %v8207_v57, %s8913_s8  ;;  %v5997_v44 = vrot.slane %v5995_v13, 5  ;;  %7457 = vmatmul.mubr.bf16.gmra.mxu1 %v7035_v1  ;;  %v8223_v30 = vcombine.low %v12452_v37, %v12437_v18  ;;  %v13227_v33 = vshll.u32 %v11763_v9, 16  ;;  %v12477_v9 = vld [vmem:[#allocation3 + $0xb8] sm:$0xf]  ;;  %v12514_v41 = vld [vmem:[#allocation3 + $0x3c] sm:$0xf] }
 0x31a   : > { %v12444_v5 = vrot.slane %v13225_v29, 4  ;;  %v5993_v8 = vrot.slane %v5992_v49, 4  ;;  %v13228_v42 = vsel %vm9130_vm11, %v12229_v31, %v12237_v10  ;;  %v7130_v27 = vsel %vm6991_vm1, %v7087_v19, %v12026_v26  ;;  %v8805_v31 = vld [vmem:[#allocation3 + $0x48] sm:$0xf]  ;;  %v8806_v26 = vld [vmem:[#allocation3 + $0x64] sm:$0xf] }
 0x31b   : > { %v12463_v0 = vrot.slane %v13227_v33, 5  ;;  %v8230_v20 = vcombine.low %v5235_v59, %v13228_v42  ;;  %v5988_v50 = vsel %vm9130_vm11, %v5983_v60, %v5987_v55  ;;  %v6024_v47 = vshrl.u32 %v5689_v24, 16  ;;  %v13230_v55 = vld [vmem:[#allocation26_spill] sm:$0xff]  ;;  %v12492_v19 = vld [vmem:[#allocation3 + $0xc0] sm:$0xf] }
 0x31c   : > { %v5998_v14 = vsel %vm9130_vm11, %v5993_v8, %v5997_v44  ;;  %v7166_v48 = vsel %vm7024_vm3, %v7130_v27, %v12280_v17  ;;  %v8167_v10 = vcombine.low %v8805_v31, %v8804_v40  ;;  %v5280_v15 = vshll.u32 %v8806_v26, 16  ;;  %v13229_v17 = vld [vmem:[#allocation25_spill] sm:$0xff]  ;;  %v12510_v22 = vld [vmem:[#allocation3 + $0xb8] sm:$0xf]  ;;  %v4893_v29 = vld [vmem:[#allocation3 + $0xb4] sm:$0xe] }
 0x31d   : > { %v8284_v61 = vcombine.low %v5988_v50, %v5998_v14  ;;  %7464 = vmatprep.mubr.bf16.mxu1 %v7166_v48  ;;  %v5284_v28 = vshrl.u32 %v8806_v26, 16  ;;  %v12483_v35 = vrot.slane %v5343_v53, 4  ;;  %v7090_v52 = vsel %vm3623_vm2, %v8230_v20, %v12190_v2  ;;  %6587 = vrot.lane.b32.xlu1 %v8223_v30, %s8914_s12  ;;  %13234 = vst [vmem:[#allocation17_spill] sm:$0xff] %v12510_v22  ;;  %v12512_v53 = vld [vmem:[#allocation3 + $0x40] sm:$0xf]  ;;  %v12538_v48 = vpop.permute.xlu0 %6873 }
 0x31e   : > { %v6027_v23 = vshll.u32 %v5689_v24, 16  ;;  %v5277_v13 = vor.u32 %v13230_v55, %v13229_v17  ;;  %v13233_v62 = vcombine.low %v13231_v38, %v13232_v21  ;;  %v12502_v60 = vsel %vm3623_vm2, %v8167_v10, %v6396_v11  ;;  %v8809_v59 = vld [vmem:[#allocation3 + $0x58] sm:$0xf]  ;;  %v12528_v42 = vld [vmem:[#allocation3 + $0xbc] sm:$0x1] }
 0x31f   : > { %v12506_v2 = vsel %vm6991_vm1, %v7090_v52, %v12306_v58  ;;  %6885 = vrot.lane.b32.xlu0 %v8284_v61, %s8914_s12  ;;  %v8270_v49 = vcombine.low %v5689_v24, %v12477_v9  ;;  %v12519_v1 = vrot.slane %v6024_v47, 4  ;;  %v12521_v58 = vld [vmem:[#allocation3 + $0xc4] sm:$0xf]  ;;  %v5256_v8 = vshll.u32 %v8809_v59, 16  ;;  %v12534_v50 = vld [vmem:[#allocation3 + $0x68] sm:$0x1] }
 0x320   : > { %v12499_v57 = vsel %vm3623_vm2, %v13233_v62, %v12157_v16  ;;  %v12523_v44 = vrot.slane %v5280_v15, 5  ;;  %v12525_v24 = vrot.slane %v5284_v28, 4  ;;  %v6048_v30 = vshrl.u32 %v12492_v19, 16  ;;  %v6108_v26 = vld [vmem:[#allocation3 + $0xb4] sm:$0xe]  ;;  %v12545_v15 = vpop.permute.xlu1 %6393  ;;  %v13235_v28 = vld [vmem:[#allocation27_spill] sm:$0xff] }
 0x321   : > { %v5260_v33 = vshrl.u32 %v8809_v59, 16  ;;  %v12530_v20 = vrot.slane %v6027_v23, 5  ;;  %v12532_v27 = vrot.slane %v5277_v13, 4  ;;  %v5049_v47 = vrot.slane %v12510_v22, 5  ;;  %v13236_v52 = vld [vmem:[#allocation28_spill] sm:$0xff] }
 0x322   : > { %v12543_v10 = vrot.slane %v5256_v8, 5  ;;  %v5253_v23 = vor.u32 %v13236_v52, %v13235_v28  ;;  %v8128_v17 = vrot.slane %v4893_v29, 9  ;;  %v5052_v13 = vrot.slane %v12528_v42, 5  ;;  %v12550_v38 = vld [vmem:[#allocation3 + $0xbc] sm:$0x1] }
 0x323   : > { %6809 = vrot.lane.b32.xlu0 %v8270_v49, %s8913_s8  ;;  %v5262_v61 = vrot.slane %v5260_v33, 4  ;;  %v5051_v55 = vrot.slane %v5049_v47, 4  ;;  %v12554_v62 = vrot.slane %v6048_v30, 4  ;;  %v8271_v49 = vcombine.low %v12492_v19, %v12521_v58  ;;  %v12559_v8 = vld [vmem:[#allocation3 + $0xc8] sm:$0x1] }
 0x324   : > { %v6252_v59 = vrot.slane %v12477_v9, 5  ;;  %v6109_v33 = vld [vmem:[#allocation3 + $0xc0] sm:$0xe]  ;;  %v5050_v29 = vsel %vm9110_vm7, %v8128_v17, %v5049_v47  ;;  %v8158_v52 = vrot.slane %v6108_v26, 9  ;;  %v6259_v34 = vrot.slane %v12521_v58, 5 }
 0x325   : > { %v5053_v28 = vsel %vm9110_vm7, %v5051_v55, %v5052_v13  ;;  %v5263_v30 = vor.u32 %v5262_v61, %v12543_v10  ;;  %v6255_v14 = vrot.slane %v12550_v38, 5  ;;  %v12569_v21 = vrot.slane %v5253_v23, 4  ;;  %v12572_v17 = vld [vmem:[#allocation3 + $0xb4] sm:$0xf]  ;;  %v12574_v55 = vpop.permute.xlu0 %6705  ;;  %v8811_v26 = vld [vmem:[#allocation3 + $0x5c] sm:$0x1] }
 0x326   : > { %v8208_v16 = vcombine.low %v5050_v29, %v5053_v28  ;;  %v6254_v31 = vrot.slane %v6252_v59, 4  ;;  %v8159_v40 = vrot.slane %v6109_v33, 9  ;;  %v6261_v11 = vrot.slane %v6259_v34, 4  ;;  %13237 = vst [vmem:[#allocation22_spill] sm:$0xff] %v12572_v17  ;;  %v5500_v33 = vld [vmem:[#allocation3 + $0xb4] sm:$0xe]  ;;  %v12584_v29 = vpop.permute.xlu1 %6479 }
 0x327   : > { %6811 = vrot.lane.b32.xlu0 %v8271_v49, %s8913_s8  ;;  %v6262_v47 = vrot.slane %v12559_v8, 5  ;;  %v5266_v13 = vshll.u32 %v8811_v26, 16  ;;  %v6253_v61 = vsel %vm9110_vm7, %v8158_v52, %v6252_v59  ;;  %v7001_v23 = vsel %vm6991_vm1, %v12499_v57, %v12063_v3  ;;  %13238 = vst [vmem:[#allocation10_spill] sm:$0xff] %v12584_v29  ;;  %v12592_v52 = vld [vmem:[#allocation3 + $0xbc] sm:$0x1] }
 0x328   : > { %6493 = vrot.lane.b32.xlu1 %v8208_v16, %s8913_s8  ;;  %v6256_v49 = vsel %vm9110_vm7, %v6254_v31, %v6255_v14  ;;  %v6260_v32 = vsel %vm9110_vm7, %v8159_v40, %v6259_v34  ;;  %v7038_v59 = vsel %vm7024_vm3, %v7001_v23, %v12188_v56  ;;  %13239 = vst [vmem:[#allocation8_spill] sm:$0xff] %v12592_v52  ;;  %v5264_v14 = vrot.slane %v5263_v30, 4 }
 0x329   : > { %v8302_v28 = vcombine.low %v6253_v61, %v6256_v49  ;;  %v6263_v16 = vsel %vm9110_vm7, %v6261_v11, %v6262_v47  ;;  %7465 = vmatmul.mubr.bf16.gmra.mxu1 %v7038_v59  ;;  %v5650_v3 = vrot.slane %v12437_v18, 5  ;;  %v4855_v57 = vshrl.u32 %v12572_v17, 16 }
 0x32a   : > { %v8303_v31 = vcombine.low %v6260_v32, %v6263_v16  ;;  %v8143_v26 = vrot.slane %v5500_v33, 9  ;;  %v4858_v34 = vshll.u32 %v12572_v17, 16  ;;  %v4864_v40 = vshll.u32 %v12510_v22, 16 }
 0x32b   : > { %8595 = vmatmul.mubr.msk.bf16.gmra.mxu0 %vm3623_vm2, %v8302_v28  ;;  %v4868_v11 = vshrl.u32 %v12510_v22, 16  ;;  %v5652_v56 = vrot.slane %v5650_v3, 4  ;;  %v5653_v30 = vrot.slane %v12592_v52, 5  ;;  %v4857_v32 = vrot.slane %v4855_v57, 4  ;;  %v12605_v28 = vpop.permute.xlu0 %6703 }
 0x32c   : > { %8598 = vmatprep.mubr.msk.bf16.mxu0 %vm3623_vm2, %v8303_v31  ;;  %v4874_v47 = vshll.u32 %v12528_v42, 16  ;;  %v4860_v61 = vrot.slane %v4858_v34, 5  ;;  %v4866_v49 = vrot.slane %v4864_v40, 5  ;;  %v6030_v33 = vor.u32 %v12530_v20, %v12519_v1  ;;  %v12614_v42 = vpop.permute.xlu1 %6477 }
 0x32d   : > { %v4870_v23 = vrot.slane %v4868_v11, 4  ;;  %v5651_v16 = vsel %vm9110_vm7, %v8143_v26, %v5650_v3  ;;  %v5654_v59 = vsel %vm9110_vm7, %v5652_v56, %v5653_v30  ;;  %v6033_v31 = vshll.u32 %v12477_v9, 16 }
 0x32e   : > { %v13240_v57 = vshrl.u32 %v12477_v9, 16  ;;  %v13241_v34 = vshll.u32 %v12492_v19, 16  ;;  %v8255_v11 = vcombine.low %v5651_v16, %v5654_v59  ;;  %v4861_v1 = vor.u32 %v4860_v61, %v4857_v32  ;;  %v12642_v16 = vld [vmem:[#allocation3 + $0xcc] sm:$0xf] }
 0x32f   : > { %v4871_v20 = vor.u32 %v4870_v23, %v4866_v49  ;;  %v13242_v17 = vor.u32 %v12525_v24, %v12523_v44  ;;  %v5268_v26 = vrot.slane %v5266_v13, 5  ;;  %v6035_v22 = vrot.slane %v6033_v31, 5  ;;  %v12623_v29 = vpop.permute.xlu0 %6803  ;;  %v12633_v13 = vld [vmem:[#allocation3 + $0xc4] sm:$0xf] }
 0x330   : > { %v6039_v52 = vrot.slane %v13240_v57, 4  ;;  %v6053_v40 = vrot.slane %v13241_v34, 5  ;;  %v6043_v56 = vshll.u32 %v12550_v38, 16  ;;  %6715 = vrot.lane.b32.xlu0 %v8255_v11, %s8910_s15  ;;  %v4862_v9 = vrot.slane %v4861_v1, 4 }
 0x331   : > { %v5288_v3 = vrot.slane %v13242_v17, 4  ;;  %v4872_v30 = vrot.slane %v4871_v20, 4  ;;  %v4876_v57 = vrot.slane %v4874_v47, 5  ;;  %v6031_v18 = vrot.slane %v6030_v33, 4  ;;  %v12656_v20 = vld [vmem:[#allocation3 + $0xd0] sm:$0xf] }
 0x332   : > { %v13243_v19 = vshll.u32 %v12534_v50, 16  ;;  %v5259_v24 = vsel %vm9130_vm11, %v12569_v21, %v12543_v10  ;;  %v5269_v17 = vsel %vm9130_vm11, %v5264_v14, %v5268_v26  ;;  %v6040_v38 = vor.u32 %v6039_v52, %v6035_v22  ;;  %v12639_v50 = vpop.permute.xlu1 %6577 }
 0x333   : > { %v4867_v47 = vsel %vm9130_vm11, %v4862_v9, %v4866_v49  ;;  %v4877_v61 = vsel %vm9130_vm11, %v4872_v30, %v4876_v57  ;;  %v6045_v23 = vrot.slane %v6043_v56, 5  ;;  %v6054_v33 = vor.u32 %v6053_v40, %v12554_v62  ;;  %v12668_v56 = vld [vmem:[#allocation3 + $0xc0] sm:$0xf]  ;;  %v12670_v30 = vpop.permute.xlu0 %6879 }
 0x334   : > { %v5292_v32 = vrot.slane %v13243_v19, 5  ;;  %v8192_v10 = vcombine.low %v4867_v47, %v4877_v61  ;;  %v6041_v21 = vrot.slane %v6040_v38, 4  ;;  %v6057_v14 = vshll.u32 %v12521_v58, 16  ;;  %v12683_v38 = vld [vmem:[#allocation3 + $0xd4] sm:$0x1] }
 0x335   : > { %v13244_v52 = vshrl.u32 %v12521_v58, 16  ;;  %v8231_v31 = vcombine.low %v5259_v24, %v5269_v17  ;;  %v6036_v34 = vsel %vm9130_vm11, %v6031_v18, %v6035_v22  ;;  %v5657_v11 = vrot.slane %v12633_v13, 5 }
 0x336   : > { %v5293_v49 = vsel %vm9130_vm11, %v5288_v3, %v5292_v32  ;;  %6413 = vrot.lane.b32.xlu1 %v8192_v10, %s8910_s15  ;;  %v6046_v62 = vsel %vm9130_vm11, %v6041_v21, %v6045_v23  ;;  %v6059_v40 = vrot.slane %v6057_v14, 5  ;;  %v6067_v1 = vshll.u32 %v12559_v8, 16  ;;  %v5501_v8 = vld [vmem:[#allocation3 + $0xc0] sm:$0xe] }
 0x337   : > { %v6063_v59 = vrot.slane %v13244_v52, 4  ;;  %v6072_v58 = vshrl.u32 %v12642_v16, 16  ;;  %v13245_v3 = vcombine.low %v12514_v41, %v12512_v53  ;;  %v5283_v22 = vsel %vm9130_vm11, %v12532_v27, %v12523_v44  ;;  %v12679_v44 = vpop.permute.xlu1 %6399 }
 0x338   : > { %v8286_v26 = vcombine.low %v6036_v34, %v6046_v62  ;;  %v6055_v9 = vrot.slane %v6054_v33, 4  ;;  %v8232_v57 = vcombine.low %v5283_v22, %v5293_v49  ;;  %v7093_v19 = vsel %vm3623_vm2, %v8231_v31, %v12380_v54 }
 0x339   : > { %v6960_v18 = vsel %vm3623_vm2, %v13245_v3, %v12545_v15  ;;  %v8224_v53 = vcombine.low %v12668_v56, %v12633_v13  ;;  %v6064_v41 = vor.u32 %v6063_v59, %v6059_v40  ;;  %v12676_v15 = vld [vmem:[#allocation3 + $0xc8] sm:$0x1]  ;;  %v5659_v27 = vrot.slane %v5657_v11, 4 }
 0x33a   : > { %6889 = vrot.lane.b32.xlu0 %v8286_v26, %s8914_s12  ;;  %v6074_v32 = vrot.slane %v6072_v58, 4  ;;  %v6075_v24 = vshll.u32 %v12642_v16, 16  ;;  %v6085_v17 = vshrl.u32 %v12656_v20, 16  ;;  %v6069_v47 = vrot.slane %v6067_v1, 5  ;;  %v12700_v58 = vpop.permute.xlu0 %6801 }
 0x33b   : > { %6589 = vrot.lane.b32.xlu1 %v8224_v53, %s8914_s12  ;;  %v6065_v54 = vrot.slane %v6064_v41, 4  ;;  %v8144_v61 = vrot.slane %v5501_v8, 9  ;;  %v6081_v23 = vshll.u32 %v12656_v20, 16  ;;  %v6060_v33 = vsel %vm9130_vm11, %v6055_v9, %v6059_v40  ;;  %v13246_v9 = vld [vmem:[#allocation11_spill] sm:$0xff]  ;;  %v13248_v8 = vld [vmem:[#allocation21_spill] sm:$0xff] }
 0x33c   : > { %v5660_v10 = vrot.slane %v12676_v15, 5  ;;  %v6077_v21 = vrot.slane %v6075_v24, 5  ;;  %v6087_v14 = vrot.slane %v6085_v17, 4  ;;  %v6091_v49 = vshll.u32 %v12683_v38, 16  ;;  %v8812_v41 = vld [vmem:[#allocation3 + $0x7c] sm:$0xf] }
 0x33d   : > { %v6070_v52 = vsel %vm9130_vm11, %v6065_v54, %v6069_v47  ;;  %v6083_v59 = vrot.slane %v6081_v23, 5  ;;  %v7169_v31 = vsel %vm7024_vm3, %v12506_v2, %v12538_v48  ;;  %v7003_v40 = vsel %vm6991_vm1, %v6960_v18, %v12383_v4  ;;  %v12709_v48 = vpop.permute.xlu1 %6575  ;;  %v13247_v18 = vld [vmem:[#allocation20_spill] sm:$0xff]  ;;  %v8814_v23 = vld [vmem:[#allocation3 + $0x70] sm:$0xf] }
 0x33e   : > { %v8287_v34 = vcombine.low %v6060_v33, %v6070_v52  ;;  %v5661_v62 = vsel %vm9110_vm7, %v5659_v27, %v5660_v10  ;;  %v6078_v1 = vor.u32 %v6077_v21, %v6074_v32  ;;  %7472 = vmatprep.mubr.bf16.mxu1 %v7169_v31  ;;  %v5658_v3 = vsel %vm9110_vm7, %v8144_v61, %v5657_v11  ;;  %v8813_v47 = vld [vmem:[#allocation3 + $0x80] sm:$0x1] }
 0x33f   : > { %v6088_v22 = vor.u32 %v6087_v14, %v6083_v59  ;;  %v7041_v26 = vsel %vm7024_vm3, %v7003_v40, %v12105_v45  ;;  %v7134_v2 = vsel %vm6991_vm1, %v7093_v19, %v13246_v9  ;;  %v5325_v53 = vor.u32 %v13248_v8, %v13247_v18 }
 0x340   : > { %6891 = vrot.lane.b32.xlu0 %v8287_v34, %s8914_s12  ;;  %7473 = vmatmul.mubr.bf16.gmra.mxu1 %v7041_v26  ;;  %v7172_v4 = vsel %vm7024_vm3, %v7134_v2, %v12428_v39  ;;  %v5328_v11 = vshll.u32 %v8812_v41, 16  ;;  %v5332_v27 = vshrl.u32 %v8812_v41, 16  ;;  %v8256_v32 = vcombine.low %v5658_v3, %v5661_v62  ;;  %v6878_v62 = vpop.permute.xlu0 %6877 }
 0x341   : > { %v6079_v24 = vrot.slane %v6078_v1, 4  ;;  %v6089_v45 = vrot.slane %v6088_v22, 4  ;;  %v6093_v17 = vrot.slane %v6091_v49, 5  ;;  %7480 = vmatprep.mubr.bf16.mxu1 %v7172_v4  ;;  %v5338_v61 = vshll.u32 %v8813_v47, 16  ;;  %v6398_v22 = vpop.permute.xlu1 %6397 }
 0x342   : > { %v5330_v19 = vrot.slane %v5328_v11, 5  ;;  %v5334_v54 = vrot.slane %v5332_v27, 4  ;;  %v5304_v33 = vshll.u32 %v8814_v23, 16  ;;  %v7096_v39 = vsel %vm3623_vm2, %v8232_v57, %v12354_v7  ;;  %v8815_v57 = vld [vmem:[#allocation3 + $0x74] sm:$0x1] }
 0x343   : > { %v8272_v10 = vcombine.low %v12642_v16, %v12656_v20  ;;  %v5301_v21 = vor.u32 %v12463_v0, %v12444_v5  ;;  %v5308_v14 = vshrl.u32 %v8814_v23, 16  ;;  %v7136_v52 = vsel %vm6991_vm1, %v7096_v39, %v12481_v63  ;;  %v8816_v5 = vld [vmem:[#allocation3 + $0x58] sm:$0xf]  ;;  %v8817_v0 = vld [vmem:[#allocation3 + $0x54] sm:$0xf] }
 0x344   : > { %6717 = vrot.lane.b32.xlu0 %v8256_v32, %s8910_s15  ;;  %v5326_v49 = vrot.slane %v5325_v53, 4  ;;  %v5335_v31 = vor.u32 %v5334_v54, %v5330_v19  ;;  %v5306_v34 = vrot.slane %v5304_v33, 5  ;;  %v6084_v1 = vsel %vm9130_vm11, %v6079_v24, %v6083_v59  ;;  %s215_s15 = sand.u32 1, %s8894_s19  }
 0x345   : > { %v6094_v7 = vsel %vm9130_vm11, %v6089_v45, %v6093_v17  ;;  %v5310_v16 = vrot.slane %v5308_v14, 4  ;;  %v5314_v40 = vshll.u32 %v8815_v57, 16  ;;  %v8168_v3 = vcombine.low %v8817_v0, %v8816_v5  ;;  %v8818_v17 = vld [vmem:[#allocation3 + $0x88] sm:$0xf]  ;;  %s7866_s26 = sshll.u32 %s215_s15, 8  ;;  %s13028_s14 = scalar_lea.sflag [#allocation5], %s215_s15 }
 0x346   : > { %v5336_v26 = vrot.slane %v5335_v31, 4  ;;  %v5340_v9 = vrot.slane %v5338_v61, 5  ;;  %v7005_v63 = vsel %vm6991_vm1, %v12502_v60, %v12365_v6  ;;  %v5302_v2 = vrot.slane %v5301_v21, 4  ;;  %v12760_v21 = vpop.permute.xlu0 %6709  ;;  %v8821_v31 = vld [vmem:[#allocation3 + $0x60] sm:$0xf]  ;;  %s12836_s30 = scalar_lea.vmem [#allocation4], %s7866_s26 }
 0x347   : > { %v5311_v4 = vor.u32 %v5310_v16, %v5306_v34  ;;  %v7044_v59 = vsel %vm7024_vm3, %v7005_v63, %v12487_v12  ;;  %v7175_v18 = vsel %vm7024_vm3, %v7136_v52, %v6878_v62  ;;  %v13249_v8 = vshll.u32 %v12446_v51, 16  ;;  %v8819_v52 = vld [vmem:[#allocation3 + $0x8c] sm:$0x1]  ;;  %v12764_v62 = vpop.permute.xlu1 %6483  ;;  %s7800_s7 = sshll.u32 %s12836_s30, 4  ;;  %s13022_s7 = int_to_ptr.vmem [resolvable:$true] %s7800_s7 }
 0x348   : > { %6813 = vrot.lane.b32.xlu0 %v8272_v10, %s8913_s8  ;;  %v8288_v41 = vcombine.low %v6084_v1, %v6094_v7  ;;  %v5331_v11 = vsel %vm9130_vm11, %v5326_v49, %v5330_v19  ;;  %v5341_v27 = vsel %vm9130_vm11, %v5336_v26, %v5340_v9  ;;  %7481 = vmatmul.mubr.bf16.gmra.mxu1 %v7044_v59  ;;  %v5316_v12 = vrot.slane %v5314_v40, 5  ;;  %v13250_v26 = vld [vmem:[#allocation10_spill] sm:$0xff]  ;;  %s8842_s22 = scalar_lea.vmem %s13022_s7, 4096  ;;  %p8849_p0 = scmp.lt.s32.totalorder %s13022_s7, %s8847_s17 }
 0x349   : > { %v5348_v53 = vrot.slane %v13249_v8, 5  ;;  %v6966_v6 = vsel %vm3623_vm2, %v8168_v3, %v6398_v22  ;;  %v8234_v60 = vcombine.low %v5331_v11, %v5341_v27  ;;  %v5312_v32 = vrot.slane %v5311_v4, 4  ;;  %7488 = vmatprep.mubr.bf16.mxu1 %v7175_v18  ;;  %p8843_p11 = scmp.ne.s32.totalorder %s13022_s7, %s8842_s22  ;;  %p8850_p1 = scmp.lt.s32.totalorder %s8848_s23, %s8842_s22 }
 0x34a   : > { %v5307_v24 = vsel %vm9130_vm11, %v5302_v2, %v5306_v34  ;;  %v5352_v19 = vshll.u32 %v8818_v17, 16  ;;  %v7007_v47 = vsel %vm6991_vm1, %v6966_v6, %v12614_v42  ;;  %v5356_v33 = vshrl.u32 %v8818_v17, 16  ;;  %v8820_v42 = vld [vmem:[#allocation3 + $0x64] sm:$0xf]  ;;  %v6708_v3 = vpop.permute.xlu0 %6707  ;;  %v13252_v6 = vld [vmem:[#allocation17_spill] sm:$0xff] }
 0x34b   : > { %v12744_v51 = vsel %vm3623_vm2, %v8234_v60, %v12574_v55  ;;  %v5317_v45 = vsel %vm9130_vm11, %v5312_v32, %v5316_v12  ;;  %v5349_v61 = vor.u32 %v5348_v53, %v12483_v35  ;;  %v7047_v39 = vsel %vm7024_vm3, %v7007_v47, %v12410_v46  ;;  %v13253_v60 = vld [vmem:[#allocation22_spill] sm:$0xff]  ;;  %p8844_p12 = pnand %p8843_p11, %p8985_p5  ;;  %p8851_p2 = por %p8850_p1, %p8849_p0 }
 0x34c   : > { %6893 = vrot.lane.b32.xlu0 %v8288_v41, %s8914_s12  ;;  %v8233_v54 = vcombine.low %v5307_v24, %v5317_v45  ;;  %v5354_v23 = vrot.slane %v5352_v19, 5  ;;  %v5358_v14 = vrot.slane %v5356_v33, 4  ;;  %v5362_v49 = vshll.u32 %v8819_v52, 16  ;;  %v13251_v41 = vld [vmem:[#allocation18_spill] sm:$0xff]  ;;  %v13254_v24 = vld [vmem:[#allocation8_spill] sm:$0xff] }
 0x34d   : > { %v8169_v34 = vcombine.low %v8821_v31, %v8820_v42  ;;  %v5439_v1 = vshrl.u32 %v12452_v37, 16  ;;  %v5463_v40 = vshrl.u32 %v12668_v56, 16  ;;  %v5448_v11 = vshll.u32 %v13251_v41, 16  ;;  %p8845_p13 = pneg %p8844_p12 }
 0x34e   : > { %v7099_v55 = vsel %vm3623_vm2, %v8233_v54, %v12605_v28  ;;  %v5350_v28 = vrot.slane %v5349_v61, 4  ;;  %v5359_v46 = vor.u32 %v5358_v14, %v5354_v23  ;;  %v5364_v57 = vrot.slane %v5362_v49, 5  ;;  %v6110_v54 = vld [vmem:[#allocation3 + $0xcc] sm:$0xe] }
 0x34f   : > { %v7138_v10 = vsel %vm6991_vm1, %v7099_v55, %v12402_v25  ;;  %v5442_v25 = vshll.u32 %v12452_v37, 16  ;;  %v6969_v7 = vsel %vm3623_vm2, %v8169_v34, %v12679_v44  ;;  %v5441_v9 = vrot.slane %v5439_v1, 4  ;;  %v12778_v44 = vpop.permute.xlu1 %6481  ;;  %p8852_p3 = pnand %p8851_p2, %p8845_p13 }
 0x350   : > { %7489 = vmatmul.mubr.bf16.gmra.mxu1 %v7047_v39  ;;  %v7178_v35 = vsel %vm7024_vm3, %v7138_v10, %v12670_v30  ;;  %v5360_v16 = vrot.slane %v5359_v46, 4  ;;  %v5466_v30 = vshll.u32 %v12668_v56, 16  ;;  %v5355_v5 = vsel %vm9130_vm11, %v5350_v28, %v5354_v23 }
 0x351   : > { %7496 = vmatprep.mubr.bf16.mxu1 %v7178_v35  ;;  %v7009_v37 = vsel %vm6991_vm1, %v6969_v7, %v13250_v26  ;;  %v5444_v63 = vrot.slane %v5442_v25, 5  ;;  %v5465_v4 = vrot.slane %v5463_v40, 4  ;;  %v5452_v27 = vshrl.u32 %v13251_v41, 16 }
 0x352   : > { %v5365_v0 = vsel %vm9130_vm11, %v5360_v16, %v5364_v57  ;;  %v7050_v2 = vsel %vm7024_vm3, %v7009_v37, %v12709_v48  ;;  %v5468_v59 = vrot.slane %v5466_v30, 5  ;;  %v8176_v32 = vcombine.low %v13253_v60, %v13252_v6 }
 0x353   : > { %v8235_v22 = vcombine.low %v5355_v5, %v5365_v0  ;;  %v12787_v8 = vpop.permute.xlu1 %6581  ;;  %v5445_v53 = vor.u32 %v5444_v63, %v5441_v9  ;;  %v5450_v48 = vrot.slane %v5448_v11, 5  ;;  %v5454_v12 = vrot.slane %v5452_v27, 4  ;;  %v12827_v9 = vpop.permute.xlu0 %6807 }
 0x354   : > { %v5458_v45 = vshll.u32 %v13254_v24, 16  ;;  %v5469_v17 = vor.u32 %v5468_v59, %v5465_v4  ;;  %v5472_v19 = vshll.u32 %v12633_v13, 16  ;;  %v5482_v10 = vshll.u32 %v12676_v15, 16 }
 0x355   : > { %v7105_v56 = vsel %vm3623_vm2, %v8235_v22, %v6708_v3  ;;  %v5446_v61 = vrot.slane %v5445_v53, 4  ;;  %v5455_v23 = vor.u32 %v5454_v12, %v5450_v48  ;;  %v8160_v42 = vrot.slane %v6110_v54, 9 }
 0x356   : > { %v12785_v18 = vsel %vm6991_vm1, %v7105_v56, %v12623_v29  ;;  %v5476_v29 = vshrl.u32 %v12633_v13, 16  ;;  %v5470_v33 = vrot.slane %v5469_v17, 4  ;;  %v5474_v55 = vrot.slane %v5472_v19, 5  ;;  %v8823_v17 = vld [vmem:[#allocation3 + $0x6c] sm:$0xf] }
 0x357   : > { %v12797_v14 = vpop.permute.xlu1 %6403  ;;  %v5456_v49 = vrot.slane %v5455_v23, 4  ;;  %v5460_v35 = vrot.slane %v5458_v45, 5  ;;  %v6266_v31 = vrot.slane %v12656_v20, 5  ;;  %v6269_v28 = vrot.slane %v12683_v38, 5  ;;  %v12815_v38 = vld [vmem:[%s13073_s4] ss:$0 sm:$0xff] }
 0x358   : > { %7497 = vmatmul.mubr.bf16.gmra.mxu1 %v7050_v2  ;;  %v5478_v39 = vrot.slane %v5476_v29, 4  ;;  %v5475_v13 = vsel %vm9130_vm11, %v5470_v33, %v5474_v55  ;;  %v5451_v46 = vsel %vm9130_vm11, %v5446_v61, %v5450_v48  ;;  %v5484_v40 = vrot.slane %v5482_v10, 5  ;;  %v8822_v45 = vld [vmem:[#allocation3 + $0x70] sm:$0xf]  ;;  %v8824_v33 = vld [vmem:[#allocation3 + $0x94] sm:$0xf] }
 0x359   : > { %v5461_v15 = vsel %vm9130_vm11, %v5456_v49, %v5460_v35  ;;  %v6267_v25 = vsel %vm9110_vm7, %v8160_v42, %v6266_v31  ;;  %v6268_v7 = vrot.slane %v6266_v31, 4  ;;  %v8170_v19 = vcombine.low %v8823_v17, %v8822_v45  ;;  %v8825_v49 = vld [vmem:[#allocation3 + $0xa0] sm:$0xf]  ;;  %v8826_v31 = vld [vmem:[#allocation3 + $0x90] sm:$0xf] }
 0x35a   : > { %v5479_v34 = vor.u32 %v5478_v39, %v5474_v55  ;;  %v12809_v20 = vcombine.low %v5451_v46, %v5461_v15  ;;  %v7140_v23 = vsel %vm6991_vm1, %v12744_v51, %v12700_v58  ;;  %v5376_v55 = vshll.u32 %v8824_v33, 16  ;;  %v8828_v51 = vld [vmem:[#allocation3 + $0x7c] sm:$0xf] }
 0x35b   : > { %v6270_v5 = vsel %vm9110_vm7, %v6268_v7, %v6269_v28  ;;  %v12821_v22 = vpop.permute.xlu1 %6579  ;;  %v5380_v10 = vshrl.u32 %v8824_v33, 16  ;;  %v5400_v35 = vshll.u32 %v8825_v49, 16  ;;  %v5404_v42 = vshrl.u32 %v8825_v49, 16  ;;  %v8827_v28 = vld [vmem:[#allocation3 + $0x9c] sm:$0xf] }
 0x35c   : > { %v8414_v47 = vpop.f32.mrf.mxu0  ;;  %v5480_v57 = vrot.slane %v5479_v34, 4  ;;  %v8304_v3 = vcombine.low %v6267_v25, %v6270_v5  ;;  %v5391_v46 = vshrl.u32 %v8827_v28, 16  ;;  %v5394_v15 = vshll.u32 %v8827_v28, 16 }
 0x35d   : > { %v6884_v27 = vpop.permute.xlu0 %6883  ;;  %v5378_v7 = vrot.slane %v5376_v55, 5  ;;  %v5406_v5 = vrot.slane %v5404_v42, 4 }
 0x35e   : > { %v8415_v52 = vpop.f32.mrf.mxu0  ;;  %v5485_v0 = vsel %vm9130_vm11, %v5480_v57, %v5484_v40  ;;  %8599 = vmatmul.mubr.msk.bf16.gmra.mxu0 %vm3623_vm2, %v8304_v3  ;;  %v7184_v58 = vsel %vm7024_vm3, %v12785_v18, %v6884_v27 }
 0x35f   : > { %v8416_v16 = vadd.f32 %v8415_v52, %v8414_v47  ;;  %v12825_v37 = vcombine.low %v5475_v13, %v5485_v0  ;;  %v6402_v41 = vpop.permute.xlu1 %6401  ;;  %v5367_v13 = vshrl.u32 %v8826_v31, 16 }
 0x360   : > { %v8417_v1 = vpop.f32.mrf.mxu0  ;;  %v6972_v54 = vsel %vm3623_vm2, %v8170_v19, %v6402_v41 }
 0x361   : > { %v7435_v2 = vadd.f32 %v8416_v16, %v12815_v38  ;;  %v7011_v61 = vsel %vm6991_vm1, %v6972_v54, %v12778_v44  ;;  %v5370_v44 = vshll.u32 %v8826_v31, 16  ;;  %v5382_v16 = vrot.slane %v5380_v10, 4 }
 0x362   : > { %v8418_v30 = vpop.f32.mrf.mxu0  ;;  %v7053_v34 = vsel %vm7024_vm3, %v7011_v61, %v12639_v50  ;;  %v5369_v0 = vrot.slane %v5367_v13, 4 }
 0x363   : > { %v8419_v63 = vadd.f32 %v8418_v30, %v8417_v1  ;;  %v12842_v24 = vpop.permute.xlu1 %6487  ;;  %v12844_v29 = vpop.permute.xlu0 %6805  ;;  %v8829_v1 = vld [vmem:[#allocation3 + $0x78] sm:$0xf]  ;;  %v5402_v30 = vrot.slane %v5400_v35, 5  ;;  %v5372_v3 = vrot.slane %v5370_v44, 5 }
 0x364   : > { %v8171_v25 = vcombine.low %v8829_v1, %v8828_v51 }
 0x365   : > { %v7438_v53 = vadd.f32 %v8419_v63, %v12815_v38  ;;  %v5393_v63 = vrot.slane %v5391_v46, 4  ;;  %v5373_v41 = vor.u32 %v5372_v3, %v5369_v0 }
 0x366   : > { %v6975_v50 = vsel %vm3623_vm2, %v8171_v25, %v12797_v14 }
 0x367   : > { %v12823_v26 = vpop.f32.mrf.mxu0  ;;  %v12847_v47 = vpop.permute.xlu1 %6485  ;;  %v5374_v54 = vrot.slane %v5373_v41, 4 }
 0x369   : > { %v7595_v43 = vpop.f32.mrf.mxu0  ;;  %v5379_v35 = vsel %vm9130_vm11, %v5374_v54, %v5378_v7 }
 0x36a   : > { %v7596_v56 = vadd.f32 %v7595_v43, %v7435_v2  ;;  %v5396_v2 = vrot.slane %v5394_v15, 5  ;;  %v5383_v43 = vor.u32 %v5382_v16, %v5378_v7  ;;  %v8833_v16 = vld [vmem:[#allocation3 + $0x94] sm:$0xf] }
 0x36b   : > { %v12833_v4 = vpop.f32.mrf.mxu0  ;;  %v6408_v57 = vpop.permute.xlu1 %6407 }
 0x36c   : > { %v7722_v59 = vmax.f32 %v7596_v56, 0.0  ;;  %v5407_v56 = vor.u32 %v5406_v5, %v5402_v30  ;;  %v5384_v17 = vrot.slane %v5383_v43, 4 }
 0x36d   : > { %v7598_v11 = vpop.f32.mrf.mxu0 }
 0x36e   : > { %7754 = vst.msk [vmem:[%s12836_s30] sm:$0xff] %vm3623_vm2, %v7722_v59  ;;  %v7599_v48 = vadd.f32 %v7598_v11, %v7438_v53  ;;  %v7013_v59 = vsel %vm6991_vm1, %v6975_v50, %v12764_v62  ;;  %v8830_v11 = vld [vmem:[#allocation3 + $0x98] sm:$0x1]  ;;  %v5408_v19 = vrot.slane %v5407_v56, 4  ;;  %v8835_v50 = vld [vmem:[#allocation3 + $0xac] sm:$0xf] }
 0x36f   : > { %v6584_v18 = vpop.permute.xlu1 %6583  ;;  %v7056_v53 = vsel %vm7024_vm3, %v7013_v59, %v12821_v22  ;;  %v5386_v27 = vshll.u32 %v8830_v11, 16  ;;  %v8832_v22 = vld [vmem:[#allocation3 + $0x84] sm:$0xf]  ;;  %v5428_v0 = vshrl.u32 %v8835_v50, 16 }
 0x370   : > { %v7723_v12 = vmax.f32 %v7599_v48, 0.0  ;;  %v5397_v48 = vor.u32 %v5396_v2, %v5393_v63  ;;  %v8836_v63 = vld [vmem:[#allocation3 + $0xa8] sm:$0xf] }
 0x371   : > { %v5388_v61 = vrot.slane %v5386_v27, 5  ;;  %v5415_v2 = vshrl.u32 %v8836_v63, 16  ;;  %v5418_v43 = vshll.u32 %v8836_v63, 16  ;;  %v5430_v56 = vrot.slane %v5428_v0, 4 }
 0x372   : > { %7755 = vst.msk [vmem:[%s12836_s30 + $0x8] sm:$0xff] %vm3623_vm2, %v7723_v12  ;;  %v13255_v12 = vld [vmem:[#allocation9_spill] sm:$0xff]  ;;  %v5398_v33 = vrot.slane %v5397_v48, 4 }
 0x373   : > { %v5410_v45 = vshll.u32 %v13255_v12, 16  ;;  %v5389_v62 = vsel %vm9130_vm11, %v5384_v17, %v5388_v61  ;;  %v5417_v11 = vrot.slane %v5415_v2, 4  ;;  %v5420_v27 = vrot.slane %v5418_v43, 5 }
 0x374   : > { %v5403_v31 = vsel %vm9130_vm11, %v5398_v33, %v5402_v30  ;;  %v8236_v13 = vcombine.low %v5379_v35, %v5389_v62  ;;  %v8834_v30 = vld [vmem:[#allocation3 + $0x90] sm:$0xf] }
 0x375   : > { %v5412_v55 = vrot.slane %v5410_v45, 5  ;;  %v8173_v5 = vcombine.low %v8834_v30, %v8833_v16  ;;  %v5421_v45 = vor.u32 %v5420_v27, %v5417_v11  ;;  %v8840_v30 = vld [vmem:[#allocation3 + $0xa8] sm:$0xf] }
 0x376   : > { %v7108_v28 = vsel %vm3623_vm2, %v8236_v13, %v12760_v21 }
 0x377   : > { %v6981_v3 = vsel %vm3623_vm2, %v8173_v5, %v6408_v57  ;;  %v8841_v5 = vld [vmem:[#allocation3 + $0xac] sm:$0xf]  ;;  %v8576_v63 = vpop.f32.mrf.mxu0 }
 0x37a   : > { %v6882_v39 = vpop.permute.xlu0 %6881 }
 0x37b   : > { %v7181_v52 = vsel %vm7024_vm3, %v7140_v23, %v6882_v39  ;;  %v6406_v23 = vpop.permute.xlu1 %6405  ;;  %v8831_v39 = vld [vmem:[#allocation3 + $0x88] sm:$0xf] }
 0x37c   : > { %7504 = vmatprep.mubr.bf16.mxu1 %v7181_v52  ;;  %v8172_v10 = vcombine.low %v8832_v22, %v8831_v39  ;;  %v5413_v52 = vsel %vm9130_vm11, %v5408_v19, %v5412_v55 }
 0x37d   : > { %7505 = vmatmul.mubr.bf16.gmra.mxu1 %v7053_v34  ;;  %v8237_v34 = vcombine.low %v5403_v31, %v5413_v52  ;;  %v8838_v52 = vld [vmem:[#allocation3 + $0xa0] sm:$0xf] }
 0x37e   : > { %7512 = vmatprep.mubr.bf16.mxu1 %v7184_v58  ;;  %v12859_v40 = vpop.permute.xlu0 %6713  ;;  %v6978_v42 = vsel %vm3623_vm2, %v8172_v10, %v6406_v23  ;;  %v7144_v58 = vsel %vm6991_vm1, %v7108_v28, %v12844_v29  ;;  %v5424_v29 = vshll.u32 %v8835_v50, 16  ;;  %v8175_v50 = vcombine.low %v8840_v30, %v8841_v5 }
 0x37f   : > { %v12877_v44 = vpop.permute.xlu1 %6489  ;;  %v7015_v15 = vsel %vm6991_vm1, %v6978_v42, %v12847_v47 }
 0x380   : > { %v7059_v25 = vsel %vm7024_vm3, %v7015_v15, %v12787_v8  ;;  %v5426_v8 = vrot.slane %v5424_v29, 5 }
 0x382   : > { %v6712_v14 = vpop.permute.xlu0 %6711  ;;  %v5431_v48 = vor.u32 %v5430_v56, %v5426_v8  ;;  %v7611_v56 = vpop.f32.mrf.mxu0 }
 0x383   : > { %v7111_v46 = vsel %vm3623_vm2, %v8237_v34, %v6712_v14  ;;  %v6586_v47 = vpop.permute.xlu1 %6585  ;;  %v8837_v14 = vld [vmem:[#allocation3 + $0xb0] sm:$0x1] }
 0x384   : > { %v7146_v7 = vsel %vm6991_vm1, %v7111_v46, %v12827_v9  ;;  %v7017_v9 = vsel %vm6991_vm1, %v6981_v3, %v12842_v24  ;;  %v5434_v57 = vshll.u32 %v8837_v14, 16  ;;  %v5432_v23 = vrot.slane %v5431_v48, 4  ;;  %v8577_v48 = vpop.f32.mrf.mxu0 }
 0x385   : > { %7513 = vmatmul.mubr.bf16.gmra.mxu1 %v7056_v53  ;;  %v7062_v41 = vsel %vm7024_vm3, %v7017_v9, %v6584_v18  ;;  %v5422_v24 = vrot.slane %v5421_v45, 4 }
 0x386   : > { %v5436_v62 = vrot.slane %v5434_v57, 5 }
 0x387   : > { %v6412_v53 = vpop.permute.xlu1 %6411  ;;  %v5427_v28 = vsel %vm9130_vm11, %v5422_v24, %v5426_v8 }
 0x388   : > { %v5437_v10 = vsel %vm9130_vm11, %v5432_v23, %v5436_v62  ;;  %v6987_v3 = vsel %vm3623_vm2, %v8175_v50, %v6412_v53 }
 0x389   : > { %v8238_v15 = vcombine.low %v5427_v28, %v5437_v10 }
 0x38a   : > { %v6888_v49 = vpop.permute.xlu0 %6887 }
 0x38b   : > { %v7190_v21 = vsel %vm7024_vm3, %v7146_v7, %v6888_v49  ;;  %v6410_v54 = vpop.permute.xlu1 %6409  ;;  %v8839_v49 = vld [vmem:[#allocation3 + $0x9c] sm:$0xf] }
 0x38c   : > { %v8174_v35 = vcombine.low %v8839_v49, %v8838_v52 }
 0x38e   : > { %v6984_v46 = vsel %vm3623_vm2, %v8174_v35, %v6410_v54 }
 0x38f   : > { %v6492_v31 = vpop.permute.xlu1 %6491 }
 0x390   : > { %v7021_v2 = vsel %vm6991_vm1, %v6987_v3, %v6492_v31 }
 0x391   : > { %v6886_v51 = vpop.permute.xlu0 %6885 }
 0x392   : > { %v7187_v1 = vsel %vm7024_vm3, %v7144_v58, %v6886_v51  ;;  %v7114_v58 = vsel %vm3623_vm2, %v8238_v15, %v12859_v40 }
 0x393   : > { %7520 = vmatprep.mubr.bf16.mxu1 %v7187_v1  ;;  %v6588_v51 = vpop.permute.xlu1 %6587  ;;  %v7019_v1 = vsel %vm6991_vm1, %v6984_v46, %v12877_v44 }
 0x394   : > { %7521 = vmatmul.mubr.bf16.gmra.mxu1 %v7059_v25  ;;  %v7065_v16 = vsel %vm7024_vm3, %v7019_v1, %v6586_v47  ;;  %v7068_v43 = vsel %vm7024_vm3, %v7021_v2, %v6588_v51 }
 0x395   : > { %7528 = vmatprep.mubr.bf16.mxu1 %v7190_v21  ;;  %v6810_v59 = vpop.permute.xlu0 %6809 }
 0x396   : > { %v7148_v7 = vsel %vm6991_vm1, %v7114_v58, %v6810_v59 }
 0x399   : > { %v6812_v17 = vpop.permute.xlu0 %6811 }
 0x39a   : > { %v6494_v40 = vpop.permute.xlu1 %6493 }
 0x39c   : > { %7529 = vmatmul.mubr.bf16.gmra.mxu1 %v7062_v41  ;;  %v8420_v12 = vpop.f32.mrf.mxu1 }
 0x39e   : > { %v8421_v19 = vpop.f32.mrf.mxu1 }
 0x39f   : > { %v8422_v61 = vadd.f32 %v8421_v19, %v8420_v12 }
 0x3a0   : > { %v8423_v33 = vpop.f32.mrf.mxu1 }
 0x3a1   : > { %v7443_v55 = vadd.f32 %v8422_v61, %v12815_v38 }
 0x3a2   : > { %v8424_v18 = vpop.f32.mrf.mxu1  ;;  %v6716_v42 = vpop.permute.xlu0 %6715 }
 0x3a3   : > { %v7604_v39 = vadd.f32 %v12823_v26, %v7443_v55  ;;  %v8425_v22 = vadd.f32 %v8424_v18, %v8423_v33 }
 0x3a5   : > { %v7724_v13 = vmax.f32 %v7604_v39, 0.0  ;;  %v7446_v34 = vadd.f32 %v8425_v22, %v12815_v38 }
 0x3a7   : > { %7756 = vst.msk [vmem:[%s12836_s30 + $0x10] sm:$0xff] %vm3623_vm2, %v7724_v13  ;;  %v7607_v26 = vadd.f32 %v12833_v4, %v7446_v34  ;;  %v7117_v4 = vsel %vm3623_vm2, %v12809_v20, %v6716_v42 }
 0x3a8   : > { %v7150_v29 = vsel %vm6991_vm1, %v7117_v4, %v6812_v17  ;;  %v6414_v8 = vpop.permute.xlu1 %6413 }
 0x3a9   : > { %v7725_v25 = vmax.f32 %v7607_v26, 0.0  ;;  %v6990_v53 = vsel %vm3623_vm2, %v8176_v32, %v6414_v8  ;;  %v7614_v32 = vpop.f32.mrf.mxu0 }
 0x3aa   : > { %v7023_v23 = vsel %vm6991_vm1, %v6990_v53, %v6494_v40 }
 0x3ab   : > { %7757 = vst.msk [vmem:[%s12836_s30 + $0x18] sm:$0xff] %vm3623_vm2, %v7725_v25  ;;  %v8580_v34 = vpop.f32.mrf.mxu0 }
 0x3ac   : > { %v6890_v21 = vpop.permute.xlu0 %6889 }
 0x3ad   : > { %v7193_v36 = vsel %vm7024_vm3, %v7148_v7, %v6890_v21  ;;  %v6590_v45 = vpop.permute.xlu1 %6589  ;;  %v7627_v46 = vpop.f32.mrf.mxu0 }
 0x3ae   : > { %7536 = vmatprep.mubr.bf16.mxu1 %v7193_v36  ;;  %v7071_v33 = vsel %vm7024_vm3, %v7023_v23, %v6590_v45 }
 0x3af   : > { %7537 = vmatmul.mubr.bf16.gmra.mxu1 %v7065_v16  ;;  %v8581_v1 = vpop.f32.mrf.mxu0 }
 0x3b1   : > { %v7630_v4 = vpop.f32.mrf.mxu0 }
 0x3b2   : > { %v6892_v44 = vpop.permute.xlu0 %6891 }
 0x3b3   : > { %v7196_v0 = vsel %vm7024_vm3, %v7150_v29, %v6892_v44  ;;  %v8584_v3 = vpop.f32.mrf.mxu0 }
 0x3b4   : > { %7544 = vmatprep.mubr.bf16.mxu1 %v7196_v0  ;;  %v8426_v20 = vpop.f32.mrf.mxu1 }
 0x3b6   : > { %v6718_v47 = vpop.permute.xlu0 %6717  ;;  %v8427_v59 = vpop.f32.mrf.mxu1 }
 0x3b7   : > { %7545 = vmatmul.mubr.bf16.gmra.mxu1 %v7068_v43  ;;  %v8428_v9 = vadd.f32 %v8427_v59, %v8426_v20  ;;  %v7120_v14 = vsel %vm3623_vm2, %v12825_v37, %v6718_v47 }
 0x3b8   : > { %v8429_v11 = vpop.f32.mrf.mxu1 }
 0x3b9   : > { %v7451_v27 = vadd.f32 %v8428_v9, %v12815_v38 }
 0x3ba   : > { %v6814_v41 = vpop.permute.xlu0 %6813  ;;  %v8430_v12 = vpop.f32.mrf.mxu1 }
 0x3bb   : > { %v7612_v57 = vadd.f32 %v7611_v56, %v7451_v27  ;;  %v8431_v17 = vadd.f32 %v8430_v12, %v8429_v11  ;;  %v7152_v19 = vsel %vm6991_vm1, %v7120_v14, %v6814_v41  ;;  %v7643_v56 = vpop.f32.mrf.mxu0 }
 0x3bd   : > { %v7726_v6 = vmax.f32 %v7612_v57, 0.0  ;;  %v7454_v60 = vadd.f32 %v8431_v17, %v12815_v38 }
 0x3be   : > { %v6894_v54 = vpop.permute.xlu0 %6893 }
 0x3bf   : > { %v7199_v61 = vsel %vm7024_vm3, %v7152_v19, %v6894_v54  ;;  %7758 = vst.msk [vmem:[%s12836_s30 + $0x20] sm:$0xff] %vm3623_vm2, %v7726_v6  ;;  %v7615_v37 = vadd.f32 %v7614_v32, %v7454_v60 }
 0x3c0   : > { %7552 = vmatprep.mubr.bf16.mxu1 %v7199_v61 }
 0x3c1   : > { %7553 = vmatmul.mubr.bf16.gmra.mxu1 %v7071_v33  ;;  %v7727_v55 = vmax.f32 %v7615_v37, 0.0 }
 0x3c3   : > { %7759 = vst.msk [vmem:[%s12836_s30 + $0x28] sm:$0xff] %vm3623_vm2, %v7727_v55 }
 0x3d9   : > { %v8432_v24 = vpop.f32.mrf.mxu1 }
 0x3db   : > { %v8433_v62 = vpop.f32.mrf.mxu1 }
 0x3dc   : > { %v8434_v18 = vadd.f32 %v8433_v62, %v8432_v24 }
 0x3dd   : > { %v8435_v39 = vpop.f32.mrf.mxu1 }
 0x3de   : > { %v7459_v22 = vadd.f32 %v8434_v18, %v12815_v38 }
 0x3df   : > { %v8436_v10 = vpop.f32.mrf.mxu1 }
 0x3e0   : > { %v7620_v52 = vadd.f32 %v8576_v63, %v7459_v22  ;;  %v8437_v49 = vadd.f32 %v8436_v10, %v8435_v39 }
 0x3e2   : > { %v7728_v35 = vmax.f32 %v7620_v52, 0.0  ;;  %v7462_v42 = vadd.f32 %v8437_v49, %v12815_v38 }
 0x3e4   : > { %7760 = vst.msk [vmem:[%s12836_s30 + $0x30] sm:$0xff] %vm3623_vm2, %v7728_v35  ;;  %v7623_v31 = vadd.f32 %v8577_v48, %v7462_v42  ;;  %v8585_v48 = vpop.f32.mrf.mxu0 }
 0x3e6   : > { %v7729_v13 = vmax.f32 %v7623_v31, 0.0  ;;  %v7646_v54 = vpop.f32.mrf.mxu0 }
 0x3e8   : > { %7761 = vst.msk [vmem:[%s12836_s30 + $0x38] sm:$0xff] %vm3623_vm2, %v7729_v13  ;;  %v8588_v37 = vpop.f32.mrf.mxu0 }
 0x3e9   : > { %v8438_v28 = vpop.f32.mrf.mxu1 }
 0x3ea   : > { %v7659_v10 = vpop.f32.mrf.mxu0 }
 0x3eb   : > { %v8439_v15 = vpop.f32.mrf.mxu1 }
 0x3ec   : > { %v8440_v26 = vadd.f32 %v8439_v15, %v8438_v28 }
 0x3ed   : > { %v8441_v58 = vpop.f32.mrf.mxu1 }
 0x3ee   : > { %v7467_v51 = vadd.f32 %v8440_v26, %v12815_v38 }
 0x3ef   : > { %v8442_v25 = vpop.f32.mrf.mxu1 }
 0x3f0   : > { %v7628_v7 = vadd.f32 %v7627_v46, %v7467_v51  ;;  %v8443_v21 = vadd.f32 %v8442_v25, %v8441_v58 }
 0x3f2   : > { %v7730_v36 = vmax.f32 %v7628_v7, 0.0  ;;  %v7470_v16 = vadd.f32 %v8443_v21, %v12815_v38 }
 0x3f4   : > { %7762 = vst.msk [vmem:[%s12836_s30 + $0x40] sm:$0xff] %vm3623_vm2, %v7730_v36  ;;  %v7631_v40 = vadd.f32 %v7630_v4, %v7470_v16 }
 0x3f6   : > { %v7731_v30 = vmax.f32 %v7631_v40, 0.0 }
 0x3f8   : > { %7763 = vst.msk [vmem:[%s12836_s30 + $0x48] sm:$0xff] %vm3623_vm2, %v7731_v30 }
 0x400   : > { %v8444_v5 = vpop.f32.mrf.mxu1 }
 0x402   : > { %v8445_v50 = vpop.f32.mrf.mxu1 }
 0x403   : > { %v8446_v44 = vadd.f32 %v8445_v50, %v8444_v5 }
 0x404   : > { %v8447_v29 = vpop.f32.mrf.mxu1 }
 0x405   : > { %v7475_v0 = vadd.f32 %v8446_v44, %v12815_v38 }
 0x406   : > { %v8448_v63 = vpop.f32.mrf.mxu1 }
 0x407   : > { %v7636_v2 = vadd.f32 %v8580_v34, %v7475_v0  ;;  %v8449_v47 = vadd.f32 %v8448_v63, %v8447_v29  ;;  %v8589_v34 = vpop.f32.mrf.mxu0 }
 0x408   : > { %v8450_v43 = vpop.f32.mrf.mxu1 }
 0x409   : > { %v7732_v20 = vmax.f32 %v7636_v2, 0.0  ;;  %v7478_v8 = vadd.f32 %v8449_v47, %v12815_v38  ;;  %v7662_v51 = vpop.f32.mrf.mxu0 }
 0x40a   : > { %v8451_v59 = vpop.f32.mrf.mxu1 }
 0x40b   : > { %7764 = vst.msk [vmem:[%s12836_s30 + $0x50] sm:$0xff] %vm3623_vm2, %v7732_v20  ;;  %v7639_v9 = vadd.f32 %v8581_v1, %v7478_v8  ;;  %v8452_v41 = vadd.f32 %v8451_v59, %v8450_v43  ;;  %v8592_v40 = vpop.f32.mrf.mxu0 }
 0x40c   : > { %v8453_v11 = vpop.f32.mrf.mxu1 }
 0x40d   : > { %v7733_v27 = vmax.f32 %v7639_v9, 0.0  ;;  %v7483_v53 = vadd.f32 %v8452_v41, %v12815_v38 }
 0x40e   : > { %v8454_v12 = vpop.f32.mrf.mxu1 }
 0x40f   : > { %7765 = vst.msk [vmem:[%s12836_s30 + $0x58] sm:$0xff] %vm3623_vm2, %v7733_v27  ;;  %v7644_v45 = vadd.f32 %v7643_v56, %v7483_v53  ;;  %v8455_v14 = vadd.f32 %v8454_v12, %v8453_v11 }
 0x410   : > { %v8456_v57 = vpop.f32.mrf.mxu1 }
 0x411   : > { %v7734_v17 = vmax.f32 %v7644_v45, 0.0  ;;  %v7486_v19 = vadd.f32 %v8455_v14, %v12815_v38 }
 0x412   : > { %v8457_v61 = vpop.f32.mrf.mxu1 }
 0x413   : > { %7766 = vst.msk [vmem:[%s12836_s30 + $0x60] sm:$0xff] %vm3623_vm2, %v7734_v17  ;;  %v7647_v23 = vadd.f32 %v7646_v54, %v7486_v19  ;;  %v8458_v6 = vadd.f32 %v8457_v61, %v8456_v57 }
 0x414   : > { %v8459_v60 = vpop.f32.mrf.mxu1 }
 0x415   : > { %v7735_v32 = vmax.f32 %v7647_v23, 0.0  ;;  %v7491_v33 = vadd.f32 %v8458_v6, %v12815_v38 }
 0x416   : > { %v8460_v55 = vpop.f32.mrf.mxu1 }
 0x417   : > { %7767 = vst.msk [vmem:[%s12836_s30 + $0x68] sm:$0xff] %vm3623_vm2, %v7735_v32  ;;  %v7652_v24 = vadd.f32 %v8584_v3, %v7491_v33  ;;  %v8461_v62 = vadd.f32 %v8460_v55, %v8459_v60  ;;  %v7675_v3 = vpop.f32.mrf.mxu0 }
 0x418   : > { %v8462_v18 = vpop.f32.mrf.mxu1 }
 0x419   : > { %v7736_v39 = vmax.f32 %v7652_v24, 0.0  ;;  %v7494_v22 = vadd.f32 %v8461_v62, %v12815_v38  ;;  %v8593_v56 = vpop.f32.mrf.mxu0 }
 0x41a   : > { %v8463_v52 = vpop.f32.mrf.mxu1 }
 0x41b   : > { %7768 = vst.msk [vmem:[%s12836_s30 + $0x70] sm:$0xff] %vm3623_vm2, %v7736_v39  ;;  %v7655_v49 = vadd.f32 %v8585_v48, %v7494_v22  ;;  %v8464_v35 = vadd.f32 %v8463_v52, %v8462_v18  ;;  %v7678_v53 = vpop.f32.mrf.mxu0 }
 0x41c   : > { %v8465_v42 = vpop.f32.mrf.mxu1 }
 0x41d   : > { %v7737_v31 = vmax.f32 %v7655_v49, 0.0  ;;  %v7499_v13 = vadd.f32 %v8464_v35, %v12815_v38  ;;  %v8596_v54 = vpop.f32.mrf.mxu0 }
 0x41e   : > { %v8466_v28 = vpop.f32.mrf.mxu1 }
 0x41f   : > { %7769 = vst.msk [vmem:[%s12836_s30 + $0x78] sm:$0xff] %vm3623_vm2, %v7737_v31  ;;  %v7660_v46 = vadd.f32 %v7659_v10, %v7499_v13  ;;  %v8467_v15 = vadd.f32 %v8466_v28, %v8465_v42 }
 0x421   : > { %v7738_v26 = vmax.f32 %v7660_v46, 0.0  ;;  %v7502_v58 = vadd.f32 %v8467_v15, %v12815_v38 }
 0x423   : > { %7770 = vst.msk [vmem:[%s12836_s30 + $0x80] sm:$0xff] %vm3623_vm2, %v7738_v26  ;;  %v7663_v1 = vadd.f32 %v7662_v51, %v7502_v58 }
 0x425   : > { %v7739_v25 = vmax.f32 %v7663_v1, 0.0 }
 0x427   : > { %7771 = vst.msk [vmem:[%s12836_s30 + $0x88] sm:$0xff] %vm3623_vm2, %v7739_v25 }
 0x43d   : > { %v8468_v7 = vpop.f32.mrf.mxu1 }
 0x43f   : > { %v8469_v21 = vpop.f32.mrf.mxu1 }
 0x440   : > { %v8470_v36 = vadd.f32 %v8469_v21, %v8468_v7 }
 0x441   : > { %v8471_v16 = vpop.f32.mrf.mxu1 }
 0x442   : > { %v7507_v4 = vadd.f32 %v8470_v36, %v12815_v38 }
 0x443   : > { %v8472_v30 = vpop.f32.mrf.mxu1 }
 0x444   : > { %v7668_v5 = vadd.f32 %v8588_v37, %v7507_v4  ;;  %v8473_v50 = vadd.f32 %v8472_v30, %v8471_v16  ;;  %v7691_v37 = vpop.f32.mrf.mxu0 }
 0x445   : > { %v8474_v44 = vpop.f32.mrf.mxu1 }
 0x446   : > { %v7740_v29 = vmax.f32 %v7668_v5, 0.0  ;;  %v7510_v0 = vadd.f32 %v8473_v50, %v12815_v38  ;;  %v8597_v10 = vpop.f32.mrf.mxu0 }
 0x447   : > { %v8475_v63 = vpop.f32.mrf.mxu1 }
 0x448   : > { %7772 = vst.msk [vmem:[%s12836_s30 + $0x90] sm:$0xff] %vm3623_vm2, %v7740_v29  ;;  %v7671_v2 = vadd.f32 %v8589_v34, %v7510_v0  ;;  %v8476_v47 = vadd.f32 %v8475_v63, %v8474_v44  ;;  %v7694_v13 = vpop.f32.mrf.mxu0 }
 0x449   : > { %v8477_v43 = vpop.f32.mrf.mxu1 }
 0x44a   : > { %v7741_v20 = vmax.f32 %v7671_v2, 0.0  ;;  %v7515_v8 = vadd.f32 %v8476_v47, %v12815_v38  ;;  %v8600_v51 = vpop.f32.mrf.mxu0 }
 0x44b   : > { %v8478_v59 = vpop.f32.mrf.mxu1 }
 0x44c   : > { %7773 = vst.msk [vmem:[%s12836_s30 + $0x98] sm:$0xff] %vm3623_vm2, %v7741_v20  ;;  %v7676_v9 = vadd.f32 %v7675_v3, %v7515_v8  ;;  %v8479_v41 = vadd.f32 %v8478_v59, %v8477_v43  ;;  %v7707_v16 = vpop.f32.mrf.mxu0 }
 0x44e   : > { %v7742_v11 = vmax.f32 %v7676_v9, 0.0  ;;  %v7518_v27 = vadd.f32 %v8479_v41, %v12815_v38  ;;  %v8601_v29 = vpop.f32.mrf.mxu0 }
 0x450   : > { %7774 = vst.msk [vmem:[%s12836_s30 + $0xa0] sm:$0xff] %vm3623_vm2, %v7742_v11  ;;  %v7679_v48 = vadd.f32 %v7678_v53, %v7518_v27  ;;  %v7710_v43 = vpop.f32.mrf.mxu0 }
 0x452   : > { %v7743_v12 = vmax.f32 %v7679_v48, 0.0 }
 0x454   : > { %7775 = vst.msk [vmem:[%s12836_s30 + $0xa8] sm:$0xff] %vm3623_vm2, %v7743_v12  ;;  %v8480_v45 = vpop.f32.mrf.mxu1 }
 0x456   : > { %v8481_v14 = vpop.f32.mrf.mxu1 }
 0x457   : > { %v8482_v57 = vadd.f32 %v8481_v14, %v8480_v45 }
 0x458   : > { %v8483_v17 = vpop.f32.mrf.mxu1 }
 0x459   : > { %v7523_v19 = vadd.f32 %v8482_v57, %v12815_v38 }
 0x45a   : > { %v8484_v61 = vpop.f32.mrf.mxu1 }
 0x45b   : > { %v7684_v23 = vadd.f32 %v8592_v40, %v7523_v19  ;;  %v8485_v6 = vadd.f32 %v8484_v61, %v8483_v17 }
 0x45c   : > { %v8486_v60 = vpop.f32.mrf.mxu1 }
 0x45d   : > { %v7744_v32 = vmax.f32 %v7684_v23, 0.0  ;;  %v7526_v33 = vadd.f32 %v8485_v6, %v12815_v38 }
 0x45e   : > { %v8487_v55 = vpop.f32.mrf.mxu1 }
 0x45f   : > { %7776 = vst.msk [vmem:[%s12836_s30 + $0xb0] sm:$0xff] %vm3623_vm2, %v7744_v32  ;;  %v7687_v24 = vadd.f32 %v8593_v56, %v7526_v33  ;;  %v8488_v62 = vadd.f32 %v8487_v55, %v8486_v60 }
 0x460   : > { %v8489_v18 = vpop.f32.mrf.mxu1 }
 0x461   : > { %v7745_v39 = vmax.f32 %v7687_v24, 0.0  ;;  %v7531_v22 = vadd.f32 %v8488_v62, %v12815_v38 }
 0x462   : > { %v8490_v52 = vpop.f32.mrf.mxu1 }
 0x463   : > { %7777 = vst.msk [vmem:[%s12836_s30 + $0xb8] sm:$0xff] %vm3623_vm2, %v7745_v39  ;;  %v7692_v49 = vadd.f32 %v7691_v37, %v7531_v22  ;;  %v8491_v35 = vadd.f32 %v8490_v52, %v8489_v18 }
 0x465   : > { %v7746_v42 = vmax.f32 %v7692_v49, 0.0  ;;  %v7534_v31 = vadd.f32 %v8491_v35, %v12815_v38 }
 0x467   : > { %7778 = vst.msk [vmem:[%s12836_s30 + $0xc0] sm:$0xff] %vm3623_vm2, %v7746_v42  ;;  %v7695_v34 = vadd.f32 %v7694_v13, %v7534_v31 }
 0x469   : > { %v7747_v28 = vmax.f32 %v7695_v34, 0.0 }
 0x46b   : > { %7779 = vst.msk [vmem:[%s12836_s30 + $0xc8] sm:$0xff] %vm3623_vm2, %v7747_v28 }
 0x46f   : > { %v8492_v46 = vpop.f32.mrf.mxu1 }
 0x471   : > { %v8493_v15 = vpop.f32.mrf.mxu1 }
 0x472   : > { %v8494_v26 = vadd.f32 %v8493_v15, %v8492_v46 }
 0x473   : > { %v8495_v58 = vpop.f32.mrf.mxu1 }
 0x474   : > { %v7539_v1 = vadd.f32 %v8494_v26, %v12815_v38 }
 0x475   : > { %v8496_v25 = vpop.f32.mrf.mxu1 }
 0x476   : > { %v7700_v7 = vadd.f32 %v8596_v54, %v7539_v1  ;;  %v8497_v21 = vadd.f32 %v8496_v25, %v8495_v58 }
 0x477   : > { %v8498_v36 = vpop.f32.mrf.mxu1 }
 0x478   : > { %v7748_v4 = vmax.f32 %v7700_v7, 0.0  ;;  %v7542_v40 = vadd.f32 %v8497_v21, %v12815_v38 }
 0x479   : > { %v8499_v30 = vpop.f32.mrf.mxu1 }
 0x47a   : > { %7780 = vst.msk [vmem:[%s12836_s30 + $0xd0] sm:$0xff] %vm3623_vm2, %v7748_v4  ;;  %v7703_v5 = vadd.f32 %v8597_v10, %v7542_v40  ;;  %v8500_v50 = vadd.f32 %v8499_v30, %v8498_v36 }
 0x47b   : > { %v8501_v44 = vpop.f32.mrf.mxu1 }
 0x47c   : > { %v7749_v0 = vmax.f32 %v7703_v5, 0.0  ;;  %v7547_v3 = vadd.f32 %v8500_v50, %v12815_v38 }
 0x47d   : > { %v8502_v63 = vpop.f32.mrf.mxu1 }
 0x47e   : > { %7781 = vst.msk [vmem:[%s12836_s30 + $0xd8] sm:$0xff] %vm3623_vm2, %v7749_v0  ;;  %v8503_v2 = vadd.f32 %v8502_v63, %v8501_v44  ;;  %v7708_v47 = vadd.f32 %v7707_v16, %v7547_v3 }
 0x480   : > { %v7750_v20 = vmax.f32 %v7708_v47, 0.0  ;;  %v7550_v8 = vadd.f32 %v8503_v2, %v12815_v38 }
 0x481   : > { %v8504_v56 = vpop.f32.mrf.mxu1 }
 0x482   : > { %7782 = vst.msk [vmem:[%s12836_s30 + $0xe0] sm:$0xff] %vm3623_vm2, %v7750_v20  ;;  %v7711_v59 = vadd.f32 %v7710_v43, %v7550_v8 }
 0x483   : > { %v8505_v9 = vpop.f32.mrf.mxu1 }
 0x484   : > { %v8506_v41 = vadd.f32 %v8505_v9, %v8504_v56  ;;  %v7751_v11 = vmax.f32 %v7711_v59, 0.0 }
 0x485   : > { %v8507_v27 = vpop.f32.mrf.mxu1 }
 0x486   : > { %v7555_v53 = vadd.f32 %v8506_v41, %v12815_v38  ;;  %7783 = vst.msk [vmem:[%s12836_s30 + $0xe8] sm:$0xff] %vm3623_vm2, %v7751_v11 }
 0x487   : > { %v8508_v48 = vpop.f32.mrf.mxu1 }
 0x488   : > { %v7716_v12 = vadd.f32 %v8600_v51, %v7555_v53  ;;  %v8509_v45 = vadd.f32 %v8508_v48, %v8507_v27 }
 0x48a   : > { %v7752_v14 = vmax.f32 %v7716_v12, 0.0  ;;  %v7558_v57 = vadd.f32 %v8509_v45, %v12815_v38 }
 0x48c   : > { %7784 = vst.msk [vmem:[%s12836_s30 + $0xf0] sm:$0xff] %vm3623_vm2, %v7752_v14  ;;  %v7719_v17 = vadd.f32 %v8601_v29, %v7558_v57 }
 0x48e   : > { %v7753_v19 = vmax.f32 %v7719_v17, 0.0 }
 0x490   : > { %7785 = vst.msk [vmem:[%s12836_s30 + $0xf8] sm:$0xff] %vm3623_vm2, %v7753_v19 }
 0x491   : > { %8855 = shalt.err (!%p8852_p3)
}
 0x492   : > { %s8856_s25 = scalar_lea.hbm %s13020_s13, 4096  ;;  %s8860_s12 = scalar_lea.hbm %s13074_s5, 8192 }
 0x493   : > { %p8857_p4 = scmp.ne.s32.totalorder %s13020_s13, %s8856_s25  ;;  %p8861_p9 = scmp.lt.s32.totalorder %s13020_s13, %s13074_s5 }
 0x494   : > { %p8862_p10 = scmp.lt.s32.totalorder %s8860_s12, %s8856_s25 }
 0x495   : > { %p8858_p7 = pnand %p8857_p4, %p8985_p5 }
 0x496   : > { %p8863_p11 = por %p8862_p10, %p8861_p9 }
 0x497   : > { %p8859_p8 = pneg %p8858_p7 }
 0x499   : > { %p8864_p12 = pnand %p8863_p11, %p8859_p8 }
 0x49b   : > { %8867 = shalt.err (!%p8864_p12)
}
 0x49c   : > { %s8916_s6 = smov 128  }
 0x49d   : > { %8619 = dma.vmem_to_hbm [thread:$0]  (%p8985_p5), %s13022_s7, 4096, %s13020_s13, %s13028_s14, %s8916_s6, %s8916_s6, %s8905_s10  }
 0x49e PF: > { %p8625_p13 = scmp.ge.s32.totalorder %s8902_s21, 2  ;;  %s7815_s9 = sand.u32 1, %s8890_s18  }
 0x49f   : > { %s7816_s11 = scalar_lea.sflag [#allocation5], %s7815_s9 }
 0x4a0   : > { %p8622_p0 = pnand %p8625_p13, %p8989_p6 }
 0x4a2   : > { %p8623_p1 = pneg %p8622_p0 }
 0x4a4   : > { %8885 = dma.done.wait (%p8623_p1), %s7816_s11, 4096  }
 0x4a5   : > { %8887 = vsyncadd (%p8623_p1), %s7816_s11, 4294963200  ;;  %p15_p2 = scmp.ge.s32.totalorder %s8972_s24, 4   ;;  %s13256_s18 = smov %s8894_s19 }
 0x4a6   : > { %s13257_s19 = smov %s8898_s20  ;;  %s13258_s20 = smov %s8983_s27 }
 0x4a7   : > { %s13259_s21 = smov %s8972_s24  ;;  %17 = sbr.rel (!%p15_p2) target bundleno = 3 (0x3), region = 79 }
 0x4ac   :  { %7821 = vsyncpa [#allocation5], 1 }
 0x4ad   :  { %7823 = vsyncpa [#allocation5 + $0x1], 1 }

</bundles_post_ra>
